<compile_context>
chip_gen: v7x
topology: tpu7x:2x2x1
jax: 0.10.0
libtpu: 0.0.40
codegen_flags: <defaults>
</compile_context>

<pallas_src>
import functools

import jax
import jax.numpy as jnp
import numpy as np
from jax.experimental import pallas as pl
from jax.experimental.pallas import tpu as pltpu

EPS = 1e-5


def _resblock_kernel(N, H, W, C, WP,
                     x_ref, w1_hbm_ref, w2_hbm_ref, g1_ref, be1_ref, g2_ref, be2_ref,
                     out_ref, xp_ref, col_ref, w1_ref, w2_ref, w_sem):
    """Whole residual block in one kernel invocation (everything fits in VMEM).

    x_ref      : (N, H, W, C)     unpadded input, NHWC, f32
    w1_hbm_ref : (9C, C)          conv1 weights, bf16, HBM (manually prefetched)
    w2_hbm_ref : (9C, C)          conv2 weights, bf16, HBM (manually prefetched)
    g*/be*     : (1, C)           BN gamma / beta, f32
    out_ref    : (N, H, W, C)     f32
    xp_ref     : (N, H+2, WP, C)  bf16 scratch: zero-padded activations (reused for conv2)
    col_ref    : (M, 9C)          bf16 scratch: im2col LHS
    w1_ref     : (9C, C)          bf16 scratch: VMEM landing buffer for conv1 weights
    w2_ref     : (9C, C)          bf16 scratch: VMEM landing buffer for conv2 weights
    w_sem      : (2,)             DMA semaphores
    """
    M = N * H * W
    inv_m = 1.0 / M

    # ---- prefetch both weight tensors from HBM; w1 overlaps pad + im2col(conv1),
    #      w2 additionally overlaps conv1 matmul + BN1 + ReLU + im2col(conv2) ----
    w1_copy = pltpu.make_async_copy(w1_hbm_ref, w1_ref, w_sem.at[0])
    w2_copy = pltpu.make_async_copy(w2_hbm_ref, w2_ref, w_sem.at[1])
    w1_copy.start()
    w2_copy.start()

    # ---- zero the halo of the padded-activation scratch once (interior is overwritten
    #      below; right-side padding columns [W+1, WP) are zeroed too) ----
    xp_ref[:, 0:1, :, :] = jnp.zeros((N, 1, WP, C), jnp.bfloat16)
    xp_ref[:, H + 1:H + 2, :, :] = jnp.zeros((N, 1, WP, C), jnp.bfloat16)
    xp_ref[:, 1:H + 1, 0:1, :] = jnp.zeros((N, H, 1, C), jnp.bfloat16)
    xp_ref[:, 1:H + 1, W + 1:WP, :] = jnp.zeros((N, H, WP - (W + 1), C), jnp.bfloat16)

    # ---- pad input into scratch (single f32 -> bf16 cast) ----
    xp_ref[:, 1:H + 1, 1:W + 1, :] = x_ref[...].astype(jnp.bfloat16)

    # ---- conv1: im2col -> one (M, 9C) x (9C, C) bf16 matmul on the MXU ----
    for ky in range(3):
        for kx in range(3):
            tap = ky * 3 + kx
            col_ref[:, tap * C:(tap + 1) * C] = (
                xp_ref[:, ky:ky + H, kx:kx + W, :].reshape(M, C))
    w1_copy.wait()
    acc = jnp.dot(col_ref[...], w1_ref[...], preferred_element_type=jnp.float32)

    # ---- batchnorm1 (batch stats over N*H*W, biased var) + ReLU, all in f32.
    #      sum and sum-of-squares fused into one lane-concatenated reduction.
    #      NOTE: E[x^2]-E[x]^2 is adequate for the fresh-init distribution / tolerance here.
    stats1 = jnp.sum(jnp.concatenate([acc, acc * acc], axis=1),
                     axis=0, keepdims=True) * inv_m          # (1, 2C)
    mean1 = stats1[:, :C]
    var1 = stats1[:, C:] - mean1 * mean1
    h = (acc - mean1) * jax.lax.rsqrt(var1 + EPS) * g1_ref[...] + be1_ref[...]
    h = jnp.maximum(h, 0.0)

    # ---- reuse padded scratch for conv2 input (halo already zero; single cast) ----
    xp_ref[:, 1:H + 1, 1:W + 1, :] = h.reshape(N, H, W, C).astype(jnp.bfloat16)

    # ---- conv2: im2col -> single long-K matmul with the prefetched weights ----
    for ky in range(3):
        for kx in range(3):
            tap = ky * 3 + kx
            col_ref[:, tap * C:(tap + 1) * C] = (
                xp_ref[:, ky:ky + H, kx:kx + W, :].reshape(M, C))
    w2_copy.wait()
    acc2 = jnp.dot(col_ref[...], w2_ref[...], preferred_element_type=jnp.float32)

    # ---- batchnorm2 (fused single-pass stats) ----
    stats2 = jnp.sum(jnp.concatenate([acc2, acc2 * acc2], axis=1),
                     axis=0, keepdims=True) * inv_m
    mean2 = stats2[:, :C]
    var2 = stats2[:, C:] - mean2 * mean2
    y2 = (acc2 - mean2) * jax.lax.rsqrt(var2 + EPS) * g2_ref[...] + be2_ref[...]

    # ---- residual add (contiguous read of the unpadded f32 input) ----
    out_ref[...] = y2.reshape(N, H, W, C) + x_ref[...]


def residual_block_nhwc(x, w1_hwio, g1, be1, w2_hwio, g2, be2):
    """x: (N, H, W, C) f32; w*_hwio: (3, 3, C, C); vectors: (C,).

    Conv biases are intentionally not taken: training-mode BN cancels them exactly.
    """
    N, H, W, C = x.shape
    WP = ((W + 2 + 7) // 8) * 8  # pad sublane dim of the padded scratch to a multiple of 8

    w1_t = w1_hwio.reshape(9 * C, C).astype(jnp.bfloat16)
    w2_t = w2_hwio.reshape(9 * C, C).astype(jnp.bfloat16)
    vec = lambda v: v.reshape(1, C).astype(jnp.float32)

    kernel = functools.partial(_resblock_kernel, N, H, W, C, WP)

    return pl.pallas_call(
        kernel,
        out_shape=jax.ShapeDtypeStruct((N, H, W, C), jnp.float32),
        in_specs=[
            pl.BlockSpec(memory_space=pltpu.MemorySpace.VMEM),  # x
            pl.BlockSpec(memory_space=pl.ANY),                  # w1 stays in HBM (manual DMA)
            pl.BlockSpec(memory_space=pl.ANY),                  # w2 stays in HBM (manual DMA)
            pl.BlockSpec(memory_space=pltpu.MemorySpace.VMEM),  # g1
            pl.BlockSpec(memory_space=pltpu.MemorySpace.VMEM),  # be1
            pl.BlockSpec(memory_space=pltpu.MemorySpace.VMEM),  # g2
            pl.BlockSpec(memory_space=pltpu.MemorySpace.VMEM),  # be2
        ],
        out_specs=pl.BlockSpec(memory_space=pltpu.MemorySpace.VMEM),
        scratch_shapes=[
            pltpu.VMEM((N, H + 2, WP, C), jnp.bfloat16),     # padded activations (shared, bf16)
            pltpu.VMEM((N * H * W, 9 * C), jnp.bfloat16),    # im2col LHS
            pltpu.VMEM((9 * C, C), jnp.bfloat16),            # conv1 weight landing buffer
            pltpu.VMEM((9 * C, C), jnp.bfloat16),            # conv2 weight landing buffer
            pltpu.SemaphoreType.DMA((2,)),                   # DMA completion semaphores
        ],
    )(x, w1_t, w2_t, vec(g1), vec(be1), vec(g2), vec(be2))


def residual_block_reference(x, w1, b1, g1, be1, w2, b2, g2, be2):
    """Pure-JAX reference (NHWC / HWIO), mirrors the PyTorch training-mode forward,
    including the conv biases (which training-mode BN cancels)."""
    def conv(xx, w, b):
        y = jax.lax.conv_general_dilated(
            xx, w, window_strides=(1, 1), padding="SAME",
            dimension_numbers=("NHWC", "HWIO", "NHWC"),
            precision=jax.lax.Precision.HIGHEST)
        return y + b.reshape(1, 1, 1, -1)

    def bn(y, g, be):
        m = jnp.mean(y, axis=(0, 1, 2), keepdims=True)
        v = jnp.mean((y - m) ** 2, axis=(0, 1, 2), keepdims=True)
        return (y - m) * jax.lax.rsqrt(v + EPS) * g.reshape(1, 1, 1, -1) + be.reshape(1, 1, 1, -1)

    h = jax.nn.relu(bn(conv(x, w1, b1), g1, be1))
    return bn(conv(h, w2, b2), g2, be2) + x


if __name__ == "__main__":
    # Module fixes channels at 256; keep batch/spatial small.
    N, C, H, W = 2, 256, 8, 8

    key = jax.random.PRNGKey(0)
    ks = jax.random.split(key, 9)

    # PyTorch-convention shapes, deterministically initialized in-script.
    x_nchw = jax.random.normal(ks[0], (N, C, H, W), jnp.float32)
    w1_oihw = 0.05 * jax.random.normal(ks[1], (C, C, 3, 3), jnp.float32)
    b1 = 0.05 * jax.random.normal(ks[2], (C,), jnp.float32)
    w2_oihw = 0.05 * jax.random.normal(ks[3], (C, C, 3, 3), jnp.float32)
    b2 = 0.05 * jax.random.normal(ks[4], (C,), jnp.float32)
    g1 = 1.0 + 0.1 * jax.random.normal(ks[5], (C,), jnp.float32)
    be1 = 0.1 * jax.random.normal(ks[6], (C,), jnp.float32)
    g2 = 1.0 + 0.1 * jax.random.normal(ks[7], (C,), jnp.float32)
    be2 = 0.1 * jax.random.normal(ks[8], (C,), jnp.float32)

    # NCHW -> NHWC, OIHW -> HWIO for the kernel.
    x = jnp.transpose(x_nchw, (0, 2, 3, 1))
    w1 = jnp.transpose(w1_oihw, (2, 3, 1, 0))
    w2 = jnp.transpose(w2_oihw, (2, 3, 1, 0))

    # Kernel (biases dropped: cancelled exactly by training-mode BN).
    out = residual_block_nhwc(x, w1, g1, be1, w2, g2, be2)
    out = jax.block_until_ready(out)

    # Reference keeps the biases, so the test also verifies the cancellation.
    ref = residual_block_reference(x, w1, b1, g1, be1, w2, b2, g2, be2)
    np.testing.assert_allclose(np.asarray(out), np.asarray(ref), atol=2e-2, rtol=2e-2)

    print("KERNEL_OK")
</pallas_src>

<mosaic_0001>
module attributes {stable_mosaic.version = 11 : i64} {
  func.func @_resblock_kernel(%arg0: memref<2x8x8x256xf32, #tpu.memory_space<vmem>>, %arg1: memref<2304x256xbf16, #tpu.memory_space<any>>, %arg2: memref<2304x256xbf16, #tpu.memory_space<any>>, %arg3: memref<1x256xf32, #tpu.memory_space<vmem>>, %arg4: memref<1x256xf32, #tpu.memory_space<vmem>>, %arg5: memref<1x256xf32, #tpu.memory_space<vmem>>, %arg6: memref<1x256xf32, #tpu.memory_space<vmem>>, %arg7: memref<2x8x8x256xf32, #tpu.memory_space<vmem>>, %arg8: memref<2x10x16x256xbf16, #tpu.memory_space<vmem>>, %arg9: memref<128x2304xbf16, #tpu.memory_space<vmem>>, %arg10: memref<2304x256xbf16, #tpu.memory_space<vmem>>, %arg11: memref<2304x256xbf16, #tpu.memory_space<vmem>>, %arg12: memref<2x!tpu.dma_semaphore, #tpu.memory_space<semaphore_mem>>) attributes {dimension_semantics = [], scalar_prefetch = 0 : i64, scratch_operands = 5 : i64, tpu.core_type = #tpu.core_type<tc>} {
    %c0_i32 = arith.constant 0 : i32
    %0 = tpu.memref_slice %arg12[%c0_i32] : memref<2x!tpu.dma_semaphore, #tpu.memory_space<semaphore_mem>> -> memref<1x!tpu.dma_semaphore, #tpu.memory_space<semaphore_mem>>
    %1 = tpu.memref_squeeze %0 : memref<1x!tpu.dma_semaphore, #tpu.memory_space<semaphore_mem>> -> memref<!tpu.dma_semaphore, #tpu.memory_space<semaphore_mem>>
    tpu.enqueue_dma source(%arg1 : memref<2304x256xbf16, #tpu.memory_space<any>>) target(%arg10 : memref<2304x256xbf16, #tpu.memory_space<vmem>>) target_semaphore(%1 : memref<!tpu.dma_semaphore, #tpu.memory_space<semaphore_mem>>)
    %c1_i32 = arith.constant 1 : i32
    %2 = tpu.memref_slice %arg12[%c1_i32] : memref<2x!tpu.dma_semaphore, #tpu.memory_space<semaphore_mem>> -> memref<1x!tpu.dma_semaphore, #tpu.memory_space<semaphore_mem>>
    %3 = tpu.memref_squeeze %2 : memref<1x!tpu.dma_semaphore, #tpu.memory_space<semaphore_mem>> -> memref<!tpu.dma_semaphore, #tpu.memory_space<semaphore_mem>>
    tpu.enqueue_dma source(%arg2 : memref<2304x256xbf16, #tpu.memory_space<any>>) target(%arg11 : memref<2304x256xbf16, #tpu.memory_space<vmem>>) target_semaphore(%3 : memref<!tpu.dma_semaphore, #tpu.memory_space<semaphore_mem>>)
    %cst = arith.constant 0.000000e+00 : bf16
    %4 = vector.broadcast %cst : bf16 to vector<2x1x16x256xbf16>
    %c0 = arith.constant 0 : index
    %c0_0 = arith.constant 0 : index
    %c0_1 = arith.constant 0 : index
    %c0_2 = arith.constant 0 : index
    %5 = vector.load %arg8[%c0, %c0_0, %c0_1, %c0_2] : memref<2x10x16x256xbf16, #tpu.memory_space<vmem>>, vector<2x1x16x256xbf16>
    tpu.vector_store %arg8[%c0, %c0_0, %c0_1, %c0_2], %4 {strides = array<i32>} : memref<2x10x16x256xbf16, #tpu.memory_space<vmem>>, vector<2x1x16x256xbf16>,
    %cst_3 = arith.constant 0.000000e+00 : bf16
    %6 = vector.broadcast %cst_3 : bf16 to vector<2x1x16x256xbf16>
    %c0_4 = arith.constant 0 : index
    %c9 = arith.constant 9 : index
    %c0_5 = arith.constant 0 : index
    %c0_6 = arith.constant 0 : index
    %7 = vector.load %arg8[%c0_4, %c9, %c0_5, %c0_6] : memref<2x10x16x256xbf16, #tpu.memory_space<vmem>>, vector<2x1x16x256xbf16>
    tpu.vector_store %arg8[%c0_4, %c9, %c0_5, %c0_6], %6 {strides = array<i32>} : memref<2x10x16x256xbf16, #tpu.memory_space<vmem>>, vector<2x1x16x256xbf16>,
    %cst_7 = arith.constant 0.000000e+00 : bf16
    %8 = vector.broadcast %cst_7 : bf16 to vector<2x8x1x256xbf16>
    %c0_8 = arith.constant 0 : index
    %c1 = arith.constant 1 : index
    %c0_9 = arith.constant 0 : index
    %c0_10 = arith.constant 0 : index
    %9 = vector.load %arg8[%c0_8, %c1, %c0_9, %c0_10] : memref<2x10x16x256xbf16, #tpu.memory_space<vmem>>, vector<2x8x1x256xbf16>
    tpu.vector_store %arg8[%c0_8, %c1, %c0_9, %c0_10], %8 {strides = array<i32>} : memref<2x10x16x256xbf16, #tpu.memory_space<vmem>>, vector<2x8x1x256xbf16>,
    %cst_11 = arith.constant 0.000000e+00 : bf16
    %10 = vector.broadcast %cst_11 : bf16 to vector<2x8x7x256xbf16>
    %c0_12 = arith.constant 0 : index
    %c1_13 = arith.constant 1 : index
    %c9_14 = arith.constant 9 : index
    %c0_15 = arith.constant 0 : index
    %11 = vector.load %arg8[%c0_12, %c1_13, %c9_14, %c0_15] : memref<2x10x16x256xbf16, #tpu.memory_space<vmem>>, vector<2x8x7x256xbf16>
    tpu.vector_store %arg8[%c0_12, %c1_13, %c9_14, %c0_15], %10 {strides = array<i32>} : memref<2x10x16x256xbf16, #tpu.memory_space<vmem>>, vector<2x8x7x256xbf16>,
    %c0_16 = arith.constant 0 : index
    %c0_17 = arith.constant 0 : index
    %c0_18 = arith.constant 0 : index
    %c0_19 = arith.constant 0 : index
    %12 = vector.load %arg0[%c0_16, %c0_17, %c0_18, %c0_19] : memref<2x8x8x256xf32, #tpu.memory_space<vmem>>, vector<2x8x8x256xf32>
    %13 = arith.truncf %12 : vector<2x8x8x256xf32> to vector<2x8x8x256xbf16>
    %c0_20 = arith.constant 0 : index
    %c1_21 = arith.constant 1 : index
    %c1_22 = arith.constant 1 : index
    %c0_23 = arith.constant 0 : index
    %14 = vector.load %arg8[%c0_20, %c1_21, %c1_22, %c0_23] : memref<2x10x16x256xbf16, #tpu.memory_space<vmem>>, vector<2x8x8x256xbf16>
    tpu.vector_store %arg8[%c0_20, %c1_21, %c1_22, %c0_23], %13 {strides = array<i32>} : memref<2x10x16x256xbf16, #tpu.memory_space<vmem>>, vector<2x8x8x256xbf16>,
    %c0_24 = arith.constant 0 : index
    %c0_25 = arith.constant 0 : index
    %c0_26 = arith.constant 0 : index
    %c0_27 = arith.constant 0 : index
    %15 = vector.load %arg8[%c0_24, %c0_25, %c0_26, %c0_27] : memref<2x10x16x256xbf16, #tpu.memory_space<vmem>>, vector<2x8x8x256xbf16>
    %16 = vector.shape_cast %15 : vector<2x8x8x256xbf16> to vector<128x256xbf16>
    %c0_28 = arith.constant 0 : index
    %c0_29 = arith.constant 0 : index
    %17 = vector.load %arg9[%c0_28, %c0_29] : memref<128x2304xbf16, #tpu.memory_space<vmem>>, vector<128x256xbf16>
    tpu.vector_store %arg9[%c0_28, %c0_29], %16 {strides = array<i32>} : memref<128x2304xbf16, #tpu.memory_space<vmem>>, vector<128x256xbf16>,
    %c0_30 = arith.constant 0 : index
    %c0_31 = arith.constant 0 : index
    %c1_32 = arith.constant 1 : index
    %c0_33 = arith.constant 0 : index
    %18 = vector.load %arg8[%c0_30, %c0_31, %c1_32, %c0_33] : memref<2x10x16x256xbf16, #tpu.memory_space<vmem>>, vector<2x8x8x256xbf16>
    %19 = vector.shape_cast %18 : vector<2x8x8x256xbf16> to vector<128x256xbf16>
    %c0_34 = arith.constant 0 : index
    %c256 = arith.constant 256 : index
    %20 = vector.load %arg9[%c0_34, %c256] : memref<128x2304xbf16, #tpu.memory_space<vmem>>, vector<128x256xbf16>
    tpu.vector_store %arg9[%c0_34, %c256], %19 {strides = array<i32>} : memref<128x2304xbf16, #tpu.memory_space<vmem>>, vector<128x256xbf16>,
    %c0_35 = arith.constant 0 : index
    %c0_36 = arith.constant 0 : index
    %c2 = arith.constant 2 : index
    %c0_37 = arith.constant 0 : index
    %21 = vector.load %arg8[%c0_35, %c0_36, %c2, %c0_37] : memref<2x10x16x256xbf16, #tpu.memory_space<vmem>>, vector<2x8x8x256xbf16>
    %22 = vector.shape_cast %21 : vector<2x8x8x256xbf16> to vector<128x256xbf16>
    %c0_38 = arith.constant 0 : index
    %c512 = arith.constant 512 : index
    %23 = vector.load %arg9[%c0_38, %c512] : memref<128x2304xbf16, #tpu.memory_space<vmem>>, vector<128x256xbf16>
    tpu.vector_store %arg9[%c0_38, %c512], %22 {strides = array<i32>} : memref<128x2304xbf16, #tpu.memory_space<vmem>>, vector<128x256xbf16>,
    %c0_39 = arith.constant 0 : index
    %c1_40 = arith.constant 1 : index
    %c0_41 = arith.constant 0 : index
    %c0_42 = arith.constant 0 : index
    %24 = vector.load %arg8[%c0_39, %c1_40, %c0_41, %c0_42] : memref<2x10x16x256xbf16, #tpu.memory_space<vmem>>, vector<2x8x8x256xbf16>
    %25 = vector.shape_cast %24 : vector<2x8x8x256xbf16> to vector<128x256xbf16>
    %c0_43 = arith.constant 0 : index
    %c768 = arith.constant 768 : index
    %26 = vector.load %arg9[%c0_43, %c768] : memref<128x2304xbf16, #tpu.memory_space<vmem>>, vector<128x256xbf16>
    tpu.vector_store %arg9[%c0_43, %c768], %25 {strides = array<i32>} : memref<128x2304xbf16, #tpu.memory_space<vmem>>, vector<128x256xbf16>,
    %c0_44 = arith.constant 0 : index
    %c1_45 = arith.constant 1 : index
    %c1_46 = arith.constant 1 : index
    %c0_47 = arith.constant 0 : index
    %27 = vector.load %arg8[%c0_44, %c1_45, %c1_46, %c0_47] : memref<2x10x16x256xbf16, #tpu.memory_space<vmem>>, vector<2x8x8x256xbf16>
    %28 = vector.shape_cast %27 : vector<2x8x8x256xbf16> to vector<128x256xbf16>
    %c0_48 = arith.constant 0 : index
    %c1024 = arith.constant 1024 : index
    %29 = vector.load %arg9[%c0_48, %c1024] : memref<128x2304xbf16, #tpu.memory_space<vmem>>, vector<128x256xbf16>
    tpu.vector_store %arg9[%c0_48, %c1024], %28 {strides = array<i32>} : memref<128x2304xbf16, #tpu.memory_space<vmem>>, vector<128x256xbf16>,
    %c0_49 = arith.constant 0 : index
    %c1_50 = arith.constant 1 : index
    %c2_51 = arith.constant 2 : index
    %c0_52 = arith.constant 0 : index
    %30 = vector.load %arg8[%c0_49, %c1_50, %c2_51, %c0_52] : memref<2x10x16x256xbf16, #tpu.memory_space<vmem>>, vector<2x8x8x256xbf16>
    %31 = vector.shape_cast %30 : vector<2x8x8x256xbf16> to vector<128x256xbf16>
    %c0_53 = arith.constant 0 : index
    %c1280 = arith.constant 1280 : index
    %32 = vector.load %arg9[%c0_53, %c1280] : memref<128x2304xbf16, #tpu.memory_space<vmem>>, vector<128x256xbf16>
    tpu.vector_store %arg9[%c0_53, %c1280], %31 {strides = array<i32>} : memref<128x2304xbf16, #tpu.memory_space<vmem>>, vector<128x256xbf16>,
    %c0_54 = arith.constant 0 : index
    %c2_55 = arith.constant 2 : index
    %c0_56 = arith.constant 0 : index
    %c0_57 = arith.constant 0 : index
    %33 = vector.load %arg8[%c0_54, %c2_55, %c0_56, %c0_57] : memref<2x10x16x256xbf16, #tpu.memory_space<vmem>>, vector<2x8x8x256xbf16>
    %34 = vector.shape_cast %33 : vector<2x8x8x256xbf16> to vector<128x256xbf16>
    %c0_58 = arith.constant 0 : index
    %c1536 = arith.constant 1536 : index
    %35 = vector.load %arg9[%c0_58, %c1536] : memref<128x2304xbf16, #tpu.memory_space<vmem>>, vector<128x256xbf16>
    tpu.vector_store %arg9[%c0_58, %c1536], %34 {strides = array<i32>} : memref<128x2304xbf16, #tpu.memory_space<vmem>>, vector<128x256xbf16>,
    %c0_59 = arith.constant 0 : index
    %c2_60 = arith.constant 2 : index
    %c1_61 = arith.constant 1 : index
    %c0_62 = arith.constant 0 : index
    %36 = vector.load %arg8[%c0_59, %c2_60, %c1_61, %c0_62] : memref<2x10x16x256xbf16, #tpu.memory_space<vmem>>, vector<2x8x8x256xbf16>
    %37 = vector.shape_cast %36 : vector<2x8x8x256xbf16> to vector<128x256xbf16>
    %c0_63 = arith.constant 0 : index
    %c1792 = arith.constant 1792 : index
    %38 = vector.load %arg9[%c0_63, %c1792] : memref<128x2304xbf16, #tpu.memory_space<vmem>>, vector<128x256xbf16>
    tpu.vector_store %arg9[%c0_63, %c1792], %37 {strides = array<i32>} : memref<128x2304xbf16, #tpu.memory_space<vmem>>, vector<128x256xbf16>,
    %c0_64 = arith.constant 0 : index
    %c2_65 = arith.constant 2 : index
    %c2_66 = arith.constant 2 : index
    %c0_67 = arith.constant 0 : index
    %39 = vector.load %arg8[%c0_64, %c2_65, %c2_66, %c0_67] : memref<2x10x16x256xbf16, #tpu.memory_space<vmem>>, vector<2x8x8x256xbf16>
    %40 = vector.shape_cast %39 : vector<2x8x8x256xbf16> to vector<128x256xbf16>
    %c0_68 = arith.constant 0 : index
    %c2048 = arith.constant 2048 : index
    %41 = vector.load %arg9[%c0_68, %c2048] : memref<128x2304xbf16, #tpu.memory_space<vmem>>, vector<128x256xbf16>
    tpu.vector_store %arg9[%c0_68, %c2048], %40 {strides = array<i32>} : memref<128x2304xbf16, #tpu.memory_space<vmem>>, vector<128x256xbf16>,
    %c0_i32_69 = arith.constant 0 : i32
    %42 = tpu.memref_slice %arg12[%c0_i32_69] : memref<2x!tpu.dma_semaphore, #tpu.memory_space<semaphore_mem>> -> memref<1x!tpu.dma_semaphore, #tpu.memory_space<semaphore_mem>>
    %43 = tpu.memref_squeeze %42 : memref<1x!tpu.dma_semaphore, #tpu.memory_space<semaphore_mem>> -> memref<!tpu.dma_semaphore, #tpu.memory_space<semaphore_mem>>
    tpu.wait_dma2 semaphore(%43 : memref<!tpu.dma_semaphore, #tpu.memory_space<semaphore_mem>>) src(%arg1 : memref<2304x256xbf16, #tpu.memory_space<any>>) dst(%arg10 : memref<2304x256xbf16, #tpu.memory_space<vmem>>)
    %c0_70 = arith.constant 0 : index
    %c0_71 = arith.constant 0 : index
    %44 = vector.load %arg9[%c0_70, %c0_71] : memref<128x2304xbf16, #tpu.memory_space<vmem>>, vector<128x2304xbf16>
    %c0_72 = arith.constant 0 : index
    %c0_73 = arith.constant 0 : index
    %45 = vector.load %arg10[%c0_72, %c0_73] : memref<2304x256xbf16, #tpu.memory_space<vmem>>, vector<2304x256xbf16>
    %cst_74 = arith.constant dense<0.000000e+00> : vector<128x256xf32>
    %46 = tpu.matmul %44, %45, %cst_74 {dimension_numbers = #tpu.dot_dimension_numbers<[1], [0], [0], [1], [0, 0, 1, 1], [], []>} : vector<128x2304xbf16>, vector<2304x256xbf16>, vector<128x256xf32> -> vector<128x256xf32>
    %47 = arith.mulf %46, %46 : vector<128x256xf32>
    %48 = tpu.concatenate %46, %47 in 1 : vector<128x256xf32>, vector<128x256xf32> -> vector<128x512xf32>
    %cst_75 = arith.constant dense<0.000000e+00> : vector<512xf32>
    %49 = vector.multi_reduction <add>, %48, %cst_75 [0] : vector<128x512xf32> to vector<512xf32>
    %50 = vector.shape_cast %49 : vector<512xf32> to vector<1x512xf32>
    %cst_76 = arith.constant 7.812500e-03 : f32
    %51 = vector.broadcast %cst_76 : f32 to vector<1x512xf32>
    %52 = arith.mulf %50, %51 : vector<1x512xf32>
    %53 = vector.extract_strided_slice %52 {offsets = [0, 0], sizes = [1, 256], strides = [1, 1]} : vector<1x512xf32> to vector<1x256xf32>
    %54 = vector.extract_strided_slice %52 {offsets = [0, 256], sizes = [1, 256], strides = [1, 1]} : vector<1x512xf32> to vector<1x256xf32>
    %55 = arith.mulf %53, %53 : vector<1x256xf32>
    %56 = arith.subf %54, %55 : vector<1x256xf32>
    %57 = vector.broadcast %53 : vector<1x256xf32> to vector<128x256xf32>
    %58 = arith.subf %46, %57 : vector<128x256xf32>
    %cst_77 = arith.constant 9.99999974E-6 : f32
    %59 = vector.broadcast %cst_77 : f32 to vector<1x256xf32>
    %60 = arith.addf %56, %59 : vector<1x256xf32>
    %61 = math.rsqrt %60 : vector<1x256xf32>
    %62 = vector.broadcast %61 : vector<1x256xf32> to vector<128x256xf32>
    %63 = arith.mulf %58, %62 : vector<128x256xf32>
    %c0_78 = arith.constant 0 : index
    %c0_79 = arith.constant 0 : index
    %64 = vector.load %arg3[%c0_78, %c0_79] : memref<1x256xf32, #tpu.memory_space<vmem>>, vector<1x256xf32>
    %65 = vector.broadcast %64 : vector<1x256xf32> to vector<128x256xf32>
    %66 = arith.mulf %63, %65 : vector<128x256xf32>
    %c0_80 = arith.constant 0 : index
    %c0_81 = arith.constant 0 : index
    %67 = vector.load %arg4[%c0_80, %c0_81] : memref<1x256xf32, #tpu.memory_space<vmem>>, vector<1x256xf32>
    %68 = vector.broadcast %67 : vector<1x256xf32> to vector<128x256xf32>
    %69 = arith.addf %66, %68 : vector<128x256xf32>
    %cst_82 = arith.constant 0.000000e+00 : f32
    %70 = vector.broadcast %cst_82 : f32 to vector<128x256xf32>
    %71 = arith.maximumf %69, %70 : vector<128x256xf32>
    %72 = vector.shape_cast %71 : vector<128x256xf32> to vector<2x8x8x256xf32>
    %73 = arith.truncf %72 : vector<2x8x8x256xf32> to vector<2x8x8x256xbf16>
    %c0_83 = arith.constant 0 : index
    %c1_84 = arith.constant 1 : index
    %c1_85 = arith.constant 1 : index
    %c0_86 = arith.constant 0 : index
    %74 = vector.load %arg8[%c0_83, %c1_84, %c1_85, %c0_86] : memref<2x10x16x256xbf16, #tpu.memory_space<vmem>>, vector<2x8x8x256xbf16>
    tpu.vector_store %arg8[%c0_83, %c1_84, %c1_85, %c0_86], %73 {strides = array<i32>} : memref<2x10x16x256xbf16, #tpu.memory_space<vmem>>, vector<2x8x8x256xbf16>,
    %c0_87 = arith.constant 0 : index
    %c0_88 = arith.constant 0 : index
    %c0_89 = arith.constant 0 : index
    %c0_90 = arith.constant 0 : index
    %75 = vector.load %arg8[%c0_87, %c0_88, %c0_89, %c0_90] : memref<2x10x16x256xbf16, #tpu.memory_space<vmem>>, vector<2x8x8x256xbf16>
    %76 = vector.shape_cast %75 : vector<2x8x8x256xbf16> to vector<128x256xbf16>
    %c0_91 = arith.constant 0 : index
    %c0_92 = arith.constant 0 : index
    %77 = vector.load %arg9[%c0_91, %c0_92] : memref<128x2304xbf16, #tpu.memory_space<vmem>>, vector<128x256xbf16>
    tpu.vector_store %arg9[%c0_91, %c0_92], %76 {strides = array<i32>} : memref<128x2304xbf16, #tpu.memory_space<vmem>>, vector<128x256xbf16>,
    %c0_93 = arith.constant 0 : index
    %c0_94 = arith.constant 0 : index
    %c1_95 = arith.constant 1 : index
    %c0_96 = arith.constant 0 : index
    %78 = vector.load %arg8[%c0_93, %c0_94, %c1_95, %c0_96] : memref<2x10x16x256xbf16, #tpu.memory_space<vmem>>, vector<2x8x8x256xbf16>
    %79 = vector.shape_cast %78 : vector<2x8x8x256xbf16> to vector<128x256xbf16>
    %c0_97 = arith.constant 0 : index
    %c256_98 = arith.constant 256 : index
    %80 = vector.load %arg9[%c0_97, %c256_98] : memref<128x2304xbf16, #tpu.memory_space<vmem>>, vector<128x256xbf16>
    tpu.vector_store %arg9[%c0_97, %c256_98], %79 {strides = array<i32>} : memref<128x2304xbf16, #tpu.memory_space<vmem>>, vector<128x256xbf16>,
    %c0_99 = arith.constant 0 : index
    %c0_100 = arith.constant 0 : index
    %c2_101 = arith.constant 2 : index
    %c0_102 = arith.constant 0 : index
    %81 = vector.load %arg8[%c0_99, %c0_100, %c2_101, %c0_102] : memref<2x10x16x256xbf16, #tpu.memory_space<vmem>>, vector<2x8x8x256xbf16>
    %82 = vector.shape_cast %81 : vector<2x8x8x256xbf16> to vector<128x256xbf16>
    %c0_103 = arith.constant 0 : index
    %c512_104 = arith.constant 512 : index
    %83 = vector.load %arg9[%c0_103, %c512_104] : memref<128x2304xbf16, #tpu.memory_space<vmem>>, vector<128x256xbf16>
    tpu.vector_store %arg9[%c0_103, %c512_104], %82 {strides = array<i32>} : memref<128x2304xbf16, #tpu.memory_space<vmem>>, vector<128x256xbf16>,
    %c0_105 = arith.constant 0 : index
    %c1_106 = arith.constant 1 : index
    %c0_107 = arith.constant 0 : index
    %c0_108 = arith.constant 0 : index
    %84 = vector.load %arg8[%c0_105, %c1_106, %c0_107, %c0_108] : memref<2x10x16x256xbf16, #tpu.memory_space<vmem>>, vector<2x8x8x256xbf16>
    %85 = vector.shape_cast %84 : vector<2x8x8x256xbf16> to vector<128x256xbf16>
    %c0_109 = arith.constant 0 : index
    %c768_110 = arith.constant 768 : index
    %86 = vector.load %arg9[%c0_109, %c768_110] : memref<128x2304xbf16, #tpu.memory_space<vmem>>, vector<128x256xbf16>
    tpu.vector_store %arg9[%c0_109, %c768_110], %85 {strides = array<i32>} : memref<128x2304xbf16, #tpu.memory_space<vmem>>, vector<128x256xbf16>,
    %c0_111 = arith.constant 0 : index
    %c1_112 = arith.constant 1 : index
    %c1_113 = arith.constant 1 : index
    %c0_114 = arith.constant 0 : index
    %87 = vector.load %arg8[%c0_111, %c1_112, %c1_113, %c0_114] : memref<2x10x16x256xbf16, #tpu.memory_space<vmem>>, vector<2x8x8x256xbf16>
    %88 = vector.shape_cast %87 : vector<2x8x8x256xbf16> to vector<128x256xbf16>
    %c0_115 = arith.constant 0 : index
    %c1024_116 = arith.constant 1024 : index
    %89 = vector.load %arg9[%c0_115, %c1024_116] : memref<128x2304xbf16, #tpu.memory_space<vmem>>, vector<128x256xbf16>
    tpu.vector_store %arg9[%c0_115, %c1024_116], %88 {strides = array<i32>} : memref<128x2304xbf16, #tpu.memory_space<vmem>>, vector<128x256xbf16>,
    %c0_117 = arith.constant 0 : index
    %c1_118 = arith.constant 1 : index
    %c2_119 = arith.constant 2 : index
    %c0_120 = arith.constant 0 : index
    %90 = vector.load %arg8[%c0_117, %c1_118, %c2_119, %c0_120] : memref<2x10x16x256xbf16, #tpu.memory_space<vmem>>, vector<2x8x8x256xbf16>
    %91 = vector.shape_cast %90 : vector<2x8x8x256xbf16> to vector<128x256xbf16>
    %c0_121 = arith.constant 0 : index
    %c1280_122 = arith.constant 1280 : index
    %92 = vector.load %arg9[%c0_121, %c1280_122] : memref<128x2304xbf16, #tpu.memory_space<vmem>>, vector<128x256xbf16>
    tpu.vector_store %arg9[%c0_121, %c1280_122], %91 {strides = array<i32>} : memref<128x2304xbf16, #tpu.memory_space<vmem>>, vector<128x256xbf16>,
    %c0_123 = arith.constant 0 : index
    %c2_124 = arith.constant 2 : index
    %c0_125 = arith.constant 0 : index
    %c0_126 = arith.constant 0 : index
    %93 = vector.load %arg8[%c0_123, %c2_124, %c0_125, %c0_126] : memref<2x10x16x256xbf16, #tpu.memory_space<vmem>>, vector<2x8x8x256xbf16>
    %94 = vector.shape_cast %93 : vector<2x8x8x256xbf16> to vector<128x256xbf16>
    %c0_127 = arith.constant 0 : index
    %c1536_128 = arith.constant 1536 : index
    %95 = vector.load %arg9[%c0_127, %c1536_128] : memref<128x2304xbf16, #tpu.memory_space<vmem>>, vector<128x256xbf16>
    tpu.vector_store %arg9[%c0_127, %c1536_128], %94 {strides = array<i32>} : memref<128x2304xbf16, #tpu.memory_space<vmem>>, vector<128x256xbf16>,
    %c0_129 = arith.constant 0 : index
    %c2_130 = arith.constant 2 : index
    %c1_131 = arith.constant 1 : index
    %c0_132 = arith.constant 0 : index
    %96 = vector.load %arg8[%c0_129, %c2_130, %c1_131, %c0_132] : memref<2x10x16x256xbf16, #tpu.memory_space<vmem>>, vector<2x8x8x256xbf16>
    %97 = vector.shape_cast %96 : vector<2x8x8x256xbf16> to vector<128x256xbf16>
    %c0_133 = arith.constant 0 : index
    %c1792_134 = arith.constant 1792 : index
    %98 = vector.load %arg9[%c0_133, %c1792_134] : memref<128x2304xbf16, #tpu.memory_space<vmem>>, vector<128x256xbf16>
    tpu.vector_store %arg9[%c0_133, %c1792_134], %97 {strides = array<i32>} : memref<128x2304xbf16, #tpu.memory_space<vmem>>, vector<128x256xbf16>,
    %c0_135 = arith.constant 0 : index
    %c2_136 = arith.constant 2 : index
    %c2_137 = arith.constant 2 : index
    %c0_138 = arith.constant 0 : index
    %99 = vector.load %arg8[%c0_135, %c2_136, %c2_137, %c0_138] : memref<2x10x16x256xbf16, #tpu.memory_space<vmem>>, vector<2x8x8x256xbf16>
    %100 = vector.shape_cast %99 : vector<2x8x8x256xbf16> to vector<128x256xbf16>
    %c0_139 = arith.constant 0 : index
    %c2048_140 = arith.constant 2048 : index
    %101 = vector.load %arg9[%c0_139, %c2048_140] : memref<128x2304xbf16, #tpu.memory_space<vmem>>, vector<128x256xbf16>
    tpu.vector_store %arg9[%c0_139, %c2048_140], %100 {strides = array<i32>} : memref<128x2304xbf16, #tpu.memory_space<vmem>>, vector<128x256xbf16>,
    %c1_i32_141 = arith.constant 1 : i32
    %102 = tpu.memref_slice %arg12[%c1_i32_141] : memref<2x!tpu.dma_semaphore, #tpu.memory_space<semaphore_mem>> -> memref<1x!tpu.dma_semaphore, #tpu.memory_space<semaphore_mem>>
    %103 = tpu.memref_squeeze %102 : memref<1x!tpu.dma_semaphore, #tpu.memory_space<semaphore_mem>> -> memref<!tpu.dma_semaphore, #tpu.memory_space<semaphore_mem>>
    tpu.wait_dma2 semaphore(%103 : memref<!tpu.dma_semaphore, #tpu.memory_space<semaphore_mem>>) src(%arg2 : memref<2304x256xbf16, #tpu.memory_space<any>>) dst(%arg11 : memref<2304x256xbf16, #tpu.memory_space<vmem>>)
    %c0_142 = arith.constant 0 : index
    %c0_143 = arith.constant 0 : index
    %104 = vector.load %arg9[%c0_142, %c0_143] : memref<128x2304xbf16, #tpu.memory_space<vmem>>, vector<128x2304xbf16>
    %c0_144 = arith.constant 0 : index
    %c0_145 = arith.constant 0 : index
    %105 = vector.load %arg11[%c0_144, %c0_145] : memref<2304x256xbf16, #tpu.memory_space<vmem>>, vector<2304x256xbf16>
    %cst_146 = arith.constant dense<0.000000e+00> : vector<128x256xf32>
    %106 = tpu.matmul %104, %105, %cst_146 {dimension_numbers = #tpu.dot_dimension_numbers<[1], [0], [0], [1], [0, 0, 1, 1], [], []>} : vector<128x2304xbf16>, vector<2304x256xbf16>, vector<128x256xf32> -> vector<128x256xf32>
    %107 = arith.mulf %106, %106 : vector<128x256xf32>
    %108 = tpu.concatenate %106, %107 in 1 : vector<128x256xf32>, vector<128x256xf32> -> vector<128x512xf32>
    %cst_147 = arith.constant dense<0.000000e+00> : vector<512xf32>
    %109 = vector.multi_reduction <add>, %108, %cst_147 [0] : vector<128x512xf32> to vector<512xf32>
    %110 = vector.shape_cast %109 : vector<512xf32> to vector<1x512xf32>
    %cst_148 = arith.constant 7.812500e-03 : f32
    %111 = vector.broadcast %cst_148 : f32 to vector<1x512xf32>
    %112 = arith.mulf %110, %111 : vector<1x512xf32>
    %113 = vector.extract_strided_slice %112 {offsets = [0, 0], sizes = [1, 256], strides = [1, 1]} : vector<1x512xf32> to vector<1x256xf32>
    %114 = vector.extract_strided_slice %112 {offsets = [0, 256], sizes = [1, 256], strides = [1, 1]} : vector<1x512xf32> to vector<1x256xf32>
    %115 = arith.mulf %113, %113 : vector<1x256xf32>
    %116 = arith.subf %114, %115 : vector<1x256xf32>
    %117 = vector.broadcast %113 : vector<1x256xf32> to vector<128x256xf32>
    %118 = arith.subf %106, %117 : vector<128x256xf32>
    %cst_149 = arith.constant 9.99999974E-6 : f32
    %119 = vector.broadcast %cst_149 : f32 to vector<1x256xf32>
    %120 = arith.addf %116, %119 : vector<1x256xf32>
    %121 = math.rsqrt %120 : vector<1x256xf32>
    %122 = vector.broadcast %121 : vector<1x256xf32> to vector<128x256xf32>
    %123 = arith.mulf %118, %122 : vector<128x256xf32>
    %c0_150 = arith.constant 0 : index
    %c0_151 = arith.constant 0 : index
    %124 = vector.load %arg5[%c0_150, %c0_151] : memref<1x256xf32, #tpu.memory_space<vmem>>, vector<1x256xf32>
    %125 = vector.broadcast %124 : vector<1x256xf32> to vector<128x256xf32>
    %126 = arith.mulf %123, %125 : vector<128x256xf32>
    %c0_152 = arith.constant 0 : index
    %c0_153 = arith.constant 0 : index
    %127 = vector.load %arg6[%c0_152, %c0_153] : memref<1x256xf32, #tpu.memory_space<vmem>>, vector<1x256xf32>
    %128 = vector.broadcast %127 : vector<1x256xf32> to vector<128x256xf32>
    %129 = arith.addf %126, %128 : vector<128x256xf32>
    %130 = vector.shape_cast %129 : vector<128x256xf32> to vector<2x8x8x256xf32>
    %c0_154 = arith.constant 0 : index
    %c0_155 = arith.constant 0 : index
    %c0_156 = arith.constant 0 : index
    %c0_157 = arith.constant 0 : index
    %131 = vector.load %arg0[%c0_154, %c0_155, %c0_156, %c0_157] : memref<2x8x8x256xf32, #tpu.memory_space<vmem>>, vector<2x8x8x256xf32>
    %132 = arith.addf %130, %131 : vector<2x8x8x256xf32>
    %c0_158 = arith.constant 0 : index
    %c0_159 = arith.constant 0 : index
    %c0_160 = arith.constant 0 : index
    %c0_161 = arith.constant 0 : index
    %133 = vector.load %arg7[%c0_158, %c0_159, %c0_160, %c0_161] : memref<2x8x8x256xf32, #tpu.memory_space<vmem>>, vector<2x8x8x256xf32>
    tpu.vector_store %arg7[%c0_158, %c0_159, %c0_160, %c0_161], %132 {strides = array<i32>} : memref<2x8x8x256xf32, #tpu.memory_space<vmem>>, vector<2x8x8x256xf32>,
    return
  }
}

</mosaic_0001>

<bundles_post_ra>
// kernel: tpu_custom_call.1
= control target key start
LH: loop header
LB: loop body
LE: loop exit
PB: predicated region body
PF: predicated region fallthrough
CT: control target
= control target key end

     0   :  { %12 = vsyncpa [#allocation8], 0  ;;  %s16381_s0 = inlined_call_operand.hbm [shape: f32[2,8,8,256], index: 0, kind: input, shape index: {}]   ;;  %s16382_s1 = inlined_call_operand.hbm [shape: bf16[2304,256], index: 1, kind: input, shape index: {}]   ;;  %s16383_s2 = inlined_call_operand.hbm [shape: bf16[2304,256], index: 2, kind: input, shape index: {}]   ;;  %s16384_s3 = inlined_call_operand.hbm [shape: f32[1,256], index: 3, kind: input, shape index: {}]   ;;  %s16385_s4 = inlined_call_operand.hbm [shape: f32[1,256], index: 4, kind: input, shape index: {}]   ;;  %s16386_s5 = inlined_call_operand.hbm [shape: f32[1,256], index: 5, kind: input, shape index: {}]   ;;  %s16387_s6 = inlined_call_operand.hbm [shape: f32[1,256], index: 6, kind: input, shape index: {}]   ;;  %s16388_s7 = inlined_call_operand.hbm [shape: f32[2,8,8,256], index: 7, kind: output, shape index: {}]  }
   0x1   :  { %13 = vsyncpa [#allocation11], 0 }
   0x2   :  { %14 = vsyncpa [#allocation14], 0 }
   0x3   :  { %15 = vsyncpa [#allocation9], 0  ;;  %s11840_s24 = smov [#allocation10]   ;;  %s11841_s26 = smov [#allocation13]  }
   0x4   :  { %s34_s25 = sshll.u32 %s11840_s24, 4  ;;  %s54_s27 = sshll.u32 %s11841_s26, 4  ;;  %s35_s25 = int_to_ptr.vmem [resolvable:$true] %s34_s25  ;;  %s55_s27 = int_to_ptr.vmem [resolvable:$true] %s54_s27 }
   0x5   :  { %s11696_s30 = scalar_lea.hbm %s16384_s3, 32 }
   0x6   :  { %p11697_p0 = scmp.ne.s32.totalorder %s16384_s3, %s11696_s30  ;;  %p11700_p1 = scmp.lt.u32.totalorder %s11696_s30, %s16384_s3 }
   0x8   :  { %p11702_p2 = pnand %p11700_p1, %p11697_p0 }
   0xa   :  { %11705 = shalt.err (!%p11702_p2)
}
   0xb   :  { %s11706_s12 = scalar_lea.vmem %s35_s25, 32  ;;  %p11711_p4 = scmp.lt.s32.totalorder %s35_s25, %s35_s25 }
   0xc   :  { %p11707_p3 = scmp.ne.s32.totalorder %s35_s25, %s11706_s12  ;;  %p11712_p5 = scmp.lt.s32.totalorder %s11706_s12, %s11706_s12 }
   0xe   :  { %p11713_p6 = por %p11712_p5, %p11711_p4 }
  0x10   :  { %p11714_p7 = pnand %p11713_p6, %p11707_p3 }
  0x12   :  { %11717 = shalt.err (!%p11714_p7)
}
  0x13   :  { %37 = dma.hbm_to_vmem [thread:$0]  %s16384_s3, 32, %s35_s25, [#allocation11]  }
  0x14   :  { %s11718_s17 = scalar_lea.hbm %s16386_s5, 32 }
  0x15   :  { %p11719_p8 = scmp.ne.s32.totalorder %s16386_s5, %s11718_s17  ;;  %p11722_p9 = scmp.lt.u32.totalorder %s11718_s17, %s16386_s5 }
  0x17   :  { %p11724_p10 = pnand %p11722_p9, %p11719_p8 }
  0x19   :  { %11727 = shalt.err (!%p11724_p10)
}
  0x1a   :  { %s11728_s22 = scalar_lea.vmem %s55_s27, 32  ;;  %p11733_p12 = scmp.lt.s32.totalorder %s55_s27, %s55_s27 }
  0x1b   :  { %p11729_p11 = scmp.ne.s32.totalorder %s55_s27, %s11728_s22  ;;  %p11734_p13 = scmp.lt.s32.totalorder %s11728_s22, %s11728_s22 }
  0x1d   :  { %p11735_p0 = por %p11734_p13, %p11733_p12 }
  0x1f   :  { %p11736_p1 = pnand %p11735_p0, %p11729_p11 }
  0x21   :  { %11739 = shalt.err (!%p11736_p1)
}
  0x22   :  { %57 = dma.hbm_to_vmem [thread:$0]  %s16386_s5, 32, %s55_s27, [#allocation14]  }
  0x23   :  { %s11842_s24 = smov [#allocation7]   ;;  %s11740_s29 = scalar_lea.hbm %s16381_s0, 4096 }
  0x24   :  { %s21_s25 = sshll.u32 %s11842_s24, 4  ;;  %p11741_p2 = scmp.ne.s32.totalorder %s16381_s0, %s11740_s29  ;;  %s22_s25 = int_to_ptr.vmem [resolvable:$true] %s21_s25 }
  0x25   :  { %p11744_p3 = scmp.lt.u32.totalorder %s11740_s29, %s16381_s0 }
  0x27   :  { %p11746_p4 = pnand %p11744_p3, %p11741_p2 }
  0x29   :  { %11749 = shalt.err (!%p11746_p4)
}
  0x2a   :  { %s11750_s11 = scalar_lea.vmem %s22_s25, 4096  ;;  %p11755_p6 = scmp.lt.s32.totalorder %s22_s25, %s22_s25 }
  0x2b   :  { %p11751_p5 = scmp.ne.s32.totalorder %s22_s25, %s11750_s11  ;;  %p11756_p7 = scmp.lt.s32.totalorder %s11750_s11, %s11750_s11 }
  0x2d   :  { %p11757_p8 = por %p11756_p7, %p11755_p6 }
  0x2f   :  { %p11758_p9 = pnand %p11757_p8, %p11751_p5 }
  0x31   :  { %11761 = shalt.err (!%p11758_p9)
}
  0x32   :  { %s11843_s5 = smov 256   ;;  %s11844_s27 = smov 16  }
  0x33   :  { %27 = dma.hbm_to_vmem [thread:$0]  %s16381_s0, 4096, %s22_s25, [#allocation8], %s11843_s5, %s11843_s5, %s11844_s27  }
  0x34   :  { %s11845_s14 = smov [#allocation12]   ;;  %s11846_s16 = smov [#allocation15]  }
  0x35   :  { %s44_s15 = sshll.u32 %s11845_s14, 4  ;;  %s64_s17 = sshll.u32 %s11846_s16, 4  ;;  %s45_s15 = int_to_ptr.vmem [resolvable:$true] %s44_s15  ;;  %s65_s17 = int_to_ptr.vmem [resolvable:$true] %s64_s17 }
  0x36   :  { %s11762_s20 = scalar_lea.hbm %s16385_s4, 32 }
  0x37   :  { %p11763_p10 = scmp.ne.s32.totalorder %s16385_s4, %s11762_s20  ;;  %p11766_p11 = scmp.lt.u32.totalorder %s11762_s20, %s16385_s4 }
  0x39   :  { %p11768_p12 = pnand %p11766_p11, %p11763_p10 }
  0x3b   :  { %11771 = shalt.err (!%p11768_p12)
}
  0x3c   :  { %s11772_s0 = scalar_lea.vmem %s45_s15, 32  ;;  %p11777_p0 = scmp.lt.s32.totalorder %s45_s15, %s45_s15 }
  0x3d   :  { %p11773_p13 = scmp.ne.s32.totalorder %s45_s15, %s11772_s0  ;;  %p11778_p1 = scmp.lt.s32.totalorder %s11772_s0, %s11772_s0 }
  0x3f   :  { %p11779_p2 = por %p11778_p1, %p11777_p0 }
  0x41   :  { %p11780_p3 = pnand %p11779_p2, %p11773_p13 }
  0x43   :  { %11783 = shalt.err (!%p11780_p3)
}
  0x44   :  { %47 = dma.hbm_to_vmem [thread:$0]  %s16385_s4, 32, %s45_s15, [#allocation11]  }
  0x45   :  { %s11784_s29 = scalar_lea.hbm %s16387_s6, 32 }
  0x46   :  { %p11785_p4 = scmp.ne.s32.totalorder %s16387_s6, %s11784_s29  ;;  %p11788_p5 = scmp.lt.u32.totalorder %s11784_s29, %s16387_s6 }
  0x48   :  { %p11790_p6 = pnand %p11788_p5, %p11785_p4 }
  0x4a   :  { %11793 = shalt.err (!%p11790_p6)
}
  0x4b   :  { %s11794_s11 = scalar_lea.vmem %s65_s17, 32  ;;  %p11799_p8 = scmp.lt.s32.totalorder %s65_s17, %s65_s17 }
  0x4c   :  { %p11795_p7 = scmp.ne.s32.totalorder %s65_s17, %s11794_s11  ;;  %p11800_p9 = scmp.lt.s32.totalorder %s11794_s11, %s11794_s11 }
  0x4e   :  { %p11801_p10 = por %p11800_p9, %p11799_p8 }
  0x50   :  { %p11802_p11 = pnand %p11801_p10, %p11795_p7 }
  0x52   :  { %11805 = shalt.err (!%p11802_p11)
}
  0x53   :  { %67 = dma.hbm_to_vmem [thread:$0]  %s16387_s6, 32, %s65_s17, [#allocation14]  }
  0x54   :  { %11828 = dma.done.wait [#allocation8], 4096  }
  0x55   :  { %11829 = vsyncadd [#allocation8], 4294963200 }
  0x56   :  { %11830 = dma.done.wait [#allocation11], 64  }
  0x57   :  { %11831 = vsyncadd [#allocation11], 4294967232 }
  0x58   :  { %11832 = dma.done.wait [#allocation14], 64  }
  0x59   :  { %11833 = vsyncadd [#allocation14], 4294967232  ;;  %s88_s13 = sld [smem:[#allocation0]]   ;;  %100 = sst [smem:[#allocation18]] %s11843_s5  ;;  %v11857_v0 = vmov 0   ;;  %vm164_vm0 = vcmask 1040384  }
  0x5a   :  { %102 = sst [smem:[#allocation18 + $0x1]] %s11843_s5  ;;  %s11847_s14 = smov [#allocation4]   ;;  %vm165_vm1 = vsmask.f32 256  ;;  %vm263_vm3 = vcmask 1047556   ;;  %vm682_vm6 = vcmask 1044480  }
  0x5b   :  { %s96_s15 = sshll.u32 %s11847_s14, 4  ;;  %s11848_s16 = smov 2   ;;  %vm11972_vm2 = vmand %vm164_vm0, %vm165_vm1  ;;  %vm264_vm4 = vsmask.f32 7954  ;;  %vm683_vm7 = vsmask.f32 4354  ;;  %s97_s15 = int_to_ptr.vmem [resolvable:$true] %s96_s15 }
  0x5c   :  { %104 = sst [smem:[#allocation18 + $0x2]] %s11848_s16  ;;  %s11849_s18 = smov 64   ;;  %vm12034_vm5 = vmand %vm263_vm3, %vm264_vm4  ;;  %vm1085_vm8 = vsmask.f32 3328  ;;  %vm1086_vm9 = vsmask.f32 7440 }
  0x5d   :  { %106 = sst [smem:[#allocation18 + $0x3]] %s11849_s18  ;;  %s11850_s19 = smov 128   ;;  %vm1552_vm10 = vcmask 1042432   ;;  %vm1553_vm11 = vcmask 1046532   ;;  %vm12123_vm12 = vmand %vm682_vm6, %vm683_vm7 }
  0x5e   :  { %108 = sst [smem:[#allocation18 + $0x4]] %s11850_s19  ;;  %s11851_s20 = smov 4   ;;  %vm12149_vm13 = vmor %vm1085_vm8, %vm1086_vm9 }
  0x5f   :  { %s10268_s6 = sshll.u32 %s88_s13, 26  ;;  %110 = sst [smem:[#allocation18 + $0x5]] %s11848_s16  ;;  %vm12162_vm14 = vmor %vm1552_vm10, %vm1553_vm11 }
  0x60   :  { %s10269_s17 = sadd.s32 134217728, %s10268_s6  ;;  %112 = sst [smem:[#allocation18 + $0x6]] %s11850_s19 }
  0x61   :  { %114 = sst [smem:[#allocation18 + $0x7]] %s11849_s18  ;;  %s11852_s21 = smov [#allocation6]  }
  0x62   :  { %116 = sst [smem:[#allocation18 + $0x8]] %s11851_s20  ;;  %s11853_s22 = smov [#allocation17]  }
  0x63   :  { %118 = dma.general %s16382_s1, 36864, %s97_s15, %s11852_s21, %s11853_s22, [#allocation18], %s10269_s17, 0  }
  0x64   :  { %135 = sst [smem:[#allocation20]] %s11843_s5  ;;  %s11854_s0 = smov [#allocation5]  }
  0x65   :  { %137 = sst [smem:[#allocation20 + $0x1]] %s11843_s5  ;;  %s131_s24 = sshll.u32 %s11854_s0, 4  ;;  %s132_s24 = int_to_ptr.vmem [resolvable:$true] %s131_s24 }
  0x66   :  { %139 = sst [smem:[#allocation20 + $0x2]] %s11848_s16  ;;  %s11855_s25 = smov [#allocation6 + $0x1]  }
  0x67   :  { %141 = sst [smem:[#allocation20 + $0x3]] %s11849_s18  ;;  %s11856_s26 = smov [#allocation19]  }
  0x68   :  { %143 = sst [smem:[#allocation20 + $0x4]] %s11850_s19 }
  0x69   :  { %145 = sst [smem:[#allocation20 + $0x5]] %s11848_s16 }
  0x6a   :  { %147 = sst [smem:[#allocation20 + $0x6]] %s11850_s19 }
  0x6b   :  { %149 = sst [smem:[#allocation20 + $0x7]] %s11849_s18 }
  0x6c   :  { %151 = sst [smem:[#allocation20 + $0x8]] %s11851_s20 }
  0x6d   :  { %153 = dma.general %s16383_s2, 36864, %s132_s24, %s11855_s25, %s11856_s26, [#allocation20], %s10269_s17, 0  }
  0x6e   :  { %154 = vst [vmem:[#allocation2] sm:$0xff] %v11857_v0  ;;  %155 = vst [vmem:[#allocation2 + $0x8] sm:$0xff] %v11857_v0  ;;  %v167_v2 = vld [vmem:[#allocation2 + $0x10] sm:$0x1]  ;;  %v170_v3 = vld [vmem:[#allocation2 + $0x18] sm:$0x1] }
  0x6f   :  { %156 = vst [vmem:[#allocation2 + $0xa0] sm:$0xff] %v11857_v0  ;;  %157 = vst [vmem:[#allocation2 + $0xa8] sm:$0xff] %v11857_v0  ;;  %v173_v4 = vld [vmem:[#allocation2 + $0x20] sm:$0x1]  ;;  %v168_v5 = vsel %vm11972_vm2, 0, %v167_v2  ;;  %v171_v6 = vsel %vm11972_vm2, 0, %v170_v3 }
  0x70   :  { %159 = vst [vmem:[#allocation2 + $0x90] sm:$0xff] %v11857_v0  ;;  %160 = vst [vmem:[#allocation2 + $0x98] sm:$0xff] %v11857_v0  ;;  %v174_v7 = vsel %vm11972_vm2, 0, %v173_v4  ;;  %v176_v8 = vld [vmem:[#allocation2 + $0x28] sm:$0x1] }
  0x71   :  { %161 = vst [vmem:[#allocation2 + $0x130] sm:$0xff] %v11857_v0  ;;  %162 = vst [vmem:[#allocation2 + $0x138] sm:$0xff] %v11857_v0  ;;  %v177_v9 = vsel %vm11972_vm2, 0, %v176_v8  ;;  %v179_v10 = vld [vmem:[#allocation2 + $0x30] sm:$0x1] }
  0x72   :  { %169 = vst [vmem:[#allocation2 + $0x10] sm:$0x1] %v168_v5  ;;  %172 = vst [vmem:[#allocation2 + $0x18] sm:$0x1] %v171_v6  ;;  %v182_v11 = vld [vmem:[#allocation2 + $0x38] sm:$0x1] }
  0x73   :  { %175 = vst [vmem:[#allocation2 + $0x20] sm:$0x1] %v174_v7  ;;  %178 = vst [vmem:[#allocation2 + $0x28] sm:$0x1] %v177_v9  ;;  %v180_v12 = vsel %vm11972_vm2, 0, %v179_v10  ;;  %v183_v13 = vsel %vm11972_vm2, 0, %v182_v11 }
  0x74   :  { %v185_v14 = vld [vmem:[#allocation2 + $0x40] sm:$0x1]  ;;  %v188_v15 = vld [vmem:[#allocation2 + $0x48] sm:$0x1]  ;;  %181 = vst [vmem:[#allocation2 + $0x30] sm:$0x1] %v180_v12 }
  0x75   :  { %184 = vst [vmem:[#allocation2 + $0x38] sm:$0x1] %v183_v13  ;;  %v186_v16 = vsel %vm11972_vm2, 0, %v185_v14  ;;  %v189_v17 = vsel %vm11972_vm2, 0, %v188_v15  ;;  %v191_v18 = vld [vmem:[#allocation2 + $0x50] sm:$0x1] }
  0x76   :  { %v194_v19 = vld [vmem:[#allocation2 + $0x58] sm:$0x1]  ;;  %187 = vst [vmem:[#allocation2 + $0x40] sm:$0x1] %v186_v16  ;;  %190 = vst [vmem:[#allocation2 + $0x48] sm:$0x1] %v189_v17 }
  0x77   :  { %v192_v20 = vsel %vm11972_vm2, 0, %v191_v18  ;;  %v195_v21 = vsel %vm11972_vm2, 0, %v194_v19  ;;  %v197_v22 = vld [vmem:[#allocation2 + $0x60] sm:$0x1]  ;;  %v200_v23 = vld [vmem:[#allocation2 + $0x68] sm:$0x1] }
  0x78   :  { %193 = vst [vmem:[#allocation2 + $0x50] sm:$0x1] %v192_v20  ;;  %196 = vst [vmem:[#allocation2 + $0x58] sm:$0x1] %v195_v21  ;;  %v198_v24 = vsel %vm11972_vm2, 0, %v197_v22  ;;  %v201_v25 = vsel %vm11972_vm2, 0, %v200_v23 }
  0x79   :  { %v203_v26 = vld [vmem:[#allocation2 + $0x70] sm:$0x1]  ;;  %v206_v27 = vld [vmem:[#allocation2 + $0x78] sm:$0x1]  ;;  %199 = vst [vmem:[#allocation2 + $0x60] sm:$0x1] %v198_v24 }
  0x7a   :  { %202 = vst [vmem:[#allocation2 + $0x68] sm:$0x1] %v201_v25  ;;  %v204_v28 = vsel %vm11972_vm2, 0, %v203_v26  ;;  %v207_v29 = vsel %vm11972_vm2, 0, %v206_v27  ;;  %v209_v30 = vld [vmem:[#allocation2 + $0x80] sm:$0x1] }
  0x7b   :  { %v212_v31 = vld [vmem:[#allocation2 + $0x88] sm:$0x1]  ;;  %205 = vst [vmem:[#allocation2 + $0x70] sm:$0x1] %v204_v28  ;;  %208 = vst [vmem:[#allocation2 + $0x78] sm:$0x1] %v207_v29 }
  0x7c   :  { %v210_v32 = vsel %vm11972_vm2, 0, %v209_v30  ;;  %v213_v33 = vsel %vm11972_vm2, 0, %v212_v31  ;;  %v215_v34 = vld [vmem:[#allocation2 + $0xb0] sm:$0x1]  ;;  %v218_v35 = vld [vmem:[#allocation2 + $0xb8] sm:$0x1] }
  0x7d   :  { %211 = vst [vmem:[#allocation2 + $0x80] sm:$0x1] %v210_v32  ;;  %214 = vst [vmem:[#allocation2 + $0x88] sm:$0x1] %v213_v33  ;;  %v216_v36 = vsel %vm11972_vm2, 0, %v215_v34  ;;  %v219_v37 = vsel %vm11972_vm2, 0, %v218_v35 }
  0x7e   :  { %v221_v38 = vld [vmem:[#allocation2 + $0xc0] sm:$0x1]  ;;  %v224_v39 = vld [vmem:[#allocation2 + $0xc8] sm:$0x1]  ;;  %217 = vst [vmem:[#allocation2 + $0xb0] sm:$0x1] %v216_v36 }
  0x7f   :  { %220 = vst [vmem:[#allocation2 + $0xb8] sm:$0x1] %v219_v37  ;;  %v222_v40 = vsel %vm11972_vm2, 0, %v221_v38  ;;  %v225_v41 = vsel %vm11972_vm2, 0, %v224_v39  ;;  %v227_v42 = vld [vmem:[#allocation2 + $0xd0] sm:$0x1] }
  0x80   :  { %v230_v43 = vld [vmem:[#allocation2 + $0xd8] sm:$0x1]  ;;  %223 = vst [vmem:[#allocation2 + $0xc0] sm:$0x1] %v222_v40  ;;  %226 = vst [vmem:[#allocation2 + $0xc8] sm:$0x1] %v225_v41 }
  0x81   :  { %v228_v44 = vsel %vm11972_vm2, 0, %v227_v42  ;;  %v231_v45 = vsel %vm11972_vm2, 0, %v230_v43  ;;  %v233_v46 = vld [vmem:[#allocation2 + $0xe0] sm:$0x1]  ;;  %v236_v47 = vld [vmem:[#allocation2 + $0xe8] sm:$0x1] }
  0x82   :  { %229 = vst [vmem:[#allocation2 + $0xd0] sm:$0x1] %v228_v44  ;;  %232 = vst [vmem:[#allocation2 + $0xd8] sm:$0x1] %v231_v45  ;;  %v234_v48 = vsel %vm11972_vm2, 0, %v233_v46  ;;  %v237_v49 = vsel %vm11972_vm2, 0, %v236_v47 }
  0x83   :  { %v239_v50 = vld [vmem:[#allocation2 + $0xf0] sm:$0x1]  ;;  %v242_v51 = vld [vmem:[#allocation2 + $0xf8] sm:$0x1]  ;;  %235 = vst [vmem:[#allocation2 + $0xe0] sm:$0x1] %v234_v48 }
  0x84   :  { %238 = vst [vmem:[#allocation2 + $0xe8] sm:$0x1] %v237_v49  ;;  %v240_v52 = vsel %vm11972_vm2, 0, %v239_v50  ;;  %v243_v53 = vsel %vm11972_vm2, 0, %v242_v51  ;;  %v245_v54 = vld [vmem:[#allocation2 + $0x100] sm:$0x1] }
  0x85   :  { %v248_v55 = vld [vmem:[#allocation2 + $0x108] sm:$0x1]  ;;  %241 = vst [vmem:[#allocation2 + $0xf0] sm:$0x1] %v240_v52  ;;  %244 = vst [vmem:[#allocation2 + $0xf8] sm:$0x1] %v243_v53 }
  0x86   :  { %v246_v56 = vsel %vm11972_vm2, 0, %v245_v54  ;;  %v249_v57 = vsel %vm11972_vm2, 0, %v248_v55  ;;  %v251_v58 = vld [vmem:[#allocation2 + $0x110] sm:$0x1]  ;;  %v254_v59 = vld [vmem:[#allocation2 + $0x118] sm:$0x1] }
  0x87   :  { %247 = vst [vmem:[#allocation2 + $0x100] sm:$0x1] %v246_v56  ;;  %250 = vst [vmem:[#allocation2 + $0x108] sm:$0x1] %v249_v57  ;;  %v252_v61 = vsel %vm11972_vm2, 0, %v251_v58  ;;  %v255_v62 = vsel %vm11972_vm2, 0, %v254_v59 }
  0x88   :  { %v257_v63 = vld [vmem:[#allocation2 + $0x120] sm:$0x1]  ;;  %v260_v0 = vld [vmem:[#allocation2 + $0x128] sm:$0x1]  ;;  %253 = vst [vmem:[#allocation2 + $0x110] sm:$0x1] %v252_v61 }
  0x89   :  { %256 = vst [vmem:[#allocation2 + $0x118] sm:$0x1] %v255_v62  ;;  %v258_v2 = vsel %vm11972_vm2, 0, %v257_v63  ;;  %v261_v3 = vsel %vm11972_vm2, 0, %v260_v0  ;;  %v266_v4 = vld [vmem:[#allocation2 + $0x10] sm:$0xf0] }
  0x8a   :  { %v269_v5 = vld [vmem:[#allocation2 + $0x18] sm:$0xf0]  ;;  %259 = vst [vmem:[#allocation2 + $0x120] sm:$0x1] %v258_v2  ;;  %262 = vst [vmem:[#allocation2 + $0x128] sm:$0x1] %v261_v3 }
  0x8b   :  { %v267_v6 = vsel %vm12034_vm5, 0, %v266_v4  ;;  %v270_v7 = vsel %vm12034_vm5, 0, %v269_v5  ;;  %v272_v8 = vld [vmem:[#allocation2 + $0x20] sm:$0xf0]  ;;  %v275_v9 = vld [vmem:[#allocation2 + $0x28] sm:$0xf0] }
  0x8c   :  { %268 = vst [vmem:[#allocation2 + $0x10] sm:$0xf0] %v267_v6  ;;  %271 = vst [vmem:[#allocation2 + $0x18] sm:$0xf0] %v270_v7  ;;  %v273_v10 = vsel %vm12034_vm5, 0, %v272_v8  ;;  %v276_v1 = vsel %vm12034_vm5, 0, %v275_v9 }
  0x8d   :  { %v278_v11 = vld [vmem:[#allocation2 + $0x30] sm:$0xf0]  ;;  %v281_v12 = vld [vmem:[#allocation2 + $0x38] sm:$0xf0]  ;;  %274 = vst [vmem:[#allocation2 + $0x20] sm:$0xf0] %v273_v10 }
  0x8e   :  { %277 = vst [vmem:[#allocation2 + $0x28] sm:$0xf0] %v276_v1  ;;  %v279_v13 = vsel %vm12034_vm5, 0, %v278_v11  ;;  %v282_v14 = vsel %vm12034_vm5, 0, %v281_v12  ;;  %v284_v15 = vld [vmem:[#allocation2 + $0x40] sm:$0xf0] }
  0x8f   :  { %v287_v16 = vld [vmem:[#allocation2 + $0x48] sm:$0xf0]  ;;  %280 = vst [vmem:[#allocation2 + $0x30] sm:$0xf0] %v279_v13  ;;  %283 = vst [vmem:[#allocation2 + $0x38] sm:$0xf0] %v282_v14 }
  0x90   :  { %v285_v17 = vsel %vm12034_vm5, 0, %v284_v15  ;;  %v288_v18 = vsel %vm12034_vm5, 0, %v287_v16  ;;  %v290_v19 = vld [vmem:[#allocation2 + $0x50] sm:$0xf0]  ;;  %v293_v20 = vld [vmem:[#allocation2 + $0x58] sm:$0xf0] }
  0x91   :  { %286 = vst [vmem:[#allocation2 + $0x40] sm:$0xf0] %v285_v17  ;;  %289 = vst [vmem:[#allocation2 + $0x48] sm:$0xf0] %v288_v18  ;;  %v291_v21 = vsel %vm12034_vm5, 0, %v290_v19  ;;  %v294_v22 = vsel %vm12034_vm5, 0, %v293_v20 }
  0x92   :  { %v296_v23 = vld [vmem:[#allocation2 + $0x60] sm:$0xf0]  ;;  %v299_v24 = vld [vmem:[#allocation2 + $0x68] sm:$0xf0]  ;;  %292 = vst [vmem:[#allocation2 + $0x50] sm:$0xf0] %v291_v21 }
  0x93   :  { %295 = vst [vmem:[#allocation2 + $0x58] sm:$0xf0] %v294_v22  ;;  %v297_v25 = vsel %vm12034_vm5, 0, %v296_v23  ;;  %v300_v26 = vsel %vm12034_vm5, 0, %v299_v24  ;;  %v302_v27 = vld [vmem:[#allocation2 + $0x70] sm:$0xf0] }
  0x94   :  { %v305_v28 = vld [vmem:[#allocation2 + $0x78] sm:$0xf0]  ;;  %298 = vst [vmem:[#allocation2 + $0x60] sm:$0xf0] %v297_v25  ;;  %301 = vst [vmem:[#allocation2 + $0x68] sm:$0xf0] %v300_v26 }
  0x95   :  { %v303_v29 = vsel %vm12034_vm5, 0, %v302_v27  ;;  %v306_v30 = vsel %vm12034_vm5, 0, %v305_v28  ;;  %v308_v31 = vld [vmem:[#allocation2 + $0x80] sm:$0xf0]  ;;  %v311_v32 = vld [vmem:[#allocation2 + $0x88] sm:$0xf0] }
  0x96   :  { %304 = vst [vmem:[#allocation2 + $0x70] sm:$0xf0] %v303_v29  ;;  %307 = vst [vmem:[#allocation2 + $0x78] sm:$0xf0] %v306_v30  ;;  %v309_v33 = vsel %vm12034_vm5, 0, %v308_v31  ;;  %v312_v34 = vsel %vm12034_vm5, 0, %v311_v32 }
  0x97   :  { %v314_v35 = vld [vmem:[#allocation2 + $0xb0] sm:$0xf0]  ;;  %v317_v36 = vld [vmem:[#allocation2 + $0xb8] sm:$0xf0]  ;;  %310 = vst [vmem:[#allocation2 + $0x80] sm:$0xf0] %v309_v33 }
  0x98   :  { %313 = vst [vmem:[#allocation2 + $0x88] sm:$0xf0] %v312_v34  ;;  %v315_v37 = vsel %vm12034_vm5, 0, %v314_v35  ;;  %v318_v38 = vsel %vm12034_vm5, 0, %v317_v36  ;;  %v320_v39 = vld [vmem:[#allocation2 + $0xc0] sm:$0xf0] }
  0x99   :  { %v323_v40 = vld [vmem:[#allocation2 + $0xc8] sm:$0xf0]  ;;  %316 = vst [vmem:[#allocation2 + $0xb0] sm:$0xf0] %v315_v37  ;;  %319 = vst [vmem:[#allocation2 + $0xb8] sm:$0xf0] %v318_v38 }
  0x9a   :  { %v321_v41 = vsel %vm12034_vm5, 0, %v320_v39  ;;  %v324_v42 = vsel %vm12034_vm5, 0, %v323_v40  ;;  %v326_v43 = vld [vmem:[#allocation2 + $0xd0] sm:$0xf0]  ;;  %v329_v44 = vld [vmem:[#allocation2 + $0xd8] sm:$0xf0] }
  0x9b   :  { %322 = vst [vmem:[#allocation2 + $0xc0] sm:$0xf0] %v321_v41  ;;  %325 = vst [vmem:[#allocation2 + $0xc8] sm:$0xf0] %v324_v42  ;;  %v327_v45 = vsel %vm12034_vm5, 0, %v326_v43  ;;  %v330_v46 = vsel %vm12034_vm5, 0, %v329_v44 }
  0x9c   :  { %v332_v47 = vld [vmem:[#allocation2 + $0xe0] sm:$0xf0]  ;;  %v335_v48 = vld [vmem:[#allocation2 + $0xe8] sm:$0xf0]  ;;  %328 = vst [vmem:[#allocation2 + $0xd0] sm:$0xf0] %v327_v45 }
  0x9d   :  { %331 = vst [vmem:[#allocation2 + $0xd8] sm:$0xf0] %v330_v46  ;;  %v333_v49 = vsel %vm12034_vm5, 0, %v332_v47  ;;  %v336_v50 = vsel %vm12034_vm5, 0, %v335_v48  ;;  %v338_v51 = vld [vmem:[#allocation2 + $0xf0] sm:$0xf0] }
  0x9e   :  { %v341_v52 = vld [vmem:[#allocation2 + $0xf8] sm:$0xf0]  ;;  %334 = vst [vmem:[#allocation2 + $0xe0] sm:$0xf0] %v333_v49  ;;  %337 = vst [vmem:[#allocation2 + $0xe8] sm:$0xf0] %v336_v50 }
  0x9f   :  { %v339_v53 = vsel %vm12034_vm5, 0, %v338_v51  ;;  %v342_v54 = vsel %vm12034_vm5, 0, %v341_v52  ;;  %v344_v55 = vld [vmem:[#allocation2 + $0x100] sm:$0xf0]  ;;  %v347_v56 = vld [vmem:[#allocation2 + $0x108] sm:$0xf0] }
  0xa0   :  { %340 = vst [vmem:[#allocation2 + $0xf0] sm:$0xf0] %v339_v53  ;;  %343 = vst [vmem:[#allocation2 + $0xf8] sm:$0xf0] %v342_v54  ;;  %v345_v57 = vsel %vm12034_vm5, 0, %v344_v55  ;;  %v348_v58 = vsel %vm12034_vm5, 0, %v347_v56 }
  0xa1   :  { %v350_v59 = vld [vmem:[#allocation2 + $0x110] sm:$0xf0]  ;;  %v353_v61 = vld [vmem:[#allocation2 + $0x118] sm:$0xf0]  ;;  %346 = vst [vmem:[#allocation2 + $0x100] sm:$0xf0] %v345_v57 }
  0xa2   :  { %349 = vst [vmem:[#allocation2 + $0x108] sm:$0xf0] %v348_v58  ;;  %v351_v62 = vsel %vm12034_vm5, 0, %v350_v59  ;;  %v354_v63 = vsel %vm12034_vm5, 0, %v353_v61  ;;  %v356_v0 = vld [vmem:[#allocation2 + $0x120] sm:$0xf0] }
  0xa3   :  { %v359_v2 = vld [vmem:[#allocation2 + $0x128] sm:$0xf0]  ;;  %352 = vst [vmem:[#allocation2 + $0x110] sm:$0xf0] %v351_v62  ;;  %355 = vst [vmem:[#allocation2 + $0x118] sm:$0xf0] %v354_v63 }
  0xa4   :  { %v357_v3 = vsel %vm12034_vm5, 0, %v356_v0  ;;  %v360_v4 = vsel %vm12034_vm5, 0, %v359_v2  ;;  %v362_v5 = vld [vmem:[#allocation7] sm:$0xff]  ;;  %v363_v6 = vld [vmem:[#allocation7 + $0x8] sm:$0xff]  ;;  %v11579_v19 = vld [vmem:[#allocation2 + $0x90] ss:$8 sps:$4 sm:$0xff]  }
  0xa5   :  { %358 = vst [vmem:[#allocation2 + $0x120] sm:$0xf0] %v357_v3  ;;  %361 = vst [vmem:[#allocation2 + $0x128] sm:$0xf0] %v360_v4  ;;  %v925_v7 = vld [vmem:[#allocation2] sm:$0x1f]  ;;  %v394_v9 = vpack.c.bf16 %v362_v5, %v362_v5  ;;  %v395_v10 = vpack.c.bf16 %v363_v6, %v363_v6 }
  0xa6   :  { %v926_v8 = vld [vmem:[#allocation2 + $0x8] sm:$0x1f]  ;;  %v1392_v1 = vld [vmem:[#allocation2] sm:$0x1e]  ;;  %v364_v27 = vld [vmem:[#allocation7 + $0x10] sm:$0xff]  ;;  %v3015_v32 = vshrl.u32 %v11579_v19, 16 }
  0xa7   :  { %v10288_v11 = vcombine.low %v925_v7, %v926_v8  ;;  %v10289_v12 = vcombine.high %v925_v7, %v926_v8  ;;  %v11573_v13 = vld [vmem:[#allocation2 + $0xa0] ss:$8 sps:$4 sm:$0xff]   ;;  %v11575_v15 = vld [vmem:[#allocation2 + $0xa4] ss:$8 sps:$4 sm:$0x11]   ;;  %v427_v16 = vshrl.u32 %v394_v9, 16  ;;  %v396_v34 = vpack.c.bf16 %v364_v27, %v364_v27 }
  0xa8   :  { %v1393_v14 = vld [vmem:[#allocation2 + $0x8] sm:$0x1e]  ;;  %v434_v17 = vshrl.u32 %v395_v10, 16  ;;  %v1201_v22 = vshrl.u32 %v11573_v13, 16  ;;  %v1204_v23 = vshll.u32 %v11573_v13, 16  ;;  %v1210_v24 = vshll.u32 %v11575_v15, 16 }
  0xa9   :  { %v10336_v18 = vcombine.low %v1392_v1, %v1393_v14  ;;  %v1089_v60 = vshrl.u32 %v10288_v11, 16  ;;  %v1092_v20 = vshll.u32 %v10288_v11, 16  ;;  %v12110_v21 = vshll.u32 %v10289_v12, 16  ;;  %v12112_v30 = vld [vmem:[#allocation2 + $0xa0] ss:$8 sps:$4 sm:$0xee]  }
  0xaa   :  { %v429_v25 = vrot.slane %v427_v16, 7  ;;  %v430_v26 = vshll.u32 %v394_v9, 16  ;;  %v436_v28 = vrot.slane %v434_v17, 7  ;;  %v437_v29 = vshll.u32 %v395_v10, 16  ;;  %v365_v35 = vld [vmem:[#allocation7 + $0x18] sm:$0xff]  ;;  %v366_v40 = vld [vmem:[#allocation7 + $0x20] sm:$0xff] }
  0xab   :  { %v12114_v31 = vrot.slane %v10336_v18, 9  ;;  %v3018_v33 = vshll.u32 %v11579_v19, 16  ;;  %v1091_v36 = vrot.slane %v1089_v60, 4  ;;  %v1094_v37 = vrot.slane %v1092_v20, 5  ;;  %v367_v45 = vld [vmem:[#allocation7 + $0x28] sm:$0xff]  ;;  %v368_v8 = vld [vmem:[#allocation7 + $0x30] sm:$0xff] }
  0xac   :  { %v1100_v38 = vrot.slane %v12110_v21, 5  ;;  %v10337_v39 = vcombine.high %v1392_v1, %v1393_v14  ;;  %v1203_v41 = vrot.slane %v1201_v22, 4  ;;  %v1206_v42 = vrot.slane %v1204_v23, 5  ;;  %v12119_v46 = vld [vmem:[#allocation2 + $0xa4] ss:$8 sps:$4 sm:$0x11]  }
  0xad   :  { %v12117_v43 = vrot.slane %v1210_v24, 5  ;;  %v432_v44 = vor.u32 %v430_v26, %v429_v25  ;;  %v11581_v47 = vld [vmem:[#allocation2 + $0x94] ss:$8 sps:$4 sm:$0x11]   ;;  %v16772_v48 = vmov 0  ;;  %v439_v49 = vor.u32 %v437_v29, %v436_v28  ;;  %v370_v29 = vld [vmem:[#allocation7 + $0x40] sm:$0xff] }
  0xae   :  { %v16773_v48 = vsel %vm12123_vm12, 4294967295, %v16772_v48  ;;  %v397_v50 = vpack.c.bf16 %v365_v35, %v365_v35  ;;  %v3017_v51 = vrot.slane %v3015_v32, 4  ;;  %v3020_v52 = vrot.slane %v3018_v33, 5  ;;  %v685_v57 = vld [vmem:[#allocation2 + $0x10] sm:$0x1f]  ;;  %v369_v17 = vld [vmem:[#allocation7 + $0x38] sm:$0xff] }
  0xaf   :  { %16774 = vst [vmem:[#allocation27_spill] sm:$0xff] %v16773_v48  ;;  %v441_v53 = vshrl.u32 %v396_v34, 16  ;;  %v398_v54 = vpack.c.bf16 %v366_v40, %v366_v40  ;;  %v1095_v55 = vor.u32 %v1094_v37, %v1091_v36  ;;  %v12127_v56 = vrot.slane %v10337_v39, 5  ;;  %v688_v0 = vld [vmem:[#allocation2 + $0x18] sm:$0x1f] }
  0xb0   :  { %v444_v58 = vshll.u32 %v396_v34, 16  ;;  %v399_v59 = vpack.c.bf16 %v367_v45, %v367_v45  ;;  %v1207_v61 = vor.u32 %v1206_v42, %v1203_v41  ;;  %v686_v63 = vsel %vm12123_vm12, %v432_v44, %v685_v57  ;;  %v691_v6 = vld [vmem:[#allocation2 + $0x20] sm:$0x1f]  ;;  %v12135_v9 = vld [vmem:[#allocation2 + $0x130] ss:$8 sps:$4 sm:$0xff]  }
  0xb1   :  { %v443_v2 = vrot.slane %v441_v53, 7  ;;  %v3024_v4 = vshll.u32 %v11581_v47, 16  ;;  %687 = vst [vmem:[#allocation2 + $0x10] sm:$0x1f] %v686_v63  ;;  %v689_v5 = vsel %vm12123_vm12, %v439_v49, %v688_v0  ;;  %v448_v7 = vshrl.u32 %v397_v50, 16 }
  0xb2   :  { %v3021_v10 = vor.u32 %v3020_v52, %v3017_v51  ;;  %690 = vst [vmem:[#allocation2 + $0x18] sm:$0x1f] %v689_v5  ;;  %v451_v11 = vshll.u32 %v397_v50, 16  ;;  %v455_v12 = vshrl.u32 %v398_v54, 16  ;;  %v458_v14 = vshll.u32 %v398_v54, 16 }
  0xb3   :  { %v446_v1 = vor.u32 %v444_v58, %v443_v2  ;;  %v450_v13 = vrot.slane %v448_v7, 7  ;;  %v462_v15 = vshrl.u32 %v399_v59, 16  ;;  %v465_v16 = vshll.u32 %v399_v59, 16  ;;  %v12137_v18 = vld [vmem:[#allocation2] sm:$0xf] }
  0xb4   :  { %v1096_v19 = vrot.slane %v1095_v55, 4  ;;  %v694_v20 = vld [vmem:[#allocation2 + $0x28] sm:$0x1f]  ;;  %v457_v22 = vrot.slane %v455_v12, 7  ;;  %v12141_v23 = vpack.c.bf16 %v368_v8, %v368_v8  ;;  %v12143_v24 = vrot.slane %v1207_v61, 4 }
  0xb5   :  { %v692_v60 = vsel %vm12123_vm12, %v446_v1, %v691_v6  ;;  %v453_v25 = vor.u32 %v451_v11, %v450_v13  ;;  %v697_v26 = vld [vmem:[#allocation2 + $0x30] sm:$0x1f]  ;;  %v464_v27 = vrot.slane %v462_v15, 7  ;;  %v12145_v28 = vpack.c.bf16 %v369_v17, %v369_v17  ;;  %v700_v37 = vld [vmem:[#allocation2 + $0x38] sm:$0x1f] }
  0xb6   :  { %693 = vst [vmem:[#allocation2 + $0x20] sm:$0x1f] %v692_v60  ;;  %v16775_v32 = vmov 0  ;;  %v12153_v33 = vrot.slane %v3021_v10, 4  ;;  %v12155_v34 = vrot.slane %v3024_v4, 5  ;;  %v460_v36 = vor.u32 %v458_v14, %v457_v22 }
  0xb7   :  { %v16776_v32 = vsel %vm12149_vm13, 4294967295, %v16775_v32  ;;  %v12158_v39 = vld [vmem:[#allocation2 + $0x8] sm:$0xf]  ;;  %v16778_v40 = vmov 0  ;;  %v695_v41 = vsel %vm12123_vm12, %v453_v25, %v694_v20  ;;  %v467_v42 = vor.u32 %v465_v16, %v464_v27  ;;  %v372_v20 = vld [vmem:[#allocation7 + $0x50] sm:$0xff] }
  0xb8   :  { %16777 = vst [vmem:[#allocation28_spill] sm:$0xff] %v16776_v32  ;;  %v16779_v40 = vsel %vm12162_vm14, 4294967295, %v16778_v40  ;;  %v469_v44 = vshrl.u32 %v12141_v23, 16  ;;  %v12170_v47 = vld [vmem:[#allocation2 + $0x10] sm:$0xf]  ;;  %v698_v51 = vsel %vm12123_vm12, %v460_v36, %v697_v26  ;;  %v12174_v52 = vpack.c.bf16 %v370_v29, %v370_v29 }
  0xb9   :  { %16780 = vst [vmem:[#allocation29_spill] sm:$0xff] %v16779_v40  ;;  %v927_v49 = vld [vmem:[#allocation2 + $0x10] sm:$0x1f]  ;;  %696 = vst [vmem:[#allocation2 + $0x28] sm:$0x1f] %v695_v41  ;;  %v701_v57 = vsel %vm12123_vm12, %v467_v42, %v700_v37  ;;  %v476_v58 = vshrl.u32 %v12145_v28, 16  ;;  %v12186_v61 = vsel %vm12149_vm13, %v1096_v19, %v1100_v38  ;;  %v12192_v63 = vsel %vm12162_vm14, %v12114_v31, %v12127_v56 }
  0xba   :  { %v1394_v50 = vld [vmem:[#allocation2 + $0x10] sm:$0x1e]  ;;  %699 = vst [vmem:[#allocation2 + $0x30] sm:$0x1f] %v698_v51  ;;  %16781 = vst [vmem:[#allocation30_spill] sm:$0xff] %v12186_v61  ;;  %v371_v31 = vld [vmem:[#allocation7 + $0x48] sm:$0xff] }
  0xbb   :  { %v1843_v54 = vld [vmem:[#allocation2 + $0x10] sm:$0x1f]  ;;  %16782 = vst [vmem:[#allocation31_spill] sm:$0xff] %v12192_v63  ;;  %v12194_v0 = vld [vmem:[#allocation2 + $0x18] sm:$0xf]  ;;  %v12203_v36 = vpack.c.bf16 %v371_v31, %v371_v31 }
  0xbc   :  { %v2307_v55 = vld [vmem:[#allocation2 + $0x10] sm:$0x1e]  ;;  %v928_v2 = vld [vmem:[#allocation2 + $0x18] sm:$0x1f]  ;;  %702 = vst [vmem:[#allocation2 + $0x38] sm:$0x1f] %v701_v57 }
  0xbd   :  { %v1395_v4 = vld [vmem:[#allocation2 + $0x18] sm:$0x1e]  ;;  %v10290_v6 = vcombine.low %v927_v49, %v928_v2  ;;  %v10291_v21 = vcombine.high %v927_v49, %v928_v2  ;;  %v12199_v22 = vld [vmem:[#allocation2 + $0x10] sm:$0xf]  ;;  %v12201_v29 = vld [vmem:[#allocation2 + $0x20] sm:$0xf] }
  0xbe   :  { %v10338_v7 = vcombine.low %v1394_v50, %v1395_v4  ;;  %v1844_v8 = vld [vmem:[#allocation2 + $0x18] sm:$0x1f]  ;;  %v10339_v10 = vcombine.high %v1394_v50, %v1395_v4  ;;  %16783 = vst [vmem:[#allocation32_spill] sm:$0xff] %v12199_v22  ;;  %16784 = vst [vmem:[#allocation33_spill] sm:$0xff] %v12201_v29  ;;  %v929_v50 = vld [vmem:[#allocation2 + $0x20] sm:$0x1f] }
  0xbf   :  { %v2308_v38 = vld [vmem:[#allocation2 + $0x18] sm:$0x1e]  ;;  %v10416_v1 = vcombine.low %v1843_v54, %v1844_v8  ;;  %v10417_v11 = vcombine.high %v1843_v54, %v1844_v8  ;;  %v1103_v56 = vshrl.u32 %v10290_v6, 16  ;;  %v1106_v13 = vshll.u32 %v10290_v6, 16  ;;  %v374_v4 = vld [vmem:[#allocation7 + $0x60] sm:$0xff] }
  0xc0   :  { %v10369_v14 = vrot.slane %v10338_v7, 9  ;;  %v10464_v15 = vcombine.low %v2307_v55, %v2308_v38  ;;  %v1112_v16 = vshll.u32 %v10291_v21, 16  ;;  %v1561_v17 = vrot.slane %v10339_v10, 5  ;;  %v373_v2 = vld [vmem:[#allocation7 + $0x58] sm:$0xff]  ;;  %v1396_v8 = vld [vmem:[#allocation2 + $0x20] sm:$0x1e] }
  0xc1   :  { %v2004_v19 = vshrl.u32 %v10416_v1, 16  ;;  %v2007_v60 = vshll.u32 %v10416_v1, 16  ;;  %v1105_v25 = vrot.slane %v1103_v56, 4  ;;  %v1108_v26 = vrot.slane %v1106_v13, 5  ;;  %v930_v10 = vld [vmem:[#allocation2 + $0x28] sm:$0x1f] }
  0xc2   :  { %v10465_v27 = vcombine.high %v2307_v55, %v2308_v38  ;;  %v12207_v37 = vsel %vm12162_vm14, %v10369_v14, %v1561_v17  ;;  %v2013_v49 = vshll.u32 %v10417_v11, 16  ;;  %v12213_v55 = vpack.c.bf16 %v372_v20, %v372_v20  ;;  %v12217_v11 = vld [vmem:[#allocation2 + $0x18] sm:$0xf]  ;;  %v1845_v56 = vld [vmem:[#allocation2 + $0x20] sm:$0x1f] }
  0xc3   :  { %16785 = vst [vmem:[#allocation34_spill] sm:$0xff] %v12207_v37  ;;  %v2006_v41 = vrot.slane %v2004_v19, 4  ;;  %v2009_v42 = vrot.slane %v2007_v60, 5  ;;  %v1109_v51 = vor.u32 %v1108_v26, %v1105_v25  ;;  %v1114_v6 = vrot.slane %v1112_v16, 5  ;;  %16786 = vst [vmem:[#allocation35_spill] sm:$0xff] %v12217_v11 }
  0xc4   :  { %v10496_v7 = vrot.slane %v10464_v15, 9  ;;  %v2469_v31 = vrot.slane %v10465_v27, 5  ;;  %v2309_v13 = vld [vmem:[#allocation2 + $0x20] sm:$0x1e]  ;;  %v10292_v14 = vcombine.low %v929_v50, %v930_v10  ;;  %v10293_v17 = vcombine.high %v929_v50, %v930_v10  ;;  %v1397_v19 = vld [vmem:[#allocation2 + $0x28] sm:$0x1e] }
  0xc5   :  { %v2010_v21 = vor.u32 %v2009_v42, %v2006_v41  ;;  %v1110_v1 = vrot.slane %v1109_v51, 4  ;;  %v2015_v20 = vrot.slane %v2013_v49, 5  ;;  %v12219_v25 = vld [vmem:[#allocation2 + $0x28] sm:$0xf]  ;;  %v12223_v15 = vrot.slane %v469_v44, 7 }
  0xc6   :  { %16787 = vst [vmem:[#allocation36_spill] sm:$0xff] %v12219_v25  ;;  %v12225_v16 = vpack.c.bf16 %v373_v2, %v373_v2  ;;  %v1117_v27 = vshrl.u32 %v10292_v14, 16  ;;  %v1120_v41 = vshll.u32 %v10292_v14, 16  ;;  %v1846_v42 = vld [vmem:[#allocation2 + $0x28] sm:$0x1f]  ;;  %v12231_v50 = vpack.c.bf16 %v374_v4, %v374_v4 }
  0xc7   :  { %v2011_v60 = vrot.slane %v2010_v21, 4  ;;  %v12229_v26 = vsel %vm12149_vm13, %v1110_v1, %v1114_v6  ;;  %v2310_v51 = vld [vmem:[#allocation2 + $0x28] sm:$0x1e]  ;;  %v2756_v44 = vld [vmem:[#allocation2 + $0x20] sm:$0x1f]  ;;  %v10340_v10 = vcombine.low %v1396_v8, %v1397_v19  ;;  %v12239_v38 = vrot.slane %v476_v58, 7 }
  0xc8   :  { %16788 = vst [vmem:[#allocation37_spill] sm:$0xff] %v12229_v26  ;;  %v2757_v2 = vld [vmem:[#allocation2 + $0x28] sm:$0x1f]  ;;  %v12247_v4 = vsel %vm12162_vm14, %v10496_v7, %v2469_v31  ;;  %v12249_v1 = vshll.u32 %v10293_v17, 16  ;;  %v10341_v14 = vcombine.high %v1396_v8, %v1397_v19  ;;  %v10418_v57 = vcombine.low %v1845_v56, %v1846_v42  ;;  %v12253_v62 = vld [vmem:[#allocation2 + $0x20] sm:$0xf] }
  0xc9   :  { %v12243_v6 = vsel %vm12149_vm13, %v2011_v60, %v2015_v20  ;;  %16790 = vst [vmem:[#allocation39_spill] sm:$0xff] %v12247_v4  ;;  %v10419_v49 = vcombine.high %v1845_v56, %v1846_v42  ;;  %v10466_v21 = vcombine.low %v2309_v13, %v2310_v51  ;;  %v1119_v53 = vrot.slane %v1117_v27, 4  ;;  %v3220_v60 = vld [vmem:[#allocation2 + $0x20] sm:$0x1e]  ;;  %v12257_v8 = vld [vmem:[#allocation2 + $0x28] sm:$0xf] }
  0xca   :  { %16789 = vst [vmem:[#allocation38_spill] sm:$0xff] %v12243_v6  ;;  %v1122_v58 = vrot.slane %v1120_v41, 5  ;;  %v10467_v5 = vcombine.high %v2309_v13, %v2310_v51  ;;  %v10544_v35 = vcombine.low %v2756_v44, %v2757_v2  ;;  %v10370_v20 = vrot.slane %v10340_v10, 9  ;;  %v12255_v17 = vld [vmem:[#allocation2 + $0x20] sm:$0xf] }
  0xcb   :  { %v2018_v3 = vshrl.u32 %v10418_v57, 16  ;;  %v2021_v7 = vshll.u32 %v10418_v57, 16  ;;  %v10497_v31 = vrot.slane %v10466_v21, 9  ;;  %16791 = vst [vmem:[#allocation40_spill] sm:$0xff] %v12255_v17  ;;  %v1128_v19 = vrot.slane %v12249_v1, 5 }
  0xcc   :  { %v2027_v54 = vshll.u32 %v10419_v49, 16  ;;  %v2473_v56 = vrot.slane %v10467_v5, 5  ;;  %v2917_v42 = vshrl.u32 %v10544_v35, 16  ;;  %v3221_v27 = vld [vmem:[#allocation2 + $0x28] sm:$0x1e]  ;;  %v1565_v41 = vrot.slane %v10341_v14, 5 }
  0xcd   :  { %v2020_v13 = vrot.slane %v2018_v3, 4  ;;  %v2023_v51 = vrot.slane %v2021_v7, 5  ;;  %v2920_v12 = vshll.u32 %v10544_v35, 16  ;;  %v12260_v59 = vld [vmem:[#allocation2 + $0x30] sm:$0xf]  ;;  %v1123_v10 = vor.u32 %v1122_v58, %v1119_v53 }
  0xce   :  { %v12264_v57 = vsel %vm12162_vm14, %v10497_v31, %v2473_v56  ;;  %v10545_v21 = vcombine.high %v2756_v44, %v2757_v2  ;;  %v2919_v45 = vrot.slane %v2917_v42, 4  ;;  %v12266_v29 = vld [vmem:[#allocation2 + $0x30] sm:$0xf]  ;;  %v12268_v1 = vld [vmem:[#allocation2 + $0x38] sm:$0xf]  ;;  %v2029_v58 = vrot.slane %v2027_v54, 5 }
  0xcf   :  { %16792 = vst [vmem:[#allocation41_spill] sm:$0xff] %v12264_v57  ;;  %16793 = vst [vmem:[#allocation42_spill] sm:$0xff] %v12266_v29  ;;  %v2024_v5 = vor.u32 %v2023_v51, %v2020_v13  ;;  %v2922_v35 = vrot.slane %v2920_v12, 5  ;;  %v931_v14 = vld [vmem:[#allocation2 + $0x30] sm:$0x1f]  ;;  %v10592_v7 = vcombine.low %v3220_v60, %v3221_v27  ;;  %v10593_v31 = vcombine.high %v3220_v60, %v3221_v27 }
  0xd0   :  { %v932_v53 = vld [vmem:[#allocation2 + $0x38] sm:$0x1f]  ;;  %v1398_v2 = vld [vmem:[#allocation2 + $0x30] sm:$0x1e]  ;;  %v1124_v49 = vrot.slane %v1123_v10, 4  ;;  %v2926_v12 = vshll.u32 %v10545_v21, 16 }
  0xd1   :  { %v1399_v56 = vld [vmem:[#allocation2 + $0x38] sm:$0x1e]  ;;  %v2025_v42 = vrot.slane %v2024_v5, 4  ;;  %v2923_v22 = vor.u32 %v2922_v35, %v2919_v45  ;;  %v10294_v3 = vcombine.low %v931_v14, %v932_v53  ;;  %v10295_v57 = vcombine.high %v931_v14, %v932_v53  ;;  %v1847_v27 = vld [vmem:[#allocation2 + $0x30] sm:$0x1f]  ;;  %v375_v21 = vld [vmem:[#allocation7 + $0x68] sm:$0xff] }
  0xd2   :  { %v10624_v60 = vrot.slane %v10592_v7, 9  ;;  %v10342_v44 = vcombine.low %v1398_v2, %v1399_v56  ;;  %v10343_v4 = vcombine.high %v1398_v2, %v1399_v56  ;;  %v1848_v5 = vld [vmem:[#allocation2 + $0x38] sm:$0x1f]  ;;  %v3382_v13 = vrot.slane %v10593_v31, 5  ;;  %v12298_v35 = vld [vmem:[#allocation2 + $0x30] sm:$0x1e] }
  0xd3   :  { %v12282_v54 = vsel %vm12149_vm13, %v2025_v42, %v2029_v58  ;;  %v1131_v10 = vshrl.u32 %v10294_v3, 16  ;;  %v12290_v14 = vsel %vm12162_vm14, %v10370_v20, %v1565_v41  ;;  %v2924_v53 = vrot.slane %v2923_v22, 4  ;;  %v12292_v42 = vld [vmem:[#allocation2 + $0x28] sm:$0xf]  ;;  %v2758_v17 = vld [vmem:[#allocation2 + $0x30] sm:$0x1f] }
  0xd4   :  { %16794 = vst [vmem:[#allocation43_spill] sm:$0xff] %v12282_v54  ;;  %16795 = vst [vmem:[#allocation44_spill] sm:$0xff] %v12290_v14  ;;  %v1134_v58 = vshll.u32 %v10294_v3, 16  ;;  %v10371_v7 = vrot.slane %v10342_v44, 9  ;;  %v1140_v56 = vshll.u32 %v10295_v57, 16  ;;  %v1569_v51 = vrot.slane %v10343_v4, 5 }
  0xd5   :  { %16796 = vst [vmem:[#allocation45_spill] sm:$0xff] %v12292_v42  ;;  %v1133_v2 = vrot.slane %v1131_v10, 4  ;;  %v10420_v29 = vcombine.low %v1847_v27, %v1848_v5  ;;  %v12296_v45 = vsel %vm12149_vm13, %v1124_v49, %v1128_v19  ;;  %v2928_v31 = vrot.slane %v2926_v12, 5  ;;  %v12310_v3 = vld [vmem:[#allocation2 + $0x38] sm:$0xf] }
  0xd6   :  { %16797 = vst [vmem:[#allocation46_spill] sm:$0xff] %v12296_v45  ;;  %v1136_v54 = vrot.slane %v1134_v58, 5  ;;  %v12300_v20 = vpack.c.bf16 %v375_v21, %v375_v21  ;;  %v12304_v22 = vsel %vm12162_vm14, %v10624_v60, %v3382_v13  ;;  %v12308_v41 = vsel %vm12162_vm14, %v10371_v7, %v1569_v51  ;;  %16800 = vst [vmem:[#allocation49_spill] sm:$0xff] %v12310_v3  ;;  %v2759_v19 = vld [vmem:[#allocation2 + $0x38] sm:$0x1f] }
  0xd7   :  { %16798 = vst [vmem:[#allocation47_spill] sm:$0xff] %v12304_v22  ;;  %16799 = vst [vmem:[#allocation48_spill] sm:$0xff] %v12308_v41  ;;  %v2032_v4 = vshrl.u32 %v10420_v29, 16  ;;  %v2035_v57 = vshll.u32 %v10420_v29, 16  ;;  %v12314_v49 = vsel %vm12149_vm13, %v2924_v53, %v2928_v31  ;;  %v3222_v44 = vld [vmem:[#allocation2 + $0x30] sm:$0x1e]  ;;  %v10421_v29 = vcombine.high %v1847_v27, %v1848_v5 }
  0xd8   :  { %16801 = vst [vmem:[#allocation50_spill] sm:$0xff] %v12314_v49  ;;  %v1137_v12 = vor.u32 %v1136_v54, %v1133_v2  ;;  %v12320_v60 = vld [vmem:[#allocation2 + $0x38] sm:$0x1e]  ;;  %v1142_v21 = vrot.slane %v1140_v56, 5  ;;  %v10546_v54 = vcombine.low %v2758_v17, %v2759_v19  ;;  %v10547_v2 = vcombine.high %v2758_v17, %v2759_v19  ;;  %v703_v53 = vld [vmem:[#allocation2 + $0x40] sm:$0x1f] }
  0xd9   :  { %v3223_v51 = vld [vmem:[#allocation2 + $0x38] sm:$0x1e]  ;;  %v12322_v58 = vrot.slane %v2032_v4, 4  ;;  %v12324_v7 = vrot.slane %v2035_v57, 5  ;;  %v10468_v31 = vcombine.low %v12298_v35, %v12320_v60  ;;  %v12340_v19 = vshll.u32 %v10421_v29, 16 }
  0xda   :  { %v1138_v6 = vrot.slane %v1137_v12, 4  ;;  %v10594_v13 = vcombine.low %v3222_v44, %v3223_v51  ;;  %v10595_v25 = vcombine.high %v3222_v44, %v3223_v51  ;;  %v2931_v5 = vshrl.u32 %v10546_v54, 16 }
  0xdb   :  { %v2934_v56 = vshll.u32 %v10546_v54, 16  ;;  %v2940_v4 = vshll.u32 %v10547_v2, 16  ;;  %v2038_v44 = vor.u32 %v12324_v7, %v12322_v58  ;;  %v16803_v54 = vshll.u32 %v12141_v23, 16 }
  0xdc   :  { %v12334_v27 = vsel %vm12149_vm13, %v1138_v6, %v1142_v21  ;;  %v10625_v12 = vrot.slane %v10594_v13, 9  ;;  %v2933_v51 = vrot.slane %v2931_v5, 4  ;;  %v3386_v6 = vrot.slane %v10595_v25, 5  ;;  %v706_v21 = vld [vmem:[#allocation2 + $0x48] sm:$0x1f] }
  0xdd   :  { %16802 = vst [vmem:[#allocation51_spill] sm:$0xff] %v12334_v27  ;;  %v2936_v10 = vrot.slane %v2934_v56, 5  ;;  %v2942_v3 = vrot.slane %v2940_v4, 5  ;;  %v474_v2 = vor.u32 %v16803_v54, %v12223_v15  ;;  %v16804_v57 = vshll.u32 %v12145_v28, 16 }
  0xde   :  { %v16805_v29 = vshrl.u32 %v12174_v52, 16  ;;  %v12354_v58 = vsel %vm12162_vm14, %v10625_v12, %v3386_v6  ;;  %v486_v25 = vshll.u32 %v12174_v52, 16  ;;  %v490_v7 = vshrl.u32 %v12203_v36, 16  ;;  %v712_v12 = vld [vmem:[#allocation2 + $0x58] sm:$0x1f] }
  0xdf   :  { %v481_v17 = vor.u32 %v16804_v57, %v12239_v38  ;;  %v2937_v42 = vor.u32 %v2936_v10, %v2933_v51  ;;  %16806 = vst [vmem:[#allocation52_spill] sm:$0xff] %v12354_v58  ;;  %v704_v28 = vsel %vm12123_vm12, %v474_v2, %v703_v53  ;;  %v709_v10 = vld [vmem:[#allocation2 + $0x50] sm:$0x1f]  ;;  %v493_v4 = vshll.u32 %v12203_v36, 16 }
  0xe0   :  { %v485_v13 = vrot.slane %v16805_v29, 7  ;;  %705 = vst [vmem:[#allocation2 + $0x40] sm:$0x1f] %v704_v28  ;;  %v492_v52 = vrot.slane %v490_v7, 7  ;;  %v497_v51 = vshrl.u32 %v12213_v55, 16  ;;  %v500_v6 = vshll.u32 %v12213_v55, 16 }
  0xe1   :  { %v707_v38 = vsel %vm12123_vm12, %v481_v17, %v706_v21  ;;  %v2938_v5 = vrot.slane %v2937_v42, 4  ;;  %v12367_v57 = vld [vmem:[#allocation2 + $0x90] ss:$8 sps:$4 sm:$0xee]   ;;  %v504_v53 = vshrl.u32 %v12225_v16, 16  ;;  %v507_v54 = vshll.u32 %v12225_v16, 16 }
  0xe2   :  { %708 = vst [vmem:[#allocation2 + $0x48] sm:$0x1f] %v707_v38  ;;  %v488_v56 = vor.u32 %v486_v25, %v485_v13  ;;  %v12373_v17 = vld [vmem:[#allocation2 + $0x94] ss:$8 sps:$4 sm:$0x11]   ;;  %v495_v21 = vor.u32 %v493_v4, %v492_v52  ;;  %v511_v2 = vshrl.u32 %v12231_v50, 16 }
  0xe3   :  { %v12377_v42 = vsel %vm12149_vm13, %v2938_v5, %v2942_v3  ;;  %v499_v16 = vrot.slane %v497_v51, 7  ;;  %v715_v13 = vld [vmem:[#allocation2 + $0x60] sm:$0x1f]  ;;  %v506_v25 = vrot.slane %v504_v53, 7  ;;  %v718_v7 = vld [vmem:[#allocation2 + $0x68] sm:$0x1f]  ;;  %v16809_v53 = vcombine.high %v12298_v35, %v12320_v60 }
  0xe4   :  { %16807 = vst [vmem:[#allocation53_spill] sm:$0xff] %v12377_v42  ;;  %v710_v36 = vsel %vm12123_vm12, %v488_v56, %v709_v10  ;;  %v713_v3 = vsel %vm12123_vm12, %v495_v21, %v712_v12  ;;  %v513_v28 = vrot.slane %v511_v2, 7  ;;  %v514_v38 = vshll.u32 %v12231_v50, 16  ;;  %v721_v4 = vld [vmem:[#allocation2 + $0x70] sm:$0x1f] }
  0xe5   :  { %711 = vst [vmem:[#allocation2 + $0x50] sm:$0x1f] %v710_v36  ;;  %v518_v10 = vshrl.u32 %v12300_v20, 16  ;;  %v10498_v5 = vrot.slane %v10468_v31, 9  ;;  %714 = vst [vmem:[#allocation2 + $0x58] sm:$0x1f] %v713_v3  ;;  %v502_v56 = vor.u32 %v500_v6, %v499_v16  ;;  %v509_v52 = vor.u32 %v507_v54, %v506_v25 }
  0xe6   :  { %v521_v23 = vshll.u32 %v12300_v20, 16  ;;  %v12391_v36 = vld [vmem:[#allocation2 + $0x30] sm:$0xf]  ;;  %v2039_v51 = vrot.slane %v2038_v44, 4  ;;  %v2477_v12 = vrot.slane %v16809_v53, 5  ;;  %v516_v21 = vor.u32 %v514_v38, %v513_v28  ;;  %v377_v16 = vld [vmem:[#allocation7 + $0x78] sm:$0xff] }
  0xe7   :  { %16808 = vst [vmem:[#allocation54_spill] sm:$0xff] %v12391_v36  ;;  %v520_v2 = vrot.slane %v518_v10, 7  ;;  %v716_v31 = vsel %vm12123_vm12, %v502_v56, %v715_v13  ;;  %v719_v6 = vsel %vm12123_vm12, %v509_v52, %v718_v7  ;;  %v724_v20 = vld [vmem:[#allocation2 + $0x78] sm:$0x1f]  ;;  %v376_v54 = vld [vmem:[#allocation7 + $0x70] sm:$0xff]  ;;  %v2043_v44 = vrot.slane %v12340_v19, 5 }
  0xe8   :  { %v933_v25 = vld [vmem:[#allocation2 + $0x40] sm:$0x1f]  ;;  %717 = vst [vmem:[#allocation2 + $0x60] sm:$0x1f] %v716_v31  ;;  %720 = vst [vmem:[#allocation2 + $0x68] sm:$0x1f] %v719_v6  ;;  %v722_v60 = vsel %vm12123_vm12, %v516_v21, %v721_v4  ;;  %v12417_v52 = vsel %vm12162_vm14, %v10498_v5, %v2477_v12 }
  0xe9   :  { %v12403_v35 = vld [vmem:[#allocation2 + $0x40] sm:$0xf]  ;;  %v523_v3 = vor.u32 %v521_v23, %v520_v2  ;;  %v12407_v38 = vld [vmem:[#allocation2 + $0x38] sm:$0xf]  ;;  %723 = vst [vmem:[#allocation2 + $0x70] sm:$0x1f] %v722_v60  ;;  %v12413_v19 = vsel %vm12149_vm13, %v2039_v51, %v2043_v44  ;;  %v12421_v2 = vpack.c.bf16 %v376_v54, %v376_v54  ;;  %v12425_v51 = vpack.c.bf16 %v377_v16, %v377_v16 }
  0xea   :  { %16810 = vst [vmem:[#allocation55_spill] sm:$0xff] %v12403_v35  ;;  %v378_v28 = vld [vmem:[#allocation7 + $0x80] sm:$0xff]  ;;  %16811 = vst [vmem:[#allocation56_spill] sm:$0xff] %v12407_v38  ;;  %v379_v56 = vld [vmem:[#allocation7 + $0x88] sm:$0xff] }
  0xeb   :  { %v1400_v13 = vld [vmem:[#allocation2 + $0x40] sm:$0x1e]  ;;  %16812 = vst [vmem:[#allocation57_spill] sm:$0xff] %v12413_v19  ;;  %16813 = vst [vmem:[#allocation58_spill] sm:$0xff] %v12417_v52  ;;  %v934_v23 = vld [vmem:[#allocation2 + $0x48] sm:$0x1f]  ;;  %v725_v21 = vsel %vm12123_vm12, %v523_v3, %v724_v20  ;;  %v12427_v44 = vpack.c.bf16 %v378_v28, %v378_v28  ;;  %v12433_v42 = vpack.c.bf16 %v379_v56, %v379_v56 }
  0xec   :  { %v1849_v10 = vld [vmem:[#allocation2 + $0x40] sm:$0x1f]  ;;  %v1401_v53 = vld [vmem:[#allocation2 + $0x48] sm:$0x1e]  ;;  %v10296_v31 = vcombine.low %v933_v25, %v934_v23  ;;  %v10297_v6 = vcombine.high %v933_v25, %v934_v23  ;;  %726 = vst [vmem:[#allocation2 + $0x78] sm:$0x1f] %v725_v21 }
  0xed   :  { %v2313_v4 = vld [vmem:[#allocation2 + $0x40] sm:$0x1e]  ;;  %v12423_v60 = vld [vmem:[#allocation2 + $0x48] sm:$0xf]  ;;  %v10344_v5 = vcombine.low %v1400_v13, %v1401_v53  ;;  %v10345_v15 = vcombine.high %v1400_v13, %v1401_v53  ;;  %v380_v23 = vld [vmem:[#allocation7 + $0x90] sm:$0xff] }
  0xee   :  { %16814 = vst [vmem:[#allocation59_spill] sm:$0xff] %v12423_v60  ;;  %v1850_v29 = vld [vmem:[#allocation2 + $0x48] sm:$0x1f]  ;;  %v2760_v20 = vld [vmem:[#allocation2 + $0x40] sm:$0x1f]  ;;  %v1145_v54 = vshrl.u32 %v10296_v31, 16  ;;  %v12435_v38 = vpack.c.bf16 %v380_v23, %v380_v23 }
  0xef   :  { %v2314_v55 = vld [vmem:[#allocation2 + $0x48] sm:$0x1e]  ;;  %v10422_v7 = vcombine.low %v1849_v10, %v1850_v29  ;;  %v10423_v50 = vcombine.high %v1849_v10, %v1850_v29  ;;  %v1148_v3 = vshll.u32 %v10296_v31, 16  ;;  %v12431_v58 = vshll.u32 %v10297_v6, 16  ;;  %v3224_v12 = vld [vmem:[#allocation2 + $0x40] sm:$0x1e] }
  0xf0   :  { %v10470_v25 = vcombine.low %v2313_v4, %v2314_v55  ;;  %v2761_v16 = vld [vmem:[#allocation2 + $0x48] sm:$0x1f]  ;;  %v1147_v28 = vrot.slane %v1145_v54, 4  ;;  %v10471_v36 = vcombine.high %v2313_v4, %v2314_v55  ;;  %v10372_v60 = vrot.slane %v10344_v5, 9  ;;  %v12437_v13 = vld [vmem:[#allocation2 + $0x40] sm:$0xf] }
  0xf1   :  { %v2046_v22 = vshrl.u32 %v10422_v7, 16  ;;  %v2049_v21 = vshll.u32 %v10422_v7, 16  ;;  %v1150_v49 = vrot.slane %v1148_v3, 5  ;;  %v2055_v35 = vshll.u32 %v10423_v50, 16  ;;  %16815 = vst [vmem:[#allocation60_spill] sm:$0xff] %v12437_v13 }
  0xf2   :  { %v1573_v53 = vrot.slane %v10345_v15, 5  ;;  %v10499_v31 = vrot.slane %v10470_v25, 9  ;;  %v2481_v6 = vrot.slane %v10471_v36, 5  ;;  %v10548_v11 = vcombine.low %v2760_v20, %v2761_v16  ;;  %v3225_v7 = vld [vmem:[#allocation2 + $0x48] sm:$0x1e] }
  0xf3   :  { %v2048_v29 = vrot.slane %v2046_v22, 4  ;;  %v2051_v10 = vrot.slane %v2049_v21, 5  ;;  %v12439_v41 = vld [vmem:[#allocation2 + $0x40] sm:$0xf]  ;;  %v1151_v56 = vor.u32 %v1150_v49, %v1147_v28  ;;  %v1156_v54 = vrot.slane %v12431_v58, 5  ;;  %v381_v22 = vld [vmem:[#allocation7 + $0x98] sm:$0xff] }
  0xf4   :  { %16816 = vst [vmem:[#allocation61_spill] sm:$0xff] %v12439_v41  ;;  %v10549_v55 = vcombine.high %v2760_v20, %v2761_v16  ;;  %v12442_v4 = vld [vmem:[#allocation2 + $0x50] sm:$0xf]  ;;  %v12444_v5 = vld [vmem:[#allocation2 + $0x48] sm:$0xf]  ;;  %v2057_v3 = vrot.slane %v2055_v35, 5  ;;  %v12448_v15 = vsel %vm12162_vm14, %v10499_v31, %v2481_v6  ;;  %v10596_v20 = vcombine.low %v3224_v12, %v3225_v7 }
  0xf5   :  { %v2052_v50 = vor.u32 %v2051_v10, %v2048_v29  ;;  %16817 = vst [vmem:[#allocation62_spill] sm:$0xff] %v12442_v4  ;;  %16818 = vst [vmem:[#allocation63_spill] sm:$0xff] %v12448_v15  ;;  %v2945_v36 = vshrl.u32 %v10548_v11, 16  ;;  %v2948_v25 = vshll.u32 %v10548_v11, 16  ;;  %v935_v23 = vld [vmem:[#allocation2 + $0x50] sm:$0x1f]  ;;  %v10597_v14 = vcombine.high %v3224_v12, %v3225_v7 }
  0xf6   :  { %v1402_v16 = vld [vmem:[#allocation2 + $0x50] sm:$0x1e]  ;;  %v12456_v31 = vld [vmem:[#allocation2 + $0x58] sm:$0xf]  ;;  %v12458_v11 = vpack.c.bf16 %v381_v22, %v381_v22  ;;  %v2954_v37 = vshll.u32 %v10549_v55, 16  ;;  %v10626_v22 = vrot.slane %v10596_v20, 9 }
  0xf7   :  { %v2053_v21 = vrot.slane %v2052_v50, 4  ;;  %v1851_v28 = vld [vmem:[#allocation2 + $0x50] sm:$0x1f]  ;;  %v2947_v35 = vrot.slane %v2945_v36, 4  ;;  %v2950_v10 = vrot.slane %v2948_v25, 5  ;;  %v1152_v50 = vrot.slane %v1151_v56, 4 }
  0xf8   :  { %v12454_v29 = vld [vmem:[#allocation2 + $0x50] sm:$0xf]  ;;  %v936_v6 = vld [vmem:[#allocation2 + $0x58] sm:$0x1f]  ;;  %v12476_v36 = vsel %vm12162_vm14, %v10372_v60, %v1573_v53  ;;  %v12478_v45 = vld [vmem:[#allocation2 + $0x48] sm:$0xf] }
  0xf9   :  { %16819 = vst [vmem:[#allocation64_spill] sm:$0xff] %v12454_v29  ;;  %v12462_v49 = vsel %vm12149_vm13, %v2053_v21, %v2057_v3  ;;  %v1403_v15 = vld [vmem:[#allocation2 + $0x58] sm:$0x1e]  ;;  %v2951_v7 = vor.u32 %v2950_v10, %v2947_v35  ;;  %v10298_v55 = vcombine.low %v935_v23, %v936_v6  ;;  %v10299_v25 = vcombine.high %v935_v23, %v936_v6  ;;  %v2315_v10 = vld [vmem:[#allocation2 + $0x50] sm:$0x1e] }
  0xfa   :  { %16820 = vst [vmem:[#allocation65_spill] sm:$0xff] %v12462_v49  ;;  %v1852_v52 = vld [vmem:[#allocation2 + $0x58] sm:$0x1f]  ;;  %v3390_v21 = vrot.slane %v10597_v14, 5  ;;  %v10346_v58 = vcombine.low %v1402_v16, %v1403_v15  ;;  %v10347_v63 = vcombine.high %v1402_v16, %v1403_v15  ;;  %16821 = vst [vmem:[#allocation66_spill] sm:$0xff] %v12476_v36  ;;  %v2956_v23 = vrot.slane %v2954_v37, 5 }
  0xfb   :  { %v10424_v27 = vcombine.low %v1851_v28, %v1852_v52  ;;  %16822 = vst [vmem:[#allocation67_spill] sm:$0xff] %v12478_v45  ;;  %v2952_v35 = vrot.slane %v2951_v7, 4  ;;  %v1159_v12 = vshrl.u32 %v10298_v55, 16  ;;  %v1162_v56 = vshll.u32 %v10298_v55, 16  ;;  %v2316_v49 = vld [vmem:[#allocation2 + $0x58] sm:$0x1e] }
  0xfc   :  { %v1168_v20 = vshll.u32 %v10299_v25, 16  ;;  %v10373_v29 = vrot.slane %v10346_v58, 9  ;;  %v1577_v41 = vrot.slane %v10347_v63, 5  ;;  %v10425_v3 = vcombine.high %v1851_v28, %v1852_v52  ;;  %v12480_v14 = vld [vmem:[#allocation2 + $0x50] sm:$0xf] }
  0xfd   :  { %16823 = vst [vmem:[#allocation68_spill] sm:$0xff] %v12480_v14  ;;  %v1161_v15 = vrot.slane %v1159_v12, 4  ;;  %v1164_v16 = vrot.slane %v1162_v56, 5  ;;  %v2060_v6 = vshrl.u32 %v10424_v27, 16  ;;  %v12482_v19 = vld [vmem:[#allocation2 + $0x58] sm:$0xf]  ;;  %v12486_v60 = vsel %vm12149_vm13, %v1152_v50, %v1156_v54 }
  0xfe   :  { %16824 = vst [vmem:[#allocation69_spill] sm:$0xff] %v12482_v19  ;;  %16825 = vst [vmem:[#allocation70_spill] sm:$0xff] %v12486_v60  ;;  %v12490_v53 = vsel %vm12162_vm14, %v10626_v22, %v3390_v21  ;;  %v2762_v58 = vld [vmem:[#allocation2 + $0x50] sm:$0x1f]  ;;  %v12494_v63 = vsel %vm12162_vm14, %v10373_v29, %v1577_v41  ;;  %v2063_v37 = vshll.u32 %v10424_v27, 16  ;;  %v12498_v28 = vsel %vm12149_vm13, %v2952_v35, %v2956_v23 }
  0xff   :  { %16826 = vst [vmem:[#allocation71_spill] sm:$0xff] %v12490_v53  ;;  %16827 = vst [vmem:[#allocation72_spill] sm:$0xff] %v12494_v63  ;;  %v2763_v52 = vld [vmem:[#allocation2 + $0x58] sm:$0x1f]  ;;  %v3226_v12 = vld [vmem:[#allocation2 + $0x50] sm:$0x1e]  ;;  %v1165_v7 = vor.u32 %v1164_v16, %v1161_v15  ;;  %v10472_v27 = vcombine.low %v2315_v10, %v2316_v49 }
 0x100   :  { %16828 = vst [vmem:[#allocation73_spill] sm:$0xff] %v12498_v28  ;;  %v3227_v56 = vld [vmem:[#allocation2 + $0x58] sm:$0x1e]  ;;  %v12504_v22 = vld [vmem:[#allocation2 + $0x60] sm:$0xf]  ;;  %v1170_v55 = vrot.slane %v1168_v20, 5  ;;  %v10550_v35 = vcombine.low %v2762_v58, %v2763_v52  ;;  %v10551_v23 = vcombine.high %v2762_v58, %v2763_v52  ;;  %v10473_v20 = vcombine.high %v2315_v10, %v2316_v49 }
 0x101   :  { %16829 = vst [vmem:[#allocation74_spill] sm:$0xff] %v12504_v22  ;;  %v12506_v41 = vshll.u32 %v10425_v3, 16  ;;  %v1166_v25 = vrot.slane %v1165_v7, 4  ;;  %v2062_v21 = vrot.slane %v2060_v6, 4  ;;  %v12510_v15 = vld [vmem:[#allocation2 + $0x58] sm:$0xf]  ;;  %v10598_v54 = vcombine.low %v3226_v12, %v3227_v56 }
 0x102   :  { %16830 = vst [vmem:[#allocation75_spill] sm:$0xff] %v12510_v15  ;;  %v2065_v16 = vrot.slane %v2063_v37, 5  ;;  %v10599_v26 = vcombine.high %v3226_v12, %v3227_v56  ;;  %v937_v50 = vld [vmem:[#allocation2 + $0x60] sm:$0x1f]  ;;  %v2959_v36 = vshrl.u32 %v10550_v35, 16  ;;  %v2962_v29 = vshll.u32 %v10550_v35, 16 }
 0x103   :  { %v12516_v3 = vsel %vm12149_vm13, %v1166_v25, %v1170_v55  ;;  %v1404_v7 = vld [vmem:[#allocation2 + $0x60] sm:$0x1e]  ;;  %v938_v6 = vld [vmem:[#allocation2 + $0x68] sm:$0x1f]  ;;  %v2071_v52 = vrot.slane %v12506_v41, 5  ;;  %v10500_v12 = vrot.slane %v10472_v27, 9 }
 0x104   :  { %16831 = vst [vmem:[#allocation76_spill] sm:$0xff] %v12516_v3  ;;  %v1405_v56 = vld [vmem:[#allocation2 + $0x68] sm:$0x1e]  ;;  %v2961_v19 = vrot.slane %v2959_v36, 4  ;;  %v2964_v55 = vrot.slane %v2962_v29, 5  ;;  %v2968_v25 = vshll.u32 %v10551_v23, 16  ;;  %v2066_v10 = vor.u32 %v2065_v16, %v2062_v21 }
 0x105   :  { %v12523_v63 = vld [vmem:[#allocation2 + $0x68] sm:$0xf]  ;;  %v10627_v49 = vrot.slane %v10598_v54, 9  ;;  %v3394_v35 = vrot.slane %v10599_v26, 5  ;;  %v10300_v45 = vcombine.low %v937_v50, %v938_v6  ;;  %v10301_v22 = vcombine.high %v937_v50, %v938_v6  ;;  %v1853_v58 = vld [vmem:[#allocation2 + $0x60] sm:$0x1f] }
 0x106   :  { %16832 = vst [vmem:[#allocation77_spill] sm:$0xff] %v12523_v63  ;;  %v2485_v14 = vrot.slane %v10473_v20, 5  ;;  %v2965_v61 = vor.u32 %v2964_v55, %v2961_v19  ;;  %v2317_v4 = vld [vmem:[#allocation2 + $0x60] sm:$0x1e]  ;;  %v10348_v13 = vcombine.low %v1404_v7, %v1405_v56  ;;  %v10349_v23 = vcombine.high %v1404_v7, %v1405_v56  ;;  %v1854_v54 = vld [vmem:[#allocation2 + $0x68] sm:$0x1f] }
 0x107   :  { %v12529_v27 = vsel %vm12162_vm14, %v10627_v49, %v3394_v35  ;;  %v1173_v36 = vshrl.u32 %v10300_v45, 16  ;;  %v1176_v29 = vshll.u32 %v10300_v45, 16  ;;  %v2318_v21 = vld [vmem:[#allocation2 + $0x68] sm:$0x1e]  ;;  %v2970_v16 = vrot.slane %v2968_v25, 5 }
 0x108   :  { %16833 = vst [vmem:[#allocation78_spill] sm:$0xff] %v12529_v27  ;;  %v2966_v26 = vrot.slane %v2965_v61, 4  ;;  %v2067_v20 = vrot.slane %v2066_v10, 4  ;;  %v12535_v41 = vshll.u32 %v10301_v22, 16  ;;  %v2764_v45 = vld [vmem:[#allocation2 + $0x60] sm:$0x1f]  ;;  %v10426_v7 = vcombine.low %v1853_v58, %v1854_v54 }
 0x109   :  { %v1175_v6 = vrot.slane %v1173_v36, 4  ;;  %v1178_v55 = vrot.slane %v1176_v29, 5  ;;  %v10427_v56 = vcombine.high %v1853_v58, %v1854_v54  ;;  %v10474_v61 = vcombine.low %v2317_v4, %v2318_v21  ;;  %v2765_v25 = vld [vmem:[#allocation2 + $0x68] sm:$0x1f]  ;;  %v3228_v54 = vld [vmem:[#allocation2 + $0x60] sm:$0x1e] }
 0x10a   :  { %v12539_v49 = vsel %vm12149_vm13, %v2966_v26, %v2970_v16  ;;  %v10374_v10 = vrot.slane %v10348_v13, 9  ;;  %v1581_v36 = vrot.slane %v10349_v23, 5  ;;  %v12547_v22 = vsel %vm12162_vm14, %v10500_v12, %v2485_v14  ;;  %v3229_v27 = vld [vmem:[#allocation2 + $0x68] sm:$0x1e]  ;;  %v12553_v53 = vld [vmem:[#allocation2 + $0x60] sm:$0xf] }
 0x10b   :  { %16834 = vst [vmem:[#allocation79_spill] sm:$0xff] %v12539_v49  ;;  %16835 = vst [vmem:[#allocation80_spill] sm:$0xff] %v12547_v22  ;;  %v2074_v29 = vshrl.u32 %v10426_v7, 16  ;;  %v2077_v26 = vshll.u32 %v10426_v7, 16  ;;  %v10475_v16 = vcombine.high %v2317_v4, %v2318_v21  ;;  %v12551_v58 = vsel %vm12149_vm13, %v2067_v20, %v2071_v52  ;;  %v12555_v13 = vld [vmem:[#allocation2 + $0x60] sm:$0xf] }
 0x10c   :  { %16836 = vst [vmem:[#allocation81_spill] sm:$0xff] %v12551_v58  ;;  %v1179_v50 = vor.u32 %v1178_v55, %v1175_v6  ;;  %v10501_v37 = vrot.slane %v10474_v61, 9  ;;  %v10552_v35 = vcombine.low %v2764_v45, %v2765_v25  ;;  %16837 = vst [vmem:[#allocation82_spill] sm:$0xff] %v12553_v53  ;;  %v12557_v23 = vld [vmem:[#allocation2 + $0x68] sm:$0xf]  ;;  %v2083_v19 = vshll.u32 %v10427_v56, 16 }
 0x10d   :  { %16838 = vst [vmem:[#allocation83_spill] sm:$0xff] %v12555_v13  ;;  %v2076_v14 = vrot.slane %v2074_v29, 4  ;;  %v2079_v12 = vrot.slane %v2077_v26, 5  ;;  %v2489_v7 = vrot.slane %v10475_v16, 5  ;;  %v1184_v4 = vrot.slane %v12535_v41, 5 }
 0x10e   :  { %v12562_v52 = vsel %vm12162_vm14, %v10374_v10, %v1581_v36  ;;  %v2973_v21 = vshrl.u32 %v10552_v35, 16  ;;  %v2976_v20 = vshll.u32 %v10552_v35, 16  ;;  %v12564_v6 = vld [vmem:[#allocation2 + $0x70] sm:$0xf]  ;;  %v10553_v49 = vcombine.high %v2764_v45, %v2765_v25  ;;  %v12572_v16 = vld [vmem:[#allocation2 + $0x78] sm:$0xf] }
 0x10f   :  { %16839 = vst [vmem:[#allocation84_spill] sm:$0xff] %v12562_v52  ;;  %16840 = vst [vmem:[#allocation85_spill] sm:$0xff] %v12564_v6  ;;  %v2080_v55 = vor.u32 %v2079_v12, %v2076_v14  ;;  %v12568_v61 = vsel %vm12162_vm14, %v10501_v37, %v2489_v7  ;;  %v10600_v29 = vcombine.low %v3228_v54, %v3229_v27  ;;  %v939_v26 = vld [vmem:[#allocation2 + $0x70] sm:$0x1f]  ;;  %v940_v12 = vld [vmem:[#allocation2 + $0x78] sm:$0x1f] }
 0x110   :  { %16841 = vst [vmem:[#allocation86_spill] sm:$0xff] %v12568_v61  ;;  %v12570_v56 = vld [vmem:[#allocation2 + $0x70] sm:$0xf]  ;;  %v2975_v10 = vrot.slane %v2973_v21, 4  ;;  %v2978_v36 = vrot.slane %v2976_v20, 5  ;;  %v1180_v28 = vrot.slane %v1179_v50, 4  ;;  %v10601_v45 = vcombine.high %v3228_v54, %v3229_v27 }
 0x111   :  { %16842 = vst [vmem:[#allocation87_spill] sm:$0xff] %v12570_v56  ;;  %v1406_v14 = vld [vmem:[#allocation2 + $0x70] sm:$0x1e]  ;;  %v2081_v37 = vrot.slane %v2080_v55, 4  ;;  %v2085_v7 = vrot.slane %v2083_v19, 5  ;;  %v2982_v20 = vshll.u32 %v10553_v49, 16  ;;  %v10302_v55 = vcombine.low %v939_v26, %v940_v12 }
 0x112   :  { %v1407_v25 = vld [vmem:[#allocation2 + $0x78] sm:$0x1e]  ;;  %v2979_v63 = vor.u32 %v2978_v36, %v2975_v10  ;;  %v1855_v50 = vld [vmem:[#allocation2 + $0x70] sm:$0x1f]  ;;  %v10303_v19 = vcombine.high %v939_v26, %v940_v12  ;;  %v10628_v36 = vrot.slane %v10600_v29, 9  ;;  %v3398_v15 = vrot.slane %v10601_v45, 5 }
 0x113   :  { %v12586_v21 = vsel %vm12149_vm13, %v2081_v37, %v2085_v7  ;;  %v1856_v27 = vld [vmem:[#allocation2 + $0x78] sm:$0x1f]  ;;  %v10350_v3 = vcombine.low %v1406_v14, %v1407_v25  ;;  %v12592_v35 = vld [vmem:[#allocation2 + $0x68] sm:$0xf]  ;;  %v1187_v41 = vshrl.u32 %v10302_v55, 16  ;;  %v1190_v56 = vshll.u32 %v10302_v55, 16 }
 0x114   :  { %16843 = vst [vmem:[#allocation88_spill] sm:$0xff] %v12586_v21  ;;  %16844 = vst [vmem:[#allocation89_spill] sm:$0xff] %v12592_v35  ;;  %v10351_v37 = vcombine.high %v1406_v14, %v1407_v25  ;;  %v382_v7 = vld [vmem:[#allocation7 + $0xa0] sm:$0xff]  ;;  %v2980_v49 = vrot.slane %v2979_v63, 4  ;;  %v1196_v13 = vshll.u32 %v10303_v19, 16  ;;  %v10428_v26 = vcombine.low %v1855_v50, %v1856_v27 }
 0x115   :  { %v10375_v61 = vrot.slane %v10350_v3, 9  ;;  %v12594_v12 = vld [vmem:[#allocation2 + $0x78] sm:$0xf]  ;;  %v1189_v22 = vrot.slane %v1187_v41, 4  ;;  %v1192_v54 = vrot.slane %v1190_v56, 5  ;;  %v10429_v6 = vcombine.high %v1855_v50, %v1856_v27 }
 0x116   :  { %16845 = vst [vmem:[#allocation90_spill] sm:$0xff] %v12594_v12  ;;  %v1585_v60 = vrot.slane %v10351_v37, 5  ;;  %v2984_v10 = vrot.slane %v2982_v20, 5  ;;  %v2766_v29 = vld [vmem:[#allocation2 + $0x70] sm:$0x1f]  ;;  %v2088_v21 = vshrl.u32 %v10428_v26, 16  ;;  %v12596_v53 = vpack.c.bf16 %v382_v7, %v382_v7 }
 0x117   :  { %v2091_v58 = vshll.u32 %v10428_v26, 16  ;;  %v12600_v14 = vsel %vm12149_vm13, %v1180_v28, %v1184_v4  ;;  %v3230_v63 = vld [vmem:[#allocation2 + $0x70] sm:$0x1e]  ;;  %v1193_v45 = vor.u32 %v1192_v54, %v1189_v22  ;;  %v2767_v41 = vld [vmem:[#allocation2 + $0x78] sm:$0x1f]  ;;  %v12614_v50 = vsel %vm12162_vm14, %v10628_v36, %v3398_v15 }
 0x118   :  { %16846 = vst [vmem:[#allocation91_spill] sm:$0xff] %v12600_v14  ;;  %v12604_v3 = vsel %vm12162_vm14, %v10375_v61, %v1585_v60  ;;  %v3231_v25 = vld [vmem:[#allocation2 + $0x78] sm:$0x1e]  ;;  %v12610_v20 = vsel %vm12149_vm13, %v2980_v49, %v2984_v10  ;;  %16849 = vst [vmem:[#allocation94_spill] sm:$0xff] %v12614_v50  ;;  %v12616_v28 = vld [vmem:[#allocation2 + $0x70] sm:$0x1e]  ;;  %v10554_v15 = vcombine.low %v2766_v29, %v2767_v41 }
 0x119   :  { %16847 = vst [vmem:[#allocation92_spill] sm:$0xff] %v12604_v3  ;;  %16848 = vst [vmem:[#allocation93_spill] sm:$0xff] %v12610_v20  ;;  %v12622_v4 = vld [vmem:[#allocation2 + $0x78] sm:$0x1e]  ;;  %v1194_v61 = vrot.slane %v1193_v45, 4  ;;  %v1198_v55 = vrot.slane %v1196_v13, 5  ;;  %v10555_v10 = vcombine.high %v2766_v29, %v2767_v41  ;;  %v10602_v36 = vcombine.low %v3230_v63, %v3231_v25 }
 0x11a   :  { %v12624_v19 = vrot.slane %v2088_v21, 4  ;;  %v12626_v27 = vshll.u32 %v10429_v6, 16  ;;  %v12628_v54 = vrot.slane %v2091_v58, 5  ;;  %v10476_v7 = vcombine.low %v12616_v28, %v12622_v4  ;;  %v727_v58 = vld [vmem:[#allocation2 + $0x80] sm:$0x1f] }
 0x11b   :  { %v12632_v37 = vsel %vm12149_vm13, %v1194_v61, %v1198_v55  ;;  %v10603_v49 = vcombine.high %v3230_v63, %v3231_v25  ;;  %v525_v26 = vshrl.u32 %v12421_v2, 16  ;;  %v10477_v6 = vcombine.high %v12616_v28, %v12622_v4 }
 0x11c   :  { %16850 = vst [vmem:[#allocation95_spill] sm:$0xff] %v12632_v37  ;;  %v2987_v21 = vshrl.u32 %v10554_v15, 16  ;;  %v2990_v29 = vshll.u32 %v10554_v15, 16  ;;  %v2996_v45 = vshll.u32 %v10555_v10, 16  ;;  %v10629_v41 = vrot.slane %v10602_v36, 9 }
 0x11d   :  { %v3402_v61 = vrot.slane %v10603_v49, 5  ;;  %v2094_v55 = vor.u32 %v12628_v54, %v12624_v19  ;;  %v527_v25 = vrot.slane %v525_v26, 7  ;;  %v528_v56 = vshll.u32 %v12421_v2, 16 }
 0x11e   :  { %v2989_v63 = vrot.slane %v2987_v21, 4  ;;  %v2992_v22 = vrot.slane %v2990_v29, 5  ;;  %v2998_v60 = vrot.slane %v2996_v45, 5  ;;  %v532_v28 = vshrl.u32 %v12425_v51, 16  ;;  %v730_v21 = vld [vmem:[#allocation2 + $0x88] sm:$0x1f] }
 0x11f   :  { %v12648_v13 = vsel %vm12162_vm14, %v10629_v41, %v3402_v61  ;;  %v530_v19 = vor.u32 %v528_v56, %v527_v25  ;;  %v535_v54 = vshll.u32 %v12425_v51, 16  ;;  %v539_v36 = vshrl.u32 %v12427_v44, 16 }
 0x120   :  { %16851 = vst [vmem:[#allocation96_spill] sm:$0xff] %v12648_v13  ;;  %v2993_v10 = vor.u32 %v2992_v22, %v2989_v63  ;;  %v534_v2 = vrot.slane %v532_v28, 7  ;;  %v542_v49 = vshll.u32 %v12427_v44, 16  ;;  %v546_v29 = vshrl.u32 %v12433_v42, 16  ;;  %v733_v63 = vld [vmem:[#allocation2 + $0xb0] sm:$0x1f] }
 0x121   :  { %v728_v26 = vsel %vm12123_vm12, %v530_v19, %v727_v58  ;;  %v549_v45 = vshll.u32 %v12433_v42, 16  ;;  %v553_v41 = vshrl.u32 %v12435_v38, 16  ;;  %v541_v51 = vrot.slane %v539_v36, 7 }
 0x122   :  { %v2994_v61 = vrot.slane %v2993_v10, 4  ;;  %729 = vst [vmem:[#allocation2 + $0x80] sm:$0x1f] %v728_v26  ;;  %v537_v56 = vor.u32 %v535_v54, %v534_v2  ;;  %v556_v22 = vshll.u32 %v12435_v38, 16  ;;  %v548_v25 = vrot.slane %v546_v29, 7 }
 0x123   :  { %v555_v28 = vrot.slane %v553_v41, 7  ;;  %v560_v44 = vshrl.u32 %v12458_v11, 16  ;;  %v563_v58 = vshll.u32 %v12458_v11, 16  ;;  %v544_v10 = vor.u32 %v542_v49, %v541_v51  ;;  %v736_v26 = vld [vmem:[#allocation2 + $0xb8] sm:$0x1f] }
 0x124   :  { %v12668_v19 = vsel %vm12149_vm13, %v2994_v61, %v2998_v60  ;;  %v731_v42 = vsel %vm12123_vm12, %v537_v56, %v730_v21  ;;  %v739_v54 = vld [vmem:[#allocation2 + $0xc0] sm:$0x1f]  ;;  %v567_v2 = vshrl.u32 %v12596_v53, 16  ;;  %v551_v11 = vor.u32 %v549_v45, %v548_v25  ;;  %v12677_v41 = vld [vmem:[#allocation2 + $0x90] sm:$0xf]  ;;  %v383_v25 = vld [vmem:[#allocation7 + $0xa8] sm:$0xff] }
 0x125   :  { %16852 = vst [vmem:[#allocation97_spill] sm:$0xff] %v12668_v19  ;;  %732 = vst [vmem:[#allocation2 + $0x88] sm:$0x1f] %v731_v42  ;;  %v558_v29 = vor.u32 %v556_v22, %v555_v28  ;;  %v734_v60 = vsel %vm12123_vm12, %v544_v10, %v733_v63  ;;  %v562_v21 = vrot.slane %v560_v44, 7  ;;  %v742_v49 = vld [vmem:[#allocation2 + $0xc8] sm:$0x1f] }
 0x126   :  { %16853 = vst [vmem:[#allocation98_spill] sm:$0xff] %v12677_v41  ;;  %v569_v61 = vrot.slane %v567_v2, 7  ;;  %v570_v56 = vshll.u32 %v12596_v53, 16  ;;  %v12682_v51 = vld [vmem:[#allocation2 + $0x70] sm:$0xf]  ;;  %v10502_v4 = vrot.slane %v10476_v7, 9  ;;  %v737_v15 = vsel %vm12123_vm12, %v551_v11, %v736_v26 }
 0x127   :  { %16854 = vst [vmem:[#allocation99_spill] sm:$0xff] %v12682_v51  ;;  %735 = vst [vmem:[#allocation2 + $0xb0] sm:$0x1f] %v734_v60  ;;  %v740_v45 = vsel %vm12123_vm12, %v558_v29, %v739_v54  ;;  %v745_v22 = vld [vmem:[#allocation2 + $0xd0] sm:$0x1f]  ;;  %v2095_v28 = vrot.slane %v2094_v55, 4  ;;  %v565_v63 = vor.u32 %v563_v58, %v562_v21  ;;  %v12692_v7 = vsel %vm12149_vm13, %v12143_v24, %v12117_v43 }
 0x128   :  { %v2493_v42 = vrot.slane %v10477_v6, 5  ;;  %738 = vst [vmem:[#allocation2 + $0xb8] sm:$0x1f] %v737_v15  ;;  %741 = vst [vmem:[#allocation2 + $0xc0] sm:$0x1f] %v740_v45  ;;  %v572_v44 = vor.u32 %v570_v56, %v569_v61  ;;  %v384_v10 = vld [vmem:[#allocation7 + $0xb0] sm:$0xff]  ;;  %v12706_v55 = vsel %vm12149_vm13, %v12153_v33, %v12155_v34  ;;  %v12733_v56 = vpack.c.bf16 %v383_v25, %v383_v25 }
 0x129   :  { %v385_v53 = vld [vmem:[#allocation7 + $0xb8] sm:$0xff]  ;;  %v386_v2 = vld [vmem:[#allocation7 + $0xc0] sm:$0xff]  ;;  %16855 = vst [vmem:[#allocation100_spill] sm:$0xff] %v12692_v7  ;;  %v16856_v26 = vrot.slane %v12119_v46, 5  ;;  %v16857_v54 = vrot.slane %v12112_v30, 9  ;;  %16859 = vst [vmem:[#allocation102_spill] sm:$0xff] %v12706_v55  ;;  %v12735_v45 = vpack.c.bf16 %v384_v10, %v384_v10 }
 0x12a   :  { %v12708_v15 = vld [vmem:[#allocation2 + $0x78] sm:$0xf]  ;;  %v2099_v58 = vrot.slane %v12626_v27, 5  ;;  %v12711_v43 = vld [vmem:[#allocation2 + $0x80] sm:$0xf]  ;;  %v387_v24 = vld [vmem:[#allocation7 + $0xc8] sm:$0xff]  ;;  %v743_v27 = vsel %vm12123_vm12, %v565_v63, %v742_v49  ;;  %v746_v21 = vsel %vm12123_vm12, %v572_v44, %v745_v22  ;;  %v12745_v22 = vsel %vm12162_vm14, %v10502_v4, %v2493_v42 }
 0x12b   :  { %v12700_v6 = vsel %vm12162_vm14, %v16857_v54, %v16856_v26  ;;  %16860 = vst [vmem:[#allocation103_spill] sm:$0xff] %v12708_v15  ;;  %16861 = vst [vmem:[#allocation104_spill] sm:$0xff] %v12711_v43  ;;  %v16862_v46 = vrot.slane %v12373_v17, 5  ;;  %v16863_v30 = vrot.slane %v12367_v57, 9  ;;  %v1857_v33 = vld [vmem:[#allocation2 + $0x80] sm:$0x1f]  ;;  %v12737_v26 = vpack.c.bf16 %v385_v53, %v385_v53 }
 0x12c   :  { %16858 = vst [vmem:[#allocation101_spill] sm:$0xff] %v12700_v6  ;;  %v2321_v34 = vld [vmem:[#allocation2 + $0x80] sm:$0x1e]  ;;  %v12729_v17 = vld [vmem:[#allocation2 + $0x98] sm:$0xf]  ;;  %v12741_v49 = vsel %vm12149_vm13, %v2095_v28, %v2099_v58  ;;  %16868 = vst [vmem:[#allocation109_spill] sm:$0xff] %v12745_v22  ;;  %v12751_v25 = vpack.c.bf16 %v387_v24, %v387_v24 }
 0x12d   :  { %v12719_v11 = vsel %vm12162_vm14, %v16863_v30, %v16862_v46  ;;  %v12723_v60 = vld [vmem:[#allocation2 + $0x80] sm:$0xf]  ;;  %16866 = vst [vmem:[#allocation107_spill] sm:$0xff] %v12729_v17  ;;  %744 = vst [vmem:[#allocation2 + $0xc8] sm:$0x1f] %v743_v27  ;;  %v12749_v46 = vpack.c.bf16 %v386_v2, %v386_v2 }
 0x12e   :  { %16864 = vst [vmem:[#allocation105_spill] sm:$0xff] %v12719_v11  ;;  %16865 = vst [vmem:[#allocation106_spill] sm:$0xff] %v12723_v60  ;;  %v2768_v61 = vld [vmem:[#allocation2 + $0x80] sm:$0x1f]  ;;  %v12747_v63 = vld [vmem:[#allocation2 + $0x88] sm:$0xf] }
 0x12f   :  { %747 = vst [vmem:[#allocation2 + $0xd0] sm:$0x1f] %v746_v21  ;;  %16867 = vst [vmem:[#allocation108_spill] sm:$0xff] %v12741_v49  ;;  %v1858_v44 = vld [vmem:[#allocation2 + $0x88] sm:$0x1f] }
 0x130   :  { %16869 = vst [vmem:[#allocation110_spill] sm:$0xff] %v12747_v63  ;;  %v2322_v54 = vld [vmem:[#allocation2 + $0x88] sm:$0x1e]  ;;  %v10430_v53 = vcombine.low %v1857_v33, %v1858_v44  ;;  %v10431_v30 = vcombine.high %v1857_v33, %v1858_v44  ;;  %v3232_v21 = vld [vmem:[#allocation2 + $0x80] sm:$0x1e] }
 0x131   :  { %v10478_v27 = vcombine.low %v2321_v34, %v2322_v54  ;;  %v12755_v28 = vld [vmem:[#allocation2 + $0x88] sm:$0xf]  ;;  %v10479_v4 = vcombine.high %v2321_v34, %v2322_v54  ;;  %v12759_v57 = vld [vmem:[#allocation2 + $0xa0] sm:$0xf]  ;;  %v12763_v44 = vld [vmem:[#allocation2 + $0xb0] sm:$0xf] }
 0x132   :  { %16870 = vst [vmem:[#allocation111_spill] sm:$0xff] %v12755_v28  ;;  %v2769_v58 = vld [vmem:[#allocation2 + $0x88] sm:$0x1f]  ;;  %v2102_v29 = vshrl.u32 %v10430_v53, 16  ;;  %v2105_v10 = vshll.u32 %v10430_v53, 16  ;;  %v2111_v13 = vshll.u32 %v10431_v30, 16 }
 0x133   :  { %v10556_v38 = vcombine.low %v2768_v61, %v2769_v58  ;;  %v10557_v36 = vcombine.high %v2768_v61, %v2769_v58  ;;  %v3233_v2 = vld [vmem:[#allocation2 + $0x88] sm:$0x1e]  ;;  %v10503_v33 = vrot.slane %v10478_v27, 9  ;;  %v2497_v50 = vrot.slane %v10479_v4, 5  ;;  %v943_v54 = vld [vmem:[#allocation2 + $0xb0] sm:$0x1f] }
 0x134   :  { %v12761_v24 = vld [vmem:[#allocation2 + $0xa8] sm:$0xf]  ;;  %v2104_v41 = vrot.slane %v2102_v29, 4  ;;  %v2107_v42 = vrot.slane %v2105_v10, 5  ;;  %v2113_v60 = vrot.slane %v2111_v13, 5  ;;  %v10604_v61 = vcombine.low %v3232_v21, %v3233_v2 }
 0x135   :  { %v3001_v19 = vshrl.u32 %v10556_v38, 16  ;;  %v3004_v20 = vshll.u32 %v10556_v38, 16  ;;  %v3010_v34 = vshll.u32 %v10557_v36, 16  ;;  %v1410_v58 = vld [vmem:[#allocation2 + $0xb0] sm:$0x1e]  ;;  %v12767_v17 = vsel %vm12162_vm14, %v10503_v33, %v2497_v50 }
 0x136   :  { %16871 = vst [vmem:[#allocation112_spill] sm:$0xff] %v12767_v17  ;;  %v12769_v27 = vld [vmem:[#allocation2 + $0xb8] sm:$0xf]  ;;  %v2108_v12 = vor.u32 %v2107_v42, %v2104_v41  ;;  %v10605_v29 = vcombine.high %v3232_v21, %v3233_v2  ;;  %v12775_v13 = vld [vmem:[#allocation2 + $0xb0] sm:$0x1f]  ;;  %v10630_v50 = vrot.slane %v10604_v61, 9 }
 0x137   :  { %v3003_v28 = vrot.slane %v3001_v19, 4  ;;  %v3006_v53 = vrot.slane %v3004_v20, 5  ;;  %v3012_v30 = vrot.slane %v3010_v34, 5  ;;  %v944_v10 = vld [vmem:[#allocation2 + $0xb8] sm:$0x1f]  ;;  %v581_v19 = vshrl.u32 %v12735_v45, 16 }
 0x138   :  { %v1411_v4 = vld [vmem:[#allocation2 + $0xb8] sm:$0x1e]  ;;  %v2109_v42 = vrot.slane %v2108_v12, 4  ;;  %v3406_v33 = vrot.slane %v10605_v29, 5  ;;  %v10306_v34 = vcombine.low %v943_v54, %v944_v10  ;;  %v10307_v38 = vcombine.high %v943_v54, %v944_v10  ;;  %v12817_v11 = vld [vmem:[#allocation2 + $0xc0] sm:$0xf] }
 0x139   :  { %v3007_v35 = vor.u32 %v3006_v53, %v3003_v28  ;;  %v12781_v41 = vld [vmem:[#allocation2 + $0xb8] sm:$0x1f]  ;;  %v10354_v21 = vcombine.low %v1410_v58, %v1411_v4  ;;  %v10355_v2 = vcombine.high %v1410_v58, %v1411_v4  ;;  %v2323_v4 = vld [vmem:[#allocation2 + $0xb0] sm:$0x1e]  ;;  %16877 = vst [vmem:[#allocation118_spill] sm:$0xff] %v12817_v11 }
 0x13a   :  { %v10432_v17 = vcombine.low %v12775_v13, %v12781_v41  ;;  %v12787_v28 = vsel %vm12149_vm13, %v2109_v42, %v2113_v60  ;;  %v12791_v61 = vsel %vm12162_vm14, %v10630_v50, %v3406_v33  ;;  %v1215_v53 = vshrl.u32 %v10306_v34, 16  ;;  %v2324_v42 = vld [vmem:[#allocation2 + $0xb8] sm:$0x1e]  ;;  %v12811_v58 = vld [vmem:[#allocation2 + $0xb0] sm:$0xf] }
 0x13b   :  { %v3008_v36 = vrot.slane %v3007_v35, 4  ;;  %16872 = vst [vmem:[#allocation113_spill] sm:$0xff] %v12787_v28  ;;  %16873 = vst [vmem:[#allocation114_spill] sm:$0xff] %v12791_v61  ;;  %v1218_v20 = vshll.u32 %v10306_v34, 16  ;;  %v1224_v34 = vshll.u32 %v10307_v38, 16  ;;  %v10377_v12 = vrot.slane %v10354_v21, 9 }
 0x13c   :  { %v1217_v50 = vrot.slane %v1215_v53, 4  ;;  %v2119_v35 = vshll.u32 %v10432_v17, 16  ;;  %v574_v60 = vshrl.u32 %v12733_v56, 16  ;;  %16875 = vst [vmem:[#allocation116_spill] sm:$0xff] %v12811_v58  ;;  %v10480_v10 = vcombine.low %v2323_v4, %v2324_v42  ;;  %v388_v38 = vld [vmem:[#allocation7 + $0xd0] sm:$0xff] }
 0x13d   :  { %v12799_v54 = vsel %vm12149_vm13, %v3008_v36, %v3012_v30  ;;  %v1220_v33 = vrot.slane %v1218_v20, 5  ;;  %v1593_v30 = vrot.slane %v10355_v2, 5  ;;  %v2116_v36 = vshrl.u32 %v10432_v17, 16  ;;  %v945_v21 = vld [vmem:[#allocation2 + $0xc0] sm:$0x1f] }
 0x13e   :  { %16874 = vst [vmem:[#allocation115_spill] sm:$0xff] %v12799_v54  ;;  %v10481_v53 = vcombine.high %v2323_v4, %v2324_v42  ;;  %v946_v2 = vld [vmem:[#allocation2 + $0xc8] sm:$0x1f]  ;;  %v2121_v61 = vrot.slane %v2119_v35, 5  ;;  %v389_v4 = vld [vmem:[#allocation7 + $0xd8] sm:$0xff]  ;;  %v390_v42 = vld [vmem:[#allocation7 + $0xe0] sm:$0xff]  ;;  %v10433_v20 = vcombine.high %v12775_v13, %v12781_v41  ;;  %v12833_v49 = vpack.c.bf16 %v388_v38, %v388_v38 }
 0x13f   :  { %v1221_v22 = vor.u32 %v1220_v33, %v1217_v50  ;;  %v12815_v29 = vsel %vm12162_vm14, %v10377_v12, %v1593_v30  ;;  %v1226_v12 = vrot.slane %v1224_v34, 5  ;;  %v2118_v30 = vrot.slane %v2116_v36, 4  ;;  %v12825_v55 = vld [vmem:[#allocation2 + $0xb8] sm:$0xf]  ;;  %v1861_v54 = vld [vmem:[#allocation2 + $0xc0] sm:$0x1f] }
 0x140   :  { %16876 = vst [vmem:[#allocation117_spill] sm:$0xff] %v12815_v29  ;;  %16878 = vst [vmem:[#allocation119_spill] sm:$0xff] %v12825_v55  ;;  %v12831_v28 = vrot.slane %v574_v60, 7  ;;  %v391_v50 = vld [vmem:[#allocation7 + $0xe8] sm:$0xff]  ;;  %v10504_v35 = vrot.slane %v10480_v10, 9  ;;  %v2501_v34 = vrot.slane %v10481_v53, 5  ;;  %v10308_v36 = vcombine.low %v945_v21, %v946_v2 }
 0x141   :  { %v1222_v33 = vrot.slane %v1221_v22, 4  ;;  %v12839_v43 = vld [vmem:[#allocation2 + $0xc8] sm:$0xf]  ;;  %v12845_v60 = vld [vmem:[#allocation2 + $0xc0] sm:$0x1e]  ;;  %v12847_v38 = vrot.slane %v581_v19, 7  ;;  %v12852_v11 = vpack.c.bf16 %v389_v4, %v389_v4  ;;  %v12854_v58 = vpack.c.bf16 %v390_v42, %v390_v42 }
 0x142   :  { %16880 = vst [vmem:[#allocation121_spill] sm:$0xff] %v12839_v43  ;;  %v1862_v51 = vld [vmem:[#allocation2 + $0xc8] sm:$0x1f]  ;;  %v12850_v10 = vld [vmem:[#allocation2 + $0xc0] sm:$0x1f]  ;;  %v12856_v63 = vpack.c.bf16 %v391_v50, %v391_v50  ;;  %v2125_v13 = vshll.u32 %v10433_v20, 16  ;;  %v10309_v15 = vcombine.high %v945_v21, %v946_v2 }
 0x143   :  { %v12837_v22 = vsel %vm12149_vm13, %v1222_v33, %v1226_v12  ;;  %v2122_v33 = vor.u32 %v2121_v61, %v2118_v30  ;;  %v2325_v12 = vld [vmem:[#allocation2 + $0xc0] sm:$0x1e]  ;;  %v2326_v53 = vld [vmem:[#allocation2 + $0xc8] sm:$0x1e]  ;;  %v10434_v29 = vcombine.low %v1861_v54, %v1862_v51  ;;  %v12864_v61 = vsel %vm12162_vm14, %v10504_v35, %v2501_v34  ;;  %v12879_v37 = vld [vmem:[#allocation2 + $0xd0] sm:$0xf] }
 0x144   :  { %16879 = vst [vmem:[#allocation120_spill] sm:$0xff] %v12837_v22  ;;  %v12858_v41 = vld [vmem:[#allocation2 + $0xc8] sm:$0x1e]  ;;  %16881 = vst [vmem:[#allocation122_spill] sm:$0xff] %v12864_v61  ;;  %v1229_v30 = vshrl.u32 %v10308_v36, 16  ;;  %v1232_v4 = vshll.u32 %v10308_v36, 16  ;;  %v10435_v6 = vcombine.high %v1861_v54, %v1862_v51  ;;  %v10482_v50 = vcombine.low %v2325_v12, %v2326_v53 }
 0x145   :  { %v2773_v17 = vld [vmem:[#allocation2 + $0xc8] sm:$0x1f]  ;;  %v2130_v42 = vshrl.u32 %v10434_v29, 16  ;;  %v2133_v3 = vshll.u32 %v10434_v29, 16  ;;  %v10483_v52 = vcombine.high %v2325_v12, %v2326_v53  ;;  %v2123_v20 = vrot.slane %v2122_v33, 4  ;;  %16884 = vst [vmem:[#allocation125_spill] sm:$0xff] %v12879_v37 }
 0x146   :  { %v10356_v21 = vcombine.low %v12845_v60, %v12858_v41  ;;  %v2139_v2 = vshll.u32 %v10435_v6, 16  ;;  %v10560_v19 = vcombine.low %v12850_v10, %v2773_v17  ;;  %v12869_v43 = vld [vmem:[#allocation2 + $0xc0] sm:$0xf]  ;;  %v10505_v35 = vrot.slane %v10482_v50, 9 }
 0x147   :  { %v2132_v55 = vrot.slane %v2130_v42, 4  ;;  %v2135_v22 = vrot.slane %v2133_v3, 5  ;;  %v2505_v34 = vrot.slane %v10483_v52, 5  ;;  %v2127_v7 = vrot.slane %v2125_v13, 5  ;;  %v12871_v36 = vld [vmem:[#allocation2 + $0xc0] sm:$0xf] }
 0x148   :  { %16882 = vst [vmem:[#allocation123_spill] sm:$0xff] %v12871_v36  ;;  %v1231_v51 = vrot.slane %v1229_v30, 4  ;;  %v1234_v54 = vrot.slane %v1232_v4, 5  ;;  %v12873_v29 = vshll.u32 %v10309_v15, 16  ;;  %v3029_v6 = vshrl.u32 %v10560_v19, 16 }
 0x149   :  { %v2136_v33 = vor.u32 %v2135_v22, %v2132_v55  ;;  %v12877_v12 = vsel %vm12162_vm14, %v10505_v35, %v2505_v34  ;;  %v3032_v53 = vshll.u32 %v10560_v19, 16  ;;  %v12881_v42 = vld [vmem:[#allocation2 + $0xd0] sm:$0xf]  ;;  %v3236_v3 = vld [vmem:[#allocation2 + $0xc0] sm:$0x1e]  ;;  %v10357_v52 = vcombine.high %v12845_v60, %v12858_v41 }
 0x14a   :  { %16883 = vst [vmem:[#allocation124_spill] sm:$0xff] %v12877_v12  ;;  %16885 = vst [vmem:[#allocation126_spill] sm:$0xff] %v12881_v42  ;;  %v12885_v13 = vrot.slane %v10356_v21, 9  ;;  %v3237_v22 = vld [vmem:[#allocation2 + $0xc8] sm:$0x1e]  ;;  %v12893_v19 = vsel %vm12149_vm13, %v2123_v20, %v2127_v7  ;;  %v2141_v4 = vrot.slane %v2139_v2, 5  ;;  %v10561_v50 = vcombine.high %v12850_v10, %v2773_v17 }
 0x14b   :  { %16886 = vst [vmem:[#allocation127_spill] sm:$0xff] %v12893_v19  ;;  %v2137_v30 = vrot.slane %v2136_v33, 4  ;;  %v748_v35 = vld [vmem:[#allocation2 + $0xd8] sm:$0x1f]  ;;  %v1235_v34 = vor.u32 %v1234_v54, %v1231_v51  ;;  %v16887_v21 = vshll.u32 %v12733_v56, 16  ;;  %v3031_v20 = vrot.slane %v3029_v6, 4 }
 0x14c   :  { %v3034_v2 = vrot.slane %v3032_v53, 5  ;;  %v10608_v33 = vcombine.low %v3236_v3, %v3237_v22  ;;  %v751_v17 = vld [vmem:[#allocation2 + $0xe0] sm:$0x1f]  ;;  %v16889_v56 = vshll.u32 %v12735_v45, 16  ;;  %v16890_v6 = vshrl.u32 %v12737_v26, 16 }
 0x14d   :  { %v579_v15 = vor.u32 %v16887_v21, %v12831_v28  ;;  %v12905_v7 = vsel %vm12149_vm13, %v2137_v30, %v2141_v4  ;;  %v12916_v21 = vshll.u32 %v10561_v50, 16  ;;  %v10609_v30 = vcombine.high %v3236_v3, %v3237_v22  ;;  %v754_v55 = vld [vmem:[#allocation2 + $0xe8] sm:$0x1f] }
 0x14e   :  { %16888 = vst [vmem:[#allocation128_spill] sm:$0xff] %v12905_v7  ;;  %v586_v28 = vor.u32 %v16889_v56, %v12847_v38  ;;  %v590_v53 = vrot.slane %v16890_v6, 7  ;;  %v591_v4 = vshll.u32 %v12737_v26, 16  ;;  %v595_v10 = vshrl.u32 %v12749_v46, 16  ;;  %v392_v38 = vld [vmem:[#allocation7 + $0xf0] sm:$0xff] }
 0x14f   :  { %v749_v54 = vsel %vm12123_vm12, %v579_v15, %v748_v35  ;;  %v598_v15 = vshll.u32 %v12749_v46, 16  ;;  %v602_v45 = vshrl.u32 %v12751_v25, 16  ;;  %v3035_v50 = vor.u32 %v3034_v2, %v3031_v20  ;;  %v757_v6 = vld [vmem:[#allocation2 + $0xf0] sm:$0x1f]  ;;  %v760_v20 = vld [vmem:[#allocation2 + $0xf8] sm:$0x1f] }
 0x150   :  { %750 = vst [vmem:[#allocation2 + $0xd8] sm:$0x1f] %v749_v54  ;;  %v752_v60 = vsel %vm12123_vm12, %v586_v28, %v751_v17  ;;  %v593_v3 = vor.u32 %v591_v4, %v590_v53  ;;  %v605_v22 = vshll.u32 %v12751_v25, 16  ;;  %v609_v35 = vshrl.u32 %v12833_v49, 16  ;;  %v12928_v28 = vld [vmem:[#allocation2 + $0xc8] sm:$0xf] }
 0x151   :  { %753 = vst [vmem:[#allocation2 + $0xe0] sm:$0x1f] %v752_v60  ;;  %v1236_v54 = vrot.slane %v1235_v34, 4  ;;  %v1597_v26 = vrot.slane %v10357_v52, 5  ;;  %v597_v56 = vrot.slane %v595_v10, 7  ;;  %v604_v17 = vrot.slane %v602_v45, 7 }
 0x152   :  { %v1240_v51 = vrot.slane %v12873_v29, 5  ;;  %v10632_v46 = vrot.slane %v10608_v33, 9  ;;  %v755_v41 = vsel %vm12123_vm12, %v593_v3, %v754_v55  ;;  %v12933_v60 = vpack.c.bf16 %v392_v38, %v392_v38  ;;  %v947_v53 = vld [vmem:[#allocation2 + $0xd0] sm:$0x1f]  ;;  %v12959_v29 = vld [vmem:[#allocation2 + $0xc8] sm:$0xf] }
 0x153   :  { %v3040_v25 = vrot.slane %v12916_v21, 5  ;;  %v3414_v2 = vrot.slane %v10609_v30, 5  ;;  %v1414_v34 = vld [vmem:[#allocation2 + $0xd0] sm:$0x1e]  ;;  %756 = vst [vmem:[#allocation2 + $0xe8] sm:$0x1f] %v755_v41  ;;  %v600_v52 = vor.u32 %v598_v15, %v597_v56  ;;  %v607_v10 = vor.u32 %v605_v22, %v604_v17 }
 0x154   :  { %v3036_v4 = vrot.slane %v3035_v50, 4  ;;  %v1863_v45 = vld [vmem:[#allocation2 + $0xd0] sm:$0x1f]  ;;  %v12936_v42 = vrot.slane %v609_v35, 7  ;;  %v616_v33 = vshrl.u32 %v12852_v11, 16  ;;  %v12942_v55 = vsel %vm12149_vm13, %v1236_v54, %v1240_v51  ;;  %16893 = vst [vmem:[#allocation131_spill] sm:$0xff] %v12959_v29 }
 0x155   :  { %16891 = vst [vmem:[#allocation129_spill] sm:$0xff] %v12942_v55  ;;  %v12947_v21 = vsel %vm12162_vm14, %v12885_v13, %v1597_v26  ;;  %v758_v38 = vsel %vm12123_vm12, %v600_v52, %v757_v6  ;;  %v761_v50 = vsel %vm12123_vm12, %v607_v10, %v760_v20  ;;  %v623_v17 = vshrl.u32 %v12854_v58, 16  ;;  %v2774_v6 = vld [vmem:[#allocation2 + $0xd0] sm:$0x1f] }
 0x156   :  { %16892 = vst [vmem:[#allocation130_spill] sm:$0xff] %v12947_v21  ;;  %759 = vst [vmem:[#allocation2 + $0xf0] sm:$0x1f] %v758_v38  ;;  %v12961_v36 = vrot.slane %v616_v33, 7  ;;  %v3238_v3 = vld [vmem:[#allocation2 + $0xd0] sm:$0x1e] }
 0x157   :  { %v12949_v41 = vld [vmem:[#allocation2 + $0xd8] sm:$0xf]  ;;  %762 = vst [vmem:[#allocation2 + $0xf8] sm:$0x1f] %v761_v50 }
 0x158   :  { %v948_v30 = vld [vmem:[#allocation2 + $0xd8] sm:$0x1f]  ;;  %v2329_v14 = vld [vmem:[#allocation2 + $0xe0] sm:$0x1e] }
 0x159   :  { %v1415_v15 = vld [vmem:[#allocation2 + $0xd8] sm:$0x1e]  ;;  %v10310_v51 = vcombine.low %v947_v53, %v948_v30  ;;  %v10311_v22 = vcombine.high %v947_v53, %v948_v30 }
 0x15a   :  { %v10358_v35 = vcombine.low %v1414_v34, %v1415_v15  ;;  %v1864_v54 = vld [vmem:[#allocation2 + $0xd8] sm:$0x1f]  ;;  %v10359_v13 = vcombine.high %v1414_v34, %v1415_v15  ;;  %v12966_v34 = vsel %vm12149_vm13, %v3036_v4, %v3040_v25  ;;  %v12970_v15 = vsel %vm12162_vm14, %v10632_v46, %v3414_v2  ;;  %v12991_v2 = vld [vmem:[#allocation2 + $0xe0] sm:$0xf]  ;;  %v950_v29 = vld [vmem:[#allocation2 + $0xe8] sm:$0x1f] }
 0x15b   :  { %v10436_v26 = vcombine.low %v1863_v45, %v1864_v54  ;;  %v1243_v52 = vshrl.u32 %v10310_v51, 16  ;;  %v1246_v20 = vshll.u32 %v10310_v51, 16  ;;  %v1252_v53 = vshll.u32 %v10311_v22, 16  ;;  %16894 = vst [vmem:[#allocation132_spill] sm:$0xff] %v12966_v34  ;;  %16895 = vst [vmem:[#allocation133_spill] sm:$0xff] %v12970_v15 }
 0x15c   :  { %v10379_v10 = vrot.slane %v10358_v35, 9  ;;  %v1601_v30 = vrot.slane %v10359_v13, 5  ;;  %v10437_v12 = vcombine.high %v1863_v45, %v1864_v54  ;;  %v12972_v51 = vld [vmem:[#allocation2 + $0xd8] sm:$0xf]  ;;  %v12978_v13 = vrot.slane %v623_v17, 7  ;;  %16899 = vst [vmem:[#allocation137_spill] sm:$0xff] %v12991_v2 }
 0x15d   :  { %v1245_v50 = vrot.slane %v1243_v52, 4  ;;  %v1248_v56 = vrot.slane %v1246_v20, 5  ;;  %16896 = vst [vmem:[#allocation134_spill] sm:$0xff] %v12972_v51  ;;  %v2775_v33 = vld [vmem:[#allocation2 + $0xd8] sm:$0x1f]  ;;  %v2144_v45 = vshrl.u32 %v10436_v26, 16 }
 0x15e   :  { %v12976_v22 = vsel %vm12162_vm14, %v10379_v10, %v1601_v30  ;;  %v2147_v35 = vshll.u32 %v10436_v26, 16  ;;  %v3239_v54 = vld [vmem:[#allocation2 + $0xd8] sm:$0x1e]  ;;  %v2327_v52 = vld [vmem:[#allocation2 + $0xd0] sm:$0x1e]  ;;  %v1254_v20 = vrot.slane %v1252_v53, 5  ;;  %v10562_v30 = vcombine.low %v2774_v6, %v2775_v33 }
 0x15f   :  { %16897 = vst [vmem:[#allocation135_spill] sm:$0xff] %v12976_v22  ;;  %v1249_v25 = vor.u32 %v1248_v56, %v1245_v50  ;;  %v12985_v38 = vshll.u32 %v10437_v12, 16  ;;  %v2328_v10 = vld [vmem:[#allocation2 + $0xd8] sm:$0x1e]  ;;  %v12989_v17 = vld [vmem:[#allocation2 + $0xd0] sm:$0xf]  ;;  %v10563_v50 = vcombine.high %v2774_v6, %v2775_v33  ;;  %v10610_v61 = vcombine.low %v3238_v3, %v3239_v54 }
 0x160   :  { %16898 = vst [vmem:[#allocation136_spill] sm:$0xff] %v12989_v17  ;;  %v10611_v4 = vcombine.high %v3238_v3, %v3239_v54  ;;  %v2146_v7 = vrot.slane %v2144_v45, 4  ;;  %v2149_v19 = vrot.slane %v2147_v35, 5  ;;  %v3043_v46 = vshrl.u32 %v10562_v30, 16  ;;  %v949_v51 = vld [vmem:[#allocation2 + $0xe0] sm:$0x1f] }
 0x161   :  { %v1250_v56 = vrot.slane %v1249_v25, 4  ;;  %v3046_v22 = vshll.u32 %v10562_v30, 16  ;;  %v10484_v53 = vcombine.low %v2327_v52, %v2328_v10  ;;  %v10633_v21 = vrot.slane %v10610_v61, 9  ;;  %v13001_v33 = vld [vmem:[#allocation2 + $0xd8] sm:$0xf] }
 0x162   :  { %v3418_v26 = vrot.slane %v10611_v4, 5  ;;  %16901 = vst [vmem:[#allocation139_spill] sm:$0xff] %v13001_v33  ;;  %v10485_v45 = vcombine.high %v2327_v52, %v2328_v10  ;;  %v3045_v35 = vrot.slane %v3043_v46, 4  ;;  %v13003_v54 = vld [vmem:[#allocation2 + $0xe8] sm:$0xf]  ;;  %v2150_v6 = vor.u32 %v2149_v19, %v2146_v7 }
 0x163   :  { %v12995_v12 = vsel %vm12149_vm13, %v1250_v56, %v1254_v20  ;;  %16902 = vst [vmem:[#allocation140_spill] sm:$0xff] %v13003_v54  ;;  %v3048_v25 = vrot.slane %v3046_v22, 5  ;;  %v3052_v20 = vshll.u32 %v10563_v50, 16  ;;  %v1865_v30 = vld [vmem:[#allocation2 + $0xe0] sm:$0x1f]  ;;  %v10312_v52 = vcombine.low %v949_v51, %v950_v29 }
 0x164   :  { %16900 = vst [vmem:[#allocation138_spill] sm:$0xff] %v12995_v12  ;;  %v13007_v61 = vsel %vm12162_vm14, %v10633_v21, %v3418_v26  ;;  %v1866_v56 = vld [vmem:[#allocation2 + $0xe8] sm:$0x1f]  ;;  %v2155_v22 = vrot.slane %v12985_v38, 5  ;;  %v1416_v50 = vld [vmem:[#allocation2 + $0xe0] sm:$0x1e]  ;;  %v10313_v12 = vcombine.high %v949_v51, %v950_v29 }
 0x165   :  { %16903 = vst [vmem:[#allocation141_spill] sm:$0xff] %v13007_v61  ;;  %v3049_v10 = vor.u32 %v3048_v25, %v3045_v35  ;;  %v1417_v21 = vld [vmem:[#allocation2 + $0xe8] sm:$0x1e]  ;;  %v10506_v4 = vrot.slane %v10484_v53, 9  ;;  %v1257_v2 = vshrl.u32 %v10312_v52, 16  ;;  %v1260_v17 = vshll.u32 %v10312_v52, 16 }
 0x166   :  { %v10438_v19 = vcombine.low %v1865_v30, %v1866_v56  ;;  %v2509_v7 = vrot.slane %v10485_v45, 5  ;;  %v3054_v3 = vrot.slane %v3052_v20, 5  ;;  %v10439_v37 = vcombine.high %v1865_v30, %v1866_v56  ;;  %v13018_v61 = vld [vmem:[#allocation2 + $0xe0] sm:$0x1f]  ;;  %v2330_v29 = vld [vmem:[#allocation2 + $0xe8] sm:$0x1e] }
 0x167   :  { %v3050_v55 = vrot.slane %v3049_v10, 4  ;;  %v2151_v46 = vrot.slane %v2150_v6, 4  ;;  %v10360_v38 = vcombine.low %v1416_v50, %v1417_v21  ;;  %v10361_v35 = vcombine.high %v1416_v50, %v1417_v21  ;;  %v2777_v45 = vld [vmem:[#allocation2 + $0xe8] sm:$0x1f]  ;;  %v951_v6 = vld [vmem:[#allocation2 + $0xf0] sm:$0x1f] }
 0x168   :  { %v2158_v25 = vshrl.u32 %v10438_v19, 16  ;;  %v1259_v53 = vrot.slane %v1257_v2, 4  ;;  %v13024_v26 = vshll.u32 %v10313_v12, 16  ;;  %v2161_v52 = vshll.u32 %v10438_v19, 16  ;;  %v13038_v12 = vld [vmem:[#allocation2 + $0xe0] sm:$0xf] }
 0x169   :  { %v13022_v51 = vsel %vm12149_vm13, %v3050_v55, %v3054_v3  ;;  %v1262_v30 = vrot.slane %v1260_v17, 5  ;;  %v2167_v50 = vshll.u32 %v10439_v37, 16  ;;  %v10486_v21 = vcombine.low %v2329_v14, %v2330_v29  ;;  %16907 = vst [vmem:[#allocation145_spill] sm:$0xff] %v13038_v12  ;;  %v13042_v17 = vld [vmem:[#allocation2 + $0xe0] sm:$0xf] }
 0x16a   :  { %16904 = vst [vmem:[#allocation142_spill] sm:$0xff] %v13022_v51  ;;  %v2160_v56 = vrot.slane %v2158_v25, 4  ;;  %v2163_v10 = vrot.slane %v2161_v52, 5  ;;  %v10487_v15 = vcombine.high %v2329_v14, %v2330_v29  ;;  %v13032_v55 = vsel %vm12149_vm13, %v2151_v46, %v2155_v22  ;;  %16908 = vst [vmem:[#allocation146_spill] sm:$0xff] %v13042_v17  ;;  %v13044_v29 = vld [vmem:[#allocation2 + $0xf0] sm:$0xf] }
 0x16b   :  { %16905 = vst [vmem:[#allocation143_spill] sm:$0xff] %v13032_v55  ;;  %v13036_v2 = vsel %vm12162_vm14, %v10506_v4, %v2509_v7  ;;  %v10564_v3 = vcombine.low %v13018_v61, %v2777_v45  ;;  %v10380_v25 = vrot.slane %v10360_v38, 9  ;;  %v10507_v52 = vrot.slane %v10486_v21, 9  ;;  %16909 = vst [vmem:[#allocation147_spill] sm:$0xff] %v13044_v29  ;;  %v13046_v46 = vld [vmem:[#allocation2 + $0xe8] sm:$0xf] }
 0x16c   :  { %16906 = vst [vmem:[#allocation144_spill] sm:$0xff] %v13036_v2  ;;  %v2164_v37 = vor.u32 %v2163_v10, %v2160_v56  ;;  %v2513_v14 = vrot.slane %v10487_v15, 5  ;;  %v1263_v22 = vor.u32 %v1262_v30, %v1259_v53  ;;  %v1605_v20 = vrot.slane %v10361_v35, 5  ;;  %v1418_v51 = vld [vmem:[#allocation2 + $0xf0] sm:$0x1e] }
 0x16d   :  { %v3057_v4 = vshrl.u32 %v10564_v3, 16  ;;  %v3060_v7 = vshll.u32 %v10564_v3, 16  ;;  %v1268_v34 = vrot.slane %v13024_v26, 5  ;;  %v2169_v19 = vrot.slane %v2167_v50, 5  ;;  %v13053_v56 = vld [vmem:[#allocation2 + $0xf0] sm:$0xf] }
 0x16e   :  { %v2165_v54 = vrot.slane %v2164_v37, 4  ;;  %v13051_v38 = vsel %vm12162_vm14, %v10507_v52, %v2513_v14  ;;  %16911 = vst [vmem:[#allocation149_spill] sm:$0xff] %v13053_v56  ;;  %v10565_v53 = vcombine.high %v13018_v61, %v2777_v45  ;;  %v13060_v30 = vld [vmem:[#allocation2 + $0xf8] sm:$0xf]  ;;  %v16912_v50 = vshll.u32 %v12833_v49, 16 }
 0x16f   :  { %16910 = vst [vmem:[#allocation148_spill] sm:$0xff] %v13051_v38  ;;  %v952_v10 = vld [vmem:[#allocation2 + $0xf8] sm:$0x1f]  ;;  %v3240_v3 = vld [vmem:[#allocation2 + $0xe0] sm:$0x1e]  ;;  %v3059_v52 = vrot.slane %v3057_v4, 4  ;;  %v13089_v56 = vsel %vm12162_vm14, %v10380_v25, %v1605_v20 }
 0x170   :  { %v1419_v26 = vld [vmem:[#allocation2 + $0xf8] sm:$0x1e]  ;;  %v13065_v21 = vor.u32 %v16912_v50, %v12936_v42  ;;  %v13069_v37 = vsel %vm12149_vm13, %v2165_v54, %v2169_v19  ;;  %v3062_v14 = vrot.slane %v3060_v7, 5  ;;  %v3241_v15 = vld [vmem:[#allocation2 + $0xe8] sm:$0x1e]  ;;  %v1264_v45 = vrot.slane %v1263_v22, 4 }
 0x171   :  { %16913 = vst [vmem:[#allocation150_spill] sm:$0xff] %v13069_v37  ;;  %v13079_v50 = vld [vmem:[#allocation2 + $0xf0] sm:$0x1f]  ;;  %v10314_v19 = vcombine.low %v951_v6, %v952_v10  ;;  %v10315_v4 = vcombine.high %v951_v6, %v952_v10  ;;  %v10362_v7 = vcombine.low %v1418_v51, %v1419_v26  ;;  %v13083_v38 = vld [vmem:[#allocation2 + $0xf8] sm:$0x1f]  ;;  %v3066_v22 = vshll.u32 %v10565_v53, 16 }
 0x172   :  { %v10612_v61 = vcombine.low %v3240_v3, %v3241_v15  ;;  %v10613_v2 = vcombine.high %v3240_v3, %v3241_v15  ;;  %v10363_v35 = vcombine.high %v1418_v51, %v1419_v26  ;;  %v13085_v33 = vld [vmem:[#allocation2 + $0xe8] sm:$0xf]  ;;  %v3063_v49 = vor.u32 %v3062_v14, %v3059_v52  ;;  %16915 = vst [vmem:[#allocation152_spill] sm:$0xff] %v13089_v56  ;;  %v2778_v54 = vld [vmem:[#allocation2 + $0xf0] sm:$0x1f] }
 0x173   :  { %16914 = vst [vmem:[#allocation151_spill] sm:$0xff] %v13085_v33  ;;  %v1271_v37 = vshrl.u32 %v10314_v19, 16  ;;  %v1274_v55 = vshll.u32 %v10314_v19, 16  ;;  %v10381_v42 = vrot.slane %v10362_v7, 9  ;;  %v3242_v17 = vld [vmem:[#allocation2 + $0xf0] sm:$0x1e]  ;;  %v10440_v53 = vcombine.low %v13079_v50, %v13083_v38 }
 0x174   :  { %v1280_v6 = vshll.u32 %v10315_v4, 16  ;;  %v1609_v10 = vrot.slane %v10363_v35, 5  ;;  %v13095_v51 = vsel %vm12149_vm13, %v1264_v45, %v1268_v34  ;;  %v13097_v3 = vld [vmem:[#allocation2 + $0xf8] sm:$0xf]  ;;  %v16918_v20 = vshll.u32 %v12852_v11, 16 }
 0x175   :  { %16916 = vst [vmem:[#allocation153_spill] sm:$0xff] %v13095_v51  ;;  %v1273_v15 = vrot.slane %v1271_v37, 4  ;;  %v1276_v26 = vrot.slane %v1274_v55, 5  ;;  %16917 = vst [vmem:[#allocation154_spill] sm:$0xff] %v13097_v3  ;;  %v2779_v52 = vld [vmem:[#allocation2 + $0xf8] sm:$0x1f] }
 0x176   :  { %v621_v25 = vor.u32 %v16918_v20, %v12961_v36  ;;  %v3068_v14 = vrot.slane %v3066_v22, 5  ;;  %v10634_v19 = vrot.slane %v10612_v61, 9  ;;  %v3422_v4 = vrot.slane %v10613_v2, 5  ;;  %v3243_v7 = vld [vmem:[#allocation2 + $0xf8] sm:$0x1e] }
 0x177   :  { %v13104_v35 = vsel %vm12162_vm14, %v10381_v42, %v1609_v10  ;;  %v3064_v29 = vrot.slane %v3063_v49, 4  ;;  %v1277_v34 = vor.u32 %v1276_v26, %v1273_v15  ;;  %v763_v45 = vld [vmem:[#allocation2 + $0x100] sm:$0x1f]  ;;  %v1282_v12 = vrot.slane %v1280_v6, 5  ;;  %v772_v37 = vld [vmem:[#allocation2 + $0x118] sm:$0x1f] }
 0x178   :  { %16919 = vst [vmem:[#allocation155_spill] sm:$0xff] %v13104_v35  ;;  %v2172_v11 = vshrl.u32 %v10440_v53, 16  ;;  %v2175_v36 = vshll.u32 %v10440_v53, 16  ;;  %v10566_v22 = vcombine.low %v2778_v54, %v2779_v52  ;;  %v10567_v42 = vcombine.high %v2778_v54, %v2779_v52  ;;  %v778_v51 = vld [vmem:[#allocation2 + $0x128] sm:$0x1f] }
 0x179   :  { %v1278_v61 = vrot.slane %v1277_v34, 4  ;;  %v10614_v10 = vcombine.low %v3242_v17, %v3243_v7  ;;  %v13114_v49 = vsel %vm12162_vm14, %v10634_v19, %v3422_v4  ;;  %v10441_v15 = vcombine.high %v13079_v50, %v13083_v38  ;;  %v766_v19 = vld [vmem:[#allocation2 + $0x108] sm:$0x1f]  ;;  %v769_v34 = vld [vmem:[#allocation2 + $0x110] sm:$0x1f] }
 0x17a   :  { %16920 = vst [vmem:[#allocation156_spill] sm:$0xff] %v13114_v49  ;;  %v10615_v26 = vcombine.high %v3242_v17, %v3243_v7  ;;  %v764_v6 = vsel %vm12123_vm12, %v13065_v21, %v763_v45  ;;  %v13123_v53 = vsel %vm12149_vm13, %v3064_v29, %v3068_v14  ;;  %v3071_v52 = vshrl.u32 %v10566_v22, 16  ;;  %v2331_v45 = vld [vmem:[#allocation2 + $0xf0] sm:$0x1e] }
 0x17b   :  { %16921 = vst [vmem:[#allocation157_spill] sm:$0xff] %v13123_v53  ;;  %v13127_v54 = vsel %vm12149_vm13, %v1278_v61, %v1282_v12  ;;  %v3074_v20 = vshll.u32 %v10566_v22, 16  ;;  %765 = vst [vmem:[#allocation2 + $0x100] sm:$0x1f] %v764_v6  ;;  %v2174_v50 = vrot.slane %v2172_v11, 4  ;;  %v3080_v21 = vshll.u32 %v10567_v42, 16 }
 0x17c   :  { %16922 = vst [vmem:[#allocation158_spill] sm:$0xff] %v13127_v54  ;;  %v2177_v4 = vrot.slane %v2175_v36, 5  ;;  %v3073_v7 = vrot.slane %v3071_v52, 4  ;;  %v10635_v14 = vrot.slane %v10614_v10, 9  ;;  %v3426_v12 = vrot.slane %v10615_v26, 5 }
 0x17d   :  { %v3076_v29 = vrot.slane %v3074_v20, 5  ;;  %v767_v61 = vsel %vm12123_vm12, %v621_v25, %v766_v19  ;;  %v16923_v22 = vshll.u32 %v12854_v58, 16  ;;  %v16924_v2 = vshrl.u32 %v12856_v63, 16  ;;  %v2332_v42 = vld [vmem:[#allocation2 + $0xf8] sm:$0x1e] }
 0x17e   :  { %v2181_v11 = vshll.u32 %v10441_v15, 16  ;;  %768 = vst [vmem:[#allocation2 + $0x108] sm:$0x1f] %v767_v61  ;;  %v637_v10 = vshrl.u32 %v12933_v60, 16  ;;  %v640_v52 = vshll.u32 %v12933_v60, 16  ;;  %v3082_v26 = vrot.slane %v3080_v21, 5 }
 0x17f   :  { %v628_v6 = vor.u32 %v16923_v22, %v12978_v13  ;;  %v632_v55 = vrot.slane %v16924_v2, 7  ;;  %v3077_v36 = vor.u32 %v3076_v29, %v3073_v7  ;;  %v13144_v25 = vsel %vm12162_vm14, %v10635_v14, %v3426_v12  ;;  %v13150_v20 = vld [vmem:[#allocation2 + $0xf0] sm:$0xf]  ;;  %v11584_v54 = vld [vmem:[#allocation2 + $0x134] ss:$8 sps:$4 sm:$0x11]  }
 0x180   :  { %16925 = vst [vmem:[#allocation159_spill] sm:$0xff] %v13144_v25  ;;  %v16926_v13 = vshll.u32 %v12856_v63, 16  ;;  %16927 = vst [vmem:[#allocation160_spill] sm:$0xff] %v13150_v20  ;;  %v639_v21 = vrot.slane %v637_v10, 7  ;;  %v2178_v7 = vor.u32 %v2177_v4, %v2174_v50  ;;  %v10488_v29 = vcombine.low %v2331_v45, %v2332_v42  ;;  %v11591_v12 = vld [vmem:[#allocation2 + $0x130] ss:$8 sps:$4 sm:$0xff]  }
 0x181   :  { %v770_v58 = vsel %vm12123_vm12, %v628_v6, %v769_v34  ;;  %v3078_v15 = vrot.slane %v3077_v36, 4  ;;  %v775_v34 = vld [vmem:[#allocation2 + $0x120] sm:$0x1f]  ;;  %v3130_v63 = vshll.u32 %v11591_v12, 16  ;;  %v393_v6 = vld [vmem:[#allocation7 + $0xf8] sm:$0xff]  ;;  %v10489_v36 = vcombine.high %v2331_v45, %v2332_v42 }
 0x182   :  { %v635_v2 = vor.u32 %v16926_v13, %v632_v55  ;;  %771 = vst [vmem:[#allocation2 + $0x110] sm:$0x1f] %v770_v58  ;;  %v13162_v61 = vld [vmem:[#allocation2 + $0x100] sm:$0xf]  ;;  %v642_v22 = vor.u32 %v640_v52, %v639_v21  ;;  %v16930_v58 = vshrl.u32 %v12135_v9, 16  ;;  %v2179_v42 = vrot.slane %v2178_v7, 4 }
 0x183   :  { %v13160_v55 = vsel %vm12149_vm13, %v3078_v15, %v3082_v26  ;;  %16929 = vst [vmem:[#allocation162_spill] sm:$0xff] %v13162_v61  ;;  %v13174_v13 = vld [vmem:[#allocation2 + $0xf8] sm:$0xf]  ;;  %v1869_v52 = vld [vmem:[#allocation2 + $0x100] sm:$0x1f]  ;;  %v10508_v15 = vrot.slane %v10488_v29, 9  ;;  %v13178_v12 = vpack.c.bf16 %v393_v6, %v393_v6 }
 0x184   :  { %v773_v14 = vsel %vm12123_vm12, %v635_v2, %v772_v37  ;;  %16928 = vst [vmem:[#allocation161_spill] sm:$0xff] %v13160_v55  ;;  %v953_v37 = vld [vmem:[#allocation2 + $0x100] sm:$0x1f]  ;;  %v13172_v26 = vrot.slane %v16930_v58, 4  ;;  %16931 = vst [vmem:[#allocation163_spill] sm:$0xff] %v13174_v13  ;;  %v2183_v2 = vrot.slane %v2181_v11, 5  ;;  %v776_v45 = vsel %vm12123_vm12, %v642_v22, %v775_v34 }
 0x185   :  { %774 = vst [vmem:[#allocation2 + $0x118] sm:$0x1f] %v773_v14  ;;  %v2333_v21 = vld [vmem:[#allocation2 + $0x100] sm:$0x1e]  ;;  %v954_v14 = vld [vmem:[#allocation2 + $0x108] sm:$0x1f] }
 0x186   :  { %777 = vst [vmem:[#allocation2 + $0x120] sm:$0x1f] %v776_v45  ;;  %v10316_v19 = vcombine.low %v953_v37, %v954_v14  ;;  %v13180_v60 = vld [vmem:[#allocation2 + $0x108] sm:$0xf]  ;;  %v2517_v50 = vrot.slane %v10489_v36, 5  ;;  %v13184_v7 = vrot.slane %v3130_v63, 5  ;;  %v13188_v6 = vsel %vm12149_vm13, %v2179_v42, %v2183_v2 }
 0x187   :  { %16932 = vst [vmem:[#allocation164_spill] sm:$0xff] %v13180_v60  ;;  %v1870_v9 = vld [vmem:[#allocation2 + $0x108] sm:$0x1f]  ;;  %v1420_v4 = vld [vmem:[#allocation2 + $0x100] sm:$0x1e]  ;;  %16933 = vst [vmem:[#allocation165_spill] sm:$0xff] %v13188_v6  ;;  %v10317_v55 = vcombine.high %v953_v37, %v954_v14 }
 0x188   :  { %v2334_v58 = vld [vmem:[#allocation2 + $0x108] sm:$0x1e]  ;;  %v10442_v38 = vcombine.low %v1869_v52, %v1870_v9  ;;  %v10443_v34 = vcombine.high %v1869_v52, %v1870_v9  ;;  %v1285_v29 = vshrl.u32 %v10316_v19, 16  ;;  %v1288_v22 = vshll.u32 %v10316_v19, 16  ;;  %v2780_v49 = vld [vmem:[#allocation2 + $0x100] sm:$0x1f] }
 0x189   :  { %v1421_v10 = vld [vmem:[#allocation2 + $0x108] sm:$0x1e]  ;;  %v10490_v45 = vcombine.low %v2333_v21, %v2334_v58  ;;  %v644_v36 = vshrl.u32 %v13178_v12, 16  ;;  %v10491_v11 = vcombine.high %v2333_v21, %v2334_v58  ;;  %v13193_v63 = vsel %vm12162_vm14, %v10508_v15, %v2517_v50  ;;  %v13197_v60 = vld [vmem:[#allocation2 + $0x100] sm:$0xf] }
 0x18a   :  { %v2186_v17 = vshrl.u32 %v10442_v38, 16  ;;  %v2189_v25 = vshll.u32 %v10442_v38, 16  ;;  %v10364_v53 = vcombine.low %v1420_v4, %v1421_v10  ;;  %v10365_v3 = vcombine.high %v1420_v4, %v1421_v10  ;;  %v2781_v33 = vld [vmem:[#allocation2 + $0x108] sm:$0x1f]  ;;  %16934 = vst [vmem:[#allocation166_spill] sm:$0xff] %v13193_v63  ;;  %16935 = vst [vmem:[#allocation167_spill] sm:$0xff] %v13197_v60 }
 0x18b   :  { %v2195_v9 = vshll.u32 %v10443_v34, 16  ;;  %v1287_v61 = vrot.slane %v1285_v29, 4  ;;  %v1290_v2 = vrot.slane %v1288_v22, 5  ;;  %v10509_v42 = vrot.slane %v10490_v45, 9  ;;  %v13195_v38 = vld [vmem:[#allocation2 + $0x100] sm:$0xf] }
 0x18c   :  { %v2188_v19 = vrot.slane %v2186_v17, 4  ;;  %v2191_v52 = vrot.slane %v2189_v25, 5  ;;  %v2521_v20 = vrot.slane %v10491_v11, 5  ;;  %v10568_v14 = vcombine.low %v2780_v49, %v2781_v33  ;;  %v13202_v21 = vld [vmem:[#allocation2 + $0x108] sm:$0xf] }
 0x18d   :  { %v13199_v4 = vrot.slane %v644_v36, 7  ;;  %v13204_v50 = vshll.u32 %v10317_v55, 16  ;;  %v10382_v17 = vrot.slane %v10364_v53, 9  ;;  %v1613_v25 = vrot.slane %v10365_v3, 5  ;;  %v13210_v58 = vld [vmem:[#allocation2 + $0x110] sm:$0xf] }
 0x18e   :  { %v2192_v37 = vor.u32 %v2191_v52, %v2188_v19  ;;  %v13208_v15 = vsel %vm12162_vm14, %v10509_v42, %v2521_v20  ;;  %v3244_v11 = vld [vmem:[#allocation2 + $0x100] sm:$0x1e]  ;;  %v2197_v29 = vrot.slane %v2195_v9, 5  ;;  %v3245_v36 = vld [vmem:[#allocation2 + $0x108] sm:$0x1e]  ;;  %v1291_v53 = vor.u32 %v1290_v2, %v1287_v61 }
 0x18f   :  { %16936 = vst [vmem:[#allocation168_spill] sm:$0xff] %v13208_v15  ;;  %v13216_v55 = vld [vmem:[#allocation2 + $0x110] sm:$0xf]  ;;  %v13218_v19 = vld [vmem:[#allocation2 + $0x118] sm:$0xf]  ;;  %v10569_v42 = vcombine.high %v2780_v49, %v2781_v33  ;;  %v3085_v9 = vshrl.u32 %v10568_v14, 16  ;;  %v10617_v63 = vcombine.high %v3244_v11, %v3245_v36 }
 0x190   :  { %v2193_v34 = vrot.slane %v2192_v37, 4  ;;  %16937 = vst [vmem:[#allocation169_spill] sm:$0xff] %v13216_v55  ;;  %v955_v3 = vld [vmem:[#allocation2 + $0x110] sm:$0x1f]  ;;  %v956_v20 = vld [vmem:[#allocation2 + $0x118] sm:$0x1f]  ;;  %v10616_v37 = vcombine.low %v3244_v11, %v3245_v36 }
 0x191   :  { %v1422_v22 = vld [vmem:[#allocation2 + $0x110] sm:$0x1e]  ;;  %v1423_v10 = vld [vmem:[#allocation2 + $0x118] sm:$0x1e]  ;;  %v3088_v2 = vshll.u32 %v10568_v14, 16  ;;  %v10318_v49 = vcombine.low %v955_v3, %v956_v20  ;;  %v1292_v35 = vrot.slane %v1291_v53, 4 }
 0x192   :  { %v13222_v52 = vsel %vm12149_vm13, %v2193_v34, %v2197_v29  ;;  %v13234_v34 = vsel %vm12162_vm14, %v10382_v17, %v1613_v25  ;;  %v10319_v29 = vcombine.high %v955_v3, %v956_v20  ;;  %v10366_v13 = vcombine.low %v1422_v22, %v1423_v10  ;;  %v13238_v56 = vld [vmem:[#allocation2 + $0x108] sm:$0xf]  ;;  %v2782_v17 = vld [vmem:[#allocation2 + $0x110] sm:$0x1f]  ;;  %v13247_v36 = vld [vmem:[#allocation2 + $0x118] sm:$0xf] }
 0x193   :  { %16938 = vst [vmem:[#allocation170_spill] sm:$0xff] %v13222_v52  ;;  %16939 = vst [vmem:[#allocation171_spill] sm:$0xff] %v13234_v34  ;;  %v10367_v45 = vcombine.high %v1422_v22, %v1423_v10  ;;  %v13240_v14 = vshll.u32 %v10569_v42, 16  ;;  %v1299_v61 = vshrl.u32 %v10318_v49, 16  ;;  %v1302_v15 = vshll.u32 %v10318_v49, 16 }
 0x194   :  { %16940 = vst [vmem:[#allocation172_spill] sm:$0xff] %v13238_v56  ;;  %v3087_v55 = vrot.slane %v3085_v9, 4  ;;  %v3090_v60 = vrot.slane %v3088_v2, 5  ;;  %v10383_v25 = vrot.slane %v10366_v13, 9  ;;  %v1296_v33 = vrot.slane %v13204_v50, 5  ;;  %16942 = vst [vmem:[#allocation174_spill] sm:$0xff] %v13247_v36 }
 0x195   :  { %v1617_v52 = vrot.slane %v10367_v45, 5  ;;  %v13243_v6 = vld [vmem:[#allocation2 + $0x110] sm:$0xf]  ;;  %v1301_v11 = vrot.slane %v1299_v61, 4  ;;  %v1304_v10 = vrot.slane %v1302_v15, 5  ;;  %v1308_v22 = vshll.u32 %v10319_v29, 16 }
 0x196   :  { %16941 = vst [vmem:[#allocation173_spill] sm:$0xff] %v13243_v6  ;;  %v13245_v3 = vld [vmem:[#allocation2 + $0x110] sm:$0x1f]  ;;  %v10636_v53 = vrot.slane %v10616_v37, 9  ;;  %v3430_v20 = vrot.slane %v10617_v63, 5  ;;  %v13261_v63 = vsel %vm12149_vm13, %v1292_v35, %v1296_v33  ;;  %v3091_v37 = vor.u32 %v3090_v60, %v3087_v55 }
 0x197   :  { %v3246_v42 = vld [vmem:[#allocation2 + $0x110] sm:$0x1e]  ;;  %v13251_v9 = vsel %vm12162_vm14, %v10383_v25, %v1617_v52  ;;  %v2783_v13 = vld [vmem:[#allocation2 + $0x118] sm:$0x1f]  ;;  %v1305_v45 = vor.u32 %v1304_v10, %v1301_v11  ;;  %v13257_v49 = vld [vmem:[#allocation2 + $0x120] sm:$0xf] }
 0x198   :  { %16943 = vst [vmem:[#allocation175_spill] sm:$0xff] %v13251_v9  ;;  %v1872_v61 = vld [vmem:[#allocation2 + $0x118] sm:$0x1f]  ;;  %16944 = vst [vmem:[#allocation176_spill] sm:$0xff] %v13257_v49  ;;  %v3096_v52 = vrot.slane %v13240_v14, 5  ;;  %v1310_v11 = vrot.slane %v1308_v22, 5  ;;  %v10570_v10 = vcombine.low %v2782_v17, %v2783_v13  ;;  %v10571_v50 = vcombine.high %v2782_v17, %v2783_v13 }
 0x199   :  { %v3247_v15 = vld [vmem:[#allocation2 + $0x118] sm:$0x1e]  ;;  %v1306_v25 = vrot.slane %v1305_v45, 4  ;;  %v10444_v2 = vcombine.low %v13245_v3, %v1872_v61  ;;  %v13269_v35 = vld [vmem:[#allocation2 + $0x130] sm:$0xf]  ;;  %v13273_v60 = vsel %vm12162_vm14, %v10636_v53, %v3430_v20  ;;  %v3092_v22 = vrot.slane %v3091_v37, 4 }
 0x19a   :  { %v10618_v9 = vcombine.low %v3246_v42, %v3247_v15  ;;  %v10619_v34 = vcombine.high %v3246_v42, %v3247_v15  ;;  %16945 = vst [vmem:[#allocation177_spill] sm:$0xff] %v13269_v35  ;;  %16946 = vst [vmem:[#allocation178_spill] sm:$0xff] %v13273_v60  ;;  %v3099_v33 = vshrl.u32 %v10570_v10, 16  ;;  %v3102_v14 = vshll.u32 %v10570_v10, 16  ;;  %v13279_v17 = vld [vmem:[#allocation2 + $0x120] sm:$0xf] }
 0x19b   :  { %v13277_v55 = vsel %vm12149_vm13, %v1306_v25, %v1310_v11  ;;  %16947 = vst [vmem:[#allocation179_spill] sm:$0xff] %v13279_v17  ;;  %v10445_v45 = vcombine.high %v13245_v3, %v1872_v61  ;;  %v3108_v20 = vshll.u32 %v10571_v50, 16  ;;  %v2200_v25 = vshrl.u32 %v10444_v2, 16  ;;  %v13291_v56 = vld [vmem:[#allocation2 + $0x130] ss:$8 sps:$4 sm:$0xee]  }
 0x19c   :  { %v3101_v15 = vrot.slane %v3099_v33, 4  ;;  %v3104_v53 = vrot.slane %v3102_v14, 5  ;;  %v10637_v29 = vrot.slane %v10618_v9, 9  ;;  %v3434_v11 = vrot.slane %v10619_v34, 5  ;;  %v2335_v34 = vld [vmem:[#allocation2 + $0x110] sm:$0x1e] }
 0x19d   :  { %v16948_v37 = vshll.u32 %v13178_v12, 16  ;;  %v3136_v42 = vshll.u32 %v11584_v54, 16  ;;  %v2203_v13 = vshll.u32 %v10444_v2, 16  ;;  %v3133_v3 = vor.u32 %v13184_v7, %v13172_v26  ;;  %v2336_v50 = vld [vmem:[#allocation2 + $0x118] sm:$0x1e] }
 0x19e   :  { %v3105_v49 = vor.u32 %v3104_v53, %v3101_v15  ;;  %v13297_v9 = vsel %vm12149_vm13, %v3092_v22, %v3096_v52  ;;  %v13301_v61 = vsel %vm12162_vm14, %v10637_v29, %v3434_v11  ;;  %v13305_v12 = vld [vmem:[#allocation2 + $0x134] ss:$8 sps:$4 sm:$0x11]   ;;  %v3110_v2 = vrot.slane %v3108_v20, 5  ;;  %v1873_v11 = vld [vmem:[#allocation2 + $0x120] sm:$0x1f] }
 0x19f   :  { %v649_v36 = vor.u32 %v16948_v37, %v13199_v4  ;;  %16949 = vst [vmem:[#allocation180_spill] sm:$0xff] %v13297_v9  ;;  %16950 = vst [vmem:[#allocation181_spill] sm:$0xff] %v13301_v61  ;;  %v2202_v52 = vrot.slane %v2200_v25, 4  ;;  %v2209_v33 = vshll.u32 %v10445_v45, 16  ;;  %v2205_v14 = vrot.slane %v2203_v13, 5 }
 0x1a0   :  { %v3106_v4 = vrot.slane %v3105_v49, 4  ;;  %v10492_v22 = vcombine.low %v2335_v34, %v2336_v50  ;;  %v10493_v29 = vcombine.high %v2335_v34, %v2336_v50  ;;  %v13319_v49 = vld [vmem:[#allocation2 + $0x138] sm:$0xf]  ;;  %v3134_v53 = vrot.slane %v3133_v3, 4  ;;  %v2337_v37 = vld [vmem:[#allocation2 + $0x120] sm:$0x1e] }
 0x1a1   :  { %v779_v54 = vsel %vm12123_vm12, %v649_v36, %v778_v51  ;;  %v3138_v20 = vrot.slane %v3136_v42, 5  ;;  %v10639_v25 = vrot.slane %v13291_v56, 9  ;;  %v3442_v13 = vrot.slane %v13305_v12, 5  ;;  %v13323_v45 = vld [vmem:[#allocation2 + $0x118] sm:$0xf] }
 0x1a2   :  { %780 = vst [vmem:[#allocation2 + $0x128] sm:$0x1f] %v779_v54  ;;  %v13313_v15 = vsel %vm12149_vm13, %v3106_v4, %v3110_v2  ;;  %v2206_v34 = vor.u32 %v2205_v14, %v2202_v52  ;;  %v2211_v50 = vrot.slane %v2209_v33, 5  ;;  %v10510_v54 = vrot.slane %v10492_v22, 9  ;;  %v2784_v2 = vld [vmem:[#allocation2 + $0x120] sm:$0x1f] }
 0x1a3   :  { %16951 = vst [vmem:[#allocation182_spill] sm:$0xff] %v13313_v15  ;;  %v2525_v4 = vrot.slane %v10493_v29, 5  ;;  %v3248_v48 = vld [vmem:[#allocation2 + $0x120] sm:$0x1e] }
 0x1a4   :  { %v2207_v29 = vrot.slane %v2206_v34, 4 }
 0x1a5   :  { %v13335_v42 = vsel %vm12162_vm14, %v10510_v54, %v2525_v4 }
 0x1a9   :  { %v13325_v26 = vld [vmem:[#allocation2 + $0x128] sm:$0xf] }
 0x1aa   :  { %v1874_v7 = vld [vmem:[#allocation2 + $0x128] sm:$0x1f] }
 0x1ab   :  { %v2338_v51 = vld [vmem:[#allocation2 + $0x128] sm:$0x1e]  ;;  %v10446_v3 = vcombine.low %v1873_v11, %v1874_v7  ;;  %v10447_v56 = vcombine.high %v1873_v11, %v1874_v7 }
 0x1ac   :  { %v10494_v36 = vcombine.low %v2337_v37, %v2338_v51  ;;  %v13329_v12 = vld [vmem:[#allocation2 + $0x128] sm:$0xf]  ;;  %v10495_v61 = vcombine.high %v2337_v37, %v2338_v51 }
 0x1ad   :  { %v2785_v10 = vld [vmem:[#allocation2 + $0x128] sm:$0x1f]  ;;  %v2214_v60 = vshrl.u32 %v10446_v3, 16  ;;  %v2217_v15 = vshll.u32 %v10446_v3, 16  ;;  %v2223_v51 = vshll.u32 %v10447_v56, 16 }
 0x1ae   :  { %v10572_v33 = vcombine.low %v2784_v2, %v2785_v10  ;;  %v10573_v14 = vcombine.high %v2784_v2, %v2785_v10  ;;  %v3249_v22 = vld [vmem:[#allocation2 + $0x128] sm:$0x1e]  ;;  %v10511_v9 = vrot.slane %v10494_v36, 9  ;;  %v2529_v7 = vrot.slane %v10495_v61, 5 }
 0x1af   :  { %v2216_v17 = vrot.slane %v2214_v60, 4  ;;  %v2219_v6 = vrot.slane %v2217_v15, 5  ;;  %v10620_v37 = vcombine.low %v3248_v48, %v3249_v22  ;;  %v10621_v54 = vcombine.high %v3248_v48, %v3249_v22 }
 0x1b0   :  { %v3113_v11 = vshrl.u32 %v10572_v33, 16  ;;  %v3116_v35 = vshll.u32 %v10572_v33, 16  ;;  %v13339_v52 = vsel %vm12162_vm14, %v10511_v9, %v2529_v7  ;;  %v3122_v2 = vshll.u32 %v10573_v14, 16 }
 0x1b1   :  { %v2220_v3 = vor.u32 %v2219_v6, %v2216_v17  ;;  %v10526_v36 = vcombine.low %v13335_v42, %v13339_v52  ;;  %v10527_v61 = vcombine.high %v13335_v42, %v13339_v52  ;;  %v13347_v60 = vsel %vm12162_vm14, %v10639_v25, %v3442_v13 }
 0x1b2   :  { %v3115_v10 = vrot.slane %v3113_v11, 4  ;;  %v3118_v34 = vrot.slane %v3116_v35, 5  ;;  %v10638_v4 = vrot.slane %v10620_v37, 9  ;;  %v13351_v9 = vsel %vm12149_vm13, %v2207_v29, %v2211_v50 }
 0x1b3   :  { %v2221_v35 = vrot.slane %v2220_v3, 4  ;;  %v2225_v56 = vrot.slane %v2223_v51, 5  ;;  %v3438_v6 = vrot.slane %v10621_v54, 5  ;;  %v3124_v33 = vrot.slane %v3122_v2, 5 }
 0x1b4   :  { %v3119_v15 = vor.u32 %v3118_v34, %v3115_v10  ;;  %v13355_v14 = vsel %vm12149_vm13, %v3134_v53, %v3138_v20 }
 0x1b5   :  { %v13359_v48 = vsel %vm12149_vm13, %v2221_v35, %v2225_v56  ;;  %v13363_v25 = vsel %vm12162_vm14, %v10638_v4, %v3438_v6 }
 0x1b6   :  { %v3120_v17 = vrot.slane %v3119_v15, 4  ;;  %v10462_v13 = vcombine.low %v13351_v9, %v13359_v48  ;;  %v10463_v50 = vcombine.high %v13351_v9, %v13359_v48  ;;  %v10654_v53 = vcombine.low %v13363_v25, %v13347_v60 }
 0x1b7   :  { %v10655_v7 = vcombine.high %v13363_v25, %v13347_v60 }
 0x1b8   :  { %v13371_v22 = vsel %vm12149_vm13, %v3120_v17, %v3124_v33 }
 0x1b9   :  { %v10590_v20 = vcombine.low %v13371_v22, %v13355_v14  ;;  %v10591_v29 = vcombine.high %v13371_v22, %v13355_v14 }
 0x1ba   :  { %11834 = dma.done.wait [#allocation6], 36864 }
 0x1bb   :  { %11835 = vsyncadd [#allocation6], 4294930432  ;;  %v16952_v11 = vcombine.low %v12158_v39, %v12194_v0  ;;  %v3673_v51 = vld [vmem:[#allocation4 + $0x8] sm:$0xff]  ;;  %v3672_v37 = vld [vmem:[#allocation4] sm:$0xff] }
 0x1bc   :  { %v3675_v10 = vld [vmem:[#allocation4 + $0x18] sm:$0xff]  ;;  %3960 = vmatprep.subr.bf16.mxu0 %v3673_v51  ;;  %v3674_v34 = vld [vmem:[#allocation4 + $0x10] sm:$0xff]  ;;  %v3677_v2 = vld [vmem:[#allocation4 + $0x28] sm:$0xff] }
 0x1bd   :  { %3992 = vmatprep.mubr.bf16.mxu0 %v16952_v11  ;;  %3961 = vmatpush1.bf16.msra.mxu0 %v3672_v37  ;;  %v3676_v3 = vld [vmem:[#allocation4 + $0x20] sm:$0xff]  ;;  %v3679_v54 = vld [vmem:[#allocation4 + $0x38] sm:$0xff]  ;;  %v3678_v15 = vld [vmem:[#allocation4 + $0x30] sm:$0xff] }
 0x1be   :  { %3962 = vmatprep.subr.bf16.mxu0 %v3675_v10  ;;  %v3681_v4 = vld [vmem:[#allocation4 + $0x48] sm:$0xff]  ;;  %v3680_v39 = vld [vmem:[#allocation4 + $0x40] sm:$0xff]  ;;  %v3683_v0 = vld [vmem:[#allocation4 + $0x58] sm:$0xff] }
 0x1bf   :  { %v3682_v35 = vld [vmem:[#allocation4 + $0x50] sm:$0xff]  ;;  %v3685_v56 = vld [vmem:[#allocation4 + $0x68] sm:$0xff]  ;;  %v3684_v6 = vld [vmem:[#allocation4 + $0x60] sm:$0xff] }
 0x1c0   :  { %v3687_v17 = vld [vmem:[#allocation4 + $0x78] sm:$0xff]  ;;  %v3686_v33 = vld [vmem:[#allocation4 + $0x70] sm:$0xff]  ;;  %v3689_v11 = vld [vmem:[#allocation4 + $0x88] sm:$0xff] }
 0x1c1   :  { %3963 = vmatpush1.bf16.msra.mxu0 %v3674_v34  ;;  %v3688_v51 = vld [vmem:[#allocation4 + $0x80] sm:$0xff]  ;;  %v3691_v37 = vld [vmem:[#allocation4 + $0x98] sm:$0xff]  ;;  %v3690_v10 = vld [vmem:[#allocation4 + $0x90] sm:$0xff] }
 0x1c2   :  { %3964 = vmatprep.subr.bf16.mxu0 %v3677_v2  ;;  %v3693_v34 = vld [vmem:[#allocation4 + $0xa8] sm:$0xff]  ;;  %v3692_v2 = vld [vmem:[#allocation4 + $0xa0] sm:$0xff]  ;;  %v17146_v42 = vld [vmem:[#allocation69_spill] sm:$0xff] }
 0x1c3   :  { %v17116_v9 = vld [vmem:[#allocation63_spill] sm:$0xff]  ;;  %v17221_v22 = vld [vmem:[#allocation94_spill] sm:$0xff] }
 0x1c5   :  { %3965 = vmatpush1.bf16.msra.mxu0 %v3676_v3  ;;  %v3695_v3 = vld [vmem:[#allocation4 + $0xb8] sm:$0xff] }
 0x1c6   :  { %3966 = vmatprep.subr.bf16.mxu0 %v3679_v54  ;;  %v3694_v54 = vld [vmem:[#allocation4 + $0xb0] sm:$0xff] }
 0x1c9   :  { %3967 = vmatpush1.bf16.msra.mxu0 %v3678_v15  ;;  %v3697_v15 = vld [vmem:[#allocation4 + $0xc8] sm:$0xff] }
 0x1ca   :  { %3968 = vmatprep.subr.bf16.mxu0 %v3681_v4  ;;  %v3696_v4 = vld [vmem:[#allocation4 + $0xc0] sm:$0xff] }
 0x1cd   :  { %3969 = vmatpush1.bf16.msra.mxu0 %v3680_v39  ;;  %v3699_v39 = vld [vmem:[#allocation4 + $0xd8] sm:$0xff] }
 0x1ce   :  { %3970 = vmatprep.subr.bf16.mxu0 %v3683_v0  ;;  %v3698_v0 = vld [vmem:[#allocation4 + $0xd0] sm:$0xff] }
 0x1d1   :  { %3971 = vmatpush1.bf16.msra.mxu0 %v3682_v35  ;;  %v3701_v35 = vld [vmem:[#allocation4 + $0xe8] sm:$0xff] }
 0x1d2   :  { %3972 = vmatprep.subr.bf16.mxu0 %v3685_v56  ;;  %v3700_v56 = vld [vmem:[#allocation4 + $0xe0] sm:$0xff] }
 0x1d5   :  { %3973 = vmatpush1.bf16.msra.mxu0 %v3684_v6  ;;  %v3703_v6 = vld [vmem:[#allocation4 + $0xf8] sm:$0xff] }
 0x1d6   :  { %3974 = vmatprep.subr.bf16.mxu0 %v3687_v17  ;;  %v3702_v17 = vld [vmem:[#allocation4 + $0xf0] sm:$0xff] }
 0x1d9   :  { %3975 = vmatpush1.bf16.msra.mxu0 %v3686_v33  ;;  %v3705_v33 = vld [vmem:[#allocation4 + $0x108] sm:$0xff] }
 0x1da   :  { %3976 = vmatprep.subr.bf16.mxu0 %v3689_v11  ;;  %v3704_v11 = vld [vmem:[#allocation4 + $0x100] sm:$0xff] }
 0x1dd   :  { %3977 = vmatpush1.bf16.msra.mxu0 %v3688_v51  ;;  %v3707_v51 = vld [vmem:[#allocation4 + $0x118] sm:$0xff] }
 0x1de   :  { %3978 = vmatprep.subr.bf16.mxu0 %v3691_v37  ;;  %v16953_v37 = vcombine.low %v12137_v18, %v12170_v47  ;;  %v16956_v18 = vcombine.low %v12444_v5, %v12456_v31  ;;  %v3710_v47 = vld [vmem:[#allocation4 + $0x130] sm:$0xff]  ;;  %v3717_v5 = vld [vmem:[#allocation4 + $0x168] sm:$0xff]  ;;  %v3716_v31 = vld [vmem:[#allocation4 + $0x160] sm:$0xff] }
 0x1e1   :  { %3979 = vmatpush1.bf16.msra.mxu0 %v3690_v10  ;;  %v16954_v10 = vcombine.low %v12257_v8, %v12268_v1  ;;  %v3713_v8 = vld [vmem:[#allocation4 + $0x148] sm:$0xff]  ;;  %v3712_v1 = vld [vmem:[#allocation4 + $0x140] sm:$0xff] }
 0x1e2   :  { %3980 = vmatprep.subr.bf16.mxu0 %v3693_v34  ;;  %v3706_v34 = vld [vmem:[#allocation4 + $0x110] sm:$0xff] }
 0x1e5   :  { %3981 = vmatpush1.bf16.msra.mxu0 %v3692_v2  ;;  %v3709_v2 = vld [vmem:[#allocation4 + $0x128] sm:$0xff] }
 0x1e6   :  { %3982 = vmatprep.subr.bf16.mxu0 %v3695_v3  ;;  %v3708_v3 = vld [vmem:[#allocation4 + $0x120] sm:$0xff] }
 0x1e9   :  { %3983 = vmatpush1.bf16.msra.mxu0 %v3694_v54  ;;  %v3711_v54 = vld [vmem:[#allocation4 + $0x138] sm:$0xff] }
 0x1ea   :  { %3984 = vmatprep.subr.bf16.mxu0 %v3697_v15  ;;  %v16955_v15 = vcombine.low %v12253_v62, %v12260_v59  ;;  %v16960_v62 = vcombine.low %v12557_v23, %v12572_v16  ;;  %v3714_v59 = vld [vmem:[#allocation4 + $0x150] sm:$0xff]  ;;  %v3721_v23 = vld [vmem:[#allocation4 + $0x188] sm:$0xff]  ;;  %v3720_v16 = vld [vmem:[#allocation4 + $0x180] sm:$0xff] }
 0x1ed   :  { %3985 = vmatpush1.bf16.msra.mxu0 %v3696_v4  ;;  %v3715_v4 = vld [vmem:[#allocation4 + $0x158] sm:$0xff] }
 0x1ee   :  { %3986 = vmatprep.subr.bf16.mxu0 %v3699_v39  ;;  %v16957_v39 = vld [vmem:[#allocation60_spill] sm:$0xff] }
 0x1f1   :  { %3987 = vmatpush1.bf16.msra.mxu0 %v3698_v0  ;;  %v16958_v0 = vld [vmem:[#allocation62_spill] sm:$0xff] }
 0x1f2   :  { %3988 = vmatprep.subr.bf16.mxu0 %v3701_v35  ;;  %v16959_v35 = vcombine.low %v16957_v39, %v16958_v0  ;;  %v3735_v39 = vld [vmem:[#allocation4 + $0x1f8] sm:$0xff]  ;;  %v16974_v0 = vcombine.low %v13195_v38, %v13210_v58  ;;  %v16980_v38 = vld [vmem:[#allocation51_spill] sm:$0xff] }
 0x1f5   :  { %3989 = vmatpush1.bf16.msra.mxu0 %v3700_v56  ;;  %v3719_v56 = vld [vmem:[#allocation4 + $0x178] sm:$0xff] }
 0x1f6   :  { %3990 = vmatprep.subr.bf16.mxu0 %v3703_v6  ;;  %v16961_v6 = vld [vmem:[#allocation82_spill] sm:$0xff] }
 0x1f9   :  { %3991 = vmatpush1.bf16.msra.mxu0 %v3702_v17  ;;  %v16962_v17 = vld [vmem:[#allocation85_spill] sm:$0xff] }
 0x1fa   :  { %4073 = vmatprep.subr.bf16.mxu0 %v3705_v33  ;;  %v16963_v33 = vcombine.low %v16961_v6, %v16962_v17  ;;  %v16979_v6 = vld [vmem:[#allocation46_spill] sm:$0xff]  ;;  %v3738_v17 = vld [vmem:[#allocation4 + $0x210] sm:$0xff] }
 0x1fb   :  { %v16981_v58 = vcombine.high %v16979_v6, %v16980_v38 }
 0x1fc   :  { %3993 = vmatmul.mubr.bf16.vlgmr.msra.gmra.mrb[0].mxu0 %v16953_v37  ;;  %v3723_v37 = vld [vmem:[#allocation4 + $0x198] sm:$0xff] }
 0x1fd   :  { %4074 = vmatpush1.bf16.msra.mxu0 %v3704_v11  ;;  %4002 = vmatprep.mubr.bf16.mxu0 %v16954_v10  ;;  %v16964_v11 = vcombine.low %v12761_v24, %v12769_v27  ;;  %v16965_v10 = vcombine.low %v12759_v57, %v12763_v44  ;;  %v3725_v24 = vld [vmem:[#allocation4 + $0x1a8] sm:$0xff]  ;;  %v3724_v27 = vld [vmem:[#allocation4 + $0x1a0] sm:$0xff]  ;;  %v16969_v57 = vcombine.low %v13046_v46, %v13060_v30  ;;  %v3726_v44 = vld [vmem:[#allocation4 + $0x1b0] sm:$0xff] }
 0x1fe   :  { %4075 = vmatprep.subr.bf16.mxu0 %v3707_v51  ;;  %v3718_v51 = vld [vmem:[#allocation4 + $0x170] sm:$0xff]  ;;  %v3733_v46 = vld [vmem:[#allocation4 + $0x1e8] sm:$0xff]  ;;  %v3732_v30 = vld [vmem:[#allocation4 + $0x1e0] sm:$0xff] }
 0x201   :  { %4076 = vmatpush1.bf16.msra.mxu0 %v3706_v34  ;;  %v16966_v34 = vcombine.low %v12928_v28, %v12949_v41  ;;  %v3729_v28 = vld [vmem:[#allocation4 + $0x1c8] sm:$0xff]  ;;  %v3728_v41 = vld [vmem:[#allocation4 + $0x1c0] sm:$0xff] }
 0x202   :  { %4077 = vmatprep.subr.bf16.mxu0 %v3709_v2  ;;  %v3722_v2 = vld [vmem:[#allocation4 + $0x190] sm:$0xff] }
 0x204   :  { %4003 = vmatmul.mubr.bf16.gmra.mrb[4].mxu0 %v16955_v15 }
 0x205   :  { %4078 = vmatpush1.bf16.msra.mxu0 %v3708_v3  ;;  %4012 = vmatprep.mubr.bf16.mxu0 %v16956_v18  ;;  %v3727_v3 = vld [vmem:[#allocation4 + $0x1b8] sm:$0xff] }
 0x206   :  { %4079 = vmatprep.subr.bf16.mxu0 %v3711_v54  ;;  %v16967_v54 = vld [vmem:[#allocation125_spill] sm:$0xff] }
 0x207   :  { %v16968_v15 = vcombine.low %v12869_v43, %v16967_v54  ;;  %v3731_v18 = vld [vmem:[#allocation4 + $0x1d8] sm:$0xff]  ;;  %v16973_v43 = vcombine.low %v13202_v21, %v13218_v19  ;;  %v3737_v21 = vld [vmem:[#allocation4 + $0x208] sm:$0xff]  ;;  %v3736_v19 = vld [vmem:[#allocation4 + $0x200] sm:$0xff] }
 0x208   :  { %v16987_v54 = vld [vmem:[#allocation91_spill] sm:$0xff] }
 0x209   :  { %4080 = vmatpush1.bf16.msra.mxu0 %v3710_v47  ;;  %v16970_v47 = vld [vmem:[#allocation145_spill] sm:$0xff] }
 0x20a   :  { %4081 = vmatprep.subr.bf16.mxu0 %v3713_v8  ;;  %v16971_v8 = vld [vmem:[#allocation147_spill] sm:$0xff] }
 0x20c   :  { %4013 = vmatmul.mubr.bf16.gmra.mrb[8].mxu0 %v16959_v35  ;;  %v16975_v35 = vld [vmem:[#allocation30_spill] sm:$0xff] }
 0x20d   :  { %4082 = vmatpush1.bf16.msra.mxu0 %v3712_v1  ;;  %4022 = vmatprep.mubr.bf16.mxu0 %v16960_v62  ;;  %v16972_v1 = vcombine.low %v16970_v47, %v16971_v8  ;;  %v16976_v62 = vld [vmem:[#allocation37_spill] sm:$0xff]  ;;  %v16991_v8 = vld [vmem:[#allocation100_spill] sm:$0xff] }
 0x20e   :  { %4083 = vmatprep.subr.bf16.mxu0 %v3715_v4  ;;  %v3730_v4 = vld [vmem:[#allocation4 + $0x1d0] sm:$0xff] }
 0x211   :  { %4084 = vmatpush1.bf16.msra.mxu0 %v3714_v59  ;;  %v16977_v59 = vcombine.high %v16975_v35, %v16976_v62 }
 0x212   :  { %4085 = vmatprep.subr.bf16.mxu0 %v3717_v5  ;;  %v3734_v5 = vld [vmem:[#allocation4 + $0x1f0] sm:$0xff] }
 0x214   :  { %4023 = vmatmul.mubr.bf16.gmra.mrb[12].mxu0 %v16963_v33  ;;  %v3741_v33 = vld [vmem:[#allocation4 + $0x228] sm:$0xff] }
 0x215   :  { %4086 = vmatpush1.bf16.msra.mxu0 %v3716_v31  ;;  %4032 = vmatprep.mubr.bf16.mxu0 %v16964_v11  ;;  %v3739_v31 = vld [vmem:[#allocation4 + $0x218] sm:$0xff]  ;;  %v3740_v11 = vld [vmem:[#allocation4 + $0x220] sm:$0xff] }
 0x216   :  { %4087 = vmatprep.subr.bf16.mxu0 %v3719_v56  ;;  %v16978_v56 = vcombine.low %v16975_v35, %v16976_v62  ;;  %v16995_v35 = vld [vmem:[#allocation129_spill] sm:$0xff]  ;;  %v16996_v62 = vld [vmem:[#allocation138_spill] sm:$0xff] }
 0x219   :  { %4088 = vmatpush1.bf16.msra.mxu0 %v3718_v51  ;;  %v3743_v51 = vld [vmem:[#allocation4 + $0x238] sm:$0xff] }
 0x21a   :  { %4089 = vmatprep.subr.bf16.mxu0 %v3721_v23  ;;  %v16982_v23 = vcombine.low %v16979_v6, %v16980_v38  ;;  %v16999_v6 = vld [vmem:[#allocation153_spill] sm:$0xff]  ;;  %v17000_v38 = vld [vmem:[#allocation158_spill] sm:$0xff] }
 0x21c   :  { %4033 = vmatmul.mubr.bf16.gmra.mrb[16].mxu0 %v16965_v10 }
 0x21d   :  { %4090 = vmatpush1.bf16.msra.mxu0 %v3720_v16  ;;  %4042 = vmatprep.mubr.bf16.mxu0 %v16966_v34  ;;  %v16983_v16 = vld [vmem:[#allocation70_spill] sm:$0xff]  ;;  %v3742_v34 = vld [vmem:[#allocation4 + $0x230] sm:$0xff] }
 0x21e   :  { %4091 = vmatprep.subr.bf16.mxu0 %v3723_v37  ;;  %v16984_v37 = vld [vmem:[#allocation76_spill] sm:$0xff] }
 0x21f   :  { %v16985_v10 = vcombine.high %v16983_v16, %v16984_v37 }
 0x221   :  { %4092 = vmatpush1.bf16.msra.mxu0 %v3722_v2  ;;  %v3745_v2 = vld [vmem:[#allocation4 + $0x248] sm:$0xff] }
 0x222   :  { %4093 = vmatprep.subr.bf16.mxu0 %v3725_v24  ;;  %v3744_v24 = vld [vmem:[#allocation4 + $0x240] sm:$0xff] }
 0x224   :  { %4043 = vmatmul.mubr.bf16.gmra.mrb[20].mxu0 %v16968_v15  ;;  %v16988_v15 = vld [vmem:[#allocation95_spill] sm:$0xff] }
 0x225   :  { %4094 = vmatpush1.bf16.msra.mxu0 %v3724_v27  ;;  %4052 = vmatprep.mubr.bf16.mxu0 %v16969_v57  ;;  %v3747_v27 = vld [vmem:[#allocation4 + $0x258] sm:$0xff]  ;;  %v16989_v57 = vcombine.high %v16987_v54, %v16988_v15  ;;  %v16990_v47 = vcombine.low %v16987_v54, %v16988_v15  ;;  %v3766_v15 = vld [vmem:[#allocation4 + $0x2f0] sm:$0xff] }
 0x226   :  { %4095 = vmatprep.subr.bf16.mxu0 %v3727_v3  ;;  %v16986_v3 = vcombine.low %v16983_v16, %v16984_v37  ;;  %v17003_v16 = vcombine.high %v13261_v63, %v13277_v55  ;;  %v3762_v37 = vld [vmem:[#allocation4 + $0x2d0] sm:$0xff] }
 0x229   :  { %4096 = vmatpush1.bf16.msra.mxu0 %v3726_v44  ;;  %v3746_v44 = vld [vmem:[#allocation4 + $0x250] sm:$0xff] }
 0x22a   :  { %4097 = vmatprep.subr.bf16.mxu0 %v3729_v28  ;;  %v3749_v28 = vld [vmem:[#allocation4 + $0x268] sm:$0xff] }
 0x22c   :  { %4053 = vmatmul.mubr.bf16.gmra.mrb[24].mxu0 %v16972_v1  ;;  %v16992_v1 = vld [vmem:[#allocation120_spill] sm:$0xff] }
 0x22d   :  { %4098 = vmatpush1.bf16.msra.mxu0 %v3728_v41  ;;  %4062 = vmatprep.mubr.bf16.mxu0 %v16973_v43  ;;  %v3748_v41 = vld [vmem:[#allocation4 + $0x260] sm:$0xff]  ;;  %v16993_v43 = vcombine.high %v16991_v8, %v16992_v1 }
 0x22e   :  { %4099 = vmatprep.subr.bf16.mxu0 %v3731_v18  ;;  %v3751_v18 = vld [vmem:[#allocation4 + $0x278] sm:$0xff] }
 0x231   :  { %4100 = vmatpush1.bf16.msra.mxu0 %v3730_v4  ;;  %v3750_v4 = vld [vmem:[#allocation4 + $0x270] sm:$0xff] }
 0x232   :  { %4101 = vmatprep.subr.bf16.mxu0 %v3733_v46  ;;  %v3753_v46 = vld [vmem:[#allocation4 + $0x288] sm:$0xff] }
 0x234   :  { %4063 = vmatmul.mubr.bf16.gmra.mrb[28].mxu0 %v16974_v0  ;;  %v16994_v0 = vcombine.low %v16991_v8, %v16992_v1  ;;  %v3773_v8 = vld [vmem:[#allocation4 + $0x328] sm:$0xff]  ;;  %v3772_v1 = vld [vmem:[#allocation4 + $0x320] sm:$0xff] }
 0x235   :  { %4102 = vmatpush1.bf16.msra.mxu0 %v3732_v30  ;;  %4105 = vmatprep.mubr.bf16.mxu0 %v16977_v59  ;;  %v3752_v30 = vld [vmem:[#allocation4 + $0x280] sm:$0xff]  ;;  %v16997_v59 = vcombine.high %v16995_v35, %v16996_v62 }
 0x236   :  { %4103 = vmatprep.subr.bf16.mxu0 %v3735_v39  ;;  %v3755_v39 = vld [vmem:[#allocation4 + $0x298] sm:$0xff] }
 0x239   :  { %4104 = vmatpush1.bf16.msra.mxu0 %v3734_v5  ;;  %v3754_v5 = vld [vmem:[#allocation4 + $0x290] sm:$0xff] }
 0x23a   :  { %4186 = vmatprep.subr.bf16.mxu0 %v3737_v21  ;;  %v3757_v21 = vld [vmem:[#allocation4 + $0x2a8] sm:$0xff] }
 0x23c   :  { %4106 = vmatmul.mubr.bf16.vlgmr.msra.gmra.mrb[0].mxu0 %v16978_v56  ;;  %v16998_v56 = vcombine.low %v16995_v35, %v16996_v62  ;;  %v3777_v35 = vld [vmem:[#allocation4 + $0x348] sm:$0xff]  ;;  %v3776_v62 = vld [vmem:[#allocation4 + $0x340] sm:$0xff] }
 0x23d   :  { %4187 = vmatpush1.bf16.msra.mxu0 %v3736_v19  ;;  %4115 = vmatprep.mubr.bf16.mxu0 %v16981_v58  ;;  %v3756_v19 = vld [vmem:[#allocation4 + $0x2a0] sm:$0xff]  ;;  %v17001_v58 = vcombine.high %v16999_v6, %v17000_v38 }
 0x23e   :  { %4188 = vmatprep.subr.bf16.mxu0 %v3739_v31  ;;  %v3759_v31 = vld [vmem:[#allocation4 + $0x2b8] sm:$0xff] }
 0x241   :  { %4189 = vmatpush1.bf16.msra.mxu0 %v3738_v17  ;;  %v3758_v17 = vld [vmem:[#allocation4 + $0x2b0] sm:$0xff] }
 0x242   :  { %4190 = vmatprep.subr.bf16.mxu0 %v3741_v33  ;;  %v3761_v33 = vld [vmem:[#allocation4 + $0x2c8] sm:$0xff] }
 0x244   :  { %4116 = vmatmul.mubr.bf16.gmra.mrb[4].mxu0 %v16982_v23  ;;  %v17002_v23 = vcombine.low %v16999_v6, %v17000_v38  ;;  %v3781_v6 = vld [vmem:[#allocation4 + $0x368] sm:$0xff]  ;;  %v3780_v38 = vld [vmem:[#allocation4 + $0x360] sm:$0xff] }
 0x245   :  { %4191 = vmatpush1.bf16.msra.mxu0 %v3740_v11  ;;  %4125 = vmatprep.mubr.bf16.mxu0 %v16985_v10  ;;  %v3760_v11 = vld [vmem:[#allocation4 + $0x2c0] sm:$0xff]  ;;  %v3765_v10 = vld [vmem:[#allocation4 + $0x2e8] sm:$0xff] }
 0x246   :  { %4192 = vmatprep.subr.bf16.mxu0 %v3743_v51  ;;  %v3763_v51 = vld [vmem:[#allocation4 + $0x2d8] sm:$0xff] }
 0x249   :  { %4193 = vmatpush1.bf16.msra.mxu0 %v3742_v34  ;;  %v3764_v34 = vld [vmem:[#allocation4 + $0x2e0] sm:$0xff] }
 0x24a   :  { %4194 = vmatprep.subr.bf16.mxu0 %v3745_v2  ;;  %v3767_v2 = vld [vmem:[#allocation4 + $0x2f8] sm:$0xff] }
 0x24c   :  { %4126 = vmatmul.mubr.bf16.gmra.mrb[8].mxu0 %v16986_v3  ;;  %v17006_v3 = vld [vmem:[#allocation34_spill] sm:$0xff] }
 0x24d   :  { %4195 = vmatpush1.bf16.msra.mxu0 %v3744_v24  ;;  %4135 = vmatprep.mubr.bf16.mxu0 %v16989_v57  ;;  %v17004_v24 = vcombine.low %v13261_v63, %v13277_v55  ;;  %v3769_v57 = vld [vmem:[#allocation4 + $0x308] sm:$0xff]  ;;  %v17010_v63 = vld [vmem:[#allocation48_spill] sm:$0xff] }
 0x24e   :  { %4196 = vmatprep.subr.bf16.mxu0 %v3747_v27  ;;  %v17005_v27 = vld [vmem:[#allocation31_spill] sm:$0xff] }
 0x24f   :  { %v17007_v54 = vcombine.high %v17005_v27, %v17006_v3 }
 0x251   :  { %4197 = vmatpush1.bf16.msra.mxu0 %v3746_v44  ;;  %v3768_v44 = vld [vmem:[#allocation4 + $0x300] sm:$0xff] }
 0x252   :  { %4198 = vmatprep.subr.bf16.mxu0 %v3749_v28  ;;  %v3771_v28 = vld [vmem:[#allocation4 + $0x318] sm:$0xff] }
 0x254   :  { %4136 = vmatmul.mubr.bf16.gmra.mrb[12].mxu0 %v16990_v47  ;;  %v3770_v47 = vld [vmem:[#allocation4 + $0x310] sm:$0xff] }
 0x255   :  { %4199 = vmatpush1.bf16.msra.mxu0 %v3748_v41  ;;  %4145 = vmatprep.mubr.bf16.mxu0 %v16993_v43  ;;  %v17008_v41 = vcombine.low %v17005_v27, %v17006_v3  ;;  %v3775_v43 = vld [vmem:[#allocation4 + $0x338] sm:$0xff]  ;;  %v3786_v3 = vld [vmem:[#allocation4 + $0x390] sm:$0xff] }
 0x256   :  { %4200 = vmatprep.subr.bf16.mxu0 %v3751_v18  ;;  %v17009_v18 = vld [vmem:[#allocation44_spill] sm:$0xff] }
 0x257   :  { %v17011_v55 = vcombine.high %v17009_v18, %v17010_v63 }
 0x259   :  { %4201 = vmatpush1.bf16.msra.mxu0 %v3750_v4  ;;  %v17012_v4 = vcombine.low %v17009_v18, %v17010_v63  ;;  %v3790_v63 = vld [vmem:[#allocation4 + $0x3b0] sm:$0xff] }
 0x25a   :  { %4202 = vmatprep.subr.bf16.mxu0 %v3753_v46  ;;  %v17013_v46 = vld [vmem:[#allocation66_spill] sm:$0xff] }
 0x25c   :  { %4146 = vmatmul.mubr.bf16.gmra.mrb[16].mxu0 %v16994_v0  ;;  %v3774_v0 = vld [vmem:[#allocation4 + $0x330] sm:$0xff] }
 0x25d   :  { %4203 = vmatpush1.bf16.msra.mxu0 %v3752_v30  ;;  %4155 = vmatprep.mubr.bf16.mxu0 %v16997_v59  ;;  %v17014_v30 = vld [vmem:[#allocation72_spill] sm:$0xff]  ;;  %v3779_v59 = vld [vmem:[#allocation4 + $0x358] sm:$0xff] }
 0x25e   :  { %4204 = vmatprep.subr.bf16.mxu0 %v3755_v39  ;;  %v17015_v39 = vcombine.high %v17013_v46, %v17014_v30 }
 0x261   :  { %4205 = vmatpush1.bf16.msra.mxu0 %v3754_v5  ;;  %v17016_v5 = vcombine.low %v17013_v46, %v17014_v30  ;;  %v3794_v30 = vld [vmem:[#allocation4 + $0x3d0] sm:$0xff] }
 0x262   :  { %4206 = vmatprep.subr.bf16.mxu0 %v3757_v21  ;;  %v17017_v21 = vld [vmem:[#allocation84_spill] sm:$0xff] }
 0x264   :  { %4156 = vmatmul.mubr.bf16.gmra.mrb[20].mxu0 %v16998_v56  ;;  %v3778_v56 = vld [vmem:[#allocation4 + $0x350] sm:$0xff] }
 0x265   :  { %4207 = vmatpush1.bf16.msra.mxu0 %v3756_v19  ;;  %4165 = vmatprep.mubr.bf16.mxu0 %v17001_v58  ;;  %v17018_v19 = vld [vmem:[#allocation92_spill] sm:$0xff]  ;;  %v3783_v58 = vld [vmem:[#allocation4 + $0x378] sm:$0xff] }
 0x266   :  { %4208 = vmatprep.subr.bf16.mxu0 %v3759_v31  ;;  %v17019_v31 = vcombine.high %v17017_v21, %v17018_v19 }
 0x269   :  { %4209 = vmatpush1.bf16.msra.mxu0 %v3758_v17  ;;  %v17020_v17 = vcombine.low %v17017_v21, %v17018_v19  ;;  %v3798_v19 = vld [vmem:[#allocation4 + $0x3f0] sm:$0xff] }
 0x26a   :  { %4210 = vmatprep.subr.bf16.mxu0 %v3761_v33  ;;  %v17021_v33 = vld [vmem:[#allocation101_spill] sm:$0xff] }
 0x26c   :  { %4166 = vmatmul.mubr.bf16.gmra.mrb[24].mxu0 %v17002_v23  ;;  %v3782_v23 = vld [vmem:[#allocation4 + $0x370] sm:$0xff] }
 0x26d   :  { %4211 = vmatpush1.bf16.msra.mxu0 %v3760_v11  ;;  %4175 = vmatprep.mubr.bf16.mxu0 %v17003_v16  ;;  %v17022_v11 = vld [vmem:[#allocation117_spill] sm:$0xff]  ;;  %v3785_v16 = vld [vmem:[#allocation4 + $0x388] sm:$0xff] }
 0x26e   :  { %4212 = vmatprep.subr.bf16.mxu0 %v3763_v51  ;;  %v17023_v51 = vcombine.high %v17021_v33, %v17022_v11 }
 0x271   :  { %4213 = vmatpush1.bf16.msra.mxu0 %v3762_v37  ;;  %v3784_v37 = vld [vmem:[#allocation4 + $0x380] sm:$0xff] }
 0x272   :  { %4214 = vmatprep.subr.bf16.mxu0 %v3765_v10  ;;  %v3787_v10 = vld [vmem:[#allocation4 + $0x398] sm:$0xff] }
 0x274   :  { %4176 = vmatmul.mubr.bf16.gmra.mrb[28].mxu0 %v17004_v24  ;;  %v17026_v24 = vld [vmem:[#allocation135_spill] sm:$0xff] }
 0x275   :  { %4215 = vmatpush1.bf16.msra.mxu0 %v3764_v34  ;;  %4218 = vmatprep.mubr.bf16.mxu0 %v17007_v54  ;;  %v17024_v34 = vcombine.low %v17021_v33, %v17022_v11  ;;  %v3789_v54 = vld [vmem:[#allocation4 + $0x3a8] sm:$0xff]  ;;  %v17043_v33 = vld [vmem:[#allocation56_spill] sm:$0xff] }
 0x276   :  { %4216 = vmatprep.subr.bf16.mxu0 %v3767_v2  ;;  %v17025_v2 = vld [vmem:[#allocation130_spill] sm:$0xff]  ;;  %v17044_v11 = vld [vmem:[#allocation59_spill] sm:$0xff] }
 0x277   :  { %v17027_v27 = vcombine.high %v17025_v2, %v17026_v24 }
 0x279   :  { %4217 = vmatpush1.bf16.msra.mxu0 %v3766_v15  ;;  %v3788_v15 = vld [vmem:[#allocation4 + $0x3a0] sm:$0xff] }
 0x27a   :  { %4299 = vmatprep.subr.bf16.mxu0 %v3769_v57  ;;  %v3791_v57 = vld [vmem:[#allocation4 + $0x3b8] sm:$0xff] }
 0x27c   :  { %4219 = vmatmul.mubr.bf16.vlgmr.msra.gmra.mrb[0].mxu0 %v17008_v41  ;;  %v17030_v41 = vld [vmem:[#allocation155_spill] sm:$0xff] }
 0x27d   :  { %4300 = vmatpush1.bf16.msra.mxu0 %v3768_v44  ;;  %4228 = vmatprep.mubr.bf16.mxu0 %v17011_v55  ;;  %v17028_v44 = vcombine.low %v17025_v2, %v17026_v24  ;;  %v3793_v55 = vld [vmem:[#allocation4 + $0x3c8] sm:$0xff] }
 0x27e   :  { %4301 = vmatprep.subr.bf16.mxu0 %v3771_v28  ;;  %v17029_v28 = vld [vmem:[#allocation152_spill] sm:$0xff]  ;;  %v17047_v2 = vld [vmem:[#allocation55_spill] sm:$0xff] }
 0x27f   :  { %v17031_v18 = vcombine.high %v17029_v28, %v17030_v41 }
 0x281   :  { %4302 = vmatpush1.bf16.msra.mxu0 %v3770_v47  ;;  %v3792_v47 = vld [vmem:[#allocation4 + $0x3c0] sm:$0xff] }
 0x282   :  { %4303 = vmatprep.subr.bf16.mxu0 %v3773_v8  ;;  %v3795_v8 = vld [vmem:[#allocation4 + $0x3d8] sm:$0xff] }
 0x284   :  { %4229 = vmatmul.mubr.bf16.gmra.mrb[4].mxu0 %v17012_v4  ;;  %v17034_v4 = vld [vmem:[#allocation175_spill] sm:$0xff] }
 0x285   :  { %4304 = vmatpush1.bf16.msra.mxu0 %v3772_v1  ;;  %4238 = vmatprep.mubr.bf16.mxu0 %v17015_v39  ;;  %v17032_v1 = vcombine.low %v17029_v28, %v17030_v41  ;;  %v3797_v39 = vld [vmem:[#allocation4 + $0x3e8] sm:$0xff]  ;;  %v3811_v28 = vld [vmem:[#allocation4 + $0x458] sm:$0xff]  ;;  %v17052_v41 = vld [vmem:[#allocation68_spill] sm:$0xff] }
 0x286   :  { %4305 = vmatprep.subr.bf16.mxu0 %v3775_v43  ;;  %v17033_v43 = vld [vmem:[#allocation171_spill] sm:$0xff] }
 0x287   :  { %v17035_v46 = vcombine.high %v17033_v43, %v17034_v4 }
 0x289   :  { %4306 = vmatpush1.bf16.msra.mxu0 %v3774_v0  ;;  %v3796_v0 = vld [vmem:[#allocation4 + $0x3e0] sm:$0xff] }
 0x28a   :  { %4307 = vmatprep.subr.bf16.mxu0 %v3777_v35  ;;  %v3799_v35 = vld [vmem:[#allocation4 + $0x3f8] sm:$0xff] }
 0x28c   :  { %4239 = vmatmul.mubr.bf16.gmra.mrb[8].mxu0 %v17016_v5  ;;  %v17038_v5 = vld [vmem:[#allocation36_spill] sm:$0xff] }
 0x28d   :  { %4308 = vmatpush1.bf16.msra.mxu0 %v3776_v62  ;;  %4248 = vmatprep.mubr.bf16.mxu0 %v17019_v31  ;;  %v17036_v62 = vcombine.low %v17033_v43, %v17034_v4  ;;  %v3801_v31 = vld [vmem:[#allocation4 + $0x408] sm:$0xff]  ;;  %v3812_v4 = vld [vmem:[#allocation4 + $0x460] sm:$0xff] }
 0x28e   :  { %4309 = vmatprep.subr.bf16.mxu0 %v3779_v59  ;;  %v17037_v59 = vld [vmem:[#allocation35_spill] sm:$0xff] }
 0x28f   :  { %v17039_v21 = vcombine.low %v17037_v59, %v17038_v5  ;;  %v3813_v43 = vld [vmem:[#allocation4 + $0x468] sm:$0xff]  ;;  %v3814_v5 = vld [vmem:[#allocation4 + $0x470] sm:$0xff] }
 0x291   :  { %4310 = vmatpush1.bf16.msra.mxu0 %v3778_v56  ;;  %v3800_v56 = vld [vmem:[#allocation4 + $0x400] sm:$0xff] }
 0x292   :  { %4311 = vmatprep.subr.bf16.mxu0 %v3781_v6  ;;  %v3803_v6 = vld [vmem:[#allocation4 + $0x418] sm:$0xff] }
 0x294   :  { %4249 = vmatmul.mubr.bf16.gmra.mrb[12].mxu0 %v17020_v17 }
 0x295   :  { %4312 = vmatpush1.bf16.msra.mxu0 %v3780_v38  ;;  %4258 = vmatprep.mubr.bf16.mxu0 %v17023_v51  ;;  %v17040_v38 = vld [vmem:[#allocation32_spill] sm:$0xff]  ;;  %v17045_v51 = vcombine.low %v17043_v33, %v17044_v11 }
 0x296   :  { %4313 = vmatprep.subr.bf16.mxu0 %v3783_v58  ;;  %v17041_v58 = vld [vmem:[#allocation33_spill] sm:$0xff]  ;;  %v3818_v11 = vld [vmem:[#allocation4 + $0x490] sm:$0xff] }
 0x297   :  { %v17042_v17 = vcombine.low %v17040_v38, %v17041_v58  ;;  %v17067_v58 = vld [vmem:[#allocation139_spill] sm:$0xff] }
 0x299   :  { %4314 = vmatpush1.bf16.msra.mxu0 %v3782_v23  ;;  %v3802_v23 = vld [vmem:[#allocation4 + $0x410] sm:$0xff] }
 0x29a   :  { %4315 = vmatprep.subr.bf16.mxu0 %v3785_v16  ;;  %v3805_v16 = vld [vmem:[#allocation4 + $0x428] sm:$0xff] }
 0x29c   :  { %4259 = vmatmul.mubr.bf16.gmra.mrb[16].mxu0 %v17024_v34  ;;  %v17046_v34 = vld [vmem:[#allocation54_spill] sm:$0xff] }
 0x29d   :  { %4316 = vmatpush1.bf16.msra.mxu0 %v3784_v37  ;;  %4268 = vmatprep.mubr.bf16.mxu0 %v17027_v27  ;;  %v3804_v37 = vld [vmem:[#allocation4 + $0x420] sm:$0xff]  ;;  %v17048_v24 = vcombine.low %v17046_v34, %v17047_v2  ;;  %v17049_v27 = vld [vmem:[#allocation75_spill] sm:$0xff] }
 0x29e   :  { %4317 = vmatprep.subr.bf16.mxu0 %v3787_v10  ;;  %v3807_v10 = vld [vmem:[#allocation4 + $0x438] sm:$0xff]  ;;  %v17073_v2 = vld [vmem:[#allocation163_spill] sm:$0xff] }
 0x2a1   :  { %4318 = vmatpush1.bf16.msra.mxu0 %v3786_v3  ;;  %v17050_v3 = vld [vmem:[#allocation77_spill] sm:$0xff] }
 0x2a2   :  { %4319 = vmatprep.subr.bf16.mxu0 %v3789_v54  ;;  %v17051_v54 = vcombine.low %v17049_v27, %v17050_v3  ;;  %v3822_v3 = vld [vmem:[#allocation4 + $0x4b0] sm:$0xff] }
 0x2a4   :  { %4269 = vmatmul.mubr.bf16.gmra.mrb[20].mxu0 %v17028_v44  ;;  %v3808_v44 = vld [vmem:[#allocation4 + $0x440] sm:$0xff] }
 0x2a5   :  { %4320 = vmatpush1.bf16.msra.mxu0 %v3788_v15  ;;  %4278 = vmatprep.mubr.bf16.mxu0 %v17031_v18  ;;  %v3806_v15 = vld [vmem:[#allocation4 + $0x430] sm:$0xff]  ;;  %v17053_v18 = vld [vmem:[#allocation74_spill] sm:$0xff] }
 0x2a6   :  { %4321 = vmatprep.subr.bf16.mxu0 %v3791_v57  ;;  %v3809_v57 = vld [vmem:[#allocation4 + $0x448] sm:$0xff] }
 0x2a9   :  { %4322 = vmatpush1.bf16.msra.mxu0 %v3790_v63  ;;  %v17054_v63 = vcombine.low %v17052_v41, %v17053_v18  ;;  %v17079_v18 = vcombine.low %v13323_v45, %v13325_v26  ;;  %v3833_v26 = vld [vmem:[#allocation4 + $0x508] sm:$0xff]  ;;  %v3832_v45 = vld [vmem:[#allocation4 + $0x500] sm:$0xff] }
 0x2aa   :  { %4323 = vmatprep.subr.bf16.mxu0 %v3793_v55  ;;  %v17055_v55 = vld [vmem:[#allocation103_spill] sm:$0xff] }
 0x2ac   :  { %4279 = vmatmul.mubr.bf16.gmra.mrb[24].mxu0 %v17032_v1  ;;  %v3810_v1 = vld [vmem:[#allocation4 + $0x450] sm:$0xff] }
 0x2ad   :  { %4324 = vmatpush1.bf16.msra.mxu0 %v3792_v47  ;;  %4288 = vmatprep.mubr.bf16.mxu0 %v17035_v46  ;;  %v17056_v47 = vld [vmem:[#allocation110_spill] sm:$0xff]  ;;  %v3815_v46 = vld [vmem:[#allocation4 + $0x478] sm:$0xff] }
 0x2ae   :  { %4325 = vmatprep.subr.bf16.mxu0 %v3795_v8  ;;  %v17057_v8 = vcombine.low %v17055_v55, %v17056_v47  ;;  %v3829_v55 = vld [vmem:[#allocation4 + $0x4e8] sm:$0xff]  ;;  %v3828_v47 = vld [vmem:[#allocation4 + $0x4e0] sm:$0xff] }
 0x2b1   :  { %4326 = vmatpush1.bf16.msra.mxu0 %v3794_v30  ;;  %v17058_v30 = vld [vmem:[#allocation99_spill] sm:$0xff] }
 0x2b2   :  { %4327 = vmatprep.subr.bf16.mxu0 %v3797_v39  ;;  %v17059_v39 = vld [vmem:[#allocation104_spill] sm:$0xff] }
 0x2b4   :  { %4289 = vmatmul.mubr.bf16.gmra.mrb[28].mxu0 %v17036_v62  ;;  %v17062_v62 = vld [vmem:[#allocation121_spill] sm:$0xff] }
 0x2b5   :  { %4328 = vmatpush1.bf16.msra.mxu0 %v3796_v0  ;;  %4331 = vmatprep.mubr.bf16.mxu0 %v17039_v21  ;;  %v17060_v0 = vcombine.low %v17058_v30, %v17059_v39  ;;  %v3817_v21 = vld [vmem:[#allocation4 + $0x488] sm:$0xff] }
 0x2b6   :  { %4329 = vmatprep.subr.bf16.mxu0 %v3799_v35  ;;  %v17061_v35 = vld [vmem:[#allocation119_spill] sm:$0xff] }
 0x2b7   :  { %v17063_v59 = vcombine.low %v17061_v35, %v17062_v62  ;;  %v17084_v30 = vld [vmem:[#allocation43_spill] sm:$0xff]  ;;  %v3835_v35 = vld [vmem:[#allocation4 + $0x518] sm:$0xff] }
 0x2b9   :  { %4330 = vmatpush1.bf16.msra.mxu0 %v3798_v19  ;;  %v3816_v19 = vld [vmem:[#allocation4 + $0x480] sm:$0xff] }
 0x2ba   :  { %4412 = vmatprep.subr.bf16.mxu0 %v3801_v31  ;;  %v3819_v31 = vld [vmem:[#allocation4 + $0x498] sm:$0xff] }
 0x2bc   :  { %4332 = vmatmul.mubr.bf16.vlgmr.msra.gmra.mrb[0].mxu0 %v17042_v17  ;;  %v17068_v17 = vld [vmem:[#allocation140_spill] sm:$0xff] }
 0x2bd   :  { %4413 = vmatpush1.bf16.msra.mxu0 %v3800_v56  ;;  %4341 = vmatprep.mubr.bf16.mxu0 %v17045_v51  ;;  %v17064_v56 = vld [vmem:[#allocation116_spill] sm:$0xff]  ;;  %v17069_v33 = vcombine.low %v17067_v58, %v17068_v17  ;;  %v3821_v51 = vld [vmem:[#allocation4 + $0x4a8] sm:$0xff]  ;;  %v17091_v58 = vld [vmem:[#allocation81_spill] sm:$0xff] }
 0x2be   :  { %4414 = vmatprep.subr.bf16.mxu0 %v3803_v6  ;;  %v17065_v6 = vld [vmem:[#allocation118_spill] sm:$0xff]  ;;  %v17092_v17 = vld [vmem:[#allocation88_spill] sm:$0xff] }
 0x2bf   :  { %v17066_v38 = vcombine.low %v17064_v56, %v17065_v6  ;;  %v3836_v56 = vld [vmem:[#allocation4 + $0x520] sm:$0xff]  ;;  %v3839_v6 = vld [vmem:[#allocation4 + $0x538] sm:$0xff] }
 0x2c1   :  { %4415 = vmatpush1.bf16.msra.mxu0 %v3802_v23  ;;  %v3820_v23 = vld [vmem:[#allocation4 + $0x4a0] sm:$0xff] }
 0x2c2   :  { %4416 = vmatprep.subr.bf16.mxu0 %v3805_v16  ;;  %v3823_v16 = vld [vmem:[#allocation4 + $0x4b8] sm:$0xff] }
 0x2c4   :  { %4342 = vmatmul.mubr.bf16.gmra.mrb[4].mxu0 %v17048_v24  ;;  %v17074_v24 = vld [vmem:[#allocation164_spill] sm:$0xff] }
 0x2c5   :  { %4417 = vmatpush1.bf16.msra.mxu0 %v3804_v37  ;;  %4351 = vmatprep.mubr.bf16.mxu0 %v17051_v54  ;;  %v17070_v37 = vld [vmem:[#allocation136_spill] sm:$0xff]  ;;  %v17075_v27 = vcombine.low %v17073_v2, %v17074_v24  ;;  %v3825_v54 = vld [vmem:[#allocation4 + $0x4c8] sm:$0xff] }
 0x2c6   :  { %4418 = vmatprep.subr.bf16.mxu0 %v3807_v10  ;;  %v17071_v10 = vld [vmem:[#allocation137_spill] sm:$0xff]  ;;  %v3842_v24 = vld [vmem:[#allocation4 + $0x550] sm:$0xff] }
 0x2c7   :  { %v17072_v34 = vcombine.low %v17070_v37, %v17071_v10  ;;  %v17094_v37 = vcombine.low %v17091_v58, %v17092_v17  ;;  %v17095_v10 = vld [vmem:[#allocation108_spill] sm:$0xff] }
 0x2c9   :  { %4419 = vmatpush1.bf16.msra.mxu0 %v3806_v15  ;;  %v3824_v15 = vld [vmem:[#allocation4 + $0x4c0] sm:$0xff] }
 0x2ca   :  { %4420 = vmatprep.subr.bf16.mxu0 %v3809_v57  ;;  %v3827_v57 = vld [vmem:[#allocation4 + $0x4d8] sm:$0xff] }
 0x2cc   :  { %4352 = vmatmul.mubr.bf16.gmra.mrb[8].mxu0 %v17054_v63  ;;  %v3826_v63 = vld [vmem:[#allocation4 + $0x4d0] sm:$0xff] }
 0x2cd   :  { %4421 = vmatpush1.bf16.msra.mxu0 %v3808_v44  ;;  %4361 = vmatprep.mubr.bf16.mxu0 %v17057_v8  ;;  %v17076_v44 = vld [vmem:[#allocation160_spill] sm:$0xff]  ;;  %v3831_v8 = vld [vmem:[#allocation4 + $0x4f8] sm:$0xff] }
 0x2ce   :  { %4422 = vmatprep.subr.bf16.mxu0 %v3811_v28  ;;  %v17077_v28 = vld [vmem:[#allocation162_spill] sm:$0xff] }
 0x2cf   :  { %v17078_v41 = vcombine.low %v17076_v44, %v17077_v28  ;;  %v17100_v44 = vld [vmem:[#allocation128_spill] sm:$0xff] }
 0x2d1   :  { %4423 = vmatpush1.bf16.msra.mxu0 %v3810_v1  ;;  %v17080_v1 = vld [vmem:[#allocation173_spill] sm:$0xff] }
 0x2d2   :  { %4424 = vmatprep.subr.bf16.mxu0 %v3813_v43  ;;  %v17081_v43 = vld [vmem:[#allocation176_spill] sm:$0xff] }
 0x2d4   :  { %4362 = vmatmul.mubr.bf16.gmra.mrb[12].mxu0 %v17060_v0  ;;  %v3830_v0 = vld [vmem:[#allocation4 + $0x4f0] sm:$0xff] }
 0x2d5   :  { %4425 = vmatpush1.bf16.msra.mxu0 %v3812_v4  ;;  %4371 = vmatprep.mubr.bf16.mxu0 %v17063_v59  ;;  %v17082_v4 = vcombine.low %v17080_v1, %v17081_v43  ;;  %v17087_v59 = vld [vmem:[#allocation57_spill] sm:$0xff]  ;;  %v17104_v1 = vld [vmem:[#allocation150_spill] sm:$0xff] }
 0x2d6   :  { %4426 = vmatprep.subr.bf16.mxu0 %v3815_v46  ;;  %v17083_v46 = vld [vmem:[#allocation38_spill] sm:$0xff] }
 0x2d7   :  { %v17085_v39 = vcombine.high %v17083_v46, %v17084_v30  ;;  %v17086_v62 = vcombine.low %v17083_v46, %v17084_v30  ;;  %v3853_v46 = vld [vmem:[#allocation4 + $0x5a8] sm:$0xff]  ;;  %v3852_v30 = vld [vmem:[#allocation4 + $0x5a0] sm:$0xff] }
 0x2d9   :  { %4427 = vmatpush1.bf16.msra.mxu0 %v3814_v5  ;;  %v17088_v5 = vld [vmem:[#allocation65_spill] sm:$0xff] }
 0x2da   :  { %4428 = vmatprep.subr.bf16.mxu0 %v3817_v21  ;;  %v17089_v21 = vcombine.high %v17087_v59, %v17088_v5 }
 0x2dc   :  { %4372 = vmatmul.mubr.bf16.gmra.mrb[16].mxu0 %v17066_v38  ;;  %v17090_v38 = vcombine.low %v17087_v59, %v17088_v5  ;;  %v3857_v59 = vld [vmem:[#allocation4 + $0x5c8] sm:$0xff]  ;;  %v3856_v5 = vld [vmem:[#allocation4 + $0x5c0] sm:$0xff] }
 0x2dd   :  { %4429 = vmatpush1.bf16.msra.mxu0 %v3816_v19  ;;  %4381 = vmatprep.mubr.bf16.mxu0 %v17069_v33  ;;  %v3834_v19 = vld [vmem:[#allocation4 + $0x510] sm:$0xff]  ;;  %v17093_v33 = vcombine.high %v17091_v58, %v17092_v17  ;;  %v17111_v58 = vld [vmem:[#allocation39_spill] sm:$0xff]  ;;  %v17112_v17 = vld [vmem:[#allocation41_spill] sm:$0xff] }
 0x2de   :  { %4430 = vmatprep.subr.bf16.mxu0 %v3819_v31  ;;  %v3837_v31 = vld [vmem:[#allocation4 + $0x528] sm:$0xff] }
 0x2e1   :  { %4431 = vmatpush1.bf16.msra.mxu0 %v3818_v11  ;;  %v3838_v11 = vld [vmem:[#allocation4 + $0x530] sm:$0xff] }
 0x2e2   :  { %4432 = vmatprep.subr.bf16.mxu0 %v3821_v51  ;;  %v3841_v51 = vld [vmem:[#allocation4 + $0x548] sm:$0xff] }
 0x2e4   :  { %4382 = vmatmul.mubr.bf16.gmra.mrb[20].mxu0 %v17072_v34  ;;  %v17096_v34 = vld [vmem:[#allocation113_spill] sm:$0xff] }
 0x2e5   :  { %4433 = vmatpush1.bf16.msra.mxu0 %v3820_v23  ;;  %4391 = vmatprep.mubr.bf16.mxu0 %v17075_v27  ;;  %v3840_v23 = vld [vmem:[#allocation4 + $0x540] sm:$0xff]  ;;  %v17097_v2 = vcombine.high %v17095_v10, %v17096_v34  ;;  %v3845_v27 = vld [vmem:[#allocation4 + $0x568] sm:$0xff] }
 0x2e6   :  { %4434 = vmatprep.subr.bf16.mxu0 %v3823_v16  ;;  %v3843_v16 = vld [vmem:[#allocation4 + $0x558] sm:$0xff] }
 0x2e9   :  { %4435 = vmatpush1.bf16.msra.mxu0 %v3822_v3  ;;  %v3844_v3 = vld [vmem:[#allocation4 + $0x560] sm:$0xff] }
 0x2ea   :  { %4436 = vmatprep.subr.bf16.mxu0 %v3825_v54  ;;  %v3847_v54 = vld [vmem:[#allocation4 + $0x578] sm:$0xff] }
 0x2ec   :  { %4392 = vmatmul.mubr.bf16.gmra.mrb[24].mxu0 %v17078_v41  ;;  %v3846_v41 = vld [vmem:[#allocation4 + $0x570] sm:$0xff] }
 0x2ed   :  { %4437 = vmatpush1.bf16.msra.mxu0 %v3824_v15  ;;  %4401 = vmatprep.mubr.bf16.mxu0 %v17079_v18  ;;  %v17098_v15 = vcombine.low %v17095_v10, %v17096_v34  ;;  %v3849_v18 = vld [vmem:[#allocation4 + $0x588] sm:$0xff]  ;;  %v3868_v34 = vld [vmem:[#allocation4 + $0x620] sm:$0xff] }
 0x2ee   :  { %4438 = vmatprep.subr.bf16.mxu0 %v3827_v57  ;;  %v17099_v57 = vld [vmem:[#allocation127_spill] sm:$0xff] }
 0x2ef   :  { %v17101_v28 = vcombine.high %v17099_v57, %v17100_v44  ;;  %v3869_v10 = vld [vmem:[#allocation4 + $0x628] sm:$0xff] }
 0x2f1   :  { %4439 = vmatpush1.bf16.msra.mxu0 %v3826_v63  ;;  %v3848_v63 = vld [vmem:[#allocation4 + $0x580] sm:$0xff] }
 0x2f2   :  { %4440 = vmatprep.subr.bf16.mxu0 %v3829_v55  ;;  %v3851_v55 = vld [vmem:[#allocation4 + $0x598] sm:$0xff] }
 0x2f4   :  { %4402 = vmatmul.mubr.bf16.gmra.mrb[28].mxu0 %v17082_v4  ;;  %v3850_v4 = vld [vmem:[#allocation4 + $0x590] sm:$0xff] }
 0x2f5   :  { %4441 = vmatpush1.bf16.msra.mxu0 %v3828_v47  ;;  %4444 = vmatprep.mubr.bf16.mxu0 %v17085_v39  ;;  %v17102_v47 = vcombine.low %v17099_v57, %v17100_v44  ;;  %v3855_v39 = vld [vmem:[#allocation4 + $0x5b8] sm:$0xff]  ;;  %v3873_v57 = vld [vmem:[#allocation4 + $0x648] sm:$0xff]  ;;  %v3872_v44 = vld [vmem:[#allocation4 + $0x640] sm:$0xff] }
 0x2f6   :  { %4442 = vmatprep.subr.bf16.mxu0 %v3831_v8  ;;  %v17103_v8 = vld [vmem:[#allocation143_spill] sm:$0xff] }
 0x2f7   :  { %v17105_v43 = vcombine.high %v17103_v8, %v17104_v1 }
 0x2f9   :  { %4443 = vmatpush1.bf16.msra.mxu0 %v3830_v0  ;;  %v17106_v0 = vcombine.low %v17103_v8, %v17104_v1  ;;  %v3877_v8 = vld [vmem:[#allocation4 + $0x668] sm:$0xff]  ;;  %v3876_v1 = vld [vmem:[#allocation4 + $0x660] sm:$0xff] }
 0x2fa   :  { %4525 = vmatprep.subr.bf16.mxu0 %v3833_v26  ;;  %v17107_v26 = vld [vmem:[#allocation165_spill] sm:$0xff] }
 0x2fc   :  { %4445 = vmatmul.mubr.bf16.vlgmr.msra.gmra.mrb[0].mxu0 %v17086_v62  ;;  %v3854_v62 = vld [vmem:[#allocation4 + $0x5b0] sm:$0xff] }
 0x2fd   :  { %4526 = vmatpush1.bf16.msra.mxu0 %v3832_v45  ;;  %4454 = vmatprep.mubr.bf16.mxu0 %v17089_v21  ;;  %v17108_v45 = vld [vmem:[#allocation170_spill] sm:$0xff]  ;;  %v3859_v21 = vld [vmem:[#allocation4 + $0x5d8] sm:$0xff] }
 0x2fe   :  { %4527 = vmatprep.subr.bf16.mxu0 %v3835_v35  ;;  %v17109_v35 = vcombine.high %v17107_v26, %v17108_v45 }
 0x301   :  { %4528 = vmatpush1.bf16.msra.mxu0 %v3834_v19  ;;  %v17110_v19 = vcombine.low %v17107_v26, %v17108_v45  ;;  %v3881_v26 = vld [vmem:[#allocation4 + $0x688] sm:$0xff]  ;;  %v3880_v45 = vld [vmem:[#allocation4 + $0x680] sm:$0xff] }
 0x302   :  { %4529 = vmatprep.subr.bf16.mxu0 %v3837_v31  ;;  %v3858_v31 = vld [vmem:[#allocation4 + $0x5d0] sm:$0xff] }
 0x304   :  { %4455 = vmatmul.mubr.bf16.gmra.mrb[4].mxu0 %v17090_v38  ;;  %v3863_v38 = vld [vmem:[#allocation4 + $0x5f8] sm:$0xff] }
 0x305   :  { %4530 = vmatpush1.bf16.msra.mxu0 %v3836_v56  ;;  %4464 = vmatprep.mubr.bf16.mxu0 %v17093_v33  ;;  %v3861_v56 = vld [vmem:[#allocation4 + $0x5e8] sm:$0xff]  ;;  %v17113_v33 = vcombine.high %v17111_v58, %v17112_v17 }
 0x306   :  { %4531 = vmatprep.subr.bf16.mxu0 %v3839_v6  ;;  %v3860_v6 = vld [vmem:[#allocation4 + $0x5e0] sm:$0xff] }
 0x309   :  { %4532 = vmatpush1.bf16.msra.mxu0 %v3838_v11  ;;  %v3862_v11 = vld [vmem:[#allocation4 + $0x5f0] sm:$0xff] }
 0x30a   :  { %4533 = vmatprep.subr.bf16.mxu0 %v3841_v51  ;;  %v3865_v51 = vld [vmem:[#allocation4 + $0x608] sm:$0xff] }
 0x30c   :  { %4465 = vmatmul.mubr.bf16.gmra.mrb[8].mxu0 %v17094_v37  ;;  %v17115_v37 = vld [vmem:[#allocation58_spill] sm:$0xff] }
 0x30d   :  { %4534 = vmatpush1.bf16.msra.mxu0 %v3840_v23  ;;  %4474 = vmatprep.mubr.bf16.mxu0 %v17097_v2  ;;  %v3867_v23 = vld [vmem:[#allocation4 + $0x618] sm:$0xff]  ;;  %v17117_v48 = vcombine.high %v17115_v37, %v17116_v9 }
 0x30e   :  { %4535 = vmatprep.subr.bf16.mxu0 %v3843_v16  ;;  %v17114_v16 = vcombine.low %v17111_v58, %v17112_v17  ;;  %v3871_v2 = vld [vmem:[#allocation4 + $0x638] sm:$0xff]  ;;  %v17135_v58 = vld [vmem:[#allocation166_spill] sm:$0xff]  ;;  %v17136_v17 = vld [vmem:[#allocation168_spill] sm:$0xff] }
 0x311   :  { %4536 = vmatpush1.bf16.msra.mxu0 %v3842_v24  ;;  %v17118_v24 = vcombine.low %v17115_v37, %v17116_v9  ;;  %v3890_v37 = vld [vmem:[#allocation4 + $0x6d0] sm:$0xff]  ;;  %v3893_v9 = vld [vmem:[#allocation4 + $0x6e8] sm:$0xff] }
 0x312   :  { %4537 = vmatprep.subr.bf16.mxu0 %v3845_v27  ;;  %v17119_v27 = vld [vmem:[#allocation80_spill] sm:$0xff] }
 0x314   :  { %4475 = vmatmul.mubr.bf16.gmra.mrb[12].mxu0 %v17098_v15  ;;  %v3870_v15 = vld [vmem:[#allocation4 + $0x630] sm:$0xff] }
 0x315   :  { %4538 = vmatpush1.bf16.msra.mxu0 %v3844_v3  ;;  %4484 = vmatprep.mubr.bf16.mxu0 %v17101_v28  ;;  %v17120_v3 = vld [vmem:[#allocation86_spill] sm:$0xff]  ;;  %v3875_v28 = vld [vmem:[#allocation4 + $0x658] sm:$0xff] }
 0x316   :  { %4539 = vmatprep.subr.bf16.mxu0 %v3847_v54  ;;  %v17121_v54 = vcombine.high %v17119_v27, %v17120_v3 }
 0x319   :  { %4540 = vmatpush1.bf16.msra.mxu0 %v3846_v41  ;;  %v17122_v41 = vcombine.low %v17119_v27, %v17120_v3  ;;  %v3897_v27 = vld [vmem:[#allocation4 + $0x708] sm:$0xff]  ;;  %v3899_v3 = vld [vmem:[#allocation4 + $0x718] sm:$0xff] }
 0x31a   :  { %4541 = vmatprep.subr.bf16.mxu0 %v3849_v18  ;;  %v17123_v18 = vld [vmem:[#allocation109_spill] sm:$0xff] }
 0x31c   :  { %4485 = vmatmul.mubr.bf16.gmra.mrb[16].mxu0 %v17102_v47  ;;  %v3874_v47 = vld [vmem:[#allocation4 + $0x650] sm:$0xff] }
 0x31d   :  { %4542 = vmatpush1.bf16.msra.mxu0 %v3848_v63  ;;  %4494 = vmatprep.mubr.bf16.mxu0 %v17105_v43  ;;  %v17124_v63 = vld [vmem:[#allocation112_spill] sm:$0xff]  ;;  %v3879_v43 = vld [vmem:[#allocation4 + $0x678] sm:$0xff] }
 0x31e   :  { %4543 = vmatprep.subr.bf16.mxu0 %v3851_v55  ;;  %v17125_v55 = vcombine.high %v17123_v18, %v17124_v63 }
 0x321   :  { %4544 = vmatpush1.bf16.msra.mxu0 %v3850_v4  ;;  %v17126_v4 = vcombine.low %v17123_v18, %v17124_v63  ;;  %v3903_v18 = vld [vmem:[#allocation4 + $0x738] sm:$0xff] }
 0x322   :  { %4545 = vmatprep.subr.bf16.mxu0 %v3853_v46  ;;  %v17127_v46 = vld [vmem:[#allocation122_spill] sm:$0xff]  ;;  %v17148_v63 = vld [vmem:[#allocation61_spill] sm:$0xff] }
 0x324   :  { %4495 = vmatmul.mubr.bf16.gmra.mrb[20].mxu0 %v17106_v0  ;;  %v3878_v0 = vld [vmem:[#allocation4 + $0x670] sm:$0xff] }
 0x325   :  { %4546 = vmatpush1.bf16.msra.mxu0 %v3852_v30  ;;  %4504 = vmatprep.mubr.bf16.mxu0 %v17109_v35  ;;  %v17128_v30 = vld [vmem:[#allocation124_spill] sm:$0xff]  ;;  %v3883_v35 = vld [vmem:[#allocation4 + $0x698] sm:$0xff] }
 0x326   :  { %4547 = vmatprep.subr.bf16.mxu0 %v3855_v39  ;;  %v17129_v39 = vcombine.high %v17127_v46, %v17128_v30 }
 0x329   :  { %4548 = vmatpush1.bf16.msra.mxu0 %v3854_v62  ;;  %v17130_v62 = vcombine.low %v17127_v46, %v17128_v30  ;;  %v3905_v46 = vld [vmem:[#allocation4 + $0x748] sm:$0xff]  ;;  %v3904_v30 = vld [vmem:[#allocation4 + $0x740] sm:$0xff] }
 0x32a   :  { %4549 = vmatprep.subr.bf16.mxu0 %v3857_v59  ;;  %v17131_v59 = vld [vmem:[#allocation144_spill] sm:$0xff] }
 0x32c   :  { %4505 = vmatmul.mubr.bf16.gmra.mrb[24].mxu0 %v17110_v19  ;;  %v3882_v19 = vld [vmem:[#allocation4 + $0x690] sm:$0xff] }
 0x32d   :  { %4550 = vmatpush1.bf16.msra.mxu0 %v3856_v5  ;;  %4514 = vmatprep.mubr.bf16.mxu0 %v10463_v50  ;;  %v3864_v50 = vld [vmem:[#allocation4 + $0x600] sm:$0xff]  ;;  %v17132_v5 = vld [vmem:[#allocation148_spill] sm:$0xff] }
 0x32e   :  { %4551 = vmatprep.subr.bf16.mxu0 %v3859_v21  ;;  %v17133_v21 = vcombine.high %v17131_v59, %v17132_v5 }
 0x331   :  { %4552 = vmatpush1.bf16.msra.mxu0 %v3858_v31  ;;  %v3885_v31 = vld [vmem:[#allocation4 + $0x6a8] sm:$0xff] }
 0x332   :  { %4553 = vmatprep.subr.bf16.mxu0 %v3861_v56  ;;  %v3884_v56 = vld [vmem:[#allocation4 + $0x6a0] sm:$0xff] }
 0x334   :  { %4515 = vmatmul.mubr.bf16.gmra.mrb[28].mxu0 %v10462_v13  ;;  %v3866_v13 = vld [vmem:[#allocation4 + $0x610] sm:$0xff] }
 0x335   :  { %4554 = vmatpush1.bf16.msra.mxu0 %v3860_v6  ;;  %4557 = vmatprep.mubr.bf16.mxu0 %v17113_v33  ;;  %v3887_v6 = vld [vmem:[#allocation4 + $0x6b8] sm:$0xff]  ;;  %v17137_v33 = vcombine.high %v17135_v58, %v17136_v17 }
 0x336   :  { %4555 = vmatprep.subr.bf16.mxu0 %v3863_v38  ;;  %v17134_v38 = vcombine.low %v17131_v59, %v17132_v5  ;;  %v3906_v5 = vld [vmem:[#allocation4 + $0x750] sm:$0xff] }
 0x339   :  { %4556 = vmatpush1.bf16.msra.mxu0 %v3862_v11  ;;  %v3886_v11 = vld [vmem:[#allocation4 + $0x6b0] sm:$0xff] }
 0x33a   :  { %4638 = vmatprep.subr.bf16.mxu0 %v3865_v51  ;;  %v3889_v51 = vld [vmem:[#allocation4 + $0x6c8] sm:$0xff] }
 0x33c   :  { %4558 = vmatmul.mubr.bf16.vlgmr.msra.gmra.mrb[0].mxu0 %v17114_v16  ;;  %v17138_v16 = vcombine.low %v17135_v58, %v17136_v17  ;;  %v17163_v58 = vld [vmem:[#allocation131_spill] sm:$0xff]  ;;  %v17164_v17 = vld [vmem:[#allocation134_spill] sm:$0xff] }
 0x33d   :  { %4639 = vmatpush1.bf16.msra.mxu0 %v3864_v50  ;;  %4567 = vmatprep.mubr.bf16.mxu0 %v17117_v48  ;;  %v3888_v50 = vld [vmem:[#allocation4 + $0x6c0] sm:$0xff] }
 0x33e   :  { %4640 = vmatprep.subr.bf16.mxu0 %v3867_v23  ;;  %v3891_v23 = vld [vmem:[#allocation4 + $0x6d8] sm:$0xff]  ;;  %v3892_v48 = vld [vmem:[#allocation4 + $0x6e0] sm:$0xff] }
 0x341   :  { %4641 = vmatpush1.bf16.msra.mxu0 %v3866_v13  ;;  %v3895_v13 = vld [vmem:[#allocation4 + $0x6f8] sm:$0xff] }
 0x342   :  { %4642 = vmatprep.subr.bf16.mxu0 %v3869_v10  ;;  %v17139_v10 = vld [vmem:[#allocation45_spill] sm:$0xff] }
 0x344   :  { %4568 = vmatmul.mubr.bf16.gmra.mrb[4].mxu0 %v17118_v24  ;;  %v3894_v24 = vld [vmem:[#allocation4 + $0x6f0] sm:$0xff] }
 0x345   :  { %4643 = vmatpush1.bf16.msra.mxu0 %v3868_v34  ;;  %4577 = vmatprep.mubr.bf16.mxu0 %v17121_v54  ;;  %v17140_v34 = vld [vmem:[#allocation49_spill] sm:$0xff]  ;;  %v17142_v54 = vld [vmem:[#allocation40_spill] sm:$0xff] }
 0x346   :  { %4644 = vmatprep.subr.bf16.mxu0 %v3871_v2  ;;  %v17141_v2 = vcombine.low %v17139_v10, %v17140_v34  ;;  %v3914_v34 = vld [vmem:[#allocation4 + $0x790] sm:$0xff] }
 0x349   :  { %4645 = vmatpush1.bf16.msra.mxu0 %v3870_v15  ;;  %v17143_v15 = vld [vmem:[#allocation42_spill] sm:$0xff] }
 0x34a   :  { %4646 = vmatprep.subr.bf16.mxu0 %v3873_v57  ;;  %v17144_v57 = vcombine.low %v17142_v54, %v17143_v15  ;;  %v17175_v15 = vld [vmem:[#allocation172_spill] sm:$0xff] }
 0x34c   :  { %4578 = vmatmul.mubr.bf16.gmra.mrb[8].mxu0 %v17122_v41  ;;  %v3900_v41 = vld [vmem:[#allocation4 + $0x720] sm:$0xff] }
 0x34d   :  { %4647 = vmatpush1.bf16.msra.mxu0 %v3872_v44  ;;  %4587 = vmatprep.mubr.bf16.mxu0 %v17125_v55  ;;  %v17145_v44 = vld [vmem:[#allocation67_spill] sm:$0xff]  ;;  %v17149_v55 = vld [vmem:[#allocation64_spill] sm:$0xff] }
 0x34e   :  { %4648 = vmatprep.subr.bf16.mxu0 %v3875_v28  ;;  %v17147_v52 = vcombine.low %v17145_v44, %v17146_v42  ;;  %v3901_v28 = vld [vmem:[#allocation4 + $0x728] sm:$0xff]  ;;  %v3918_v42 = vld [vmem:[#allocation4 + $0x7b0] sm:$0xff] }
 0x351   :  { %4649 = vmatpush1.bf16.msra.mxu0 %v3874_v47  ;;  %v17150_v47 = vcombine.low %v17148_v63, %v17149_v55  ;;  %v17181_v55 = vcombine.low %v13329_v12, %v13319_v49  ;;  %v3929_v49 = vld [vmem:[#allocation4 + $0x808] sm:$0xff]  ;;  %v3928_v12 = vld [vmem:[#allocation4 + $0x800] sm:$0xff] }
 0x352   :  { %4650 = vmatprep.subr.bf16.mxu0 %v3877_v8  ;;  %v17151_v8 = vld [vmem:[#allocation89_spill] sm:$0xff] }
 0x354   :  { %4588 = vmatmul.mubr.bf16.gmra.mrb[12].mxu0 %v17126_v4  ;;  %v3902_v4 = vld [vmem:[#allocation4 + $0x730] sm:$0xff] }
 0x355   :  { %4651 = vmatpush1.bf16.msra.mxu0 %v3876_v1  ;;  %4597 = vmatprep.mubr.bf16.mxu0 %v17129_v39  ;;  %v17152_v1 = vld [vmem:[#allocation90_spill] sm:$0xff]  ;;  %v3907_v39 = vld [vmem:[#allocation4 + $0x758] sm:$0xff] }
 0x356   :  { %4652 = vmatprep.subr.bf16.mxu0 %v3879_v43  ;;  %v17153_v43 = vcombine.low %v17151_v8, %v17152_v1  ;;  %v3925_v8 = vld [vmem:[#allocation4 + $0x7e8] sm:$0xff]  ;;  %v3924_v1 = vld [vmem:[#allocation4 + $0x7e0] sm:$0xff] }
 0x359   :  { %4653 = vmatpush1.bf16.msra.mxu0 %v3878_v0  ;;  %v17154_v0 = vld [vmem:[#allocation83_spill] sm:$0xff] }
 0x35a   :  { %4654 = vmatprep.subr.bf16.mxu0 %v3881_v26  ;;  %v17155_v26 = vld [vmem:[#allocation87_spill] sm:$0xff] }
 0x35c   :  { %4598 = vmatmul.mubr.bf16.gmra.mrb[16].mxu0 %v17130_v62  ;;  %v17158_v62 = vld [vmem:[#allocation107_spill] sm:$0xff] }
 0x35d   :  { %4655 = vmatpush1.bf16.msra.mxu0 %v3880_v45  ;;  %4607 = vmatprep.mubr.bf16.mxu0 %v17133_v21  ;;  %v17156_v45 = vcombine.low %v17154_v0, %v17155_v26  ;;  %v3909_v21 = vld [vmem:[#allocation4 + $0x768] sm:$0xff]  ;;  %v17186_v0 = vld [vmem:[#allocation53_spill] sm:$0xff] }
 0x35e   :  { %4656 = vmatprep.subr.bf16.mxu0 %v3883_v35  ;;  %v17157_v35 = vld [vmem:[#allocation111_spill] sm:$0xff] }
 0x35f   :  { %v17159_v59 = vcombine.low %v17157_v35, %v17158_v62  ;;  %v3931_v35 = vld [vmem:[#allocation4 + $0x818] sm:$0xff] }
 0x361   :  { %4657 = vmatpush1.bf16.msra.mxu0 %v3882_v19  ;;  %v3908_v19 = vld [vmem:[#allocation4 + $0x760] sm:$0xff] }
 0x362   :  { %4658 = vmatprep.subr.bf16.mxu0 %v3885_v31  ;;  %v3911_v31 = vld [vmem:[#allocation4 + $0x778] sm:$0xff] }
 0x364   :  { %4608 = vmatmul.mubr.bf16.gmra.mrb[20].mxu0 %v17134_v38 }
 0x365   :  { %4659 = vmatpush1.bf16.msra.mxu0 %v3884_v56  ;;  %4617 = vmatprep.mubr.bf16.mxu0 %v17137_v33  ;;  %v17160_v56 = vld [vmem:[#allocation106_spill] sm:$0xff]  ;;  %v17165_v33 = vcombine.low %v17163_v58, %v17164_v17  ;;  %v17193_v58 = vld [vmem:[#allocation93_spill] sm:$0xff] }
 0x366   :  { %4660 = vmatprep.subr.bf16.mxu0 %v3887_v6  ;;  %v17161_v6 = vld [vmem:[#allocation98_spill] sm:$0xff]  ;;  %v17194_v17 = vld [vmem:[#allocation97_spill] sm:$0xff] }
 0x367   :  { %v17162_v38 = vcombine.low %v17160_v56, %v17161_v6  ;;  %v3932_v56 = vld [vmem:[#allocation4 + $0x820] sm:$0xff]  ;;  %v3935_v6 = vld [vmem:[#allocation4 + $0x838] sm:$0xff] }
 0x369   :  { %4661 = vmatpush1.bf16.msra.mxu0 %v3886_v11  ;;  %v3910_v11 = vld [vmem:[#allocation4 + $0x770] sm:$0xff] }
 0x36a   :  { %4662 = vmatprep.subr.bf16.mxu0 %v3889_v51  ;;  %v3913_v51 = vld [vmem:[#allocation4 + $0x788] sm:$0xff] }
 0x36c   :  { %4618 = vmatmul.mubr.bf16.gmra.mrb[24].mxu0 %v17138_v16  ;;  %v17166_v16 = vld [vmem:[#allocation123_spill] sm:$0xff] }
 0x36d   :  { %4663 = vmatpush1.bf16.msra.mxu0 %v3888_v50  ;;  %4627 = vmatprep.mubr.bf16.mxu0 %v10527_v61  ;;  %v3896_v61 = vld [vmem:[#allocation4 + $0x700] sm:$0xff] }
 0x36e   :  { %4664 = vmatprep.subr.bf16.mxu0 %v3891_v23  ;;  %v3912_v50 = vld [vmem:[#allocation4 + $0x780] sm:$0xff]  ;;  %v3915_v23 = vld [vmem:[#allocation4 + $0x798] sm:$0xff] }
 0x371   :  { %4665 = vmatpush1.bf16.msra.mxu0 %v3890_v37  ;;  %v17167_v37 = vld [vmem:[#allocation126_spill] sm:$0xff] }
 0x372   :  { %4666 = vmatprep.subr.bf16.mxu0 %v3893_v9  ;;  %v17168_v9 = vcombine.low %v17166_v16, %v17167_v37  ;;  %v17196_v16 = vcombine.low %v17193_v58, %v17194_v17  ;;  %v17197_v37 = vld [vmem:[#allocation115_spill] sm:$0xff] }
 0x374   :  { %4628 = vmatmul.mubr.bf16.gmra.mrb[28].mxu0 %v10526_v36  ;;  %v3898_v36 = vld [vmem:[#allocation4 + $0x710] sm:$0xff] }
 0x375   :  { %4667 = vmatpush1.bf16.msra.mxu0 %v3892_v48  ;;  %4670 = vmatprep.mubr.bf16.mxu0 %v17141_v2  ;;  %v17169_v48 = vld [vmem:[#allocation151_spill] sm:$0xff] }
 0x376   :  { %4668 = vmatprep.subr.bf16.mxu0 %v3895_v13  ;;  %v17170_v13 = vld [vmem:[#allocation154_spill] sm:$0xff]  ;;  %v3917_v2 = vld [vmem:[#allocation4 + $0x7a8] sm:$0xff] }
 0x377   :  { %v17171_v10 = vcombine.low %v17169_v48, %v17170_v13  ;;  %v3938_v13 = vld [vmem:[#allocation4 + $0x850] sm:$0xff] }
 0x379   :  { %4669 = vmatpush1.bf16.msra.mxu0 %v3894_v24  ;;  %v3916_v24 = vld [vmem:[#allocation4 + $0x7a0] sm:$0xff] }
 0x37a   :  { %4751 = vmatprep.subr.bf16.mxu0 %v3897_v27  ;;  %v3919_v27 = vld [vmem:[#allocation4 + $0x7b8] sm:$0xff] }
 0x37c   :  { %4671 = vmatmul.mubr.bf16.vlgmr.msra.gmra.mrb[0].mxu0 %v17144_v57  ;;  %v17176_v57 = vld [vmem:[#allocation174_spill] sm:$0xff] }
 0x37d   :  { %4752 = vmatpush1.bf16.msra.mxu0 %v3896_v61  ;;  %4680 = vmatprep.mubr.bf16.mxu0 %v17147_v52  ;;  %v17172_v61 = vld [vmem:[#allocation146_spill] sm:$0xff]  ;;  %v17177_v44 = vcombine.low %v17175_v15, %v17176_v57  ;;  %v3921_v52 = vld [vmem:[#allocation4 + $0x7c8] sm:$0xff] }
 0x37e   :  { %4753 = vmatprep.subr.bf16.mxu0 %v3899_v3  ;;  %v17173_v3 = vld [vmem:[#allocation149_spill] sm:$0xff]  ;;  %v3945_v15 = vld [vmem:[#allocation4 + $0x888] sm:$0xff]  ;;  %v3944_v57 = vld [vmem:[#allocation4 + $0x880] sm:$0xff] }
 0x37f   :  { %v17174_v54 = vcombine.low %v17172_v61, %v17173_v3  ;;  %v17202_v61 = vld [vmem:[#allocation142_spill] sm:$0xff] }
 0x381   :  { %4754 = vmatpush1.bf16.msra.mxu0 %v3898_v36  ;;  %v3920_v36 = vld [vmem:[#allocation4 + $0x7c0] sm:$0xff] }
 0x382   :  { %4755 = vmatprep.subr.bf16.mxu0 %v3901_v28  ;;  %v3923_v28 = vld [vmem:[#allocation4 + $0x7d8] sm:$0xff] }
 0x384   :  { %4681 = vmatmul.mubr.bf16.gmra.mrb[4].mxu0 %v17150_v47  ;;  %v3922_v47 = vld [vmem:[#allocation4 + $0x7d0] sm:$0xff] }
 0x385   :  { %4756 = vmatpush1.bf16.msra.mxu0 %v3900_v41  ;;  %4690 = vmatprep.mubr.bf16.mxu0 %v17153_v43  ;;  %v17178_v41 = vld [vmem:[#allocation167_spill] sm:$0xff]  ;;  %v3927_v43 = vld [vmem:[#allocation4 + $0x7f8] sm:$0xff] }
 0x386   :  { %4757 = vmatprep.subr.bf16.mxu0 %v3903_v18  ;;  %v17179_v18 = vld [vmem:[#allocation169_spill] sm:$0xff] }
 0x387   :  { %v17180_v63 = vcombine.low %v17178_v41, %v17179_v18  ;;  %v3946_v41 = vld [vmem:[#allocation4 + $0x890] sm:$0xff]  ;;  %v3949_v18 = vld [vmem:[#allocation4 + $0x8a8] sm:$0xff] }
 0x389   :  { %4758 = vmatpush1.bf16.msra.mxu0 %v3902_v4  ;;  %v17182_v4 = vld [vmem:[#allocation179_spill] sm:$0xff] }
 0x38a   :  { %4759 = vmatprep.subr.bf16.mxu0 %v3905_v46  ;;  %v17183_v46 = vld [vmem:[#allocation177_spill] sm:$0xff] }
 0x38c   :  { %4691 = vmatmul.mubr.bf16.gmra.mrb[8].mxu0 %v17156_v45  ;;  %v3926_v45 = vld [vmem:[#allocation4 + $0x7f0] sm:$0xff] }
 0x38d   :  { %4760 = vmatpush1.bf16.msra.mxu0 %v3904_v30  ;;  %4700 = vmatprep.mubr.bf16.mxu0 %v17159_v59  ;;  %v17184_v30 = vcombine.low %v17182_v4, %v17183_v46  ;;  %v17189_v59 = vld [vmem:[#allocation73_spill] sm:$0xff]  ;;  %v3950_v4 = vld [vmem:[#allocation4 + $0x8b0] sm:$0xff]  ;;  %v3953_v46 = vld [vmem:[#allocation4 + $0x8c8] sm:$0xff] }
 0x38e   :  { %4761 = vmatprep.subr.bf16.mxu0 %v3907_v39  ;;  %v17185_v39 = vld [vmem:[#allocation50_spill] sm:$0xff] }
 0x38f   :  { %v17187_v26 = vcombine.high %v17185_v39, %v17186_v0  ;;  %v17188_v62 = vcombine.low %v17185_v39, %v17186_v0  ;;  %v3955_v39 = vld [vmem:[#allocation4 + $0x8d8] sm:$0xff] }
 0x391   :  { %4762 = vmatpush1.bf16.msra.mxu0 %v3906_v5  ;;  %v17190_v5 = vld [vmem:[#allocation79_spill] sm:$0xff] }
 0x392   :  { %4763 = vmatprep.subr.bf16.mxu0 %v3909_v21  ;;  %v17191_v21 = vcombine.high %v17189_v59, %v17190_v5 }
 0x394   :  { %4701 = vmatmul.mubr.bf16.gmra.mrb[12].mxu0 %v17162_v38  ;;  %v17192_v38 = vcombine.low %v17189_v59, %v17190_v5  ;;  %v3958_v5 = vld [vmem:[#allocation4 + $0x8f0] sm:$0xff] }
 0x395   :  { %4764 = vmatpush1.bf16.msra.mxu0 %v3908_v19  ;;  %4710 = vmatprep.mubr.bf16.mxu0 %v17165_v33  ;;  %v3930_v19 = vld [vmem:[#allocation4 + $0x810] sm:$0xff]  ;;  %v17195_v33 = vcombine.high %v17193_v58, %v17194_v17  ;;  %v17226_v58 = vld [vmem:[#allocation105_spill] sm:$0xff] }
 0x396   :  { %4765 = vmatprep.subr.bf16.mxu0 %v3911_v31  ;;  %v3933_v31 = vld [vmem:[#allocation4 + $0x828] sm:$0xff] }
 0x399   :  { %4766 = vmatpush1.bf16.msra.mxu0 %v3910_v11  ;;  %v3934_v11 = vld [vmem:[#allocation4 + $0x830] sm:$0xff] }
 0x39a   :  { %4767 = vmatprep.subr.bf16.mxu0 %v3913_v51  ;;  %v3937_v51 = vld [vmem:[#allocation4 + $0x848] sm:$0xff] }
 0x39c   :  { %4711 = vmatmul.mubr.bf16.gmra.mrb[16].mxu0 %v17168_v9  ;;  %v17198_v9 = vld [vmem:[#allocation102_spill] sm:$0xff] }
 0x39d   :  { %4768 = vmatpush1.bf16.msra.mxu0 %v3912_v50  ;;  %4720 = vmatprep.mubr.bf16.mxu0 %v17171_v10  ;;  %v3936_v50 = vld [vmem:[#allocation4 + $0x840] sm:$0xff]  ;;  %v17199_v48 = vcombine.high %v17197_v37, %v17198_v9  ;;  %v3941_v10 = vld [vmem:[#allocation4 + $0x868] sm:$0xff] }
 0x39e   :  { %4769 = vmatprep.subr.bf16.mxu0 %v3915_v23  ;;  %v3939_v23 = vld [vmem:[#allocation4 + $0x858] sm:$0xff] }
 0x3a1   :  { %4770 = vmatpush1.bf16.msra.mxu0 %v3914_v34  ;;  %v3940_v34 = vld [vmem:[#allocation4 + $0x860] sm:$0xff] }
 0x3a2   :  { %4771 = vmatprep.subr.bf16.mxu0 %v3917_v2  ;;  %v3943_v2 = vld [vmem:[#allocation4 + $0x878] sm:$0xff] }
 0x3a4   :  { %4721 = vmatmul.mubr.bf16.gmra.mrb[20].mxu0 %v17174_v54  ;;  %v3942_v54 = vld [vmem:[#allocation4 + $0x870] sm:$0xff] }
 0x3a5   :  { %4772 = vmatpush1.bf16.msra.mxu0 %v3916_v24  ;;  %4730 = vmatprep.mubr.bf16.mxu0 %v17177_v44  ;;  %v17200_v24 = vcombine.low %v17197_v37, %v17198_v9  ;;  %v3947_v44 = vld [vmem:[#allocation4 + $0x898] sm:$0xff]  ;;  %v17234_v37 = vld [vmem:[#allocation159_spill] sm:$0xff] }
 0x3a6   :  { %4773 = vmatprep.subr.bf16.mxu0 %v3919_v27  ;;  %v17201_v27 = vld [vmem:[#allocation132_spill] sm:$0xff] }
 0x3a7   :  { %v17203_v3 = vcombine.high %v17201_v27, %v17202_v61 }
 0x3a9   :  { %4774 = vmatpush1.bf16.msra.mxu0 %v3918_v42  ;;  %v17204_v42 = vcombine.low %v17201_v27, %v17202_v61 }
 0x3aa   :  { %4775 = vmatprep.subr.bf16.mxu0 %v3921_v52  ;;  %v17205_v52 = vld [vmem:[#allocation157_spill] sm:$0xff] }
 0x3ac   :  { %4731 = vmatmul.mubr.bf16.gmra.mrb[24].mxu0 %v17180_v63  ;;  %v3948_v63 = vld [vmem:[#allocation4 + $0x8a0] sm:$0xff] }
 0x3ad   :  { %4776 = vmatpush1.bf16.msra.mxu0 %v3920_v36  ;;  %4740 = vmatprep.mubr.bf16.mxu0 %v17181_v55  ;;  %v17206_v36 = vld [vmem:[#allocation161_spill] sm:$0xff] }
 0x3ae   :  { %4777 = vmatprep.subr.bf16.mxu0 %v3923_v28  ;;  %v17207_v28 = vcombine.high %v17205_v52, %v17206_v36  ;;  %v3951_v55 = vld [vmem:[#allocation4 + $0x8b8] sm:$0xff] }
 0x3b1   :  { %4778 = vmatpush1.bf16.msra.mxu0 %v3922_v47  ;;  %v17208_v47 = vcombine.low %v17205_v52, %v17206_v36 }
 0x3b2   :  { %4779 = vmatprep.subr.bf16.mxu0 %v3925_v8  ;;  %v17209_v8 = vld [vmem:[#allocation180_spill] sm:$0xff] }
 0x3b4   :  { %4741 = vmatmul.mubr.bf16.gmra.mrb[28].mxu0 %v17184_v30  ;;  %v3952_v30 = vld [vmem:[#allocation4 + $0x8c0] sm:$0xff] }
 0x3b5   :  { %4780 = vmatpush1.bf16.msra.mxu0 %v3924_v1  ;;  %4783 = vmatprep.mubr.bf16.mxu0 %v17187_v26  ;;  %v17210_v1 = vld [vmem:[#allocation182_spill] sm:$0xff]  ;;  %v3954_v26 = vld [vmem:[#allocation4 + $0x8d0] sm:$0xff] }
 0x3b6   :  { %4781 = vmatprep.subr.bf16.mxu0 %v3927_v43  ;;  %v17211_v43 = vcombine.high %v17209_v8, %v17210_v1  ;;  %v17212_v0 = vcombine.low %v17209_v8, %v17210_v1 }
 0x3b9   :  { %4782 = vmatpush1.bf16.msra.mxu0 %v3926_v45  ;;  %v3957_v45 = vld [vmem:[#allocation4 + $0x8e8] sm:$0xff] }
 0x3ba   :  { %4864 = vmatprep.subr.bf16.mxu0 %v3929_v49  ;;  %v3956_v49 = vld [vmem:[#allocation4 + $0x8e0] sm:$0xff] }
 0x3bc   :  { %4784 = vmatmul.mubr.bf16.vlgmr.msra.gmra.mrb[0].mxu0 %v17188_v62  ;;  %v17214_v62 = vld [vmem:[#allocation52_spill] sm:$0xff] }
 0x3bd   :  { %4865 = vmatpush1.bf16.msra.mxu0 %v3928_v12  ;;  %4793 = vmatprep.mubr.bf16.mxu0 %v17191_v21  ;;  %v3959_v12 = vld [vmem:[#allocation4 + $0x8f8] sm:$0xff]  ;;  %v17217_v21 = vld [vmem:[#allocation71_spill] sm:$0xff] }
 0x3be   :  { %4866 = vmatprep.subr.bf16.mxu0 %v3931_v35  ;;  %v17213_v35 = vld [vmem:[#allocation47_spill] sm:$0xff] }
 0x3bf   :  { %v17215_v59 = vcombine.high %v17213_v35, %v17214_v62 }
 0x3c1   :  { %4867 = vmatpush1.bf16.msra.mxu0 %v3930_v19  ;;  %v17218_v19 = vld [vmem:[#allocation78_spill] sm:$0xff] }
 0x3c2   :  { %4868 = vmatprep.subr.bf16.mxu0 %v3933_v31  ;;  %v17219_v31 = vcombine.high %v17217_v21, %v17218_v19  ;;  %v17220_v14 = vcombine.low %v17217_v21, %v17218_v19 }
 0x3c4   :  { %4794 = vmatmul.mubr.bf16.gmra.mrb[4].mxu0 %v17192_v38  ;;  %v17225_v38 = vld [vmem:[#allocation114_spill] sm:$0xff] }
 0x3c5   :  { %4869 = vmatpush1.bf16.msra.mxu0 %v3932_v56  ;;  %4803 = vmatprep.mubr.bf16.mxu0 %v17195_v33  ;;  %v17227_v17 = vcombine.high %v17225_v38, %v17226_v58  ;;  %v17228_v33 = vcombine.low %v17225_v38, %v17226_v58 }
 0x3c6   :  { %4870 = vmatprep.subr.bf16.mxu0 %v3935_v6 }
 0x3c9   :  { %4871 = vmatpush1.bf16.msra.mxu0 %v3934_v11  ;;  %v17229_v11 = vld [vmem:[#allocation133_spill] sm:$0xff] }
 0x3ca   :  { %4872 = vmatprep.subr.bf16.mxu0 %v3937_v51  ;;  %v17230_v51 = vld [vmem:[#allocation141_spill] sm:$0xff] }
 0x3cc   :  { %4804 = vmatmul.mubr.bf16.gmra.mrb[8].mxu0 %v17196_v16  ;;  %v17233_v16 = vld [vmem:[#allocation156_spill] sm:$0xff] }
 0x3cd   :  { %4873 = vmatpush1.bf16.msra.mxu0 %v3936_v50  ;;  %4813 = vmatprep.mubr.bf16.mxu0 %v17199_v48  ;;  %v17231_v50 = vcombine.high %v17229_v11, %v17230_v51  ;;  %v17235_v9 = vcombine.high %v17233_v16, %v17234_v37  ;;  %v17236_v48 = vcombine.low %v17233_v16, %v17234_v37 }
 0x3ce   :  { %4874 = vmatprep.subr.bf16.mxu0 %v3939_v23  ;;  %v17232_v23 = vcombine.low %v17229_v11, %v17230_v51 }
 0x3d1   :  { %4875 = vmatpush1.bf16.msra.mxu0 %v3938_v13  ;;  %v17237_v13 = vld [vmem:[#allocation178_spill] sm:$0xff] }
 0x3d2   :  { %4876 = vmatprep.subr.bf16.mxu0 %v3941_v10  ;;  %v17238_v10 = vld [vmem:[#allocation181_spill] sm:$0xff] }
 0x3d4   :  { %4814 = vmatmul.mubr.bf16.gmra.mrb[12].mxu0 %v17200_v24 }
 0x3d5   :  { %4877 = vmatpush1.bf16.msra.mxu0 %v3940_v34  ;;  %4823 = vmatprep.mubr.bf16.mxu0 %v17203_v3  ;;  %v17239_v34 = vcombine.high %v17237_v13, %v17238_v10 }
 0x3d6   :  { %4878 = vmatprep.subr.bf16.mxu0 %v3943_v2  ;;  %v17240_v2 = vcombine.low %v17237_v13, %v17238_v10 }
 0x3d9   :  { %4879 = vmatpush1.bf16.msra.mxu0 %v3942_v54 }
 0x3da   :  { %4880 = vmatprep.subr.bf16.mxu0 %v3945_v15 }
 0x3dc   :  { %4824 = vmatmul.mubr.bf16.gmra.mrb[16].mxu0 %v17204_v42 }
 0x3dd   :  { %4881 = vmatpush1.bf16.msra.mxu0 %v3944_v57  ;;  %4833 = vmatprep.mubr.bf16.mxu0 %v17207_v28 }
 0x3de   :  { %4882 = vmatprep.subr.bf16.mxu0 %v3947_v44 }
 0x3e1   :  { %4883 = vmatpush1.bf16.msra.mxu0 %v3946_v41 }
 0x3e2   :  { %4884 = vmatprep.subr.bf16.mxu0 %v3949_v18 }
 0x3e4   :  { %4834 = vmatmul.mubr.bf16.gmra.mrb[20].mxu0 %v17208_v47 }
 0x3e5   :  { %4885 = vmatpush1.bf16.msra.mxu0 %v3948_v63  ;;  %4843 = vmatprep.mubr.bf16.mxu0 %v17211_v43 }
 0x3e6   :  { %4886 = vmatprep.subr.bf16.mxu0 %v3951_v55 }
 0x3e9   :  { %4887 = vmatpush1.bf16.msra.mxu0 %v3950_v4 }
 0x3ea   :  { %4888 = vmatprep.subr.bf16.mxu0 %v3953_v46 }
 0x3ec   :  { %4844 = vmatmul.mubr.bf16.gmra.mrb[24].mxu0 %v17212_v0 }
 0x3ed   :  { %4889 = vmatpush1.bf16.msra.mxu0 %v3952_v30  ;;  %4853 = vmatprep.mubr.bf16.mxu0 %v10591_v29  ;;  %v17216_v29 = vcombine.low %v17213_v35, %v17214_v62 }
 0x3ee   :  { %4890 = vmatprep.subr.bf16.mxu0 %v3955_v39 }
 0x3f1   :  { %4891 = vmatpush1.bf16.msra.mxu0 %v3954_v26 }
 0x3f2   :  { %4892 = vmatprep.subr.bf16.mxu0 %v3957_v45 }
 0x3f4   :  { %4854 = vmatmul.mubr.bf16.gmra.mrb[28].mxu0 %v10590_v20  ;;  %v17222_v20 = vld [vmem:[#allocation96_spill] sm:$0xff] }
 0x3f5   :  { %4893 = vmatpush1.bf16.msra.mxu0 %v3956_v49  ;;  %4896 = vmatprep.mubr.bf16.mxu0 %v17215_v59  ;;  %v17223_v56 = vcombine.high %v17221_v22, %v17222_v20  ;;  %v17224_v6 = vcombine.low %v17221_v22, %v17222_v20 }
 0x3f6   :  { %4894 = vmatprep.subr.bf16.mxu0 %v3959_v12 }
 0x3f9   :  { %4895 = vmatpush1.bf16.msra.mxu0 %v3958_v5 }
 0x3fc   :  { %4897 = vmatmul.mubr.bf16.vlgmr.msra.gmra.mrb[0].mxu0 %v17216_v29 }
 0x3fd   :  { %4906 = vmatprep.mubr.bf16.mxu0 %v17219_v31 }
 0x404   :  { %4907 = vmatmul.mubr.bf16.gmra.mrb[4].mxu0 %v17220_v14 }
 0x405   :  { %4916 = vmatprep.mubr.bf16.mxu0 %v17223_v56  ;;  %v5171_v56 = vlaneseq }
 0x40c   :  { %4917 = vmatmul.mubr.bf16.gmra.mrb[8].mxu0 %v17224_v6 }
 0x40d   :  { %4926 = vmatprep.mubr.bf16.mxu0 %v17227_v17 }
 0x414   :  { %4927 = vmatmul.mubr.bf16.gmra.mrb[12].mxu0 %v17228_v33 }
 0x415   :  { %4936 = vmatprep.mubr.bf16.mxu0 %v17231_v50  ;;  %v13885_v50 = vshrl.u32 %v5171_v56, 7 }
 0x41c   :  { %4937 = vmatmul.mubr.bf16.gmra.mrb[16].mxu0 %v17232_v23 }
 0x41d   :  { %4946 = vmatprep.mubr.bf16.mxu0 %v17235_v9 }
 0x424   :  { %4947 = vmatmul.mubr.bf16.gmra.mrb[20].mxu0 %v17236_v48 }
 0x425   :  { %4956 = vmatprep.mubr.bf16.mxu0 %v17239_v34 }
 0x42c   :  { %4957 = vmatmul.mubr.bf16.gmra.mrb[24].mxu0 %v17240_v2  ;;  %v13895_v2 = vld [vmem:[#allocation10] sm:$0x3] }
 0x42d   :  { %4966 = vmatprep.mubr.bf16.mxu0 %v10655_v7 }
 0x434   :  { %4967 = vmatmul.mubr.bf16.gmra.mrb[28].mxu0 %v10654_v53 }
 0x4cf   :  { %v13813_v24 = vpop.f32.mrb[0].mxu0 }
 0x4d0   :  { %v13815_v27 = vpop.f32.mrb[1].mxu0  ;;  %v4977_v3 = vmul.f32 %v13813_v24, %v13813_v24 }
 0x4d1   :  { %v13817_v61 = vpop.f32.mrb[2].mxu0  ;;  %v4978_v60 = vmul.f32 %v13815_v27, %v13815_v27 }
 0x4d2   :  { %v4979_v54 = vmul.f32 %v13817_v61, %v13817_v61  ;;  %v5009_v15 = vadd.f32 %v13817_v61, %v13813_v24  ;;  %v13825_v7 = vpop.f32.mrb[3].mxu0 }
 0x4d3   :  { %v4980_v25 = vmul.f32 %v13825_v7, %v13825_v7  ;;  %v5030_v53 = vadd.f32 %v13825_v7, %v13815_v27 }
 0x4d4   :  { %v5051_v57 = vadd.f32 %v4979_v54, %v4977_v3  ;;  %v13898_v54 = vsub.s32 1, %v13885_v50 }
 0x4d5   :  { %v5072_v44 = vadd.f32 %v4980_v25, %v4978_v60 }
 0x4d6   :  { %17241 = vst [vmem:[#allocation60_spill] sm:$0xff] %v13898_v54  ;;  %v13906_v25 = vrot.slane %v13895_v2, %v13898_v54 }
 0x4d7   :  { %v13833_v42 = vpop.f32.mrb[4].mxu0 }
 0x4d8   :  { %v4981_v52 = vmul.f32 %v13833_v42, %v13833_v42  ;;  %v5010_v36 = vadd.f32 %v5009_v15, %v13833_v42  ;;  %v13838_v28 = vpop.f32.mrb[5].mxu0  ;;  %v13900_v15 = vld [vmem:[#allocation12] sm:$0x3] }
 0x4d9   :  { %v4982_v41 = vmul.f32 %v13838_v28, %v13838_v28  ;;  %v5031_v18 = vadd.f32 %v5030_v53, %v13838_v28  ;;  %v13843_v63 = vpop.f32.mrb[6].mxu0 }
 0x4da   :  { %v5052_v55 = vadd.f32 %v5051_v57, %v4981_v52  ;;  %v4983_v47 = vmul.f32 %v13843_v63, %v13843_v63  ;;  %v5011_v8 = vadd.f32 %v5010_v36, %v13843_v63  ;;  %v13848_v1 = vpop.f32.mrb[7].mxu0 }
 0x4db   :  { %v5073_v43 = vadd.f32 %v5072_v44, %v4982_v41  ;;  %v4984_v4 = vmul.f32 %v13848_v1, %v13848_v1  ;;  %v5032_v46 = vadd.f32 %v5031_v18, %v13848_v1  ;;  %v13920_v18 = vrot.slane %v13900_v15, %v13898_v54 }
 0x4dc   :  { %v5053_v30 = vadd.f32 %v5052_v55, %v4983_v47 }
 0x4dd   :  { %v5074_v39 = vadd.f32 %v5073_v43, %v4984_v4 }
 0x4df   :  { %v13853_v0 = vpop.f32.mrb[8].mxu0 }
 0x4e0   :  { %v4985_v26 = vmul.f32 %v13853_v0, %v13853_v0  ;;  %v5012_v45 = vadd.f32 %v5011_v8, %v13853_v0  ;;  %v13858_v49 = vpop.f32.mrb[9].mxu0 }
 0x4e1   :  { %v4986_v12 = vmul.f32 %v13858_v49, %v13858_v49  ;;  %v5033_v35 = vadd.f32 %v5032_v46, %v13858_v49  ;;  %v13863_v62 = vpop.f32.mrb[10].mxu0 }
 0x4e2   :  { %v5054_v59 = vadd.f32 %v5053_v30, %v4985_v26  ;;  %v4987_v5 = vmul.f32 %v13863_v62, %v13863_v62  ;;  %v5013_v29 = vadd.f32 %v5012_v45, %v13863_v62  ;;  %v13868_v21 = vpop.f32.mrb[11].mxu0 }
 0x4e3   :  { %v5075_v19 = vadd.f32 %v5074_v39, %v4986_v12  ;;  %v4988_v31 = vmul.f32 %v13868_v21, %v13868_v21  ;;  %v5034_v14 = vadd.f32 %v5033_v35, %v13868_v21 }
 0x4e4   :  { %v5055_v22 = vadd.f32 %v5054_v59, %v4987_v5 }
 0x4e5   :  { %v5076_v20 = vadd.f32 %v5075_v19, %v4988_v31 }
 0x4e7   :  { %v13873_v6 = vpop.f32.mrb[12].mxu0 }
 0x4e8   :  { %v4989_v38 = vmul.f32 %v13873_v6, %v13873_v6  ;;  %v5014_v58 = vadd.f32 %v5013_v29, %v13873_v6  ;;  %v13878_v17 = vpop.f32.mrb[13].mxu0 }
 0x4e9   :  { %v4990_v33 = vmul.f32 %v13878_v17, %v13878_v17  ;;  %v5035_v11 = vadd.f32 %v5034_v14, %v13878_v17  ;;  %v13883_v51 = vpop.f32.mrb[14].mxu0 }
 0x4ea   :  { %v5056_v23 = vadd.f32 %v5055_v22, %v4989_v38  ;;  %v4991_v16 = vmul.f32 %v13883_v51, %v13883_v51  ;;  %v5015_v37 = vadd.f32 %v5014_v58, %v13883_v51  ;;  %v13890_v9 = vpop.f32.mrb[15].mxu0 }
 0x4eb   :  { %v5077_v48 = vadd.f32 %v5076_v20, %v4990_v33  ;;  %v4992_v13 = vmul.f32 %v13890_v9, %v13890_v9  ;;  %v5036_v10 = vadd.f32 %v5035_v11, %v13890_v9 }
 0x4ec   :  { %v5057_v34 = vadd.f32 %v5056_v23, %v4991_v16 }
 0x4ed   :  { %v5078_v3 = vadd.f32 %v5077_v48, %v4992_v13 }
 0x4ef   :  { %v13902_v60 = vpop.f32.mrb[16].mxu0 }
 0x4f0   :  { %v4993_v53 = vmul.f32 %v13902_v60, %v13902_v60  ;;  %v5016_v57 = vadd.f32 %v5015_v37, %v13902_v60  ;;  %v13911_v44 = vpop.f32.mrb[17].mxu0 }
 0x4f1   :  { %v4994_v52 = vmul.f32 %v13911_v44, %v13911_v44  ;;  %v5037_v36 = vadd.f32 %v5036_v10, %v13911_v44  ;;  %v13916_v41 = vpop.f32.mrb[18].mxu0 }
 0x4f2   :  { %v5058_v55 = vadd.f32 %v5057_v34, %v4993_v53  ;;  %v4995_v47 = vmul.f32 %v13916_v41, %v13916_v41  ;;  %v5017_v8 = vadd.f32 %v5016_v57, %v13916_v41  ;;  %v13925_v43 = vpop.f32.mrb[19].mxu0 }
 0x4f3   :  { %v5079_v4 = vadd.f32 %v5078_v3, %v4994_v52  ;;  %v4996_v46 = vmul.f32 %v13925_v43, %v13925_v43  ;;  %v5038_v30 = vadd.f32 %v5037_v36, %v13925_v43 }
 0x4f4   :  { %v5059_v39 = vadd.f32 %v5058_v55, %v4995_v47 }
 0x4f5   :  { %v5080_v26 = vadd.f32 %v5079_v4, %v4996_v46 }
 0x4f7   :  { %v13930_v45 = vpop.f32.mrb[20].mxu0 }
 0x4f8   :  { %v4997_v12 = vmul.f32 %v13930_v45, %v13930_v45  ;;  %v5018_v35 = vadd.f32 %v5017_v8, %v13930_v45  ;;  %v13935_v59 = vpop.f32.mrb[21].mxu0 }
 0x4f9   :  { %v4998_v5 = vmul.f32 %v13935_v59, %v13935_v59  ;;  %v5039_v29 = vadd.f32 %v5038_v30, %v13935_v59  ;;  %v13940_v19 = vpop.f32.mrb[22].mxu0 }
 0x4fa   :  { %v5060_v31 = vadd.f32 %v5059_v39, %v4997_v12  ;;  %v4999_v14 = vmul.f32 %v13940_v19, %v13940_v19  ;;  %v5019_v22 = vadd.f32 %v5018_v35, %v13940_v19  ;;  %v13945_v20 = vpop.f32.mrb[23].mxu0 }
 0x4fb   :  { %v5081_v56 = vadd.f32 %v5080_v26, %v4998_v5  ;;  %v5000_v38 = vmul.f32 %v13945_v20, %v13945_v20  ;;  %v5040_v58 = vadd.f32 %v5039_v29, %v13945_v20 }
 0x4fc   :  { %v5061_v33 = vadd.f32 %v5060_v31, %v4999_v14 }
 0x4fd   :  { %v5082_v11 = vadd.f32 %v5081_v56, %v5000_v38 }
 0x4ff   :  { %v13950_v23 = vpop.f32.mrb[24].mxu0 }
 0x500   :  { %v5001_v16 = vmul.f32 %v13950_v23, %v13950_v23  ;;  %v5020_v37 = vadd.f32 %v5019_v22, %v13950_v23  ;;  %v13955_v48 = vpop.f32.mrb[25].mxu0 }
 0x501   :  { %v5002_v13 = vmul.f32 %v13955_v48, %v13955_v48  ;;  %v5041_v10 = vadd.f32 %v5040_v58, %v13955_v48  ;;  %v13960_v34 = vpop.f32.mrb[26].mxu0 }
 0x502   :  { %v5062_v3 = vadd.f32 %v5061_v33, %v5001_v16  ;;  %v5003_v53 = vmul.f32 %v13960_v34, %v13960_v34  ;;  %v5021_v57 = vadd.f32 %v5020_v37, %v13960_v34  ;;  %v13965_v52 = vpop.f32.mrb[27].mxu0 }
 0x503   :  { %v5083_v36 = vadd.f32 %v5082_v11, %v5002_v13  ;;  %v5004_v55 = vmul.f32 %v13965_v52, %v13965_v52  ;;  %v5042_v47 = vadd.f32 %v5041_v10, %v13965_v52 }
 0x504   :  { %v5063_v8 = vadd.f32 %v5062_v3, %v5003_v53 }
 0x505   :  { %v5084_v4 = vadd.f32 %v5083_v36, %v5004_v55 }
 0x507   :  { %v13970_v46 = vpop.f32.mrb[28].mxu0 }
 0x508   :  { %v5005_v30 = vmul.f32 %v13970_v46, %v13970_v46  ;;  %v5022_v39 = vadd.f32 %v5021_v57, %v13970_v46  ;;  %v13975_v26 = vpop.f32.mrb[29].mxu0 }
 0x509   :  { %v5006_v12 = vmul.f32 %v13975_v26, %v13975_v26  ;;  %v5043_v35 = vadd.f32 %v5042_v47, %v13975_v26  ;;  %v13980_v5 = vpop.f32.mrb[30].mxu0 }
 0x50a   :  { %v5064_v29 = vadd.f32 %v5063_v8, %v5005_v30  ;;  %v5007_v31 = vmul.f32 %v13980_v5, %v13980_v5  ;;  %v5023_v14 = vadd.f32 %v5022_v39, %v13980_v5  ;;  %v13985_v22 = vpop.f32.mrb[31].mxu0 }
 0x50b   :  { %v5085_v56 = vadd.f32 %v5084_v4, %v5006_v12  ;;  %v5008_v38 = vmul.f32 %v13985_v22, %v13985_v22  ;;  %v5044_v58 = vadd.f32 %v5043_v35, %v13985_v22 }
 0x50c   :  { %v5024_v33 = vrot.slane %v5023_v14, 4  ;;  %v5065_v11 = vadd.f32 %v5064_v29, %v5007_v31 }
 0x50d   :  { %v5045_v16 = vrot.slane %v5044_v58, 4  ;;  %v5086_v37 = vadd.f32 %v5085_v56, %v5008_v38 }
 0x50e   :  { %v5025_v13 = vadd.f32 %v5024_v33, %v5023_v14  ;;  %v5066_v10 = vrot.slane %v5065_v11, 4 }
 0x50f   :  { %v5046_v3 = vadd.f32 %v5045_v16, %v5044_v58  ;;  %v5087_v53 = vrot.slane %v5086_v37, 4 }
 0x510   :  { %v5026_v57 = vrot.slane %v5025_v13, 2  ;;  %v5067_v36 = vadd.f32 %v5066_v10, %v5065_v11 }
 0x511   :  { %v5047_v55 = vrot.slane %v5046_v3, 2  ;;  %v5088_v47 = vadd.f32 %v5087_v53, %v5086_v37 }
 0x512   :  { %v5027_v8 = vadd.f32 %v5026_v57, %v5025_v13  ;;  %v5068_v30 = vrot.slane %v5067_v36, 2 }
 0x513   :  { %v5048_v4 = vadd.f32 %v5047_v55, %v5046_v3  ;;  %v5089_v39 = vrot.slane %v5088_v47, 2 }
 0x514   :  { %v5028_v12 = vrot.slane %v5027_v8, 1  ;;  %v5069_v54 = vadd.f32 %v5068_v30, %v5067_v36 }
 0x515   :  { %v5049_v32 = vrot.slane %v5048_v4, 1  ;;  %v5090_v35 = vadd.f32 %v5089_v39, %v5088_v47 }
 0x516   :  { %v5029_v40 = vadd.f32 %v5028_v12, %v5027_v8  ;;  %v5070_v29 = vrot.slane %v5069_v54, 1 }
 0x517   :  { %v5050_v31 = vadd.f32 %v5049_v32, %v5048_v4  ;;  %v5091_v56 = vrot.slane %v5090_v35, 1 }
 0x518   :  { %v5071_v14 = vadd.f32 %v5070_v29, %v5069_v54  ;;  %v13990_v38 = vmul.f32 0.0078125, %v5029_v40 }
 0x519   :  { %v5092_v58 = vadd.f32 %v5091_v56, %v5090_v35  ;;  %v13992_v33 = vmul.f32 0.0078125, %v5050_v31 }
 0x51a   :  { %v5095_v11 = vmul.f32 0.0078125, %v5071_v14  ;;  %v5097_v16 = vmul.f32 %v13990_v38, %v13990_v38  ;;  %v5101_v37 = vsub.f32 %v13813_v24, %v13990_v38  ;;  %v5103_v13 = vsub.f32 %v13817_v61, %v13990_v38 }
 0x51b   :  { %v5105_v32 = vsub.f32 %v13833_v42, %v13990_v38  ;;  %v5107_v40 = vsub.f32 %v13843_v63, %v13990_v38  ;;  %v5109_v54 = vsub.f32 %v13853_v0, %v13990_v38  ;;  %v5111_v10 = vsub.f32 %v13863_v62, %v13990_v38 }
 0x51c   :  { %v5099_v3 = vsub.f32 %v5095_v11, %v5097_v16  ;;  %v5113_v53 = vsub.f32 %v13873_v6, %v13990_v38  ;;  %v5115_v24 = vsub.f32 %v13883_v51, %v13990_v38  ;;  %v5117_v61 = vsub.f32 %v13902_v60, %v13990_v38 }
 0x51d   :  { %v5119_v42 = vsub.f32 %v13916_v41, %v13990_v38  ;;  %v5121_v63 = vsub.f32 %v13930_v45, %v13990_v38  ;;  %v5123_v0 = vsub.f32 %v13940_v19, %v13990_v38  ;;  %v5125_v62 = vsub.f32 %v13950_v23, %v13990_v38  ;;  %v5649_v23 = vld [vmem:[#allocation2 + $0xf0] sm:$0x1f] }
 0x51e   :  { %v5127_v6 = vsub.f32 %v13960_v34, %v13990_v38  ;;  %v5129_v51 = vsub.f32 %v13970_v46, %v13990_v38  ;;  %v5131_v60 = vsub.f32 %v13980_v5, %v13990_v38  ;;  %v5133_v57 = vadd.f32 1e-05, %v5099_v3  ;;  %v5637_v46 = vld [vmem:[#allocation2 + $0xd0] sm:$0x1f] }
 0x51f   :  { %v5096_v41 = vmul.f32 0.0078125, %v5092_v58  ;;  %v5098_v45 = vmul.f32 %v13992_v33, %v13992_v33  ;;  %v5102_v19 = vsub.f32 %v13815_v27, %v13992_v33  ;;  %v14063_v14 = vsub.s32 0, %v13885_v50 }
 0x520   :  { %11688 = vrsqrt.f32 %v5133_v57  ;;  %v17247_v27 = vsub.f32 %v13858_v49, %v13992_v33  ;;  %v17251_v49 = vsub.f32 %v13911_v44, %v13992_v33  ;;  %v17256_v44 = vsub.f32 %v13955_v48, %v13992_v33 }
 0x521   :  { %v5100_v36 = vsub.f32 %v5096_v41, %v5098_v45  ;;  %17242 = vst [vmem:[#allocation62_spill] sm:$0xff] %v14063_v14  ;;  %v5174_v11 = vrot.slane %v13895_v2, %v14063_v14  ;;  %v5218_v16 = vrot.slane %v13900_v15, %v14063_v14 }
 0x523   :  { %v5134_v38 = vadd.f32 1e-05, %v5100_v36 }
 0x525   :  { %11690 = vrsqrt.f32 %v5134_v38 }
 0x52a   :  { %v11689_v58 = vpop.eup %11688 }
 0x52b   :  { %v5137_v3 = vmul.f32 %v11689_v58, %v5101_v37  ;;  %v5139_v57 = vmul.f32 %v11689_v58, %v5103_v13  ;;  %v5141_v41 = vmul.f32 %v11689_v58, %v5105_v32  ;;  %v5143_v45 = vmul.f32 %v11689_v58, %v5107_v40 }
 0x52c   :  { %v5145_v31 = vmul.f32 %v11689_v58, %v5109_v54  ;;  %v5147_v29 = vmul.f32 %v11689_v58, %v5111_v10  ;;  %v5149_v35 = vmul.f32 %v11689_v58, %v5113_v53  ;;  %v5151_v56 = vmul.f32 %v11689_v58, %v5115_v24 }
 0x52d   :  { %v5153_v12 = vmul.f32 %v11689_v58, %v5117_v61  ;;  %v5155_v50 = vmul.f32 %v11689_v58, %v5119_v42  ;;  %v5157_v39 = vmul.f32 %v11689_v58, %v5121_v63  ;;  %v5159_v36 = vmul.f32 %v11689_v58, %v5123_v0 }
 0x52e   :  { %v5161_v4 = vmul.f32 %v11689_v58, %v5125_v62  ;;  %v5163_v30 = vmul.f32 %v11689_v58, %v5127_v6  ;;  %v5165_v8 = vmul.f32 %v11689_v58, %v5129_v51  ;;  %v5167_v2 = vmul.f32 %v11689_v58, %v5131_v60 }
 0x52f   :  { %v5181_v47 = vmul.f32 %v5174_v11, %v5137_v3  ;;  %v5183_v55 = vmul.f32 %v5174_v11, %v5139_v57  ;;  %v5185_v15 = vmul.f32 %v5174_v11, %v5141_v41  ;;  %v5187_v38 = vmul.f32 %v5174_v11, %v5143_v45  ;;  %v14069_v58 = vpop.eup %11690 }
 0x530   :  { %v5189_v37 = vmul.f32 %v5174_v11, %v5145_v31  ;;  %v5191_v13 = vmul.f32 %v5174_v11, %v5147_v29  ;;  %v5193_v32 = vmul.f32 %v5174_v11, %v5149_v35  ;;  %v5195_v40 = vmul.f32 %v5174_v11, %v5151_v56 }
 0x531   :  { %v5197_v54 = vmul.f32 %v5174_v11, %v5153_v12  ;;  %v5199_v10 = vmul.f32 %v5174_v11, %v5155_v50  ;;  %v5201_v53 = vmul.f32 %v5174_v11, %v5157_v39  ;;  %v5203_v24 = vmul.f32 %v5174_v11, %v5159_v36 }
 0x532   :  { %v5205_v61 = vmul.f32 %v5174_v11, %v5161_v4  ;;  %v5207_v42 = vmul.f32 %v5174_v11, %v5163_v30  ;;  %v5209_v63 = vmul.f32 %v5174_v11, %v5165_v8  ;;  %v5211_v0 = vmul.f32 %v5174_v11, %v5167_v2 }
 0x533   :  { %v5225_v62 = vadd.f32 %v5218_v16, %v5181_v47  ;;  %v5227_v6 = vadd.f32 %v5218_v16, %v5183_v55  ;;  %v5229_v51 = vadd.f32 %v5218_v16, %v5185_v15  ;;  %v5231_v60 = vadd.f32 %v5218_v16, %v5187_v38 }
 0x534   :  { %v5233_v3 = vadd.f32 %v5218_v16, %v5189_v37  ;;  %v5235_v57 = vadd.f32 %v5218_v16, %v5191_v13  ;;  %v5237_v31 = vadd.f32 %v5218_v16, %v5193_v32  ;;  %v5239_v29 = vadd.f32 %v5218_v16, %v5195_v40 }
 0x535   :  { %v5241_v35 = vadd.f32 %v5218_v16, %v5197_v54  ;;  %v5243_v56 = vadd.f32 %v5218_v16, %v5199_v10  ;;  %v5245_v12 = vadd.f32 %v5218_v16, %v5201_v53  ;;  %v5247_v41 = vadd.f32 %v5218_v16, %v5203_v24 }
 0x536   :  { %v5249_v39 = vadd.f32 %v5218_v16, %v5205_v61  ;;  %v5251_v45 = vadd.f32 %v5218_v16, %v5207_v42  ;;  %v5253_v4 = vadd.f32 %v5218_v16, %v5209_v63  ;;  %v5255_v30 = vadd.f32 %v5218_v16, %v5211_v0 }
 0x537   :  { %v5257_v8 = vmax.f32 %v5225_v62, 0.0  ;;  %v5259_v11 = vmax.f32 %v5227_v6, 0.0  ;;  %v5261_v47 = vmax.f32 %v5229_v51, 0.0  ;;  %v5263_v55 = vmax.f32 %v5231_v60, 0.0 }
 0x538   :  { %v5265_v50 = vmax.f32 %v5233_v3, 0.0  ;;  %v5267_v36 = vmax.f32 %v5235_v57, 0.0  ;;  %v5269_v2 = vmax.f32 %v5237_v31, 0.0  ;;  %v5271_v15 = vmax.f32 %v5239_v29, 0.0 }
 0x539   :  { %v5273_v38 = vmax.f32 %v5241_v35, 0.0  ;;  %v5275_v37 = vmax.f32 %v5243_v56, 0.0  ;;  %v5277_v13 = vmax.f32 %v5245_v12, 0.0  ;;  %v5279_v32 = vmax.f32 %v5247_v41, 0.0 }
 0x53a   :  { %v5281_v40 = vmax.f32 %v5249_v39, 0.0  ;;  %v5283_v54 = vmax.f32 %v5251_v45, 0.0  ;;  %v5285_v10 = vmax.f32 %v5253_v4, 0.0  ;;  %v5287_v53 = vmax.f32 %v5255_v30, 0.0 }
 0x53b   :  { %v5289_v24 = vpack.c.bf16 %v5257_v8, %v5257_v8  ;;  %v5291_v61 = vpack.c.bf16 %v5259_v11, %v5259_v11  ;;  %v5293_v42 = vpack.c.bf16 %v5261_v47, %v5261_v47  ;;  %v5295_v16 = vpack.c.bf16 %v5263_v55, %v5263_v55 }
 0x53c   :  { %v5297_v63 = vpack.c.bf16 %v5265_v50, %v5265_v50  ;;  %v5299_v0 = vpack.c.bf16 %v5267_v36, %v5267_v36  ;;  %v5301_v62 = vpack.c.bf16 %v5269_v2, %v5269_v2  ;;  %v5303_v6 = vpack.c.bf16 %v5271_v15, %v5271_v15 }
 0x53d   :  { %v5305_v51 = vpack.c.bf16 %v5273_v38, %v5273_v38  ;;  %v5307_v60 = vpack.c.bf16 %v5275_v37, %v5275_v37  ;;  %v5309_v3 = vpack.c.bf16 %v5277_v13, %v5277_v13  ;;  %v14071_v57 = vpack.c.bf16 %v5279_v32, %v5279_v32 }
 0x53e   :  { %v14073_v31 = vpack.c.bf16 %v5281_v40, %v5281_v40  ;;  %v14075_v29 = vpack.c.bf16 %v5283_v54, %v5283_v54  ;;  %v14077_v35 = vpack.c.bf16 %v5285_v10, %v5285_v10  ;;  %v14079_v56 = vpack.c.bf16 %v5287_v53, %v5287_v53 }
 0x53f   :  { %v5322_v12 = vshrl.u32 %v5289_v24, 16  ;;  %v5325_v41 = vshll.u32 %v5289_v24, 16  ;;  %v5336_v39 = vshrl.u32 %v5291_v61, 16  ;;  %v5339_v45 = vshll.u32 %v5291_v61, 16 }
 0x540   :  { %v5350_v4 = vshrl.u32 %v5293_v42, 16  ;;  %v5353_v30 = vshll.u32 %v5293_v42, 16  ;;  %v5364_v8 = vshrl.u32 %v5295_v16, 16  ;;  %v5367_v11 = vshll.u32 %v5295_v16, 16 }
 0x541   :  { %v5324_v47 = vrot.slane %v5322_v12, 7  ;;  %v5338_v55 = vrot.slane %v5336_v39, 7  ;;  %v5378_v50 = vshrl.u32 %v5297_v63, 16  ;;  %v5381_v36 = vshll.u32 %v5297_v63, 16 }
 0x542   :  { %v5352_v2 = vrot.slane %v5350_v4, 7  ;;  %v5366_v15 = vrot.slane %v5364_v8, 7  ;;  %v5392_v38 = vshrl.u32 %v5299_v0, 16  ;;  %v5395_v37 = vshll.u32 %v5299_v0, 16 }
 0x543   :  { %v5327_v13 = vor.u32 %v5325_v41, %v5324_v47  ;;  %v5341_v32 = vor.u32 %v5339_v45, %v5338_v55  ;;  %v5380_v40 = vrot.slane %v5378_v50, 7  ;;  %v5406_v54 = vshrl.u32 %v5301_v62, 16  ;;  %v5577_v50 = vld [vmem:[#allocation2 + $0x10] sm:$0x1f] }
 0x544   :  { %v5355_v10 = vor.u32 %v5353_v30, %v5352_v2  ;;  %v14081_v53 = vor.u32 %v5367_v11, %v5366_v15  ;;  %v5394_v24 = vrot.slane %v5392_v38, 7  ;;  %v5409_v61 = vshll.u32 %v5301_v62, 16  ;;  %v5583_v38 = vld [vmem:[#allocation2 + $0x20] sm:$0x1f] }
 0x545   :  { %v14083_v42 = vor.u32 %v5381_v36, %v5380_v40  ;;  %v5408_v16 = vrot.slane %v5406_v54, 7  ;;  %v5420_v12 = vshrl.u32 %v5303_v6, 16  ;;  %v5423_v39 = vshll.u32 %v5303_v6, 16 }
 0x546   :  { %v14085_v5 = vor.u32 %v5395_v37, %v5394_v24  ;;  %v5434_v63 = vshrl.u32 %v5305_v51, 16  ;;  %v5437_v4 = vshll.u32 %v5305_v51, 16  ;;  %v5448_v8 = vshrl.u32 %v5307_v60, 16  ;;  %v5589_v51 = vld [vmem:[#allocation2 + $0x30] sm:$0x1f] }
 0x547   :  { %v14087_v0 = vor.u32 %v5409_v61, %v5408_v16  ;;  %v5422_v41 = vrot.slane %v5420_v12, 7  ;;  %v5451_v45 = vshll.u32 %v5307_v60, 16  ;;  %v5462_v47 = vshrl.u32 %v5309_v3, 16  ;;  %v5595_v24 = vld [vmem:[#allocation2 + $0x40] sm:$0x1f] }
 0x548   :  { %v5436_v30 = vrot.slane %v5434_v63, 7  ;;  %v5450_v11 = vrot.slane %v5448_v8, 7  ;;  %v5465_v55 = vshll.u32 %v5309_v3, 16  ;;  %v5476_v62 = vshrl.u32 %v14071_v57, 16  ;;  %v5601_v61 = vld [vmem:[#allocation2 + $0x50] sm:$0x1f] }
 0x549   :  { %v5425_v36 = vor.u32 %v5423_v39, %v5422_v41  ;;  %v5464_v2 = vrot.slane %v5462_v47, 7  ;;  %v5479_v6 = vshll.u32 %v14071_v57, 16  ;;  %v5490_v15 = vshrl.u32 %v14073_v31, 16  ;;  %v5607_v16 = vld [vmem:[#allocation2 + $0x60] sm:$0x1f] }
 0x54a   :  { %v5439_v37 = vor.u32 %v5437_v4, %v5436_v30  ;;  %v5453_v40 = vor.u32 %v5451_v45, %v5450_v11  ;;  %v5478_v54 = vrot.slane %v5476_v62, 7  ;;  %v5493_v60 = vshll.u32 %v14073_v31, 16  ;;  %v5613_v8 = vld [vmem:[#allocation2 + $0x70] sm:$0x1f]  ;;  %v5619_v57 = vld [vmem:[#allocation2 + $0x80] sm:$0x1f] }
 0x54b   :  { %v5467_v3 = vor.u32 %v5465_v55, %v5464_v2  ;;  %v5492_v12 = vrot.slane %v5490_v15, 7  ;;  %v5504_v63 = vshrl.u32 %v14075_v29, 16  ;;  %v5507_v39 = vshll.u32 %v14075_v29, 16  ;;  %v5625_v30 = vld [vmem:[#allocation2 + $0xb0] sm:$0x1f] }
 0x54c   :  { %v5481_v41 = vor.u32 %v5479_v6, %v5478_v54  ;;  %v5518_v47 = vshrl.u32 %v14077_v35, 16  ;;  %v5521_v4 = vshll.u32 %v14077_v35, 16  ;;  %v5532_v45 = vshrl.u32 %v14079_v56, 16  ;;  %v5631_v15 = vld [vmem:[#allocation2 + $0xc0] sm:$0x1f] }
 0x54d   :  { %v5495_v31 = vor.u32 %v5493_v60, %v5492_v12  ;;  %v5506_v11 = vrot.slane %v5504_v63, 7  ;;  %v5535_v62 = vshll.u32 %v14079_v56, 16  ;;  %v5578_v2 = vsel %vm12123_vm12, %v5327_v13, %v5577_v50  ;;  %v5643_v54 = vld [vmem:[#allocation2 + $0xe0] sm:$0x1f] }
 0x54e   :  { %v5520_v29 = vrot.slane %v5518_v47, 7  ;;  %v5534_v34 = vrot.slane %v5532_v45, 7  ;;  %5579 = vst [vmem:[#allocation2 + $0x10] sm:$0x1f] %v5578_v2  ;;  %v5584_v6 = vsel %vm12123_vm12, %v5341_v32, %v5583_v38  ;;  %v5590_v35 = vsel %vm12123_vm12, %v5355_v10, %v5589_v51  ;;  %v5655_v50 = vld [vmem:[#allocation2 + $0x100] sm:$0x1f] }
 0x54f   :  { %v5509_v60 = vor.u32 %v5507_v39, %v5506_v11  ;;  %5585 = vst [vmem:[#allocation2 + $0x20] sm:$0x1f] %v5584_v6  ;;  %5591 = vst [vmem:[#allocation2 + $0x30] sm:$0x1f] %v5590_v35  ;;  %v5596_v56 = vsel %vm12123_vm12, %v14081_v53, %v5595_v24  ;;  %v5602_v13 = vsel %vm12123_vm12, %v14083_v42, %v5601_v61  ;;  %v5661_v38 = vld [vmem:[#allocation2 + $0x110] sm:$0x1f] }
 0x550   :  { %v5608_v32 = vsel %vm12123_vm12, %v14085_v5, %v5607_v16  ;;  %v5667_v10 = vld [vmem:[#allocation2 + $0x120] sm:$0x1f]  ;;  %v5523_v51 = vor.u32 %v5521_v4, %v5520_v29  ;;  %v5537_v12 = vor.u32 %v5535_v62, %v5534_v34  ;;  %5597 = vst [vmem:[#allocation2 + $0x40] sm:$0x1f] %v5596_v56  ;;  %5603 = vst [vmem:[#allocation2 + $0x50] sm:$0x1f] %v5602_v13 }
 0x551   :  { %5609 = vst [vmem:[#allocation2 + $0x60] sm:$0x1f] %v5608_v32  ;;  %v5614_v53 = vsel %vm12123_vm12, %v14087_v0, %v5613_v8  ;;  %v5620_v24 = vsel %vm12123_vm12, %v5425_v36, %v5619_v57  ;;  %v5626_v5 = vsel %vm12123_vm12, %v5439_v37, %v5625_v30  ;;  %v5632_v42 = vsel %vm12123_vm12, %v5453_v40, %v5631_v15 }
 0x552   :  { %5615 = vst [vmem:[#allocation2 + $0x70] sm:$0x1f] %v5614_v53  ;;  %5621 = vst [vmem:[#allocation2 + $0x80] sm:$0x1f] %v5620_v24  ;;  %v5638_v34 = vsel %vm12123_vm12, %v5467_v3, %v5637_v46  ;;  %v5644_v61 = vsel %vm12123_vm12, %v5481_v41, %v5643_v54  ;;  %v5650_v0 = vsel %vm12123_vm12, %v5495_v31, %v5649_v23 }
 0x553   :  { %5627 = vst [vmem:[#allocation2 + $0xb0] sm:$0x1f] %v5626_v5  ;;  %5633 = vst [vmem:[#allocation2 + $0xc0] sm:$0x1f] %v5632_v42  ;;  %v5656_v36 = vsel %vm12123_vm12, %v5509_v60, %v5655_v50  ;;  %v5662_v37 = vsel %vm12123_vm12, %v5523_v51, %v5661_v38  ;;  %v5668_v40 = vsel %vm12123_vm12, %v5537_v12, %v5667_v10 }
 0x554   :  { %5639 = vst [vmem:[#allocation2 + $0xd0] sm:$0x1f] %v5638_v34  ;;  %5645 = vst [vmem:[#allocation2 + $0xe0] sm:$0x1f] %v5644_v61  ;;  %v5138_v46 = vmul.f32 %v14069_v58, %v5102_v19  ;;  %v17244_v23 = vsub.f32 %v13825_v7, %v13992_v33  ;;  %v17245_v3 = vsub.f32 %v13838_v28, %v13992_v33 }
 0x555   :  { %5651 = vst [vmem:[#allocation2 + $0xf0] sm:$0x1f] %v5650_v0  ;;  %5657 = vst [vmem:[#allocation2 + $0x100] sm:$0x1f] %v5656_v36  ;;  %v17246_v39 = vsub.f32 %v13848_v1, %v13992_v33  ;;  %v5146_v19 = vmul.f32 %v14069_v58, %v17247_v27  ;;  %v17248_v7 = vsub.f32 %v13868_v21, %v13992_v33  ;;  %v14167_v4 = vld [vmem:[#allocation2] ss:$16 sps:$4 sm:$0xff]  }
 0x556   :  { %5663 = vst [vmem:[#allocation2 + $0x110] sm:$0x1f] %v5662_v37  ;;  %5669 = vst [vmem:[#allocation2 + $0x120] sm:$0x1f] %v5668_v40  ;;  %v5140_v16 = vmul.f32 %v14069_v58, %v17244_v23  ;;  %v5142_v63 = vmul.f32 %v14069_v58, %v17245_v3  ;;  %v17249_v28 = vsub.f32 %v13878_v17, %v13992_v33  ;;  %v14185_v62 = vld [vmem:[#allocation2 + $0x20] ss:$16 sps:$4 sm:$0xff]  }
 0x557   :  { %v5144_v8 = vmul.f32 %v14069_v58, %v17246_v39  ;;  %v5148_v57 = vmul.f32 %v14069_v58, %v17248_v7  ;;  %v17250_v1 = vsub.f32 %v13890_v9, %v13992_v33  ;;  %v5154_v45 = vmul.f32 %v14069_v58, %v17251_v49  ;;  %17255 = vst [vmem:[#allocation82_spill] sm:$0xff] %v14185_v62  ;;  %v14207_v60 = vld [vmem:[#allocation2 + $0x40] ss:$16 sps:$4 sm:$0xff]  }
 0x558   :  { %v5150_v41 = vmul.f32 %v14069_v58, %v17249_v28  ;;  %v17252_v21 = vsub.f32 %v13925_v43, %v13992_v33  ;;  %v17253_v17 = vsub.f32 %v13935_v59, %v13992_v33  ;;  %v17254_v9 = vsub.f32 %v13945_v20, %v13992_v33  ;;  %17260 = vst [vmem:[#allocation85_spill] sm:$0xff] %v14207_v60  ;;  %v14249_v28 = vld [vmem:[#allocation2 + $0x30] ss:$16 sps:$4 sm:$0xff]  }
 0x559   :  { %v5152_v47 = vmul.f32 %v14069_v58, %v17250_v1  ;;  %v5162_v2 = vmul.f32 %v14069_v58, %v17256_v44  ;;  %v17257_v43 = vsub.f32 %v13965_v52, %v13992_v33  ;;  %v17258_v59 = vsub.f32 %v13975_v26, %v13992_v33  ;;  %v14209_v56 = vld [vmem:[#allocation2 + $0x60] ss:$16 sps:$4 sm:$0xff]   ;;  %17267 = vst [vmem:[#allocation51_spill] sm:$0xff] %v14249_v28 }
 0x55a   :  { %v5156_v30 = vmul.f32 %v14069_v58, %v17252_v21  ;;  %v5158_v31 = vmul.f32 %v14069_v58, %v17253_v17  ;;  %v5160_v11 = vmul.f32 %v14069_v58, %v17254_v9  ;;  %v17259_v20 = vsub.f32 %v13985_v22, %v13992_v33  ;;  %17261 = vst [vmem:[#allocation125_spill] sm:$0xff] %v14209_v56  ;;  %v14223_v24 = vld [vmem:[#allocation2 + $0xa0] ss:$16 sps:$4 sm:$0xff]  }
 0x55b   :  { %v5164_v15 = vmul.f32 %v14069_v58, %v17257_v43  ;;  %v5166_v29 = vmul.f32 %v14069_v58, %v17258_v59  ;;  %v5182_v35 = vmul.f32 %v13906_v25, %v5138_v46  ;;  %v5184_v48 = vmul.f32 %v13906_v25, %v5140_v16  ;;  %17262 = vst [vmem:[#allocation145_spill] sm:$0xff] %v14223_v24  ;;  %v14225_v5 = vld [vmem:[#allocation2 + $0xc0] ss:$16 sps:$4 sm:$0xff]  }
 0x55c   :  { %v5168_v6 = vmul.f32 %v14069_v58, %v17259_v20  ;;  %v5186_v54 = vmul.f32 %v13906_v25, %v5142_v63  ;;  %v5188_v52 = vmul.f32 %v13906_v25, %v5144_v8  ;;  %v5190_v26 = vmul.f32 %v13906_v25, %v5146_v19  ;;  %17263 = vst [vmem:[#allocation147_spill] sm:$0xff] %v14225_v5  ;;  %v14231_v36 = vld [vmem:[#allocation2 + $0xe0] ss:$16 sps:$4 sm:$0xff]  }
 0x55d   :  { %v5192_v13 = vmul.f32 %v13906_v25, %v5148_v57  ;;  %v5194_v22 = vmul.f32 %v13906_v25, %v5150_v41  ;;  %v5196_v33 = vmul.f32 %v13906_v25, %v5152_v47  ;;  %v5198_v58 = vmul.f32 %v13906_v25, %v5154_v45  ;;  %17264 = vst [vmem:[#allocation30_spill] sm:$0xff] %v14231_v36  ;;  %v14233_v37 = vld [vmem:[#allocation2 + $0x100] ss:$16 sps:$4 sm:$0xff]  }
 0x55e   :  { %v5200_v32 = vmul.f32 %v13906_v25, %v5156_v30  ;;  %v5202_v50 = vmul.f32 %v13906_v25, %v5158_v31  ;;  %v5204_v38 = vmul.f32 %v13906_v25, %v5160_v11  ;;  %v5206_v10 = vmul.f32 %v13906_v25, %v5162_v2  ;;  %17265 = vst [vmem:[#allocation37_spill] sm:$0xff] %v14233_v37  ;;  %v14247_v57 = vld [vmem:[#allocation2 + $0x10] ss:$16 sps:$4 sm:$0xff]  }
 0x55f   :  { %v5208_v51 = vmul.f32 %v13906_v25, %v5164_v15  ;;  %v5210_v12 = vmul.f32 %v13906_v25, %v5166_v29  ;;  %v5212_v53 = vmul.f32 %v13906_v25, %v5168_v6  ;;  %v5226_v42 = vadd.f32 %v13920_v18, %v5182_v35  ;;  %17266 = vst [vmem:[#allocation46_spill] sm:$0xff] %v14247_v57  ;;  %v14251_v41 = vld [vmem:[#allocation2 + $0x50] ss:$16 sps:$4 sm:$0xff]  }
 0x560   :  { %v5228_v34 = vadd.f32 %v13920_v18, %v5184_v48  ;;  %v5230_v61 = vadd.f32 %v13920_v18, %v5186_v54  ;;  %v5232_v0 = vadd.f32 %v13920_v18, %v5188_v52  ;;  %v5234_v40 = vadd.f32 %v13920_v18, %v5190_v26  ;;  %17268 = vst [vmem:[#allocation70_spill] sm:$0xff] %v14251_v41  ;;  %v14253_v1 = vld [vmem:[#allocation2 + $0x70] ss:$16 sps:$4 sm:$0xff]  }
 0x561   :  { %v5236_v25 = vadd.f32 %v13920_v18, %v5192_v13  ;;  %v5238_v46 = vadd.f32 %v13920_v18, %v5194_v22  ;;  %v5240_v23 = vadd.f32 %v13920_v18, %v5196_v33  ;;  %v5242_v16 = vadd.f32 %v13920_v18, %v5198_v58  ;;  %17269 = vst [vmem:[#allocation76_spill] sm:$0xff] %v14253_v1  ;;  %v14255_v47 = vld [vmem:[#allocation2 + $0xb0] ss:$16 sps:$4 sm:$0xff]  }
 0x562   :  { %v5244_v3 = vadd.f32 %v13920_v18, %v5200_v32  ;;  %v5246_v63 = vadd.f32 %v13920_v18, %v5202_v50  ;;  %v5248_v39 = vadd.f32 %v13920_v18, %v5204_v38  ;;  %v5250_v8 = vadd.f32 %v13920_v18, %v5206_v10  ;;  %17270 = vst [vmem:[#allocation91_spill] sm:$0xff] %v14255_v47  ;;  %v14257_v49 = vld [vmem:[#allocation2 + $0xd0] ss:$16 sps:$4 sm:$0xff]  }
 0x563   :  { %v5252_v27 = vadd.f32 %v13920_v18, %v5208_v51  ;;  %v5254_v19 = vadd.f32 %v13920_v18, %v5210_v12  ;;  %v5256_v7 = vadd.f32 %v13920_v18, %v5212_v53  ;;  %17271 = vst [vmem:[#allocation95_spill] sm:$0xff] %v14257_v49  ;;  %v14259_v45 = vld [vmem:[#allocation2 + $0xf0] ss:$16 sps:$4 sm:$0xff]   ;;  %v5258_v43 = vmax.f32 %v5226_v42, 0.0 }
 0x564   :  { %17272 = vst [vmem:[#allocation100_spill] sm:$0xff] %v14259_v45  ;;  %v14261_v21 = vld [vmem:[#allocation2 + $0x110] ss:$16 sps:$4 sm:$0xff]   ;;  %v5260_v15 = vmax.f32 %v5228_v34, 0.0  ;;  %v5262_v59 = vmax.f32 %v5230_v61, 0.0  ;;  %v5264_v29 = vmax.f32 %v5232_v0, 0.0 }
 0x565   :  { %17273 = vst [vmem:[#allocation120_spill] sm:$0xff] %v14261_v21  ;;  %v14263_v30 = vld [vmem:[#allocation2 + $0x20] ss:$16 sps:$4 sm:$0xff]   ;;  %v5266_v20 = vmax.f32 %v5234_v40, 0.0  ;;  %v5268_v6 = vmax.f32 %v5236_v25, 0.0  ;;  %v5270_v35 = vmax.f32 %v5238_v46, 0.0  ;;  %v5290_v50 = vpack.c.bf16 %v5258_v43, %v5258_v43 }
 0x566   :  { %17274 = vst [vmem:[#allocation129_spill] sm:$0xff] %v14263_v30  ;;  %v14265_v17 = vld [vmem:[#allocation2 + $0x40] ss:$16 sps:$4 sm:$0xff]   ;;  %v5272_v48 = vmax.f32 %v5240_v23, 0.0  ;;  %v5274_v54 = vmax.f32 %v5242_v16, 0.0  ;;  %v5276_v52 = vmax.f32 %v5244_v3, 0.0  ;;  %v5292_v38 = vpack.c.bf16 %v5260_v15, %v5260_v15 }
 0x567   :  { %17275 = vst [vmem:[#allocation138_spill] sm:$0xff] %v14265_v17  ;;  %v14267_v18 = vld [vmem:[#allocation2 + $0x60] ss:$16 sps:$4 sm:$0xff]   ;;  %v5278_v26 = vmax.f32 %v5246_v63, 0.0  ;;  %v5280_v13 = vmax.f32 %v5248_v39, 0.0  ;;  %v5282_v22 = vmax.f32 %v5250_v8, 0.0  ;;  %v5294_v10 = vpack.c.bf16 %v5262_v59, %v5262_v59 }
 0x568   :  { %17276 = vst [vmem:[#allocation153_spill] sm:$0xff] %v14267_v18  ;;  %v14269_v31 = vld [vmem:[#allocation2 + $0x80] ss:$16 sps:$4 sm:$0xff]   ;;  %v5284_v33 = vmax.f32 %v5252_v27, 0.0  ;;  %v5286_v58 = vmax.f32 %v5254_v19, 0.0  ;;  %v5288_v32 = vmax.f32 %v5256_v7, 0.0  ;;  %v5296_v51 = vpack.c.bf16 %v5264_v29, %v5264_v29 }
 0x569   :  { %17277 = vst [vmem:[#allocation158_spill] sm:$0xff] %v14269_v31  ;;  %v14271_v9 = vld [vmem:[#allocation2 + $0xc0] ss:$16 sps:$4 sm:$0xff]   ;;  %v5298_v12 = vpack.c.bf16 %v5266_v20, %v5266_v20  ;;  %v5300_v53 = vpack.c.bf16 %v5268_v6, %v5268_v6  ;;  %v5302_v42 = vpack.c.bf16 %v5270_v35, %v5270_v35  ;;  %v5304_v34 = vpack.c.bf16 %v5272_v48, %v5272_v48 }
 0x56a   :  { %17278 = vst [vmem:[#allocation31_spill] sm:$0xff] %v14271_v9  ;;  %v14273_v11 = vld [vmem:[#allocation2 + $0xe0] ss:$16 sps:$4 sm:$0xff]   ;;  %v5306_v61 = vpack.c.bf16 %v5274_v54, %v5274_v54  ;;  %v5308_v0 = vpack.c.bf16 %v5276_v52, %v5276_v52  ;;  %v5310_v40 = vpack.c.bf16 %v5278_v26, %v5278_v26  ;;  %v14279_v25 = vpack.c.bf16 %v5280_v13, %v5280_v13 }
 0x56b   :  { %17279 = vst [vmem:[#allocation34_spill] sm:$0xff] %v14273_v11  ;;  %v14275_v44 = vld [vmem:[#allocation2 + $0x100] ss:$16 sps:$4 sm:$0xff]   ;;  %v14281_v46 = vpack.c.bf16 %v5282_v22, %v5282_v22  ;;  %v14283_v23 = vpack.c.bf16 %v5284_v33, %v5284_v33  ;;  %v14285_v16 = vpack.c.bf16 %v5286_v58, %v5286_v58  ;;  %v14287_v3 = vpack.c.bf16 %v5288_v32, %v5288_v32 }
 0x56c   :  { %17280 = vst [vmem:[#allocation44_spill] sm:$0xff] %v14275_v44  ;;  %v14277_v2 = vld [vmem:[#allocation2 + $0x120] ss:$16 sps:$4 sm:$0xff]   ;;  %v5329_v63 = vshrl.u32 %v5290_v50, 16  ;;  %v5332_v39 = vshll.u32 %v5290_v50, 16  ;;  %v5343_v8 = vshrl.u32 %v5292_v38, 16 }
 0x56d   :  { %17281 = vst [vmem:[#allocation48_spill] sm:$0xff] %v14277_v2  ;;  %v5346_v27 = vshll.u32 %v5292_v38, 16  ;;  %v5357_v19 = vshrl.u32 %v5294_v10, 16  ;;  %v5360_v7 = vshll.u32 %v5294_v10, 16  ;;  %v5371_v43 = vshrl.u32 %v5296_v51, 16 }
 0x56e   :  { %v5374_v15 = vshll.u32 %v5296_v51, 16  ;;  %v5331_v59 = vrot.slane %v5329_v63, 7  ;;  %v5345_v29 = vrot.slane %v5343_v8, 7  ;;  %v5385_v20 = vshrl.u32 %v5298_v12, 16  ;;  %v5658_v44 = vld [vmem:[#allocation2 + $0x108] sm:$0x1f] }
 0x56f   :  { %v5388_v6 = vshll.u32 %v5298_v12, 16  ;;  %v5359_v35 = vrot.slane %v5357_v19, 7  ;;  %v5373_v48 = vrot.slane %v5371_v43, 7  ;;  %v5399_v54 = vshrl.u32 %v5300_v53, 16 }
 0x570   :  { %v5402_v52 = vshll.u32 %v5300_v53, 16  ;;  %v5334_v26 = vor.u32 %v5332_v39, %v5331_v59  ;;  %v14289_v13 = vor.u32 %v5346_v27, %v5345_v29  ;;  %v5387_v22 = vrot.slane %v5385_v20, 7 }
 0x571   :  { %v5413_v33 = vshrl.u32 %v5302_v42, 16  ;;  %v14291_v58 = vor.u32 %v5360_v7, %v5359_v35  ;;  %v14293_v32 = vor.u32 %v5374_v15, %v5373_v48  ;;  %v5401_v50 = vrot.slane %v5399_v54, 7 }
 0x572   :  { %v5416_v38 = vshll.u32 %v5302_v42, 16  ;;  %v14295_v10 = vor.u32 %v5388_v6, %v5387_v22  ;;  %v5427_v63 = vshrl.u32 %v5304_v34, 16  ;;  %v5430_v12 = vshll.u32 %v5304_v34, 16  ;;  %v5580_v6 = vld [vmem:[#allocation2 + $0x18] sm:$0x1f] }
 0x573   :  { %v5415_v51 = vrot.slane %v5413_v33, 7  ;;  %v14297_v8 = vor.u32 %v5402_v52, %v5401_v50  ;;  %v5441_v19 = vshrl.u32 %v5306_v61, 16  ;;  %v5444_v53 = vshll.u32 %v5306_v61, 16  ;;  %v5586_v52 = vld [vmem:[#allocation2 + $0x28] sm:$0x1f] }
 0x574   :  { %v5455_v39 = vshrl.u32 %v5308_v0, 16  ;;  %v5429_v43 = vrot.slane %v5427_v63, 7  ;;  %v5458_v59 = vshll.u32 %v5308_v0, 16  ;;  %v5469_v7 = vshrl.u32 %v5310_v40, 16  ;;  %v5592_v61 = vld [vmem:[#allocation2 + $0x38] sm:$0x1f] }
 0x575   :  { %v14299_v27 = vor.u32 %v5416_v38, %v5415_v51  ;;  %v5443_v29 = vrot.slane %v5441_v19, 7  ;;  %v5472_v20 = vshll.u32 %v5310_v40, 16  ;;  %v5483_v42 = vshrl.u32 %v14279_v25, 16  ;;  %v5598_v38 = vld [vmem:[#allocation2 + $0x48] sm:$0x1f] }
 0x576   :  { %v5457_v15 = vrot.slane %v5455_v39, 7  ;;  %v5432_v35 = vor.u32 %v5430_v12, %v5429_v43  ;;  %v5471_v48 = vrot.slane %v5469_v7, 7  ;;  %v5486_v34 = vshll.u32 %v14279_v25, 16  ;;  %v5604_v51 = vld [vmem:[#allocation2 + $0x58] sm:$0x1f] }
 0x577   :  { %v5497_v54 = vshrl.u32 %v14281_v46, 16  ;;  %v5446_v22 = vor.u32 %v5444_v53, %v5443_v29  ;;  %v5485_v50 = vrot.slane %v5483_v42, 7  ;;  %v5500_v0 = vshll.u32 %v14281_v46, 16  ;;  %v5610_v63 = vld [vmem:[#allocation2 + $0x68] sm:$0x1f] }
 0x578   :  { %v5460_v33 = vor.u32 %v5458_v59, %v5457_v15  ;;  %v5474_v40 = vor.u32 %v5472_v20, %v5471_v48  ;;  %v5511_v39 = vshrl.u32 %v14283_v23, 16  ;;  %v5514_v12 = vshll.u32 %v14283_v23, 16  ;;  %v5616_v43 = vld [vmem:[#allocation2 + $0x78] sm:$0x1f]  ;;  %v5622_v25 = vld [vmem:[#allocation2 + $0x88] sm:$0x1f] }
 0x579   :  { %v5499_v19 = vrot.slane %v5497_v54, 7  ;;  %v5488_v7 = vor.u32 %v5486_v34, %v5485_v50  ;;  %v5525_v14 = vshrl.u32 %v14285_v16, 16  ;;  %v5528_v53 = vshll.u32 %v14285_v16, 16  ;;  %v5628_v29 = vld [vmem:[#allocation2 + $0xb8] sm:$0x1f] }
 0x57a   :  { %v5539_v59 = vshrl.u32 %v14287_v3, 16  ;;  %v5634_v46 = vld [vmem:[#allocation2 + $0xc8] sm:$0x1f]  ;;  %v5640_v15 = vld [vmem:[#allocation2 + $0xd8] sm:$0x1f]  ;;  %v5513_v20 = vrot.slane %v5511_v39, 7  ;;  %v5581_v23 = vsel %vm12123_vm12, %v5334_v26, %v5580_v6  ;;  %v5587_v16 = vsel %vm12123_vm12, %v14289_v13, %v5586_v52 }
 0x57b   :  { %v5646_v42 = vld [vmem:[#allocation2 + $0xe8] sm:$0x1f]  ;;  %v5502_v2 = vor.u32 %v5500_v0, %v5499_v19  ;;  %v5542_v48 = vshll.u32 %v14287_v3, 16  ;;  %v5652_v54 = vld [vmem:[#allocation2 + $0xf8] sm:$0x1f]  ;;  %v5527_v34 = vrot.slane %v5525_v14, 7  ;;  %v5593_v11 = vsel %vm12123_vm12, %v14291_v58, %v5592_v61 }
 0x57c   :  { %v5541_v50 = vrot.slane %v5539_v59, 7  ;;  %5582 = vst [vmem:[#allocation2 + $0x18] sm:$0x1f] %v5581_v23  ;;  %v5664_v0 = vld [vmem:[#allocation2 + $0x118] sm:$0x1f]  ;;  %v5516_v39 = vor.u32 %v5514_v12, %v5513_v20  ;;  %v5599_v3 = vsel %vm12123_vm12, %v14293_v32, %v5598_v38  ;;  %v5605_v14 = vsel %vm12123_vm12, %v14295_v10, %v5604_v51 }
 0x57d   :  { %v5670_v19 = vld [vmem:[#allocation2 + $0x128] sm:$0x1f]  ;;  %5588 = vst [vmem:[#allocation2 + $0x28] sm:$0x1f] %v5587_v16  ;;  %5594 = vst [vmem:[#allocation2 + $0x38] sm:$0x1f] %v5593_v11  ;;  %v5611_v26 = vsel %vm12123_vm12, %v14297_v8, %v5610_v63  ;;  %v5530_v6 = vor.u32 %v5528_v53, %v5527_v34  ;;  %v5617_v11 = vsel %vm12123_vm12, %v14299_v27, %v5616_v43 }
 0x57e   :  { %v14328_v13 = vld [vmem:[#allocation2] ss:$8 sps:$4 sm:$0xff]   ;;  %v14330_v58 = vld [vmem:[#allocation2 + $0x4] ss:$8 sps:$4 sm:$0x11]   ;;  %v5544_v52 = vor.u32 %v5542_v48, %v5541_v50  ;;  %v5623_v32 = vsel %vm12123_vm12, %v5432_v35, %v5622_v25  ;;  %v5629_v8 = vsel %vm12123_vm12, %v5446_v22, %v5628_v29  ;;  %v5635_v38 = vsel %vm12123_vm12, %v5460_v33, %v5634_v46 }
 0x57f   :  { %5600 = vst [vmem:[#allocation2 + $0x48] sm:$0x1f] %v5599_v3  ;;  %5606 = vst [vmem:[#allocation2 + $0x58] sm:$0x1f] %v5605_v14  ;;  %v14337_v10 = vld [vmem:[#allocation2 + $0xa0] ss:$8 sps:$4 sm:$0xff]   ;;  %v5641_v51 = vsel %vm12123_vm12, %v5474_v40, %v5640_v15  ;;  %v5647_v27 = vsel %vm12123_vm12, %v5488_v7, %v5646_v42  ;;  %v5653_v12 = vsel %vm12123_vm12, %v5502_v2, %v5652_v54 }
 0x580   :  { %5612 = vst [vmem:[#allocation2 + $0x68] sm:$0x1f] %v5611_v26  ;;  %v14339_v61 = vld [vmem:[#allocation2 + $0xa4] ss:$8 sps:$4 sm:$0x11]   ;;  %v5659_v22 = vsel %vm12123_vm12, %v5516_v39, %v5658_v44  ;;  %v5665_v33 = vsel %vm12123_vm12, %v5530_v6, %v5664_v0  ;;  %v5671_v40 = vsel %vm12123_vm12, %v5544_v52, %v5670_v19  ;;  %v17290_v47 = vshrl.u32 %v14328_v13, 16 }
 0x581   :  { %5618 = vst [vmem:[#allocation2 + $0x78] sm:$0x1f] %v5617_v11  ;;  %5624 = vst [vmem:[#allocation2 + $0x88] sm:$0x1f] %v5623_v32  ;;  %v14367_v15 = vld [vmem:[#allocation2 + $0x10] sm:$0x1f] }
 0x582   :  { %v11633_v63 = vld [vmem:[#allocation2] ss:$8 sps:$4 sm:$0xee]   ;;  %v11635_v35 = vld [vmem:[#allocation2 + $0x4] ss:$8 sps:$4 sm:$0x11]  }
 0x583   :  { %5630 = vst [vmem:[#allocation2 + $0xb8] sm:$0x1f] %v5629_v8  ;;  %5636 = vst [vmem:[#allocation2 + $0xc8] sm:$0x1f] %v5635_v38  ;;  %v14363_v59 = vld [vmem:[#allocation2 + $0x8] ss:$16 sps:$4 sm:$0xff]  }
 0x584   :  { %5642 = vst [vmem:[#allocation2 + $0xd8] sm:$0x1f] %v5641_v51  ;;  %5648 = vst [vmem:[#allocation2 + $0xe8] sm:$0x1f] %v5647_v27  ;;  %v10752_v55 = vrot.slane %v11633_v63, 9  ;;  %v6443_v29 = vrot.slane %v11635_v35, 5 }
 0x585   :  { %5654 = vst [vmem:[#allocation2 + $0xf8] sm:$0x1f] %v5653_v12  ;;  %5660 = vst [vmem:[#allocation2 + $0x108] sm:$0x1f] %v5659_v22  ;;  %v14365_v46 = vld [vmem:[#allocation2 + $0x28] ss:$16 sps:$4 sm:$0xff]  }
 0x586   :  { %5666 = vst [vmem:[#allocation2 + $0x118] sm:$0x1f] %v5665_v33  ;;  %5672 = vst [vmem:[#allocation2 + $0x128] sm:$0x1f] %v5671_v40  ;;  %v14369_v42 = vld [vmem:[#allocation2 + $0x18] sm:$0x1f]  ;;  %v14417_v40 = vsel %vm12162_vm14, %v10752_v55, %v6443_v29 }
 0x587   :  { %v14371_v20 = vld [vmem:[#allocation2 + $0x20] sm:$0x1f]  ;;  %v14373_v48 = vld [vmem:[#allocation2 + $0x48] ss:$16 sps:$4 sm:$0xff]   ;;  %v14377_v54 = vld [vmem:[#allocation2 + $0x30] sm:$0x1f]  ;;  %v10674_v32 = vcombine.low %v14367_v15, %v14369_v42  ;;  %v10675_v35 = vcombine.high %v14367_v15, %v14369_v42 }
 0x588   :  { %17282 = vst [vmem:[#allocation66_spill] sm:$0xff] %v14373_v48  ;;  %v14375_v23 = vld [vmem:[#allocation2 + $0x68] ss:$16 sps:$4 sm:$0xff]   ;;  %v14379_v34 = vld [vmem:[#allocation2 + $0x40] sm:$0x1f]  ;;  %17289 = vst [vmem:[#allocation130_spill] sm:$0xff] %v14417_v40 }
 0x589   :  { %17283 = vst [vmem:[#allocation72_spill] sm:$0xff] %v14375_v23  ;;  %v14381_v50 = vld [vmem:[#allocation2 + $0x50] sm:$0x1f]  ;;  %v14383_v16 = vld [vmem:[#allocation2 + $0x60] sm:$0x1f]  ;;  %v5980_v1 = vrot.slane %v17290_v47, 4 }
 0x58a   :  { %v14385_v0 = vld [vmem:[#allocation2 + $0x70] sm:$0x1f]  ;;  %v14389_v39 = vld [vmem:[#allocation2 + $0xa8] ss:$16 sps:$4 sm:$0xff]   ;;  %v14393_v14 = vld [vmem:[#allocation2 + $0xc0] sm:$0x1f] }
 0x58b   :  { %v14387_v19 = vld [vmem:[#allocation2 + $0xb0] sm:$0x1f]  ;;  %17284 = vst [vmem:[#allocation84_spill] sm:$0xff] %v14389_v39  ;;  %v14391_v3 = vld [vmem:[#allocation2 + $0xc8] ss:$16 sps:$4 sm:$0xff]   ;;  %v17291_v41 = vshll.u32 %v14328_v13, 16 }
 0x58c   :  { %17285 = vst [vmem:[#allocation92_spill] sm:$0xff] %v14391_v3  ;;  %v14395_v26 = vld [vmem:[#allocation2 + $0xd0] sm:$0x1f]  ;;  %v14397_v6 = vld [vmem:[#allocation2 + $0xe8] ss:$16 sps:$4 sm:$0xff]   ;;  %v17292_v28 = vshll.u32 %v14330_v58, 16 }
 0x58d   :  { %17286 = vst [vmem:[#allocation101_spill] sm:$0xff] %v14397_v6  ;;  %v14399_v52 = vld [vmem:[#allocation2 + $0x108] ss:$16 sps:$4 sm:$0xff]   ;;  %v14403_v8 = vld [vmem:[#allocation2 + $0xe0] sm:$0x1f]  ;;  %v5992_v37 = vshrl.u32 %v10674_v32, 16 }
 0x58e   :  { %17287 = vst [vmem:[#allocation117_spill] sm:$0xff] %v14399_v52  ;;  %v5822_v11 = vld [vmem:[#allocation2 + $0x28] sm:$0x1f]  ;;  %v14405_v38 = vld [vmem:[#allocation2 + $0xf0] sm:$0x1f]  ;;  %v5989_v57 = vrot.slane %v17292_v28, 5 }
 0x58f   :  { %v5824_v51 = vld [vmem:[#allocation2 + $0x38] sm:$0x1f]  ;;  %v14407_v27 = vld [vmem:[#allocation2 + $0x48] sm:$0x1f]  ;;  %v10676_v12 = vcombine.low %v14371_v20, %v5822_v11  ;;  %v10677_v22 = vcombine.high %v14371_v20, %v5822_v11  ;;  %v14419_v53 = vld [vmem:[#allocation2 + $0x110] sm:$0x1f] }
 0x590   :  { %v14409_v63 = vld [vmem:[#allocation2 + $0x58] sm:$0x1f]  ;;  %v14421_v44 = vld [vmem:[#allocation2 + $0x68] sm:$0x1f]  ;;  %v10678_v25 = vcombine.low %v14377_v54, %v5824_v51  ;;  %v10679_v15 = vcombine.high %v14377_v54, %v5824_v51  ;;  %v10680_v42 = vcombine.low %v14379_v34, %v14407_v27  ;;  %v10681_v20 = vcombine.high %v14379_v34, %v14407_v27 }
 0x591   :  { %v14423_v2 = vld [vmem:[#allocation2 + $0x78] sm:$0x1f]  ;;  %v14433_v55 = vld [vmem:[#allocation2 + $0xc8] sm:$0x1f]  ;;  %v14441_v43 = vcombine.low %v14381_v50, %v14409_v63  ;;  %v10683_v9 = vcombine.high %v14381_v50, %v14409_v63  ;;  %v14447_v54 = vcombine.low %v14383_v16, %v14421_v44  ;;  %v5983_v63 = vrot.slane %v17291_v41, 5 }
 0x592   :  { %v14425_v7 = vld [vmem:[#allocation2 + $0xb8] sm:$0x1f]  ;;  %v14437_v11 = vld [vmem:[#allocation2 + $0xe8] sm:$0x1f]  ;;  %v14457_v31 = vcombine.low %v14385_v0, %v14423_v2  ;;  %v14469_v34 = vcombine.low %v14393_v14, %v14433_v55  ;;  %v5995_v52 = vshll.u32 %v10674_v32, 16  ;;  %v6001_v36 = vshll.u32 %v10675_v35, 16 }
 0x593   :  { %v14435_v29 = vld [vmem:[#allocation2 + $0xd8] sm:$0x1f]  ;;  %v14463_v50 = vcombine.low %v14387_v19, %v14425_v7  ;;  %v14481_v21 = vcombine.low %v14403_v8, %v14437_v11  ;;  %v5984_v17 = vor.u32 %v5983_v63, %v5980_v1  ;;  %v6006_v6 = vshrl.u32 %v10676_v12, 16 }
 0x594   :  { %v14451_v51 = vld [vmem:[#allocation2 + $0xf8] sm:$0x1f]  ;;  %v14475_v30 = vcombine.low %v14395_v26, %v14435_v29  ;;  %v6009_v5 = vshll.u32 %v10676_v12, 16  ;;  %v6015_v3 = vshll.u32 %v10677_v22, 16  ;;  %v5994_v24 = vrot.slane %v5992_v37, 4 }
 0x595   :  { %v14453_v27 = vld [vmem:[#allocation2 + $0x118] sm:$0x1f]  ;;  %v14487_v45 = vcombine.low %v14405_v38, %v14451_v51  ;;  %v5997_v39 = vrot.slane %v5995_v52, 5  ;;  %v6003_v56 = vrot.slane %v6001_v36, 5  ;;  %v6020_v18 = vshrl.u32 %v10678_v25, 16 }
 0x596   :  { %v14493_v49 = vcombine.low %v14419_v53, %v14453_v27  ;;  %v5985_v23 = vrot.slane %v5984_v17, 4  ;;  %v6008_v60 = vrot.slane %v6006_v6, 4  ;;  %v6011_v47 = vrot.slane %v6009_v5, 5  ;;  %v8124_v28 = vld [vmem:[#allocation2 + $0xd8] sm:$0x1e] }
 0x597   :  { %v6017_v48 = vrot.slane %v6015_v3, 5  ;;  %v5998_v13 = vor.u32 %v5997_v39, %v5994_v24  ;;  %v6022_v41 = vrot.slane %v6020_v18, 4  ;;  %v6023_v62 = vshll.u32 %v10678_v25, 16 }
 0x598   :  { %v6029_v58 = vshll.u32 %v10679_v15, 16  ;;  %v14505_v32 = vsel %vm12149_vm13, %v5985_v23, %v5989_v57  ;;  %v6012_v1 = vor.u32 %v6011_v47, %v6008_v60  ;;  %v6034_v35 = vshrl.u32 %v10680_v42, 16 }
 0x599   :  { %v6037_v12 = vshll.u32 %v10680_v42, 16  ;;  %v5999_v22 = vrot.slane %v5998_v13, 4  ;;  %v6025_v37 = vrot.slane %v6023_v62, 5  ;;  %v6043_v36 = vshll.u32 %v10681_v20, 16 }
 0x59a   :  { %v6031_v52 = vrot.slane %v6029_v58, 5  ;;  %v6013_v63 = vrot.slane %v6012_v1, 4  ;;  %v6036_v17 = vrot.slane %v6034_v35, 4  ;;  %v6048_v5 = vshrl.u32 %v14441_v43, 16 }
 0x59b   :  { %v6039_v6 = vrot.slane %v6037_v12, 5  ;;  %v14510_v24 = vsel %vm12149_vm13, %v5999_v22, %v6003_v56  ;;  %v6026_v18 = vor.u32 %v6025_v37, %v6022_v41  ;;  %v6045_v25 = vrot.slane %v6043_v36, 5 }
 0x59c   :  { %17294 = vst [vmem:[#allocation135_spill] sm:$0xff] %v14510_v24  ;;  %v6051_v57 = vshll.u32 %v14441_v43, 16  ;;  %v14515_v60 = vsel %vm12149_vm13, %v6013_v63, %v6017_v48  ;;  %v6050_v23 = vrot.slane %v6048_v5, 4  ;;  %v6057_v39 = vshll.u32 %v10683_v9, 16 }
 0x59d   :  { %17295 = vst [vmem:[#allocation152_spill] sm:$0xff] %v14515_v60  ;;  %v6040_v62 = vor.u32 %v6039_v6, %v6036_v17  ;;  %v6027_v3 = vrot.slane %v6026_v18, 4  ;;  %v6062_v42 = vshrl.u32 %v14447_v54, 16  ;;  %v6065_v20 = vshll.u32 %v14447_v54, 16 }
 0x59e   :  { %v6053_v15 = vrot.slane %v6051_v57, 5  ;;  %v6059_v56 = vrot.slane %v6057_v39, 5  ;;  %v17296_v13 = vcombine.high %v14383_v16, %v14421_v44  ;;  %v6076_v43 = vshrl.u32 %v14457_v31, 16 }
 0x59f   :  { %v6041_v47 = vrot.slane %v6040_v62, 4  ;;  %v14525_v48 = vsel %vm12149_vm13, %v6027_v3, %v6031_v52  ;;  %v6064_v9 = vrot.slane %v6062_v42, 4  ;;  %v6067_v1 = vrot.slane %v6065_v20, 5 }
 0x5a0   :  { %v6071_v41 = vshll.u32 %v17296_v13, 16  ;;  %17297 = vst [vmem:[#allocation155_spill] sm:$0xff] %v14525_v48  ;;  %v6054_v58 = vor.u32 %v6053_v15, %v6050_v23  ;;  %v6078_v12 = vrot.slane %v6076_v43, 4  ;;  %v6079_v22 = vshll.u32 %v14457_v31, 16 }
 0x5a1   :  { %v14529_v35 = vsel %vm12149_vm13, %v6041_v47, %v6045_v25  ;;  %v6068_v44 = vor.u32 %v6067_v1, %v6064_v9  ;;  %v17299_v16 = vcombine.high %v14385_v0, %v14423_v2  ;;  %v17300_v52 = vshrl.u32 %v14337_v10, 16  ;;  %v11630_v1 = vld [vmem:[#allocation2 + $0x100] ss:$8 sps:$4 sm:$0xff]  }
 0x5a2   :  { %17298 = vst [vmem:[#allocation171_spill] sm:$0xff] %v14529_v35  ;;  %v6073_v54 = vrot.slane %v6071_v41, 5  ;;  %v6055_v37 = vrot.slane %v6054_v58, 4  ;;  %v6081_v17 = vrot.slane %v6079_v22, 5  ;;  %v17301_v6 = vshll.u32 %v14337_v10, 16 }
 0x5a3   :  { %v6085_v36 = vshll.u32 %v17299_v16, 16  ;;  %v6092_v63 = vrot.slane %v17300_v52, 4  ;;  %v17302_v18 = vshll.u32 %v14339_v61, 16  ;;  %v6104_v57 = vshrl.u32 %v14463_v50, 16 }
 0x5a4   :  { %v6095_v5 = vrot.slane %v17301_v6, 5  ;;  %v14544_v31 = vsel %vm12149_vm13, %v6055_v37, %v6059_v56  ;;  %v6069_v62 = vrot.slane %v6068_v44, 4  ;;  %v6107_v2 = vshll.u32 %v14463_v50, 16  ;;  %v11632_v37 = vld [vmem:[#allocation2 + $0x104] ss:$8 sps:$4 sm:$0x11]  }
 0x5a5   :  { %v6101_v25 = vrot.slane %v17302_v18, 5  ;;  %17303 = vst [vmem:[#allocation175_spill] sm:$0xff] %v14544_v31  ;;  %v6087_v23 = vrot.slane %v6085_v36, 5  ;;  %v6082_v0 = vor.u32 %v6081_v17, %v6078_v12  ;;  %v6106_v3 = vrot.slane %v6104_v57, 4  ;;  %v14577_v18 = vld [vmem:[#allocation2 + $0x18] ss:$16 sps:$4 sm:$0xff]  }
 0x5a6   :  { %v6096_v39 = vor.u32 %v6095_v5, %v6092_v63  ;;  %v17304_v10 = vcombine.high %v14387_v19, %v14425_v7  ;;  %v14552_v61 = vsel %vm12149_vm13, %v6069_v62, %v6073_v54  ;;  %v6109_v42 = vrot.slane %v6107_v2, 5  ;;  %17311 = vst [vmem:[#allocation33_spill] sm:$0xff] %v14577_v18 }
 0x5a7   :  { %17305 = vst [vmem:[#allocation35_spill] sm:$0xff] %v14552_v61  ;;  %v6118_v20 = vshrl.u32 %v14469_v34, 16  ;;  %v6121_v47 = vshll.u32 %v14469_v34, 16  ;;  %v6083_v56 = vrot.slane %v6082_v0, 4  ;;  %v17306_v50 = vcombine.high %v14393_v14, %v14433_v55  ;;  %v14586_v0 = vld [vmem:[#allocation2 + $0x58] ss:$16 sps:$4 sm:$0xff]  }
 0x5a8   :  { %v6113_v15 = vshll.u32 %v17304_v10, 16  ;;  %v6097_v13 = vrot.slane %v6096_v39, 4  ;;  %v6110_v58 = vor.u32 %v6109_v42, %v6106_v3  ;;  %v6132_v19 = vshrl.u32 %v14475_v30, 16  ;;  %17314 = vst [vmem:[#allocation54_spill] sm:$0xff] %v14586_v0 }
 0x5a9   :  { %v6127_v43 = vshll.u32 %v17306_v50, 16  ;;  %v6120_v9 = vrot.slane %v6118_v20, 4  ;;  %v6123_v7 = vrot.slane %v6121_v47, 5  ;;  %v14562_v54 = vsel %vm12149_vm13, %v6083_v56, %v6087_v23 }
 0x5aa   :  { %v6115_v41 = vrot.slane %v6113_v15, 5  ;;  %17307 = vst [vmem:[#allocation36_spill] sm:$0xff] %v14562_v54  ;;  %v14566_v34 = vsel %vm12149_vm13, %v6097_v13, %v6101_v25  ;;  %v6135_v22 = vshll.u32 %v14475_v30, 16  ;;  %v6111_v14 = vrot.slane %v6110_v58, 4  ;;  %v14596_v15 = vld [vmem:[#allocation2 + $0x78] ss:$16 sps:$4 sm:$0xff]  }
 0x5ab   :  { %17308 = vst [vmem:[#allocation32_spill] sm:$0xff] %v14566_v34  ;;  %v6129_v12 = vrot.slane %v6127_v43, 5  ;;  %v6124_v55 = vor.u32 %v6123_v7, %v6120_v9  ;;  %v6134_v44 = vrot.slane %v6132_v19, 4  ;;  %v17309_v16 = vcombine.high %v14395_v26, %v14435_v29  ;;  %v14584_v29 = vld [vmem:[#allocation2 + $0x38] ss:$16 sps:$4 sm:$0xff]   ;;  %17317 = vst [vmem:[#allocation75_spill] sm:$0xff] %v14596_v15 }
 0x5ac   :  { %v6137_v52 = vrot.slane %v6135_v22, 5  ;;  %v6146_v63 = vshrl.u32 %v14481_v21, 16  ;;  %v6149_v17 = vshll.u32 %v14481_v21, 16  ;;  %v17310_v6 = vcombine.high %v14403_v8, %v14437_v11  ;;  %17313 = vst [vmem:[#allocation59_spill] sm:$0xff] %v14584_v29  ;;  %v14598_v13 = vld [vmem:[#allocation2 + $0xb8] ss:$16 sps:$4 sm:$0xff]  }
 0x5ad   :  { %v6141_v36 = vshll.u32 %v17309_v16, 16  ;;  %v14581_v30 = vsel %vm12149_vm13, %v6111_v14, %v6115_v41  ;;  %v6125_v25 = vrot.slane %v6124_v55, 4  ;;  %v6160_v26 = vshrl.u32 %v14487_v45, 16  ;;  %17318 = vst [vmem:[#allocation77_spill] sm:$0xff] %v14598_v13  ;;  %v14601_v9 = vld [vmem:[#allocation2 + $0xd8] ss:$16 sps:$4 sm:$0xff]  }
 0x5ae   :  { %v6155_v5 = vshll.u32 %v17310_v6, 16  ;;  %17312 = vst [vmem:[#allocation56_spill] sm:$0xff] %v14581_v30  ;;  %v6138_v62 = vor.u32 %v6137_v52, %v6134_v44  ;;  %v6148_v23 = vrot.slane %v6146_v63, 4  ;;  %v6151_v2 = vrot.slane %v6149_v17, 5  ;;  %17319 = vst [vmem:[#allocation68_spill] sm:$0xff] %v14601_v9 }
 0x5af   :  { %v6143_v57 = vrot.slane %v6141_v36, 5  ;;  %v14590_v8 = vsel %vm12149_vm13, %v6125_v25, %v6129_v12  ;;  %v6162_v11 = vrot.slane %v6160_v26, 4  ;;  %v6163_v39 = vshll.u32 %v14487_v45, 16  ;;  %v14607_v19 = vld [vmem:[#allocation2 + $0xf8] ss:$16 sps:$4 sm:$0xff]  }
 0x5b0   :  { %v6157_v21 = vrot.slane %v6155_v5, 5  ;;  %17315 = vst [vmem:[#allocation55_spill] sm:$0xff] %v14590_v8  ;;  %v17316_v3 = vcombine.high %v14405_v38, %v14451_v51  ;;  %v6139_v42 = vrot.slane %v6138_v62, 4  ;;  %v6152_v20 = vor.u32 %v6151_v2, %v6148_v23  ;;  %17321 = vst [vmem:[#allocation103_spill] sm:$0xff] %v14607_v19  ;;  %v14610_v55 = vld [vmem:[#allocation2 + $0x118] ss:$16 sps:$4 sm:$0xff]  }
 0x5b1   :  { %v6174_v47 = vshrl.u32 %v11630_v1, 16  ;;  %v6177_v56 = vshll.u32 %v11630_v1, 16  ;;  %v6165_v41 = vrot.slane %v6163_v39, 5  ;;  %v6183_v43 = vshll.u32 %v11632_v37, 16  ;;  %17322 = vst [vmem:[#allocation110_spill] sm:$0xff] %v14610_v55 }
 0x5b2   :  { %v6169_v10 = vshll.u32 %v17316_v3, 16  ;;  %v6188_v58 = vshrl.u32 %v14493_v49, 16  ;;  %v14605_v45 = vsel %vm12149_vm13, %v6139_v42, %v6143_v57  ;;  %v6153_v38 = vrot.slane %v6152_v20, 4  ;;  %v14621_v63 = vld [vmem:[#allocation2 + $0x10] sm:$0x1e] }
 0x5b3   :  { %17320 = vst [vmem:[#allocation74_spill] sm:$0xff] %v14605_v45  ;;  %v6176_v51 = vrot.slane %v6174_v47, 4  ;;  %v6179_v7 = vrot.slane %v6177_v56, 5  ;;  %v6166_v12 = vor.u32 %v6165_v41, %v6162_v11  ;;  %v6185_v1 = vrot.slane %v6183_v43, 5  ;;  %v14627_v25 = vld [vmem:[#allocation2 + $0x20] sm:$0x1e] }
 0x5b4   :  { %v6171_v50 = vrot.slane %v6169_v10, 5  ;;  %v6190_v22 = vrot.slane %v6188_v58, 4  ;;  %v6191_v14 = vshll.u32 %v14493_v49, 16  ;;  %v14614_v37 = vsel %vm12149_vm13, %v6153_v38, %v6157_v21  ;;  %v14629_v57 = vld [vmem:[#allocation2 + $0x30] sm:$0x1e] }
 0x5b5   :  { %17323 = vst [vmem:[#allocation99_spill] sm:$0xff] %v14614_v37  ;;  %v6180_v44 = vor.u32 %v6179_v7, %v6176_v51  ;;  %v17324_v16 = vcombine.high %v14419_v53, %v14453_v27  ;;  %v6167_v17 = vrot.slane %v6166_v12, 4  ;;  %v14635_v23 = vld [vmem:[#allocation2 + $0x40] sm:$0x1e]  ;;  %v14645_v3 = vld [vmem:[#allocation2 + $0x18] sm:$0x1e] }
 0x5b6   :  { %v6193_v6 = vrot.slane %v6191_v14, 5  ;;  %v14647_v10 = vld [vmem:[#allocation2 + $0x28] sm:$0x1e]  ;;  %v14649_v42 = vld [vmem:[#allocation2 + $0x50] sm:$0x1e] }
 0x5b7   :  { %v6197_v36 = vshll.u32 %v17324_v16, 16  ;;  %v6181_v26 = vrot.slane %v6180_v44, 4  ;;  %v14639_v2 = vsel %vm12149_vm13, %v6167_v17, %v6171_v50  ;;  %v14651_v20 = vld [vmem:[#allocation2 + $0x60] sm:$0x1e]  ;;  %v6288_v43 = vld [vmem:[#allocation2 + $0x38] sm:$0x1e]  ;;  %v10722_v17 = vcombine.low %v14621_v63, %v14645_v3 }
 0x5b8   :  { %17325 = vst [vmem:[#allocation104_spill] sm:$0xff] %v14639_v2  ;;  %v6194_v21 = vor.u32 %v6193_v6, %v6190_v22  ;;  %v14663_v58 = vld [vmem:[#allocation2 + $0x70] sm:$0x1e]  ;;  %v6290_v22 = vld [vmem:[#allocation2 + $0x48] sm:$0x1e]  ;;  %v10723_v6 = vcombine.high %v14621_v63, %v14645_v3  ;;  %v10725_v44 = vcombine.high %v14627_v25, %v14647_v10  ;;  %v10726_v41 = vcombine.low %v14629_v57, %v6288_v43 }
 0x5b9   :  { %v6199_v53 = vrot.slane %v6197_v36, 5  ;;  %v14655_v47 = vsel %vm12149_vm13, %v6181_v26, %v6185_v1  ;;  %v14665_v38 = vld [vmem:[#allocation2 + $0xb0] sm:$0x1e]  ;;  %v14673_v14 = vld [vmem:[#allocation2 + $0xc0] sm:$0x1e]  ;;  %v10724_v26 = vcombine.low %v14627_v25, %v14647_v10  ;;  %v10727_v50 = vcombine.high %v14629_v57, %v6288_v43 }
 0x5ba   :  { %17326 = vst [vmem:[#allocation119_spill] sm:$0xff] %v14655_v47  ;;  %v6195_v51 = vrot.slane %v6194_v21, 4  ;;  %v6292_v16 = vld [vmem:[#allocation2 + $0x58] sm:$0x1e]  ;;  %v6294_v36 = vld [vmem:[#allocation2 + $0x68] sm:$0x1e]  ;;  %v10728_v56 = vcombine.low %v14635_v23, %v6290_v22  ;;  %v10729_v62 = vcombine.high %v14635_v23, %v6290_v22 }
 0x5bb   :  { %v14683_v21 = vld [vmem:[#allocation2 + $0xd0] sm:$0x1e]  ;;  %v6296_v7 = vld [vmem:[#allocation2 + $0x78] sm:$0x1e]  ;;  %v14695_v63 = vld [vmem:[#allocation2 + $0xe0] sm:$0x1e]  ;;  %v10730_v57 = vcombine.low %v14649_v42, %v6292_v16  ;;  %v10731_v43 = vcombine.high %v14649_v42, %v6292_v16  ;;  %v10732_v5 = vcombine.low %v14651_v20, %v6294_v36  ;;  %v10733_v3 = vcombine.high %v14651_v20, %v6294_v36 }
 0x5bc   :  { %v14687_v1 = vsel %vm12149_vm13, %v6195_v51, %v6199_v53  ;;  %v14689_v12 = vld [vmem:[#allocation2 + $0xb8] sm:$0x1e]  ;;  %v6302_v53 = vld [vmem:[#allocation2 + $0xc8] sm:$0x1e]  ;;  %v14703_v11 = vld [vmem:[#allocation2 + $0xf0] sm:$0x1e]  ;;  %v10734_v52 = vcombine.low %v14663_v58, %v6296_v7  ;;  %v10735_v49 = vcombine.high %v14663_v58, %v6296_v7 }
 0x5bd   :  { %17327 = vst [vmem:[#allocation121_spill] sm:$0xff] %v14687_v1  ;;  %v6304_v51 = vld [vmem:[#allocation2 + $0xd8] sm:$0x1e]  ;;  %v6306_v25 = vld [vmem:[#allocation2 + $0xe8] sm:$0x1e]  ;;  %v10738_v23 = vcombine.low %v14665_v38, %v14689_v12  ;;  %v10739_v22 = vcombine.high %v14665_v38, %v14689_v12  ;;  %v10740_v55 = vcombine.low %v14673_v14, %v6302_v53  ;;  %v10741_v42 = vcombine.high %v14673_v14, %v6302_v53 }
 0x5be   :  { %v6308_v10 = vld [vmem:[#allocation2 + $0xf8] sm:$0x1e]  ;;  %v6311_v27 = vld [vmem:[#allocation2 + $0x110] sm:$0x1e]  ;;  %v10742_v16 = vcombine.low %v14683_v21, %v6304_v51  ;;  %v10743_v20 = vcombine.high %v14683_v21, %v6304_v51  ;;  %v10744_v9 = vcombine.low %v14695_v63, %v6306_v25  ;;  %v10745_v58 = vcombine.high %v14695_v63, %v6306_v25 }
 0x5bf   :  { %v6312_v39 = vld [vmem:[#allocation2 + $0x118] sm:$0x1e]  ;;  %v11636_v36 = vld [vmem:[#allocation2 + $0xa0] ss:$8 sps:$4 sm:$0xee]   ;;  %v10746_v7 = vcombine.low %v14703_v11, %v6308_v10  ;;  %v10747_v13 = vcombine.high %v14703_v11, %v6308_v10  ;;  %v10753_v12 = vrot.slane %v10722_v17, 9 }
 0x5c0   :  { %v11638_v19 = vld [vmem:[#allocation2 + $0xa4] ss:$8 sps:$4 sm:$0x11]   ;;  %v10750_v15 = vcombine.low %v6311_v27, %v6312_v39  ;;  %v10751_v38 = vcombine.high %v6311_v27, %v6312_v39  ;;  %v6447_v0 = vrot.slane %v10723_v6, 5  ;;  %v10754_v29 = vrot.slane %v10724_v26, 9 }
 0x5c1   :  { %v6451_v14 = vrot.slane %v10725_v44, 5  ;;  %v10755_v53 = vrot.slane %v10726_v41, 9  ;;  %v6455_v18 = vrot.slane %v10727_v50, 5  ;;  %v10756_v51 = vrot.slane %v10728_v56, 9 }
 0x5c2   :  { %v14725_v21 = vsel %vm12162_vm14, %v10753_v12, %v6447_v0  ;;  %v6459_v1 = vrot.slane %v10729_v62, 5  ;;  %v10757_v47 = vrot.slane %v10730_v57, 9  ;;  %v6463_v11 = vrot.slane %v10731_v43, 5  ;;  %v11639_v44 = vld [vmem:[#allocation2 + $0x100] ss:$8 sps:$4 sm:$0xee]  }
 0x5c3   :  { %17328 = vst [vmem:[#allocation116_spill] sm:$0xff] %v14725_v21  ;;  %v14729_v63 = vsel %vm12162_vm14, %v10754_v29, %v6451_v14  ;;  %v14733_v27 = vsel %vm12162_vm14, %v10755_v53, %v6455_v18  ;;  %v10758_v39 = vrot.slane %v10732_v5, 9  ;;  %v6467_v0 = vrot.slane %v10733_v3, 5  ;;  %v11641_v62 = vld [vmem:[#allocation2 + $0x104] ss:$8 sps:$4 sm:$0x11]  }
 0x5c4   :  { %17329 = vst [vmem:[#allocation118_spill] sm:$0xff] %v14729_v63  ;;  %17330 = vst [vmem:[#allocation139_spill] sm:$0xff] %v14733_v27  ;;  %v14737_v41 = vsel %vm12162_vm14, %v10756_v51, %v6459_v1  ;;  %v10759_v50 = vrot.slane %v10734_v52, 9  ;;  %v6471_v56 = vrot.slane %v10735_v49, 5  ;;  %v14741_v17 = vsel %vm12162_vm14, %v10757_v47, %v6463_v11  ;;  %v14775_v12 = vld [vmem:[#allocation2 + $0x20] sm:$0x1f] }
 0x5c5   :  { %17331 = vst [vmem:[#allocation140_spill] sm:$0xff] %v14737_v41  ;;  %17332 = vst [vmem:[#allocation136_spill] sm:$0xff] %v14741_v17  ;;  %v10760_v29 = vrot.slane %v11636_v36, 9  ;;  %v6475_v6 = vrot.slane %v11638_v19, 5  ;;  %v10761_v26 = vrot.slane %v10738_v23, 9  ;;  %v14745_v18 = vsel %vm12162_vm14, %v10758_v39, %v6467_v0 }
 0x5c6   :  { %17333 = vst [vmem:[#allocation137_spill] sm:$0xff] %v14745_v18  ;;  %v14749_v5 = vsel %vm12162_vm14, %v10759_v50, %v6471_v56  ;;  %v6479_v1 = vrot.slane %v10739_v22, 5  ;;  %v10762_v3 = vrot.slane %v10740_v55, 9  ;;  %v6483_v49 = vrot.slane %v10741_v42, 5  ;;  %v14767_v42 = vld [vmem:[#allocation2 + $0x10] sm:$0x1f] }
 0x5c7   :  { %17334 = vst [vmem:[#allocation163_spill] sm:$0xff] %v14749_v5  ;;  %v14753_v52 = vsel %vm12162_vm14, %v10760_v29, %v6475_v6  ;;  %v10763_v47 = vrot.slane %v10742_v16, 9  ;;  %v6487_v25 = vrot.slane %v10743_v20, 5  ;;  %v10764_v10 = vrot.slane %v10744_v9, 9  ;;  %v14777_v14 = vld [vmem:[#allocation2 + $0x30] sm:$0x1f] }
 0x5c8   :  { %17335 = vst [vmem:[#allocation164_spill] sm:$0xff] %v14753_v52  ;;  %v14757_v19 = vsel %vm12162_vm14, %v10761_v26, %v6479_v1  ;;  %v6491_v57 = vrot.slane %v10745_v58, 5  ;;  %v10765_v43 = vrot.slane %v10746_v7, 9  ;;  %v14761_v23 = vsel %vm12162_vm14, %v10762_v3, %v6483_v49  ;;  %v14773_v7 = vld [vmem:[#allocation2 + $0x18] sm:$0x1f] }
 0x5c9   :  { %17336 = vst [vmem:[#allocation160_spill] sm:$0xff] %v14757_v19  ;;  %17337 = vst [vmem:[#allocation162_spill] sm:$0xff] %v14761_v23  ;;  %v14765_v55 = vsel %vm12162_vm14, %v10763_v47, %v6487_v25  ;;  %v6495_v22 = vrot.slane %v10747_v13, 5  ;;  %v10766_v36 = vrot.slane %v11639_v44, 9  ;;  %v6499_v20 = vrot.slane %v11641_v62, 5 }
 0x5ca   :  { %17338 = vst [vmem:[#allocation173_spill] sm:$0xff] %v14765_v55  ;;  %v14771_v16 = vsel %vm12162_vm14, %v10764_v10, %v6491_v57  ;;  %v10767_v9 = vrot.slane %v10750_v15, 9  ;;  %v6503_v58 = vrot.slane %v10751_v38, 5  ;;  %v14789_v38 = vld [vmem:[#allocation2 + $0x28] sm:$0x1f]  ;;  %v10800_v49 = vcombine.low %v14767_v42, %v14773_v7 }
 0x5cb   :  { %17339 = vst [vmem:[#allocation176_spill] sm:$0xff] %v14771_v16  ;;  %v14781_v53 = vsel %vm12162_vm14, %v10765_v43, %v6495_v22  ;;  %v14791_v11 = vld [vmem:[#allocation2 + $0x38] sm:$0x1f]  ;;  %v14793_v39 = vld [vmem:[#allocation2 + $0x40] sm:$0x1f]  ;;  %v14799_v0 = vsel %vm12162_vm14, %v10766_v36, %v6499_v20  ;;  %v10802_v25 = vcombine.low %v14775_v12, %v14789_v38 }
 0x5cc   :  { %17340 = vst [vmem:[#allocation38_spill] sm:$0xff] %v14781_v53  ;;  %v14795_v44 = vld [vmem:[#allocation2 + $0x50] sm:$0x1f]  ;;  %17341 = vst [vmem:[#allocation43_spill] sm:$0xff] %v14799_v0  ;;  %v14803_v50 = vsel %vm12162_vm14, %v10767_v9, %v6503_v58  ;;  %v14809_v29 = vld [vmem:[#allocation2 + $0x48] sm:$0x1f]  ;;  %v10801_v58 = vcombine.high %v14767_v42, %v14773_v7 }
 0x5cd   :  { %17342 = vst [vmem:[#allocation57_spill] sm:$0xff] %v14803_v50  ;;  %v14811_v6 = vld [vmem:[#allocation2 + $0x58] sm:$0x1f]  ;;  %v14813_v26 = vld [vmem:[#allocation2 + $0x60] sm:$0x1f]  ;;  %v10806_v42 = vcombine.low %v14793_v39, %v14809_v29  ;;  %v10807_v7 = vcombine.high %v14793_v39, %v14809_v29  ;;  %v6890_v17 = vshrl.u32 %v10800_v49, 16 }
 0x5ce   :  { %v14815_v1 = vld [vmem:[#allocation2 + $0x70] sm:$0x1f]  ;;  %v14825_v10 = vld [vmem:[#allocation2 + $0x68] sm:$0x1f]  ;;  %v14827_v57 = vld [vmem:[#allocation2 + $0x78] sm:$0x1f]  ;;  %v10809_v53 = vcombine.high %v14795_v44, %v14811_v6 }
 0x5cf   :  { %v14829_v43 = vld [vmem:[#allocation2 + $0x28] ss:$16 sps:$4 sm:$0xff]   ;;  %v14833_v36 = vld [vmem:[#allocation2 + $0x80] sm:$0x1f]  ;;  %v14835_v20 = vld [vmem:[#allocation2 + $0xb0] sm:$0x1f]  ;;  %v14913_v39 = vcombine.low %v14815_v1, %v14827_v57 }
 0x5d0   :  { %17343 = vst [vmem:[#allocation65_spill] sm:$0xff] %v14829_v43  ;;  %v14831_v22 = vld [vmem:[#allocation2 + $0x48] ss:$16 sps:$4 sm:$0xff]   ;;  %v14851_v15 = vld [vmem:[#allocation2 + $0xc0] sm:$0x1f]  ;;  %v10805_v43 = vcombine.high %v14777_v14, %v14791_v11  ;;  %v6893_v41 = vshll.u32 %v10800_v49, 16 }
 0x5d1   :  { %17344 = vst [vmem:[#allocation81_spill] sm:$0xff] %v14831_v22  ;;  %v14845_v47 = vld [vmem:[#allocation2 + $0x68] ss:$16 sps:$4 sm:$0xff]   ;;  %v14915_v29 = vld [vmem:[#allocation2 + $0x120] sm:$0x1f]  ;;  %v6899_v27 = vshll.u32 %v10801_v58, 16 }
 0x5d2   :  { %17345 = vst [vmem:[#allocation88_spill] sm:$0xff] %v14845_v47  ;;  %v14847_v62 = vld [vmem:[#allocation2 + $0x88] ss:$16 sps:$4 sm:$0xff]   ;;  %v10803_v47 = vcombine.high %v14775_v12, %v14789_v38  ;;  %v14895_v12 = vcombine.low %v14795_v44, %v14811_v6  ;;  %v14897_v38 = vld [vmem:[#allocation2 + $0x100] sm:$0x1f]  ;;  %v6904_v63 = vshrl.u32 %v10802_v25, 16 }
 0x5d3   :  { %17346 = vst [vmem:[#allocation108_spill] sm:$0xff] %v14847_v62  ;;  %v14849_v3 = vld [vmem:[#allocation2 + $0xc8] ss:$16 sps:$4 sm:$0xff]   ;;  %v6907_v21 = vshll.u32 %v10802_v25, 16  ;;  %v6895_v45 = vrot.slane %v6893_v41, 5  ;;  %v6901_v8 = vrot.slane %v6899_v27, 5 }
 0x5d4   :  { %17347 = vst [vmem:[#allocation113_spill] sm:$0xff] %v14849_v3  ;;  %v14861_v56 = vld [vmem:[#allocation2 + $0xe8] ss:$16 sps:$4 sm:$0xff]   ;;  %v14867_v3 = vld [vmem:[#allocation2 + $0xd0] sm:$0x1f]  ;;  %v6913_v40 = vshll.u32 %v10803_v47, 16 }
 0x5d5   :  { %17348 = vst [vmem:[#allocation127_spill] sm:$0xff] %v14861_v56  ;;  %v14863_v13 = vld [vmem:[#allocation2 + $0x108] ss:$16 sps:$4 sm:$0xff]   ;;  %v14881_v56 = vld [vmem:[#allocation2 + $0xe0] sm:$0x1f]  ;;  %v6906_v30 = vrot.slane %v6904_v63, 4 }
 0x5d6   :  { %17349 = vst [vmem:[#allocation128_spill] sm:$0xff] %v14863_v13  ;;  %v14865_v51 = vld [vmem:[#allocation2 + $0x128] ss:$16 sps:$4 sm:$0xff]   ;;  %v10804_v13 = vcombine.low %v14777_v14, %v14791_v11  ;;  %v14907_v14 = vcombine.low %v14813_v26, %v14825_v10  ;;  %v10811_v11 = vcombine.high %v14813_v26, %v14825_v10  ;;  %v6892_v10 = vrot.slane %v6890_v17, 4 }
 0x5d7   :  { %17350 = vst [vmem:[#allocation143_spill] sm:$0xff] %v14865_v51  ;;  %v14869_v62 = vld [vmem:[#allocation2 + $0x88] sm:$0x1f]  ;;  %v14871_v9 = vld [vmem:[#allocation2 + $0xb8] sm:$0x1f]  ;;  %v6909_v55 = vrot.slane %v6907_v21, 5 }
 0x5d8   :  { %v14883_v51 = vld [vmem:[#allocation2 + $0xc8] sm:$0x1f]  ;;  %v14885_v22 = vld [vmem:[#allocation2 + $0xd8] sm:$0x1f]  ;;  %v14923_v44 = vcombine.low %v14833_v36, %v14869_v62  ;;  %v14929_v26 = vcombine.low %v14835_v20, %v14871_v9  ;;  %v6918_v2 = vshrl.u32 %v10804_v13, 16  ;;  %v6921_v37 = vshll.u32 %v10804_v13, 16 }
 0x5d9   :  { %v14899_v50 = vld [vmem:[#allocation2 + $0xe8] sm:$0x1f]  ;;  %v14935_v23 = vcombine.low %v14851_v15, %v14883_v51  ;;  %v14941_v19 = vcombine.low %v14867_v3, %v14885_v22  ;;  %v6915_v34 = vrot.slane %v6913_v40, 5  ;;  %v6927_v31 = vshll.u32 %v10805_v43, 16 }
 0x5da   :  { %v14901_v0 = vld [vmem:[#allocation2 + $0x108] sm:$0x1f]  ;;  %v14947_v52 = vcombine.low %v14881_v56, %v14899_v50  ;;  %v6920_v54 = vrot.slane %v6918_v2, 4  ;;  %v6923_v61 = vrot.slane %v6921_v37, 5  ;;  %v6896_v35 = vor.u32 %v6895_v45, %v6892_v10 }
 0x5db   :  { %v14917_v16 = vld [vmem:[#allocation2 + $0x128] sm:$0x1f]  ;;  %v14953_v5 = vcombine.low %v14897_v38, %v14901_v0  ;;  %v6910_v48 = vor.u32 %v6909_v55, %v6906_v30  ;;  %v6932_v6 = vshrl.u32 %v10806_v42, 16  ;;  %v6935_v60 = vshll.u32 %v10806_v42, 16 }
 0x5dc   :  { %v14959_v18 = vcombine.low %v14915_v29, %v14917_v16  ;;  %v6924_v49 = vor.u32 %v6923_v61, %v6920_v54  ;;  %v6929_v58 = vrot.slane %v6927_v31, 5  ;;  %v6941_v24 = vshll.u32 %v10807_v7, 16 }
 0x5dd   :  { %v6946_v17 = vshrl.u32 %v14895_v12, 16  ;;  %v6897_v47 = vrot.slane %v6896_v35, 4  ;;  %v6911_v25 = vrot.slane %v6910_v48, 4  ;;  %v6934_v13 = vrot.slane %v6932_v6, 4 }
 0x5de   :  { %v6937_v41 = vrot.slane %v6935_v60, 5  ;;  %v6925_v27 = vrot.slane %v6924_v49, 4  ;;  %v6943_v63 = vrot.slane %v6941_v24, 5  ;;  %v6949_v40 = vshll.u32 %v14895_v12, 16 }
 0x5df   :  { %v6948_v21 = vrot.slane %v6946_v17, 4  ;;  %v14967_v45 = vsel %vm12149_vm13, %v6897_v47, %v6901_v8  ;;  %v14971_v61 = vsel %vm12149_vm13, %v6911_v25, %v6915_v34  ;;  %v6955_v54 = vshll.u32 %v10809_v53, 16 }
 0x5e0   :  { %v6938_v31 = vor.u32 %v6937_v41, %v6934_v13  ;;  %v14975_v48 = vsel %vm12149_vm13, %v6925_v27, %v6929_v58  ;;  %v6951_v60 = vrot.slane %v6949_v40, 5  ;;  %v6960_v24 = vshrl.u32 %v14907_v14, 16 }
 0x5e1   :  { %v6963_v35 = vshll.u32 %v14907_v14, 16  ;;  %v6957_v37 = vrot.slane %v6955_v54, 5  ;;  %v6969_v2 = vshll.u32 %v10811_v11, 16  ;;  %v6974_v8 = vshrl.u32 %v14913_v39, 16 }
 0x5e2   :  { %v6939_v30 = vrot.slane %v6938_v31, 4  ;;  %v6952_v55 = vor.u32 %v6951_v60, %v6948_v21  ;;  %v6962_v43 = vrot.slane %v6960_v24, 4  ;;  %v6977_v42 = vshll.u32 %v14913_v39, 16 }
 0x5e3   :  { %v6965_v34 = vrot.slane %v6963_v35, 5  ;;  %v6971_v7 = vrot.slane %v6969_v2, 5  ;;  %v6976_v12 = vrot.slane %v6974_v8, 4  ;;  %v17352_v6 = vcombine.high %v14815_v1, %v14827_v57 }
 0x5e4   :  { %v14983_v53 = vsel %vm12149_vm13, %v6939_v30, %v6943_v63  ;;  %v6953_v10 = vrot.slane %v6952_v55, 4  ;;  %v6979_v11 = vrot.slane %v6977_v42, 5  ;;  %v6988_v58 = vshrl.u32 %v14923_v44, 16 }
 0x5e5   :  { %17351 = vst [vmem:[#allocation150_spill] sm:$0xff] %v14983_v53  ;;  %v6983_v14 = vshll.u32 %v17352_v6, 16  ;;  %v6966_v49 = vor.u32 %v6965_v34, %v6962_v43  ;;  %v6991_v47 = vshll.u32 %v14923_v44, 16  ;;  %v17353_v39 = vcombine.high %v14833_v36, %v14869_v62 }
 0x5e6   :  { %v7002_v13 = vshrl.u32 %v14929_v26, 16  ;;  %v14996_v41 = vsel %vm12149_vm13, %v6953_v10, %v6957_v37  ;;  %v6980_v57 = vor.u32 %v6979_v11, %v6976_v12  ;;  %v6990_v27 = vrot.slane %v6988_v58, 4 }
 0x5e7   :  { %v6985_v17 = vrot.slane %v6983_v14, 5  ;;  %v6997_v25 = vshll.u32 %v17353_v39, 16  ;;  %17354 = vst [vmem:[#allocation165_spill] sm:$0xff] %v14996_v41  ;;  %v6967_v1 = vrot.slane %v6966_v49, 4  ;;  %v6993_v63 = vrot.slane %v6991_v47, 5 }
 0x5e8   :  { %v7004_v40 = vrot.slane %v7002_v13, 4  ;;  %v7005_v31 = vshll.u32 %v14929_v26, 16  ;;  %v6981_v62 = vrot.slane %v6980_v57, 4  ;;  %v17356_v36 = vcombine.high %v14835_v20, %v14871_v9  ;;  %v11650_v26 = vld [vmem:[#allocation2 + $0xf0] ss:$8 sps:$4 sm:$0xff]  }
 0x5e9   :  { %v6999_v21 = vrot.slane %v6997_v25, 5  ;;  %v15001_v44 = vsel %vm12149_vm13, %v6967_v1, %v6971_v7  ;;  %v7016_v60 = vshrl.u32 %v14935_v23, 16  ;;  %v6994_v24 = vor.u32 %v6993_v63, %v6990_v27  ;;  %v11652_v9 = vld [vmem:[#allocation2 + $0xf4] ss:$8 sps:$4 sm:$0x11]  }
 0x5ea   :  { %17355 = vst [vmem:[#allocation170_spill] sm:$0xff] %v15001_v44  ;;  %v7011_v54 = vshll.u32 %v17356_v36, 16  ;;  %v7007_v35 = vrot.slane %v7005_v31, 5  ;;  %v7019_v30 = vshll.u32 %v14935_v23, 16  ;;  %v17357_v37 = vcombine.high %v14851_v15, %v14883_v51  ;;  %v11653_v13 = vld [vmem:[#allocation2 + $0x110] ss:$8 sps:$4 sm:$0xff]  }
 0x5eb   :  { %v15013_v8 = vsel %vm12149_vm13, %v6981_v62, %v6985_v17  ;;  %v7018_v43 = vrot.slane %v7016_v60, 4  ;;  %v7030_v20 = vshrl.u32 %v14941_v19, 16  ;;  %v6995_v34 = vrot.slane %v6994_v24, 4 }
 0x5ec   :  { %v7025_v2 = vshll.u32 %v17357_v37, 16  ;;  %17358 = vst [vmem:[#allocation39_spill] sm:$0xff] %v15013_v8  ;;  %v7013_v55 = vrot.slane %v7011_v54, 5  ;;  %v7008_v42 = vor.u32 %v7007_v35, %v7004_v40  ;;  %v7021_v7 = vrot.slane %v7019_v30, 5 }
 0x5ed   :  { %v7032_v6 = vrot.slane %v7030_v20, 4  ;;  %v7033_v23 = vshll.u32 %v14941_v19, 16  ;;  %v17359_v51 = vcombine.high %v14867_v3, %v14885_v22  ;;  %v7044_v14 = vshrl.u32 %v14947_v52, 16 }
 0x5ee   :  { %v7027_v12 = vrot.slane %v7025_v2, 5  ;;  %v15023_v10 = vsel %vm12149_vm13, %v6995_v34, %v6999_v21  ;;  %v7009_v49 = vrot.slane %v7008_v42, 4  ;;  %v7022_v11 = vor.u32 %v7021_v7, %v7018_v43 }
 0x5ef   :  { %v7039_v15 = vshll.u32 %v17359_v51, 16  ;;  %17360 = vst [vmem:[#allocation41_spill] sm:$0xff] %v15023_v10  ;;  %v7047_v58 = vshll.u32 %v14947_v52, 16  ;;  %v7035_v17 = vrot.slane %v7033_v23, 5  ;;  %v7046_v39 = vrot.slane %v7044_v14, 4 }
 0x5f0   :  { %v17361_v19 = vcombine.high %v14881_v56, %v14899_v50  ;;  %v15031_v3 = vsel %vm12149_vm13, %v7009_v49, %v7013_v55  ;;  %v7023_v22 = vrot.slane %v7022_v11, 4  ;;  %v7058_v57 = vshrl.u32 %v11650_v26, 16  ;;  %v11655_v52 = vld [vmem:[#allocation2 + $0x114] ss:$8 sps:$4 sm:$0x11]  }
 0x5f1   :  { %v7041_v47 = vrot.slane %v7039_v15, 5  ;;  %17362 = vst [vmem:[#allocation58_spill] sm:$0xff] %v15031_v3  ;;  %v7049_v1 = vrot.slane %v7047_v58, 5  ;;  %v7036_v27 = vor.u32 %v7035_v17, %v7032_v6  ;;  %v7061_v21 = vshll.u32 %v11650_v26, 16 }
 0x5f2   :  { %v7053_v25 = vshll.u32 %v17361_v19, 16  ;;  %v7067_v40 = vshll.u32 %v11652_v9, 16  ;;  %v15035_v31 = vsel %vm12149_vm13, %v7023_v22, %v7027_v12  ;;  %v7060_v50 = vrot.slane %v7058_v57, 4  ;;  %v15063_v19 = vld [vmem:[#allocation2 + $0x20] sm:$0x1e] }
 0x5f3   :  { %17363 = vst [vmem:[#allocation63_spill] sm:$0xff] %v15035_v31  ;;  %v7050_v62 = vor.u32 %v7049_v1, %v7046_v39  ;;  %v7072_v56 = vshrl.u32 %v14953_v5, 16  ;;  %v7037_v36 = vrot.slane %v7036_v27, 4  ;;  %v7063_v54 = vrot.slane %v7061_v21, 5  ;;  %v15061_v39 = vld [vmem:[#allocation2 + $0x10] sm:$0x1e] }
 0x5f4   :  { %v7055_v63 = vrot.slane %v7053_v25, 5  ;;  %v7069_v60 = vrot.slane %v7067_v40, 5  ;;  %v7075_v24 = vshll.u32 %v14953_v5, 16  ;;  %v17364_v37 = vcombine.high %v14897_v38, %v14901_v0  ;;  %v15071_v22 = vld [vmem:[#allocation2 + $0x40] sm:$0x1e] }
 0x5f5   :  { %v7051_v35 = vrot.slane %v7050_v62, 4  ;;  %v7074_v30 = vrot.slane %v7072_v56, 4  ;;  %v7086_v26 = vshrl.u32 %v11653_v13, 16  ;;  %v15044_v55 = vsel %vm12149_vm13, %v7037_v36, %v7041_v47  ;;  %v15081_v21 = vld [vmem:[#allocation2 + $0x50] sm:$0x1e] }
 0x5f6   :  { %v7081_v2 = vshll.u32 %v17364_v37, 16  ;;  %17365 = vst [vmem:[#allocation80_spill] sm:$0xff] %v15044_v55  ;;  %v7064_v43 = vor.u32 %v7063_v54, %v7060_v50  ;;  %v7077_v20 = vrot.slane %v7075_v24, 5  ;;  %v7089_v9 = vshll.u32 %v11653_v13, 16  ;;  %v15069_v13 = vld [vmem:[#allocation2 + $0x30] sm:$0x1e] }
 0x5f7   :  { %v15048_v34 = vsel %vm12149_vm13, %v7051_v35, %v7055_v63  ;;  %v7088_v5 = vrot.slane %v7086_v26, 4  ;;  %v7095_v7 = vshll.u32 %v11655_v52, 16  ;;  %v7100_v0 = vshrl.u32 %v14959_v18, 16  ;;  %v15089_v56 = vld [vmem:[#allocation2 + $0x18] sm:$0x1e] }
 0x5f8   :  { %17366 = vst [vmem:[#allocation86_spill] sm:$0xff] %v15048_v34  ;;  %v7083_v42 = vrot.slane %v7081_v2, 5  ;;  %v7065_v12 = vrot.slane %v7064_v43, 4  ;;  %v7078_v6 = vor.u32 %v7077_v20, %v7074_v30  ;;  %v7091_v23 = vrot.slane %v7089_v9, 5  ;;  %v15091_v36 = vld [vmem:[#allocation2 + $0x28] sm:$0x1e] }
 0x5f9   :  { %v7097_v38 = vrot.slane %v7095_v7, 5  ;;  %v7103_v51 = vshll.u32 %v14959_v18, 16  ;;  %v17367_v15 = vcombine.high %v14915_v29, %v14917_v16  ;;  %v7102_v47 = vrot.slane %v7100_v0, 4  ;;  %v15093_v54 = vld [vmem:[#allocation2 + $0x60] sm:$0x1e] }
 0x5fa   :  { %v15059_v11 = vsel %vm12149_vm13, %v7065_v12, %v7069_v60  ;;  %v7079_v58 = vrot.slane %v7078_v6, 4  ;;  %v7092_v17 = vor.u32 %v7091_v23, %v7088_v5  ;;  %v15095_v60 = vld [vmem:[#allocation2 + $0x70] sm:$0x1e]  ;;  %v7198_v2 = vld [vmem:[#allocation2 + $0x38] sm:$0x1e] }
 0x5fb   :  { %v7109_v14 = vshll.u32 %v17367_v15, 16  ;;  %17368 = vst [vmem:[#allocation109_spill] sm:$0xff] %v15059_v11  ;;  %v7105_v25 = vrot.slane %v7103_v51, 5  ;;  %v7200_v26 = vld [vmem:[#allocation2 + $0x48] sm:$0x1e]  ;;  %v10849_v51 = vcombine.high %v15061_v39, %v15089_v56  ;;  %v10850_v15 = vcombine.low %v15063_v19, %v15091_v36 }
 0x5fc   :  { %v15075_v1 = vsel %vm12149_vm13, %v7079_v58, %v7083_v42  ;;  %v7093_v57 = vrot.slane %v7092_v17, 4  ;;  %v15107_v43 = vld [vmem:[#allocation2 + $0x80] sm:$0x1e]  ;;  %v15109_v20 = vld [vmem:[#allocation2 + $0xb0] sm:$0x1e] }
 0x5fd   :  { %v7111_v18 = vrot.slane %v7109_v14, 5  ;;  %17369 = vst [vmem:[#allocation112_spill] sm:$0xff] %v15075_v1  ;;  %v7106_v40 = vor.u32 %v7105_v25, %v7102_v47  ;;  %v7202_v12 = vld [vmem:[#allocation2 + $0x58] sm:$0x1e]  ;;  %v15117_v6 = vld [vmem:[#allocation2 + $0xc0] sm:$0x1e]  ;;  %v10851_v14 = vcombine.high %v15063_v19, %v15091_v36 }
 0x5fe   :  { %v15099_v24 = vsel %vm12149_vm13, %v7093_v57, %v7097_v38  ;;  %v7204_v23 = vld [vmem:[#allocation2 + $0x68] sm:$0x1e]  ;;  %v15119_v0 = vld [vmem:[#allocation2 + $0x78] sm:$0x1e]  ;;  %v10848_v38 = vcombine.low %v15061_v39, %v15089_v56  ;;  %v15129_v58 = vld [vmem:[#allocation2 + $0xd0] sm:$0x1e]  ;;  %v10852_v57 = vcombine.low %v15069_v13, %v7198_v2  ;;  %v10854_v39 = vcombine.low %v15071_v22, %v7200_v26 }
 0x5ff   :  { %17370 = vst [vmem:[#allocation122_spill] sm:$0xff] %v15099_v24  ;;  %v7107_v9 = vrot.slane %v7106_v40, 4  ;;  %v7208_v47 = vld [vmem:[#allocation2 + $0x88] sm:$0x1e]  ;;  %v7210_v25 = vld [vmem:[#allocation2 + $0xb8] sm:$0x1e]  ;;  %v10853_v40 = vcombine.high %v15069_v13, %v7198_v2  ;;  %v10857_v2 = vcombine.high %v15081_v21, %v7202_v12  ;;  %v10858_v35 = vcombine.low %v15093_v54, %v7204_v23 }
 0x600   :  { %v15138_v56 = vld [vmem:[#allocation2 + $0xe0] sm:$0x1e]  ;;  %v7212_v36 = vld [vmem:[#allocation2 + $0xc8] sm:$0x1e]  ;;  %v7214_v7 = vld [vmem:[#allocation2 + $0xd8] sm:$0x1e]  ;;  %v10859_v5 = vcombine.high %v15093_v54, %v7204_v23  ;;  %v10860_v19 = vcombine.low %v15095_v60, %v15119_v0  ;;  %v10863_v50 = vcombine.high %v15107_v43, %v7208_v47 }
 0x601   :  { %v15133_v17 = vsel %vm12149_vm13, %v7107_v9, %v7111_v18  ;;  %v10855_v18 = vcombine.high %v15071_v22, %v7200_v26  ;;  %v10856_v9 = vcombine.low %v15081_v21, %v7202_v12  ;;  %v15146_v37 = vld [vmem:[#allocation2 + $0x100] sm:$0x1e]  ;;  %v7216_v42 = vld [vmem:[#allocation2 + $0xe8] sm:$0x1e]  ;;  %v10861_v22 = vcombine.high %v15095_v60, %v15119_v0 }
 0x602   :  { %17371 = vst [vmem:[#allocation124_spill] sm:$0xff] %v15133_v17  ;;  %v15148_v13 = vld [vmem:[#allocation2 + $0x108] sm:$0x1e]  ;;  %v15155_v30 = vld [vmem:[#allocation2 + $0x120] sm:$0x1e]  ;;  %v10862_v26 = vcombine.low %v15107_v43, %v7208_v47  ;;  %v10864_v21 = vcombine.low %v15109_v20, %v7210_v25  ;;  %v10865_v12 = vcombine.high %v15109_v20, %v7210_v25  ;;  %v10866_v54 = vcombine.low %v15117_v6, %v7212_v36 }
 0x603   :  { %v15157_v62 = vld [vmem:[#allocation2 + $0x128] sm:$0x1e]  ;;  %v10867_v23 = vcombine.high %v15117_v6, %v7212_v36  ;;  %v10868_v63 = vcombine.low %v15129_v58, %v7214_v7  ;;  %v10869_v52 = vcombine.high %v15129_v58, %v7214_v7  ;;  %v10870_v29 = vcombine.low %v15138_v56, %v7216_v42 }
 0x604   :  { %v10871_v60 = vcombine.high %v15138_v56, %v7216_v42  ;;  %v10874_v0 = vcombine.low %v15146_v37, %v15148_v13  ;;  %v10875_v43 = vcombine.high %v15146_v37, %v15148_v13  ;;  %v10878_v20 = vcombine.low %v15155_v30, %v15157_v62 }
 0x605   :  { %v10879_v6 = vcombine.high %v15155_v30, %v15157_v62  ;;  %v10880_v47 = vrot.slane %v10848_v38, 9  ;;  %v7355_v25 = vrot.slane %v10849_v51, 5  ;;  %v10881_v36 = vrot.slane %v10850_v15, 9  ;;  %v11656_v62 = vld [vmem:[#allocation2 + $0xf0] ss:$8 sps:$4 sm:$0xee]  }
 0x606   :  { %v7359_v7 = vrot.slane %v10851_v14, 5  ;;  %v10882_v58 = vrot.slane %v10852_v57, 9  ;;  %v7363_v27 = vrot.slane %v10853_v40, 5  ;;  %v10883_v49 = vrot.slane %v10854_v39, 9 }
 0x607   :  { %v7367_v42 = vrot.slane %v10855_v18, 5  ;;  %v10884_v56 = vrot.slane %v10856_v9, 9  ;;  %v15181_v16 = vsel %vm12162_vm14, %v10880_v47, %v7355_v25  ;;  %v7371_v13 = vrot.slane %v10857_v2, 5  ;;  %v11658_v14 = vld [vmem:[#allocation2 + $0xf4] ss:$8 sps:$4 sm:$0x11]  }
 0x608   :  { %17372 = vst [vmem:[#allocation144_spill] sm:$0xff] %v15181_v16  ;;  %v15185_v37 = vsel %vm12162_vm14, %v10881_v36, %v7359_v7  ;;  %v10885_v17 = vrot.slane %v10858_v35, 9  ;;  %v15189_v30 = vsel %vm12162_vm14, %v10882_v58, %v7363_v27  ;;  %v7375_v51 = vrot.slane %v10859_v5, 5  ;;  %v11659_v35 = vld [vmem:[#allocation2 + $0x110] ss:$8 sps:$4 sm:$0xee]  }
 0x609   :  { %17373 = vst [vmem:[#allocation148_spill] sm:$0xff] %v15185_v37  ;;  %17374 = vst [vmem:[#allocation166_spill] sm:$0xff] %v15189_v30  ;;  %v15193_v38 = vsel %vm12162_vm14, %v10883_v49, %v7367_v42  ;;  %v10886_v15 = vrot.slane %v10860_v19, 9  ;;  %v15197_v57 = vsel %vm12162_vm14, %v10884_v56, %v7371_v13  ;;  %v7379_v40 = vrot.slane %v10861_v22, 5  ;;  %v15231_v13 = vld [vmem:[#allocation2 + $0x20] sm:$0x1f] }
 0x60a   :  { %17375 = vst [vmem:[#allocation168_spill] sm:$0xff] %v15193_v38  ;;  %17376 = vst [vmem:[#allocation45_spill] sm:$0xff] %v15197_v57  ;;  %v10887_v39 = vrot.slane %v10862_v26, 9  ;;  %v7383_v18 = vrot.slane %v10863_v50, 5  ;;  %v15201_v9 = vsel %vm12162_vm14, %v10885_v17, %v7375_v51  ;;  %v10888_v27 = vrot.slane %v10864_v21, 9 }
 0x60b   :  { %17377 = vst [vmem:[#allocation49_spill] sm:$0xff] %v15201_v9  ;;  %v7387_v2 = vrot.slane %v10865_v12, 5  ;;  %v10889_v47 = vrot.slane %v10866_v54, 9  ;;  %v11661_v49 = vld [vmem:[#allocation2 + $0x114] ss:$8 sps:$4 sm:$0x11]   ;;  %v15205_v5 = vsel %vm12162_vm14, %v10886_v15, %v7379_v40 }
 0x60c   :  { %17378 = vst [vmem:[#allocation40_spill] sm:$0xff] %v15205_v5  ;;  %v15209_v19 = vsel %vm12162_vm14, %v10887_v39, %v7383_v18  ;;  %v7391_v22 = vrot.slane %v10867_v23, 5  ;;  %v10890_v26 = vrot.slane %v10868_v63, 9  ;;  %v7395_v17 = vrot.slane %v10869_v52, 5  ;;  %v15319_v15 = vld [vmem:[#allocation2 + $0xe8] sm:$0x1f] }
 0x60d   :  { %17379 = vst [vmem:[#allocation42_spill] sm:$0xff] %v15209_v19  ;;  %v15213_v50 = vsel %vm12162_vm14, %v10888_v27, %v7387_v2  ;;  %v10891_v25 = vrot.slane %v10870_v29, 9  ;;  %v7399_v21 = vrot.slane %v10871_v60, 5  ;;  %v10892_v54 = vrot.slane %v11656_v62, 9  ;;  %v15235_v62 = vld [vmem:[#allocation2 + $0x40] sm:$0x1f] }
 0x60e   :  { %17380 = vst [vmem:[#allocation67_spill] sm:$0xff] %v15213_v50  ;;  %v15217_v12 = vsel %vm12162_vm14, %v10889_v47, %v7391_v22  ;;  %v7403_v36 = vrot.slane %v11658_v14, 5  ;;  %v10893_v7 = vrot.slane %v10874_v0, 9  ;;  %v15221_v58 = vsel %vm12162_vm14, %v10890_v26, %v7395_v17  ;;  %v15233_v0 = vld [vmem:[#allocation2 + $0x30] sm:$0x1f] }
 0x60f   :  { %17381 = vst [vmem:[#allocation69_spill] sm:$0xff] %v15217_v12  ;;  %17382 = vst [vmem:[#allocation61_spill] sm:$0xff] %v15221_v58  ;;  %v15225_v63 = vsel %vm12162_vm14, %v10891_v25, %v7399_v21  ;;  %v7407_v23 = vrot.slane %v10875_v43, 5  ;;  %v10894_v42 = vrot.slane %v11659_v35, 9  ;;  %v7411_v52 = vrot.slane %v11661_v49, 5 }
 0x610   :  { %17383 = vst [vmem:[#allocation64_spill] sm:$0xff] %v15225_v63  ;;  %v15229_v29 = vsel %vm12162_vm14, %v10892_v54, %v7403_v36  ;;  %v10895_v60 = vrot.slane %v10878_v20, 9  ;;  %v7415_v56 = vrot.slane %v10879_v6, 5  ;;  %v15247_v6 = vld [vmem:[#allocation2 + $0x50] sm:$0x1f] }
 0x611   :  { %17384 = vst [vmem:[#allocation89_spill] sm:$0xff] %v15229_v29  ;;  %v15239_v51 = vsel %vm12162_vm14, %v10893_v7, %v7407_v23  ;;  %v15249_v14 = vld [vmem:[#allocation2 + $0x60] sm:$0x1f]  ;;  %v15253_v40 = vsel %vm12162_vm14, %v10894_v42, %v7411_v52  ;;  %v7642_v27 = vld [vmem:[#allocation2 + $0x28] sm:$0x1f] }
 0x612   :  { %17385 = vst [vmem:[#allocation90_spill] sm:$0xff] %v15239_v51  ;;  %17386 = vst [vmem:[#allocation83_spill] sm:$0xff] %v15253_v40  ;;  %v15257_v39 = vsel %vm12162_vm14, %v10895_v60, %v7415_v56  ;;  %v15263_v2 = vld [vmem:[#allocation2 + $0x70] sm:$0x1f]  ;;  %v15265_v47 = vld [vmem:[#allocation2 + $0x80] sm:$0x1f]  ;;  %v10928_v52 = vcombine.low %v15231_v13, %v7642_v27  ;;  %v10929_v22 = vcombine.high %v15231_v13, %v7642_v27 }
 0x613   :  { %17387 = vst [vmem:[#allocation87_spill] sm:$0xff] %v15257_v39  ;;  %v7644_v25 = vld [vmem:[#allocation2 + $0x38] sm:$0x1f]  ;;  %v15275_v21 = vld [vmem:[#allocation2 + $0x48] sm:$0x1f] }
 0x614   :  { %v15277_v54 = vld [vmem:[#allocation2 + $0xc0] sm:$0x1f]  ;;  %v15279_v36 = vld [vmem:[#allocation2 + $0xd0] sm:$0x1f]  ;;  %v15289_v60 = vld [vmem:[#allocation2 + $0x58] sm:$0x1f]  ;;  %v10930_v18 = vcombine.low %v15233_v0, %v7644_v25  ;;  %v10931_v7 = vcombine.high %v15233_v0, %v7644_v25  ;;  %v10932_v23 = vcombine.low %v15235_v62, %v15275_v21  ;;  %v10933_v40 = vcombine.high %v15235_v62, %v15275_v21 }
 0x615   :  { %v15291_v56 = vld [vmem:[#allocation2 + $0x68] sm:$0x1f]  ;;  %v15293_v17 = vld [vmem:[#allocation2 + $0xe0] sm:$0x1f]  ;;  %v15301_v26 = vld [vmem:[#allocation2 + $0x78] sm:$0x1f]  ;;  %v10934_v51 = vcombine.low %v15247_v6, %v15289_v60  ;;  %v10935_v13 = vcombine.high %v15247_v6, %v15289_v60 }
 0x616   :  { %v15303_v42 = vld [vmem:[#allocation2 + $0x88] sm:$0x1f]  ;;  %v15306_v35 = vld [vmem:[#allocation2 + $0xf0] sm:$0x1f]  ;;  %v15310_v20 = vld [vmem:[#allocation2 + $0xd8] sm:$0x1f]  ;;  %v15331_v0 = vcombine.low %v15249_v14, %v15291_v56  ;;  %v10937_v63 = vcombine.high %v15249_v14, %v15291_v56  ;;  %v15343_v62 = vcombine.low %v15263_v2, %v15301_v26  ;;  %v10939_v6 = vcombine.high %v15263_v2, %v15301_v26 }
 0x617   :  { %v15308_v49 = vld [vmem:[#allocation2 + $0xc8] sm:$0x1f]  ;;  %v15317_v43 = vld [vmem:[#allocation2 + $0x110] sm:$0x1f]  ;;  %v15321_v39 = vld [vmem:[#allocation2 + $0xf8] sm:$0x1f]  ;;  %v15349_v21 = vcombine.low %v15265_v47, %v15303_v42  ;;  %v15361_v56 = vcombine.low %v15279_v36, %v15310_v20  ;;  %v15367_v26 = vcombine.low %v15293_v17, %v15319_v15 }
 0x618   :  { %v15333_v27 = vld [vmem:[#allocation2 + $0x120] sm:$0x1f]  ;;  %v15335_v25 = vld [vmem:[#allocation2 + $0x118] sm:$0x1f]  ;;  %v15337_v29 = vld [vmem:[#allocation2 + $0x128] sm:$0x1f]  ;;  %v15355_v58 = vcombine.low %v15277_v54, %v15308_v49  ;;  %v15373_v12 = vcombine.low %v15306_v35, %v15321_v39 }
 0x619   :  { %v15379_v50 = vcombine.low %v15317_v43, %v15335_v25  ;;  %v15385_v19 = vcombine.low %v15333_v27, %v15337_v29  ;;  %v7802_v5 = vshrl.u32 %v10928_v52, 16  ;;  %v7805_v9 = vshll.u32 %v10928_v52, 16 }
 0x61a   :  { %v7811_v57 = vshll.u32 %v10929_v22, 16  ;;  %v7816_v38 = vshrl.u32 %v10930_v18, 16  ;;  %v7819_v30 = vshll.u32 %v10930_v18, 16  ;;  %v7825_v14 = vshll.u32 %v10931_v7, 16 }
 0x61b   :  { %v7830_v37 = vshrl.u32 %v10932_v23, 16  ;;  %v7804_v16 = vrot.slane %v7802_v5, 4  ;;  %v7807_v24 = vrot.slane %v7805_v9, 5  ;;  %v7833_v11 = vshll.u32 %v10932_v23, 16 }
 0x61c   :  { %v7813_v1 = vrot.slane %v7811_v57, 5  ;;  %v7818_v34 = vrot.slane %v7816_v38, 4  ;;  %v7821_v2 = vrot.slane %v7819_v30, 5  ;;  %v7827_v55 = vrot.slane %v7825_v14, 5 }
 0x61d   :  { %v7832_v31 = vrot.slane %v7830_v37, 4  ;;  %v7808_v3 = vor.u32 %v7807_v24, %v7804_v16  ;;  %v7835_v10 = vrot.slane %v7833_v11, 5  ;;  %v7839_v8 = vshll.u32 %v10933_v40, 16  ;;  %v11670_v24 = vld [vmem:[#allocation2 + $0x90] ss:$8 sps:$4 sm:$0xff]  }
 0x61e   :  { %v7844_v44 = vshrl.u32 %v10934_v51, 16  ;;  %v7822_v60 = vor.u32 %v7821_v2, %v7818_v34  ;;  %v7847_v41 = vshll.u32 %v10934_v51, 16  ;;  %v7853_v52 = vshll.u32 %v10935_v13, 16 }
 0x61f   :  { %v7858_v22 = vshrl.u32 %v15331_v0, 16  ;;  %v7809_v18 = vrot.slane %v7808_v3, 4  ;;  %v7836_v7 = vor.u32 %v7835_v10, %v7832_v31  ;;  %v7841_v53 = vrot.slane %v7839_v8, 5  ;;  %v11672_v8 = vld [vmem:[#allocation2 + $0x94] ss:$8 sps:$4 sm:$0x11]  }
 0x620   :  { %v7846_v5 = vrot.slane %v7844_v44, 4  ;;  %v7823_v9 = vrot.slane %v7822_v60, 4  ;;  %v7849_v57 = vrot.slane %v7847_v41, 5  ;;  %v7855_v23 = vrot.slane %v7853_v52, 5 }
 0x621   :  { %v7860_v38 = vrot.slane %v7858_v22, 4  ;;  %v15392_v37 = vsel %vm12149_vm13, %v7809_v18, %v7813_v1  ;;  %v7837_v11 = vrot.slane %v7836_v7, 4  ;;  %v7861_v16 = vshll.u32 %v15331_v0, 16 }
 0x622   :  { %v7867_v34 = vshll.u32 %v10937_v63, 16  ;;  %v15397_v30 = vsel %vm12149_vm13, %v7823_v9, %v7827_v55  ;;  %v7850_v10 = vor.u32 %v7849_v57, %v7846_v5  ;;  %v7872_v44 = vshrl.u32 %v15343_v62, 16 }
 0x623   :  { %v7875_v41 = vshll.u32 %v15343_v62, 16  ;;  %v15403_v3 = vsel %vm12149_vm13, %v7837_v11, %v7841_v53  ;;  %v7863_v31 = vrot.slane %v7861_v16, 5  ;;  %v7881_v51 = vshll.u32 %v10939_v6, 16 }
 0x624   :  { %v7869_v1 = vrot.slane %v7867_v34, 5  ;;  %v7851_v40 = vrot.slane %v7850_v10, 4  ;;  %v7874_v63 = vrot.slane %v7872_v44, 4  ;;  %v7886_v0 = vshrl.u32 %v15349_v21, 16 }
 0x625   :  { %v7877_v13 = vrot.slane %v7875_v41, 5  ;;  %v7864_v55 = vor.u32 %v7863_v31, %v7860_v38  ;;  %v7883_v60 = vrot.slane %v7881_v51, 5  ;;  %v7889_v14 = vshll.u32 %v15349_v21, 16 }
 0x626   :  { %v17388_v62 = vcombine.high %v15265_v47, %v15303_v42  ;;  %v15412_v53 = vsel %vm12149_vm13, %v7851_v40, %v7855_v23  ;;  %v7888_v22 = vrot.slane %v7886_v0, 4  ;;  %v7900_v6 = vshrl.u32 %v11670_v24, 16 }
 0x627   :  { %v7878_v52 = vor.u32 %v7877_v13, %v7874_v63  ;;  %v7865_v18 = vrot.slane %v7864_v55, 4  ;;  %v7891_v7 = vrot.slane %v7889_v14, 5  ;;  %v7903_v9 = vshll.u32 %v11670_v24, 16  ;;  %v11673_v55 = vld [vmem:[#allocation2 + $0x100] ss:$8 sps:$4 sm:$0xff]  }
 0x628   :  { %v7895_v2 = vshll.u32 %v17388_v62, 16  ;;  %v7902_v38 = vrot.slane %v7900_v6, 4  ;;  %v7909_v11 = vshll.u32 %v11672_v8, 16  ;;  %v7914_v21 = vshrl.u32 %v15355_v58, 16 }
 0x629   :  { %v7879_v57 = vrot.slane %v7878_v52, 4  ;;  %v15417_v47 = vsel %vm12149_vm13, %v7865_v18, %v7869_v1  ;;  %v7892_v42 = vor.u32 %v7891_v7, %v7888_v22  ;;  %v7905_v16 = vrot.slane %v7903_v9, 5 }
 0x62a   :  { %v7897_v5 = vrot.slane %v7895_v2, 5  ;;  %v7917_v23 = vshll.u32 %v15355_v58, 16  ;;  %v7911_v10 = vrot.slane %v7909_v11, 5  ;;  %v7916_v44 = vrot.slane %v7914_v21, 4 }
 0x62b   :  { %v15422_v34 = vsel %vm12149_vm13, %v7879_v57, %v7883_v60  ;;  %v17389_v24 = vcombine.high %v15277_v54, %v15308_v49  ;;  %v7893_v8 = vrot.slane %v7892_v42, 4  ;;  %v7906_v31 = vor.u32 %v7905_v16, %v7902_v38 }
 0x62c   :  { %v7919_v51 = vrot.slane %v7917_v23, 5  ;;  %v7928_v1 = vshrl.u32 %v15361_v56, 16  ;;  %v7931_v63 = vshll.u32 %v15361_v56, 16  ;;  %v17390_v58 = vcombine.high %v15279_v36, %v15310_v20  ;;  %v11675_v56 = vld [vmem:[#allocation2 + $0x104] ss:$8 sps:$4 sm:$0x11]  }
 0x62d   :  { %v7923_v41 = vshll.u32 %v17389_v24, 16  ;;  %v7942_v0 = vshrl.u32 %v15367_v26, 16  ;;  %v15435_v60 = vsel %vm12149_vm13, %v7893_v8, %v7897_v5  ;;  %v7907_v49 = vrot.slane %v7906_v31, 4  ;;  %v11676_v8 = vld [vmem:[#allocation2 + $0x130] ss:$8 sps:$4 sm:$0xff]  }
 0x62e   :  { %v7937_v13 = vshll.u32 %v17390_v58, 16  ;;  %v7920_v54 = vor.u32 %v7919_v51, %v7916_v44  ;;  %v7930_v14 = vrot.slane %v7928_v1, 4  ;;  %v7933_v62 = vrot.slane %v7931_v63, 5 }
 0x62f   :  { %v7925_v40 = vrot.slane %v7923_v41, 5  ;;  %v7944_v52 = vrot.slane %v7942_v0, 4  ;;  %v7945_v22 = vshll.u32 %v15367_v26, 16  ;;  %v15440_v20 = vsel %vm12149_vm13, %v7907_v49, %v7911_v10  ;;  %v11678_v0 = vld [vmem:[#allocation2 + $0x134] ss:$8 sps:$4 sm:$0x11]  }
 0x630   :  { %v7939_v2 = vrot.slane %v7937_v13, 5  ;;  %v7921_v36 = vrot.slane %v7920_v54, 4  ;;  %v17391_v6 = vcombine.high %v15293_v17, %v15319_v15  ;;  %v7956_v7 = vshrl.u32 %v15373_v12, 16 }
 0x631   :  { %v7934_v5 = vor.u32 %v7933_v62, %v7930_v14  ;;  %v7947_v9 = vrot.slane %v7945_v22, 5  ;;  %v7959_v57 = vshll.u32 %v15373_v12, 16  ;;  %v17392_v38 = vcombine.high %v15306_v35, %v15321_v39 }
 0x632   :  { %v7951_v18 = vshll.u32 %v17391_v6, 16  ;;  %v15452_v11 = vsel %vm12149_vm13, %v7921_v36, %v7925_v40  ;;  %v7958_v42 = vrot.slane %v7956_v7, 4  ;;  %v7970_v16 = vshrl.u32 %v11673_v55, 16 }
 0x633   :  { %v7965_v26 = vshll.u32 %v17392_v38, 16  ;;  %v7935_v23 = vrot.slane %v7934_v5, 4  ;;  %v7948_v15 = vor.u32 %v7947_v9, %v7944_v52  ;;  %v7961_v17 = vrot.slane %v7959_v57, 5 }
 0x634   :  { %v7953_v21 = vrot.slane %v7951_v18, 5  ;;  %v7972_v44 = vrot.slane %v7970_v16, 4  ;;  %v7973_v24 = vshll.u32 %v11673_v55, 16  ;;  %v7979_v41 = vshll.u32 %v11675_v56, 16  ;;  %v15486_v16 = vld [vmem:[#allocation2 + $0x30] sm:$0x1e] }
 0x635   :  { %v7967_v10 = vrot.slane %v7965_v26, 5  ;;  %v7984_v12 = vshrl.u32 %v15379_v50, 16  ;;  %v15457_v39 = vsel %vm12149_vm13, %v7935_v23, %v7939_v2  ;;  %v7949_v35 = vrot.slane %v7948_v15, 4  ;;  %v15478_v26 = vld [vmem:[#allocation2 + $0x20] sm:$0x1e] }
 0x636   :  { %v7962_v31 = vor.u32 %v7961_v17, %v7958_v42  ;;  %v7987_v51 = vshll.u32 %v15379_v50, 16  ;;  %v7975_v1 = vrot.slane %v7973_v24, 5  ;;  %v7981_v40 = vrot.slane %v7979_v41, 5  ;;  %v15488_v23 = vld [vmem:[#allocation2 + $0x40] sm:$0x1e] }
 0x637   :  { %v7986_v63 = vrot.slane %v7984_v12, 4  ;;  %v17393_v58 = vcombine.high %v15317_v43, %v15335_v25  ;;  %v15465_v55 = vsel %vm12149_vm13, %v7949_v35, %v7953_v21  ;;  %v7998_v14 = vshrl.u32 %v15385_v19, 16  ;;  %v15498_v24 = vld [vmem:[#allocation2 + $0x50] sm:$0x1e] }
 0x638   :  { %v7963_v49 = vrot.slane %v7962_v31, 4  ;;  %v7989_v54 = vrot.slane %v7987_v51, 5  ;;  %v7976_v62 = vor.u32 %v7975_v1, %v7972_v44  ;;  %v8001_v50 = vshll.u32 %v15385_v19, 16  ;;  %v15504_v31 = vld [vmem:[#allocation2 + $0x28] sm:$0x1e] }
 0x639   :  { %v7993_v13 = vshll.u32 %v17393_v58, 16  ;;  %v17394_v52 = vcombine.high %v15333_v27, %v15337_v29  ;;  %v8000_v56 = vrot.slane %v7998_v14, 4  ;;  %v8012_v36 = vshrl.u32 %v11676_v8, 16  ;;  %v15506_v51 = vld [vmem:[#allocation2 + $0x60] sm:$0x1e] }
 0x63a   :  { %v15474_v43 = vsel %vm12149_vm13, %v7963_v49, %v7967_v10  ;;  %v7990_v25 = vor.u32 %v7989_v54, %v7986_v63  ;;  %v7977_v6 = vrot.slane %v7976_v62, 4  ;;  %v8003_v18 = vrot.slane %v8001_v50, 5  ;;  %v15508_v1 = vld [vmem:[#allocation2 + $0x70] sm:$0x1e]  ;;  %v8110_v49 = vld [vmem:[#allocation2 + $0x48] sm:$0x1e] }
 0x63b   :  { %v7995_v2 = vrot.slane %v7993_v13, 5  ;;  %v8007_v22 = vshll.u32 %v17394_v52, 16  ;;  %v8015_v5 = vshll.u32 %v11676_v8, 16  ;;  %v8014_v57 = vrot.slane %v8012_v36, 4  ;;  %v15518_v54 = vld [vmem:[#allocation2 + $0x80] sm:$0x1e] }
 0x63c   :  { %v7991_v9 = vrot.slane %v7990_v25, 4  ;;  %v8021_v38 = vshll.u32 %v11678_v0, 16  ;;  %v15482_v29 = vsel %vm12149_vm13, %v7977_v6, %v7981_v40  ;;  %v8004_v27 = vor.u32 %v8003_v18, %v8000_v56  ;;  %v8108_v0 = vld [vmem:[#allocation2 + $0x38] sm:$0x1e]  ;;  %v15520_v14 = vld [vmem:[#allocation2 + $0xc0] sm:$0x1e] }
 0x63d   :  { %v8009_v7 = vrot.slane %v8007_v22, 5  ;;  %v8017_v21 = vrot.slane %v8015_v5, 5  ;;  %v8112_v22 = vld [vmem:[#allocation2 + $0x58] sm:$0x1e]  ;;  %v15530_v25 = vld [vmem:[#allocation2 + $0xd0] sm:$0x1e]  ;;  %v10977_v5 = vcombine.high %v15478_v26, %v15504_v31 }
 0x63e   :  { %v15492_v15 = vsel %vm12149_vm13, %v7991_v9, %v7995_v2  ;;  %v8023_v17 = vrot.slane %v8021_v38, 5  ;;  %v8005_v41 = vrot.slane %v8004_v27, 4  ;;  %v8114_v6 = vld [vmem:[#allocation2 + $0x68] sm:$0x1e]  ;;  %v8116_v18 = vld [vmem:[#allocation2 + $0x78] sm:$0x1e]  ;;  %v10982_v36 = vcombine.low %v15498_v24, %v8112_v22 }
 0x63f   :  { %17395 = vst [vmem:[#allocation111_spill] sm:$0xff] %v15492_v15  ;;  %v8018_v12 = vor.u32 %v8017_v21, %v8014_v57  ;;  %v15540_v9 = vld [vmem:[#allocation2 + $0xe0] sm:$0x1e]  ;;  %v8118_v38 = vld [vmem:[#allocation2 + $0x88] sm:$0x1e]  ;;  %v10978_v21 = vcombine.low %v15486_v16, %v8108_v0  ;;  %v10983_v52 = vcombine.high %v15498_v24, %v8112_v22  ;;  %v10984_v58 = vcombine.low %v15506_v51, %v8114_v6 }
 0x640   :  { %v15524_v62 = vsel %vm12149_vm13, %v8005_v41, %v8009_v7  ;;  %v10976_v7 = vcombine.low %v15478_v26, %v15504_v31  ;;  %v15546_v27 = vld [vmem:[#allocation2 + $0xc8] sm:$0x1e]  ;;  %v10979_v41 = vcombine.high %v15486_v16, %v8108_v0  ;;  %v15551_v56 = vld [vmem:[#allocation2 + $0xf0] sm:$0x1e]  ;;  %v8128_v16 = vld [vmem:[#allocation2 + $0xf8] sm:$0x1e]  ;;  %v10985_v26 = vcombine.high %v15506_v51, %v8114_v6 }
 0x641   :  { %17396 = vst [vmem:[#allocation107_spill] sm:$0xff] %v15524_v62  ;;  %v8019_v2 = vrot.slane %v8018_v12, 4  ;;  %v10980_v12 = vcombine.low %v15488_v23, %v8110_v49  ;;  %v15561_v50 = vld [vmem:[#allocation2 + $0x110] sm:$0x1e]  ;;  %v15563_v0 = vld [vmem:[#allocation2 + $0x118] sm:$0x1e]  ;;  %v10986_v31 = vcombine.low %v15508_v1, %v8116_v18  ;;  %v10989_v63 = vcombine.high %v15518_v54, %v8118_v38 }
 0x642   :  { %v15569_v13 = vld [vmem:[#allocation2 + $0x120] sm:$0x1e]  ;;  %v15571_v40 = vld [vmem:[#allocation2 + $0x128] sm:$0x1e]  ;;  %v10992_v8 = vcombine.low %v15520_v14, %v15546_v27  ;;  %v10993_v24 = vcombine.high %v15520_v14, %v15546_v27  ;;  %v10994_v51 = vcombine.low %v15530_v25, %v8124_v28  ;;  %v10995_v22 = vcombine.high %v15530_v25, %v8124_v28 }
 0x643   :  { %v15544_v57 = vsel %vm12149_vm13, %v8019_v2, %v8023_v17  ;;  %v15557_v17 = vld [vmem:[#allocation2 + $0xe8] sm:$0x1e]  ;;  %v10981_v2 = vcombine.high %v15488_v23, %v8110_v49  ;;  %v10987_v23 = vcombine.high %v15508_v1, %v8116_v18  ;;  %v10988_v49 = vcombine.low %v15518_v54, %v8118_v38  ;;  %v11679_v35 = vld [vmem:[#allocation2 + $0x90] ss:$8 sps:$4 sm:$0xee]  }
 0x644   :  { %17397 = vst [vmem:[#allocation106_spill] sm:$0xff] %v15544_v57  ;;  %v10996_v6 = vcombine.low %v15540_v9, %v15557_v17  ;;  %v10997_v1 = vcombine.high %v15540_v9, %v15557_v17  ;;  %v10998_v18 = vcombine.low %v15551_v56, %v8128_v16  ;;  %v10999_v54 = vcombine.high %v15551_v56, %v8128_v16  ;;  %v11681_v10 = vld [vmem:[#allocation2 + $0x94] ss:$8 sps:$4 sm:$0x11]  }
 0x645   :  { %v11002_v38 = vcombine.low %v15561_v50, %v15563_v0  ;;  %v11003_v14 = vcombine.high %v15561_v50, %v15563_v0  ;;  %v11004_v25 = vcombine.low %v15569_v13, %v15571_v40  ;;  %v11005_v27 = vcombine.high %v15569_v13, %v15571_v40  ;;  %v11682_v40 = vld [vmem:[#allocation2 + $0x100] ss:$8 sps:$4 sm:$0xee]  }
 0x646   :  { %v11008_v28 = vrot.slane %v10976_v7, 9  ;;  %v8267_v44 = vrot.slane %v10977_v5, 5  ;;  %v11009_v9 = vrot.slane %v10978_v21, 9  ;;  %v8271_v17 = vrot.slane %v10979_v41, 5 }
 0x647   :  { %v11010_v19 = vrot.slane %v10980_v12, 9  ;;  %v8275_v42 = vrot.slane %v10981_v2, 5  ;;  %v11011_v56 = vrot.slane %v10982_v36, 9  ;;  %v8279_v16 = vrot.slane %v10983_v52, 5 }
 0x648   :  { %v11012_v57 = vrot.slane %v10984_v58, 9  ;;  %v15598_v62 = vsel %vm12162_vm14, %v11008_v28, %v8267_v44  ;;  %v15602_v50 = vsel %vm12162_vm14, %v11009_v9, %v8271_v17  ;;  %v8283_v0 = vrot.slane %v10985_v26, 5  ;;  %v11684_v7 = vld [vmem:[#allocation2 + $0x104] ss:$8 sps:$4 sm:$0x11]  }
 0x649   :  { %v11013_v15 = vrot.slane %v10986_v31, 9  ;;  %v15606_v13 = vsel %vm12162_vm14, %v11010_v19, %v8275_v42  ;;  %v15610_v36 = vsel %vm12162_vm14, %v11011_v56, %v8279_v16  ;;  %v8287_v58 = vrot.slane %v10987_v23, 5  ;;  %v11685_v12 = vld [vmem:[#allocation2 + $0x130] ss:$8 sps:$4 sm:$0xee]  }
 0x64a   :  { %v11014_v52 = vrot.slane %v10988_v49, 9  ;;  %v15614_v44 = vsel %vm12162_vm14, %v11012_v57, %v8283_v0  ;;  %v8291_v5 = vrot.slane %v10989_v63, 5  ;;  %v11015_v21 = vrot.slane %v11679_v35, 9  ;;  %v11687_v2 = vld [vmem:[#allocation2 + $0x134] ss:$8 sps:$4 sm:$0x11]  }
 0x64b   :  { %v8295_v41 = vrot.slane %v11681_v10, 5  ;;  %v15618_v26 = vsel %vm12162_vm14, %v11013_v15, %v8287_v58  ;;  %v11016_v19 = vrot.slane %v10992_v8, 9  ;;  %v8299_v42 = vrot.slane %v10993_v24, 5 }
 0x64c   :  { %v11017_v31 = vrot.slane %v10994_v51, 9  ;;  %v15622_v23 = vsel %vm12162_vm14, %v11014_v52, %v8291_v5  ;;  %v8303_v63 = vrot.slane %v10995_v22, 5  ;;  %v11018_v35 = vrot.slane %v10996_v6, 9 }
 0x64d   :  { %v15626_v57 = vsel %vm12162_vm14, %v11015_v21, %v8295_v41  ;;  %v15630_v10 = vsel %vm12162_vm14, %v11016_v19, %v8299_v42  ;;  %v8307_v15 = vrot.slane %v10997_v1, 5  ;;  %v11019_v49 = vrot.slane %v10998_v18, 9 }
 0x64e   :  { %v8311_v8 = vrot.slane %v10999_v54, 5  ;;  %v15634_v24 = vsel %vm12162_vm14, %v11017_v31, %v8303_v63  ;;  %v11020_v51 = vrot.slane %v11682_v40, 9  ;;  %v8315_v28 = vrot.slane %v11684_v7, 5 }
 0x64f   :  { %v11021_v9 = vrot.slane %v11002_v38, 9  ;;  %v15638_v17 = vsel %vm12162_vm14, %v11018_v35, %v8307_v15  ;;  %v8319_v6 = vrot.slane %v11003_v14, 5  ;;  %v11022_v56 = vrot.slane %v11004_v25, 9 }
 0x650   :  { %v15642_v22 = vsel %vm12162_vm14, %v11019_v49, %v8311_v8  ;;  %v15646_v1 = vsel %vm12162_vm14, %v11020_v51, %v8315_v28  ;;  %v8323_v18 = vrot.slane %v11005_v27, 5  ;;  %v11023_v54 = vrot.slane %v11685_v12, 9 }
 0x651   :  { %v8327_v16 = vrot.slane %v11687_v2, 5  ;;  %v15650_v38 = vsel %vm12162_vm14, %v11021_v9, %v8319_v6  ;;  %v11024_v0 = vcombine.low %v15598_v62, %v15602_v50  ;;  %v11025_v40 = vcombine.high %v15598_v62, %v15602_v50 }
 0x652   :  { %v11026_v14 = vcombine.low %v15606_v13, %v15610_v36  ;;  %v15660_v25 = vsel %vm12162_vm14, %v11022_v56, %v8323_v18  ;;  %v11027_v58 = vcombine.high %v15606_v13, %v15610_v36  ;;  %v11028_v52 = vcombine.low %v15614_v44, %v15618_v26 }
 0x653   :  { %v15664_v27 = vsel %vm12162_vm14, %v11023_v54, %v8327_v16  ;;  %v11029_v7 = vcombine.high %v15614_v44, %v15618_v26  ;;  %v11030_v5 = vcombine.low %v15622_v23, %v15626_v57  ;;  %v11031_v21 = vcombine.high %v15622_v23, %v15626_v57 }
 0x654   :  { %v11032_v33 = vcombine.low %v15630_v10, %v15634_v24  ;;  %v11033_v41 = vcombine.high %v15630_v10, %v15634_v24  ;;  %v11034_v12 = vcombine.low %v15638_v17, %v15642_v22  ;;  %v11035_v19 = vcombine.high %v15638_v17, %v15642_v22 }
 0x655   :  { %v11036_v42 = vcombine.low %v15646_v1, %v15650_v38  ;;  %v11037_v31 = vcombine.high %v15646_v1, %v15650_v38  ;;  %v11038_v2 = vcombine.low %v15660_v25, %v15664_v27  ;;  %v11039_v63 = vcombine.high %v15660_v25, %v15664_v27 }
 0x656   :  { %11836 = dma.done.wait [#allocation6 + $0x1], 36864 }
 0x657   :  { %11837 = vsyncadd [#allocation6 + $0x1], 4294930432  ;;  %8875 = vmatprep.mubr.bf16.mxu1 %v14363_v59  ;;  %v8556_v35 = vld [vmem:[#allocation5 + $0x8] sm:$0xff]  ;;  %v8555_v15 = vld [vmem:[#allocation5] sm:$0xff]  ;;  %s11858_s1 = smov [#allocation16]  }
 0x658   :  { %v8558_v49 = vld [vmem:[#allocation5 + $0x18] sm:$0xff]  ;;  %8843 = vmatprep.subr.bf16.mxu1 %v8556_v35  ;;  %v8557_v8 = vld [vmem:[#allocation5 + $0x10] sm:$0xff]  ;;  %v8560_v51 = vld [vmem:[#allocation5 + $0x28] sm:$0xff]  ;;  %s10241_s2 = sshll.u32 %s11858_s1, 4  ;;  %s10242_s2 = int_to_ptr.vmem [resolvable:$true] %s10241_s2 }
 0x659   :  { %8844 = vmatpush1.bf16.msra.mxu1 %v8555_v15  ;;  %v8559_v28 = vld [vmem:[#allocation5 + $0x20] sm:$0xff]  ;;  %v8562_v9 = vld [vmem:[#allocation5 + $0x38] sm:$0xff]  ;;  %v8561_v6 = vld [vmem:[#allocation5 + $0x30] sm:$0xff]  ;;  %s11806_s30 = scalar_lea.vmem %s10242_s2, 4096  ;;  %p11811_p13 = scmp.lt.s32.totalorder %s10242_s2, %s10242_s2 }
 0x65a   :  { %8845 = vmatprep.subr.bf16.mxu1 %v8558_v49  ;;  %v8564_v56 = vld [vmem:[#allocation5 + $0x48] sm:$0xff]  ;;  %v8563_v18 = vld [vmem:[#allocation5 + $0x40] sm:$0xff]  ;;  %v8566_v59 = vld [vmem:[#allocation5 + $0x58] sm:$0xff]  ;;  %p11807_p12 = scmp.ne.s32.totalorder %s10242_s2, %s11806_s30  ;;  %p11812_p0 = scmp.lt.s32.totalorder %s11806_s30, %s11806_s30 }
 0x65b   :  { %v8565_v54 = vld [vmem:[#allocation5 + $0x50] sm:$0xff]  ;;  %v8568_v16 = vld [vmem:[#allocation5 + $0x68] sm:$0xff]  ;;  %v8567_v35 = vld [vmem:[#allocation5 + $0x60] sm:$0xff] }
 0x65c   :  { %v8570_v15 = vld [vmem:[#allocation5 + $0x78] sm:$0xff]  ;;  %v8569_v49 = vld [vmem:[#allocation5 + $0x70] sm:$0xff]  ;;  %p11813_p1 = por %p11812_p0, %p11811_p13 }
 0x65d   :  { %8846 = vmatpush1.bf16.msra.mxu1 %v8557_v8  ;;  %v8572_v8 = vld [vmem:[#allocation5 + $0x88] sm:$0xff] }
 0x65e   :  { %8847 = vmatprep.subr.bf16.mxu1 %v8560_v51  ;;  %v8571_v51 = vld [vmem:[#allocation5 + $0x80] sm:$0xff]  ;;  %p11814_p2 = pnand %p11813_p1, %p11807_p12 }
 0x661   :  { %8848 = vmatpush1.bf16.msra.mxu1 %v8559_v28  ;;  %v8574_v28 = vld [vmem:[#allocation5 + $0x98] sm:$0xff] }
 0x662   :  { %8849 = vmatprep.subr.bf16.mxu1 %v8562_v9  ;;  %v8573_v9 = vld [vmem:[#allocation5 + $0x90] sm:$0xff] }
 0x665   :  { %8850 = vmatpush1.bf16.msra.mxu1 %v8561_v6  ;;  %v8576_v6 = vld [vmem:[#allocation5 + $0xa8] sm:$0xff] }
 0x666   :  { %8851 = vmatprep.subr.bf16.mxu1 %v8564_v56  ;;  %v8575_v56 = vld [vmem:[#allocation5 + $0xa0] sm:$0xff] }
 0x669   :  { %8852 = vmatpush1.bf16.msra.mxu1 %v8563_v18  ;;  %v8578_v18 = vld [vmem:[#allocation5 + $0xb8] sm:$0xff] }
 0x66a   :  { %8853 = vmatprep.subr.bf16.mxu1 %v8566_v59  ;;  %v8577_v59 = vld [vmem:[#allocation5 + $0xb0] sm:$0xff] }
 0x66d   :  { %8854 = vmatpush1.bf16.msra.mxu1 %v8565_v54  ;;  %v8580_v54 = vld [vmem:[#allocation5 + $0xc8] sm:$0xff] }
 0x66e   :  { %8855 = vmatprep.subr.bf16.mxu1 %v8568_v16  ;;  %v8579_v16 = vld [vmem:[#allocation5 + $0xc0] sm:$0xff] }
 0x671   :  { %8856 = vmatpush1.bf16.msra.mxu1 %v8567_v35  ;;  %v8582_v35 = vld [vmem:[#allocation5 + $0xd8] sm:$0xff] }
 0x672   :  { %8857 = vmatprep.subr.bf16.mxu1 %v8570_v15  ;;  %v8581_v15 = vld [vmem:[#allocation5 + $0xd0] sm:$0xff] }
 0x675   :  { %8858 = vmatpush1.bf16.msra.mxu1 %v8569_v49  ;;  %v8584_v49 = vld [vmem:[#allocation5 + $0xe8] sm:$0xff] }
 0x676   :  { %8859 = vmatprep.subr.bf16.mxu1 %v8572_v8  ;;  %v8583_v8 = vld [vmem:[#allocation5 + $0xe0] sm:$0xff] }
 0x679   :  { %8860 = vmatpush1.bf16.msra.mxu1 %v8571_v51  ;;  %v8586_v51 = vld [vmem:[#allocation5 + $0xf8] sm:$0xff] }
 0x67a   :  { %8861 = vmatprep.subr.bf16.mxu1 %v8574_v28  ;;  %v8585_v28 = vld [vmem:[#allocation5 + $0xf0] sm:$0xff] }
 0x67d   :  { %8862 = vmatpush1.bf16.msra.mxu1 %v8573_v9  ;;  %v8588_v9 = vld [vmem:[#allocation5 + $0x108] sm:$0xff] }
 0x67e   :  { %8863 = vmatprep.subr.bf16.mxu1 %v8576_v6  ;;  %v8587_v6 = vld [vmem:[#allocation5 + $0x100] sm:$0xff] }
 0x681   :  { %8864 = vmatpush1.bf16.msra.mxu1 %v8575_v56  ;;  %v8590_v56 = vld [vmem:[#allocation5 + $0x118] sm:$0xff] }
 0x682   :  { %8865 = vmatprep.subr.bf16.mxu1 %v8578_v18  ;;  %v8589_v18 = vld [vmem:[#allocation5 + $0x110] sm:$0xff] }
 0x685   :  { %8866 = vmatpush1.bf16.msra.mxu1 %v8577_v59  ;;  %v8592_v59 = vld [vmem:[#allocation5 + $0x128] sm:$0xff] }
 0x686   :  { %8867 = vmatprep.subr.bf16.mxu1 %v8580_v54  ;;  %v8591_v54 = vld [vmem:[#allocation5 + $0x120] sm:$0xff] }
 0x689   :  { %8868 = vmatpush1.bf16.msra.mxu1 %v8579_v16  ;;  %v8594_v16 = vld [vmem:[#allocation5 + $0x138] sm:$0xff] }
 0x68a   :  { %8869 = vmatprep.subr.bf16.mxu1 %v8582_v35  ;;  %v17398_v35 = vld [vmem:[#allocation82_spill] sm:$0xff] }
 0x68d   :  { %8870 = vmatpush1.bf16.msra.mxu1 %v8581_v15  ;;  %v17399_v15 = vld [vmem:[#allocation66_spill] sm:$0xff] }
 0x68e   :  { %8871 = vmatprep.subr.bf16.mxu1 %v8584_v49  ;;  %v8593_v49 = vld [vmem:[#allocation5 + $0x130] sm:$0xff] }
 0x691   :  { %8872 = vmatpush1.bf16.msra.mxu1 %v8583_v8  ;;  %v8596_v8 = vld [vmem:[#allocation5 + $0x148] sm:$0xff] }
 0x692   :  { %8873 = vmatprep.subr.bf16.mxu1 %v8586_v51  ;;  %v8598_v51 = vld [vmem:[#allocation5 + $0x158] sm:$0xff] }
 0x695   :  { %8874 = vmatpush1.bf16.msra.mxu1 %v8585_v28  ;;  %v17401_v28 = vld [vmem:[#allocation72_spill] sm:$0xff] }
 0x696   :  { %8956 = vmatprep.subr.bf16.mxu1 %v8588_v9  ;;  %v8597_v9 = vld [vmem:[#allocation5 + $0x150] sm:$0xff] }
 0x698   :  { %8876 = vmatmul.mubr.bf16.vlgmr.msra.gmra.mrb[0].mxu1 %v14167_v4  ;;  %v8595_v4 = vld [vmem:[#allocation5 + $0x140] sm:$0xff] }
 0x699   :  { %8957 = vmatpush1.bf16.msra.mxu1 %v8587_v6  ;;  %8885 = vmatprep.mubr.bf16.mxu1 %v14365_v46  ;;  %v17400_v46 = vld [vmem:[#allocation85_spill] sm:$0xff]  ;;  %v8600_v6 = vld [vmem:[#allocation5 + $0x168] sm:$0xff] }
 0x69a   :  { %8958 = vmatprep.subr.bf16.mxu1 %v8590_v56  ;;  %v8599_v56 = vld [vmem:[#allocation5 + $0x160] sm:$0xff] }
 0x69d   :  { %8959 = vmatpush1.bf16.msra.mxu1 %v8589_v18  ;;  %v8602_v18 = vld [vmem:[#allocation5 + $0x178] sm:$0xff] }
 0x69e   :  { %8960 = vmatprep.subr.bf16.mxu1 %v8592_v59  ;;  %v17402_v59 = vld [vmem:[#allocation125_spill] sm:$0xff] }
 0x6a0   :  { %8886 = vmatmul.mubr.bf16.gmra.mrb[4].mxu1 %v17398_v35  ;;  %v8604_v35 = vld [vmem:[#allocation5 + $0x188] sm:$0xff] }
 0x6a1   :  { %8961 = vmatpush1.bf16.msra.mxu1 %v8591_v54  ;;  %8895 = vmatprep.mubr.bf16.mxu1 %v17399_v15  ;;  %v17403_v54 = vld [vmem:[#allocation84_spill] sm:$0xff]  ;;  %v8603_v15 = vld [vmem:[#allocation5 + $0x180] sm:$0xff] }
 0x6a2   :  { %8962 = vmatprep.subr.bf16.mxu1 %v8594_v16  ;;  %v8601_v16 = vld [vmem:[#allocation5 + $0x170] sm:$0xff] }
 0x6a5   :  { %8963 = vmatpush1.bf16.msra.mxu1 %v8593_v49  ;;  %v8606_v49 = vld [vmem:[#allocation5 + $0x198] sm:$0xff] }
 0x6a6   :  { %8964 = vmatprep.subr.bf16.mxu1 %v8596_v8  ;;  %v17404_v8 = vld [vmem:[#allocation145_spill] sm:$0xff] }
 0x6a8   :  { %8896 = vmatmul.mubr.bf16.gmra.mrb[8].mxu1 %v17400_v46  ;;  %v8608_v46 = vld [vmem:[#allocation5 + $0x1a8] sm:$0xff] }
 0x6a9   :  { %8965 = vmatpush1.bf16.msra.mxu1 %v8595_v4  ;;  %8905 = vmatprep.mubr.bf16.mxu1 %v17401_v28  ;;  %v17405_v4 = vld [vmem:[#allocation92_spill] sm:$0xff]  ;;  %v8607_v28 = vld [vmem:[#allocation5 + $0x1a0] sm:$0xff] }
 0x6aa   :  { %8966 = vmatprep.subr.bf16.mxu1 %v8598_v51  ;;  %v8605_v51 = vld [vmem:[#allocation5 + $0x190] sm:$0xff] }
 0x6ad   :  { %8967 = vmatpush1.bf16.msra.mxu1 %v8597_v9  ;;  %v8610_v9 = vld [vmem:[#allocation5 + $0x1b8] sm:$0xff] }
 0x6ae   :  { %8968 = vmatprep.subr.bf16.mxu1 %v8600_v6  ;;  %v17406_v6 = vld [vmem:[#allocation147_spill] sm:$0xff] }
 0x6b0   :  { %8906 = vmatmul.mubr.bf16.gmra.mrb[12].mxu1 %v17402_v59  ;;  %v8612_v59 = vld [vmem:[#allocation5 + $0x1c8] sm:$0xff] }
 0x6b1   :  { %8969 = vmatpush1.bf16.msra.mxu1 %v8599_v56  ;;  %8915 = vmatprep.mubr.bf16.mxu1 %v17403_v54  ;;  %v17407_v56 = vld [vmem:[#allocation101_spill] sm:$0xff]  ;;  %v8611_v54 = vld [vmem:[#allocation5 + $0x1c0] sm:$0xff] }
 0x6b2   :  { %8970 = vmatprep.subr.bf16.mxu1 %v8602_v18  ;;  %v8609_v18 = vld [vmem:[#allocation5 + $0x1b0] sm:$0xff] }
 0x6b5   :  { %8971 = vmatpush1.bf16.msra.mxu1 %v8601_v16  ;;  %v8614_v16 = vld [vmem:[#allocation5 + $0x1d8] sm:$0xff] }
 0x6b6   :  { %8972 = vmatprep.subr.bf16.mxu1 %v8604_v35  ;;  %v17408_v35 = vld [vmem:[#allocation30_spill] sm:$0xff] }
 0x6b8   :  { %8916 = vmatmul.mubr.bf16.gmra.mrb[16].mxu1 %v17404_v8  ;;  %v8616_v8 = vld [vmem:[#allocation5 + $0x1e8] sm:$0xff] }
 0x6b9   :  { %8973 = vmatpush1.bf16.msra.mxu1 %v8603_v15  ;;  %8925 = vmatprep.mubr.bf16.mxu1 %v17405_v4  ;;  %v17409_v15 = vld [vmem:[#allocation117_spill] sm:$0xff]  ;;  %v8615_v4 = vld [vmem:[#allocation5 + $0x1e0] sm:$0xff] }
 0x6ba   :  { %8974 = vmatprep.subr.bf16.mxu1 %v8606_v49  ;;  %v8613_v49 = vld [vmem:[#allocation5 + $0x1d0] sm:$0xff] }
 0x6bd   :  { %8975 = vmatpush1.bf16.msra.mxu1 %v8605_v51  ;;  %v8618_v51 = vld [vmem:[#allocation5 + $0x1f8] sm:$0xff] }
 0x6be   :  { %8976 = vmatprep.subr.bf16.mxu1 %v8608_v46  ;;  %v17410_v46 = vld [vmem:[#allocation37_spill] sm:$0xff] }
 0x6c0   :  { %8926 = vmatmul.mubr.bf16.gmra.mrb[20].mxu1 %v17406_v6  ;;  %v8617_v6 = vld [vmem:[#allocation5 + $0x1f0] sm:$0xff] }
 0x6c1   :  { %8977 = vmatpush1.bf16.msra.mxu1 %v8607_v28  ;;  %8935 = vmatprep.mubr.bf16.mxu1 %v17407_v56  ;;  %v17411_v28 = vld [vmem:[#allocation135_spill] sm:$0xff] }
 0x6c2   :  { %8978 = vmatprep.subr.bf16.mxu1 %v8610_v9  ;;  %v17412_v9 = vcombine.high %v14505_v32, %v17411_v28  ;;  %v8620_v56 = vld [vmem:[#allocation5 + $0x208] sm:$0xff] }
 0x6c5   :  { %8979 = vmatpush1.bf16.msra.mxu1 %v8609_v18  ;;  %v8619_v18 = vld [vmem:[#allocation5 + $0x200] sm:$0xff] }
 0x6c6   :  { %8980 = vmatprep.subr.bf16.mxu1 %v8612_v59  ;;  %v8622_v59 = vld [vmem:[#allocation5 + $0x218] sm:$0xff] }
 0x6c8   :  { %8936 = vmatmul.mubr.bf16.gmra.mrb[24].mxu1 %v17408_v35  ;;  %v17415_v35 = vld [vmem:[#allocation155_spill] sm:$0xff] }
 0x6c9   :  { %8981 = vmatpush1.bf16.msra.mxu1 %v8611_v54  ;;  %8945 = vmatprep.mubr.bf16.mxu1 %v17409_v15  ;;  %v17413_v54 = vcombine.low %v14505_v32, %v17411_v28  ;;  %v17419_v32 = vld [vmem:[#allocation175_spill] sm:$0xff] }
 0x6ca   :  { %8982 = vmatprep.subr.bf16.mxu1 %v8614_v16  ;;  %v17414_v16 = vld [vmem:[#allocation152_spill] sm:$0xff] }
 0x6cb   :  { %v17416_v15 = vcombine.high %v17414_v16, %v17415_v35 }
 0x6cd   :  { %8983 = vmatpush1.bf16.msra.mxu1 %v8613_v49  ;;  %v8621_v49 = vld [vmem:[#allocation5 + $0x210] sm:$0xff] }
 0x6ce   :  { %8984 = vmatprep.subr.bf16.mxu1 %v8616_v8  ;;  %v8624_v8 = vld [vmem:[#allocation5 + $0x228] sm:$0xff] }
 0x6d0   :  { %8946 = vmatmul.mubr.bf16.gmra.mrb[28].mxu1 %v17410_v46  ;;  %v17417_v46 = vcombine.low %v17414_v16, %v17415_v35  ;;  %v17423_v16 = vld [vmem:[#allocation36_spill] sm:$0xff] }
 0x6d1   :  { %8985 = vmatpush1.bf16.msra.mxu1 %v8615_v4  ;;  %8988 = vmatprep.mubr.bf16.mxu1 %v17412_v9  ;;  %v8623_v4 = vld [vmem:[#allocation5 + $0x220] sm:$0xff]  ;;  %v17418_v9 = vld [vmem:[#allocation171_spill] sm:$0xff] }
 0x6d2   :  { %8986 = vmatprep.subr.bf16.mxu1 %v8618_v51  ;;  %v8626_v51 = vld [vmem:[#allocation5 + $0x238] sm:$0xff]  ;;  %v17420_v28 = vcombine.high %v17418_v9, %v17419_v32 }
 0x6d5   :  { %8987 = vmatpush1.bf16.msra.mxu1 %v8617_v6  ;;  %v8625_v6 = vld [vmem:[#allocation5 + $0x230] sm:$0xff] }
 0x6d6   :  { %9069 = vmatprep.subr.bf16.mxu1 %v8620_v56  ;;  %v8628_v56 = vld [vmem:[#allocation5 + $0x248] sm:$0xff] }
 0x6d8   :  { %8989 = vmatmul.mubr.bf16.vlgmr.msra.gmra.mrb[0].mxu1 %v17413_v54  ;;  %v17421_v54 = vcombine.low %v17418_v9, %v17419_v32  ;;  %v17427_v9 = vld [vmem:[#allocation56_spill] sm:$0xff] }
 0x6d9   :  { %9070 = vmatpush1.bf16.msra.mxu1 %v8619_v18  ;;  %8998 = vmatprep.mubr.bf16.mxu1 %v17416_v15  ;;  %v8627_v18 = vld [vmem:[#allocation5 + $0x240] sm:$0xff]  ;;  %v17422_v15 = vld [vmem:[#allocation35_spill] sm:$0xff] }
 0x6da   :  { %9071 = vmatprep.subr.bf16.mxu1 %v8622_v59  ;;  %v8630_v59 = vld [vmem:[#allocation5 + $0x258] sm:$0xff]  ;;  %v17424_v35 = vcombine.high %v17422_v15, %v17423_v16 }
 0x6dd   :  { %9072 = vmatpush1.bf16.msra.mxu1 %v8621_v49  ;;  %v8629_v49 = vld [vmem:[#allocation5 + $0x250] sm:$0xff] }
 0x6de   :  { %9073 = vmatprep.subr.bf16.mxu1 %v8624_v8  ;;  %v8632_v8 = vld [vmem:[#allocation5 + $0x268] sm:$0xff] }
 0x6e0   :  { %8999 = vmatmul.mubr.bf16.gmra.mrb[4].mxu1 %v17417_v46  ;;  %v17425_v46 = vcombine.low %v17422_v15, %v17423_v16  ;;  %v17431_v15 = vld [vmem:[#allocation74_spill] sm:$0xff] }
 0x6e1   :  { %9074 = vmatpush1.bf16.msra.mxu1 %v8623_v4  ;;  %9008 = vmatprep.mubr.bf16.mxu1 %v17420_v28  ;;  %v8631_v4 = vld [vmem:[#allocation5 + $0x260] sm:$0xff]  ;;  %v17426_v28 = vld [vmem:[#allocation32_spill] sm:$0xff] }
 0x6e2   :  { %9075 = vmatprep.subr.bf16.mxu1 %v8626_v51  ;;  %v8634_v51 = vld [vmem:[#allocation5 + $0x278] sm:$0xff]  ;;  %v17428_v32 = vcombine.high %v17426_v28, %v17427_v9 }
 0x6e5   :  { %9076 = vmatpush1.bf16.msra.mxu1 %v8625_v6  ;;  %v8633_v6 = vld [vmem:[#allocation5 + $0x270] sm:$0xff] }
 0x6e6   :  { %9077 = vmatprep.subr.bf16.mxu1 %v8628_v56  ;;  %v8636_v56 = vld [vmem:[#allocation5 + $0x288] sm:$0xff] }
 0x6e8   :  { %9009 = vmatmul.mubr.bf16.gmra.mrb[8].mxu1 %v17421_v54  ;;  %v17429_v54 = vcombine.low %v17426_v28, %v17427_v9  ;;  %v17435_v28 = vld [vmem:[#allocation104_spill] sm:$0xff] }
 0x6e9   :  { %9078 = vmatpush1.bf16.msra.mxu1 %v8627_v18  ;;  %9018 = vmatprep.mubr.bf16.mxu1 %v17424_v35  ;;  %v8635_v18 = vld [vmem:[#allocation5 + $0x280] sm:$0xff]  ;;  %v17430_v35 = vld [vmem:[#allocation55_spill] sm:$0xff] }
 0x6ea   :  { %9079 = vmatprep.subr.bf16.mxu1 %v8630_v59  ;;  %v8638_v59 = vld [vmem:[#allocation5 + $0x298] sm:$0xff]  ;;  %v17432_v16 = vcombine.high %v17430_v35, %v17431_v15 }
 0x6ed   :  { %9080 = vmatpush1.bf16.msra.mxu1 %v8629_v49  ;;  %v8637_v49 = vld [vmem:[#allocation5 + $0x290] sm:$0xff] }
 0x6ee   :  { %9081 = vmatprep.subr.bf16.mxu1 %v8632_v8  ;;  %v8640_v8 = vld [vmem:[#allocation5 + $0x2a8] sm:$0xff] }
 0x6f0   :  { %9019 = vmatmul.mubr.bf16.gmra.mrb[12].mxu1 %v17425_v46  ;;  %v17433_v46 = vcombine.low %v17430_v35, %v17431_v15  ;;  %v17439_v35 = vld [vmem:[#allocation121_spill] sm:$0xff] }
 0x6f1   :  { %9082 = vmatpush1.bf16.msra.mxu1 %v8631_v4  ;;  %9028 = vmatprep.mubr.bf16.mxu1 %v17428_v32  ;;  %v8639_v4 = vld [vmem:[#allocation5 + $0x2a0] sm:$0xff]  ;;  %v17434_v32 = vld [vmem:[#allocation99_spill] sm:$0xff] }
 0x6f2   :  { %9083 = vmatprep.subr.bf16.mxu1 %v8634_v51  ;;  %v8642_v51 = vld [vmem:[#allocation5 + $0x2b8] sm:$0xff]  ;;  %v17436_v9 = vcombine.high %v17434_v32, %v17435_v28 }
 0x6f5   :  { %9084 = vmatpush1.bf16.msra.mxu1 %v8633_v6  ;;  %v8641_v6 = vld [vmem:[#allocation5 + $0x2b0] sm:$0xff] }
 0x6f6   :  { %9085 = vmatprep.subr.bf16.mxu1 %v8636_v56  ;;  %v8644_v56 = vld [vmem:[#allocation5 + $0x2c8] sm:$0xff] }
 0x6f8   :  { %9029 = vmatmul.mubr.bf16.gmra.mrb[16].mxu1 %v17429_v54  ;;  %v17437_v54 = vcombine.low %v17434_v32, %v17435_v28  ;;  %v17443_v32 = vld [vmem:[#allocation116_spill] sm:$0xff] }
 0x6f9   :  { %9086 = vmatpush1.bf16.msra.mxu1 %v8635_v18  ;;  %9038 = vmatprep.mubr.bf16.mxu1 %v17432_v16  ;;  %v8643_v18 = vld [vmem:[#allocation5 + $0x2c0] sm:$0xff]  ;;  %v17438_v16 = vld [vmem:[#allocation119_spill] sm:$0xff] }
 0x6fa   :  { %9087 = vmatprep.subr.bf16.mxu1 %v8638_v59  ;;  %v8646_v59 = vld [vmem:[#allocation5 + $0x2d8] sm:$0xff]  ;;  %v17440_v15 = vcombine.high %v17438_v16, %v17439_v35 }
 0x6fd   :  { %9088 = vmatpush1.bf16.msra.mxu1 %v8637_v49  ;;  %v8645_v49 = vld [vmem:[#allocation5 + $0x2d0] sm:$0xff] }
 0x6fe   :  { %9089 = vmatprep.subr.bf16.mxu1 %v8640_v8  ;;  %v8648_v8 = vld [vmem:[#allocation5 + $0x2e8] sm:$0xff] }
 0x700   :  { %9039 = vmatmul.mubr.bf16.gmra.mrb[20].mxu1 %v17433_v46  ;;  %v17441_v46 = vcombine.low %v17438_v16, %v17439_v35  ;;  %v17447_v16 = vld [vmem:[#allocation139_spill] sm:$0xff] }
 0x701   :  { %9090 = vmatpush1.bf16.msra.mxu1 %v8639_v4  ;;  %9048 = vmatprep.mubr.bf16.mxu1 %v17436_v9  ;;  %v8647_v4 = vld [vmem:[#allocation5 + $0x2e0] sm:$0xff] }
 0x702   :  { %9091 = vmatprep.subr.bf16.mxu1 %v8642_v51  ;;  %v8650_v51 = vld [vmem:[#allocation5 + $0x2f8] sm:$0xff]  ;;  %v17442_v9 = vld [vmem:[#allocation130_spill] sm:$0xff] }
 0x703   :  { %v17444_v28 = vcombine.high %v17442_v9, %v17443_v32 }
 0x705   :  { %9092 = vmatpush1.bf16.msra.mxu1 %v8641_v6  ;;  %v8649_v6 = vld [vmem:[#allocation5 + $0x2f0] sm:$0xff] }
 0x706   :  { %9093 = vmatprep.subr.bf16.mxu1 %v8644_v56  ;;  %v8652_v56 = vld [vmem:[#allocation5 + $0x308] sm:$0xff] }
 0x708   :  { %9049 = vmatmul.mubr.bf16.gmra.mrb[24].mxu1 %v17437_v54  ;;  %v17445_v54 = vcombine.low %v17442_v9, %v17443_v32  ;;  %v17451_v9 = vld [vmem:[#allocation136_spill] sm:$0xff] }
 0x709   :  { %9094 = vmatpush1.bf16.msra.mxu1 %v8643_v18  ;;  %9058 = vmatprep.mubr.bf16.mxu1 %v17440_v15  ;;  %v8651_v18 = vld [vmem:[#allocation5 + $0x300] sm:$0xff] }
 0x70a   :  { %9095 = vmatprep.subr.bf16.mxu1 %v8646_v59  ;;  %v8654_v59 = vld [vmem:[#allocation5 + $0x318] sm:$0xff]  ;;  %v17446_v15 = vld [vmem:[#allocation118_spill] sm:$0xff] }
 0x70b   :  { %v17448_v35 = vcombine.high %v17446_v15, %v17447_v16 }
 0x70d   :  { %9096 = vmatpush1.bf16.msra.mxu1 %v8645_v49  ;;  %v8653_v49 = vld [vmem:[#allocation5 + $0x310] sm:$0xff] }
 0x70e   :  { %9097 = vmatprep.subr.bf16.mxu1 %v8648_v8  ;;  %v8656_v8 = vld [vmem:[#allocation5 + $0x328] sm:$0xff] }
 0x710   :  { %9059 = vmatmul.mubr.bf16.gmra.mrb[28].mxu1 %v17441_v46  ;;  %v17449_v46 = vcombine.low %v17446_v15, %v17447_v16  ;;  %v17455_v15 = vld [vmem:[#allocation163_spill] sm:$0xff] }
 0x711   :  { %9098 = vmatpush1.bf16.msra.mxu1 %v8647_v4  ;;  %9101 = vmatprep.mubr.bf16.mxu1 %v17444_v28  ;;  %v8655_v4 = vld [vmem:[#allocation5 + $0x320] sm:$0xff]  ;;  %v17450_v28 = vld [vmem:[#allocation140_spill] sm:$0xff] }
 0x712   :  { %9099 = vmatprep.subr.bf16.mxu1 %v8650_v51  ;;  %v8658_v51 = vld [vmem:[#allocation5 + $0x338] sm:$0xff]  ;;  %v17452_v32 = vcombine.high %v17450_v28, %v17451_v9 }
 0x715   :  { %9100 = vmatpush1.bf16.msra.mxu1 %v8649_v6  ;;  %v8657_v6 = vld [vmem:[#allocation5 + $0x330] sm:$0xff] }
 0x716   :  { %9182 = vmatprep.subr.bf16.mxu1 %v8652_v56  ;;  %v8660_v56 = vld [vmem:[#allocation5 + $0x348] sm:$0xff] }
 0x718   :  { %9102 = vmatmul.mubr.bf16.vlgmr.msra.gmra.mrb[0].mxu1 %v17445_v54  ;;  %v17453_v54 = vcombine.low %v17450_v28, %v17451_v9  ;;  %v17459_v28 = vld [vmem:[#allocation160_spill] sm:$0xff] }
 0x719   :  { %9183 = vmatpush1.bf16.msra.mxu1 %v8651_v18  ;;  %9111 = vmatprep.mubr.bf16.mxu1 %v17448_v35  ;;  %v8659_v18 = vld [vmem:[#allocation5 + $0x340] sm:$0xff]  ;;  %v17454_v35 = vld [vmem:[#allocation137_spill] sm:$0xff] }
 0x71a   :  { %9184 = vmatprep.subr.bf16.mxu1 %v8654_v59  ;;  %v8662_v59 = vld [vmem:[#allocation5 + $0x358] sm:$0xff]  ;;  %v17456_v16 = vcombine.high %v17454_v35, %v17455_v15 }
 0x71d   :  { %9185 = vmatpush1.bf16.msra.mxu1 %v8653_v49  ;;  %v8661_v49 = vld [vmem:[#allocation5 + $0x350] sm:$0xff] }
 0x71e   :  { %9186 = vmatprep.subr.bf16.mxu1 %v8656_v8  ;;  %v8664_v8 = vld [vmem:[#allocation5 + $0x368] sm:$0xff] }
 0x720   :  { %9112 = vmatmul.mubr.bf16.gmra.mrb[4].mxu1 %v17449_v46  ;;  %v17457_v46 = vcombine.low %v17454_v35, %v17455_v15  ;;  %v17463_v35 = vld [vmem:[#allocation173_spill] sm:$0xff] }
 0x721   :  { %9187 = vmatpush1.bf16.msra.mxu1 %v8655_v4  ;;  %9121 = vmatprep.mubr.bf16.mxu1 %v17452_v32  ;;  %v8663_v4 = vld [vmem:[#allocation5 + $0x360] sm:$0xff]  ;;  %v17458_v32 = vld [vmem:[#allocation164_spill] sm:$0xff] }
 0x722   :  { %9188 = vmatprep.subr.bf16.mxu1 %v8658_v51  ;;  %v8666_v51 = vld [vmem:[#allocation5 + $0x378] sm:$0xff]  ;;  %v17460_v9 = vcombine.high %v17458_v32, %v17459_v28 }
 0x725   :  { %9189 = vmatpush1.bf16.msra.mxu1 %v8657_v6  ;;  %v8665_v6 = vld [vmem:[#allocation5 + $0x370] sm:$0xff] }
 0x726   :  { %9190 = vmatprep.subr.bf16.mxu1 %v8660_v56  ;;  %v8668_v56 = vld [vmem:[#allocation5 + $0x388] sm:$0xff] }
 0x728   :  { %9122 = vmatmul.mubr.bf16.gmra.mrb[8].mxu1 %v17453_v54  ;;  %v17461_v54 = vcombine.low %v17458_v32, %v17459_v28  ;;  %v17467_v32 = vld [vmem:[#allocation38_spill] sm:$0xff] }
 0x729   :  { %9191 = vmatpush1.bf16.msra.mxu1 %v8659_v18  ;;  %9131 = vmatprep.mubr.bf16.mxu1 %v17456_v16  ;;  %v8667_v18 = vld [vmem:[#allocation5 + $0x380] sm:$0xff] }
 0x72a   :  { %9192 = vmatprep.subr.bf16.mxu1 %v8662_v59  ;;  %v8670_v59 = vld [vmem:[#allocation5 + $0x398] sm:$0xff]  ;;  %v17462_v16 = vld [vmem:[#allocation162_spill] sm:$0xff] }
 0x72b   :  { %v17464_v15 = vcombine.high %v17462_v16, %v17463_v35 }
 0x72d   :  { %9193 = vmatpush1.bf16.msra.mxu1 %v8661_v49  ;;  %v8669_v49 = vld [vmem:[#allocation5 + $0x390] sm:$0xff] }
 0x72e   :  { %9194 = vmatprep.subr.bf16.mxu1 %v8664_v8  ;;  %v8672_v8 = vld [vmem:[#allocation5 + $0x3a8] sm:$0xff] }
 0x730   :  { %9132 = vmatmul.mubr.bf16.gmra.mrb[12].mxu1 %v17457_v46  ;;  %v17465_v46 = vcombine.low %v17462_v16, %v17463_v35  ;;  %v17471_v16 = vld [vmem:[#allocation57_spill] sm:$0xff] }
 0x731   :  { %9195 = vmatpush1.bf16.msra.mxu1 %v8663_v4  ;;  %9141 = vmatprep.mubr.bf16.mxu1 %v17460_v9  ;;  %v8671_v4 = vld [vmem:[#allocation5 + $0x3a0] sm:$0xff]  ;;  %v17466_v9 = vld [vmem:[#allocation176_spill] sm:$0xff] }
 0x732   :  { %9196 = vmatprep.subr.bf16.mxu1 %v8666_v51  ;;  %v8674_v51 = vld [vmem:[#allocation5 + $0x3b8] sm:$0xff]  ;;  %v17468_v28 = vcombine.high %v17466_v9, %v17467_v32 }
 0x735   :  { %9197 = vmatpush1.bf16.msra.mxu1 %v8665_v6  ;;  %v8673_v6 = vld [vmem:[#allocation5 + $0x3b0] sm:$0xff] }
 0x736   :  { %9198 = vmatprep.subr.bf16.mxu1 %v8668_v56  ;;  %v8676_v56 = vld [vmem:[#allocation5 + $0x3c8] sm:$0xff] }
 0x738   :  { %9142 = vmatmul.mubr.bf16.gmra.mrb[16].mxu1 %v17461_v54  ;;  %v17469_v54 = vcombine.low %v17466_v9, %v17467_v32  ;;  %v8681_v9 = vld [vmem:[#allocation5 + $0x3f0] sm:$0xff]  ;;  %v8684_v32 = vld [vmem:[#allocation5 + $0x408] sm:$0xff] }
 0x739   :  { %9199 = vmatpush1.bf16.msra.mxu1 %v8667_v18  ;;  %9151 = vmatprep.mubr.bf16.mxu1 %v17464_v15  ;;  %v8675_v18 = vld [vmem:[#allocation5 + $0x3c0] sm:$0xff]  ;;  %v17470_v15 = vld [vmem:[#allocation43_spill] sm:$0xff] }
 0x73a   :  { %9200 = vmatprep.subr.bf16.mxu1 %v8670_v59  ;;  %v8678_v59 = vld [vmem:[#allocation5 + $0x3d8] sm:$0xff]  ;;  %v17472_v35 = vcombine.high %v17470_v15, %v17471_v16 }
 0x73d   :  { %9201 = vmatpush1.bf16.msra.mxu1 %v8669_v49  ;;  %v8677_v49 = vld [vmem:[#allocation5 + $0x3d0] sm:$0xff] }
 0x73e   :  { %9202 = vmatprep.subr.bf16.mxu1 %v8672_v8  ;;  %v8680_v8 = vld [vmem:[#allocation5 + $0x3e8] sm:$0xff] }
 0x740   :  { %9152 = vmatmul.mubr.bf16.gmra.mrb[20].mxu1 %v17465_v46  ;;  %v17473_v46 = vcombine.low %v17470_v15, %v17471_v16  ;;  %v8687_v15 = vld [vmem:[#allocation5 + $0x420] sm:$0xff]  ;;  %v8690_v16 = vld [vmem:[#allocation5 + $0x438] sm:$0xff] }
 0x741   :  { %9203 = vmatpush1.bf16.msra.mxu1 %v8671_v4  ;;  %9161 = vmatprep.mubr.bf16.mxu1 %v17468_v28  ;;  %v8679_v4 = vld [vmem:[#allocation5 + $0x3e0] sm:$0xff]  ;;  %v17474_v28 = vld [vmem:[#allocation33_spill] sm:$0xff] }
 0x742   :  { %9204 = vmatprep.subr.bf16.mxu1 %v8674_v51  ;;  %v8682_v51 = vld [vmem:[#allocation5 + $0x3f8] sm:$0xff] }
 0x745   :  { %9205 = vmatpush1.bf16.msra.mxu1 %v8673_v6  ;;  %v8683_v6 = vld [vmem:[#allocation5 + $0x400] sm:$0xff] }
 0x746   :  { %9206 = vmatprep.subr.bf16.mxu1 %v8676_v56  ;;  %v8686_v56 = vld [vmem:[#allocation5 + $0x418] sm:$0xff] }
 0x748   :  { %9162 = vmatmul.mubr.bf16.gmra.mrb[24].mxu1 %v17469_v54  ;;  %v8685_v54 = vld [vmem:[#allocation5 + $0x410] sm:$0xff] }
 0x749   :  { %9207 = vmatpush1.bf16.msra.mxu1 %v8675_v18  ;;  %9171 = vmatprep.mubr.bf16.mxu1 %v17472_v35  ;;  %v17475_v18 = vld [vmem:[#allocation46_spill] sm:$0xff]  ;;  %v8688_v35 = vld [vmem:[#allocation5 + $0x428] sm:$0xff] }
 0x74a   :  { %9208 = vmatprep.subr.bf16.mxu1 %v8678_v59  ;;  %v17476_v59 = vld [vmem:[#allocation59_spill] sm:$0xff] }
 0x74d   :  { %9209 = vmatpush1.bf16.msra.mxu1 %v8677_v49  ;;  %v17477_v49 = vld [vmem:[#allocation51_spill] sm:$0xff] }
 0x74e   :  { %9210 = vmatprep.subr.bf16.mxu1 %v8680_v8  ;;  %v17478_v8 = vld [vmem:[#allocation54_spill] sm:$0xff] }
 0x750   :  { %9172 = vmatmul.mubr.bf16.gmra.mrb[28].mxu1 %v17473_v46  ;;  %v8691_v46 = vld [vmem:[#allocation5 + $0x440] sm:$0xff] }
 0x751   :  { %9211 = vmatpush1.bf16.msra.mxu1 %v8679_v4  ;;  %9214 = vmatprep.mubr.bf16.mxu1 %v17474_v28  ;;  %v8689_v4 = vld [vmem:[#allocation5 + $0x430] sm:$0xff]  ;;  %v8694_v28 = vld [vmem:[#allocation5 + $0x458] sm:$0xff] }
 0x752   :  { %9212 = vmatprep.subr.bf16.mxu1 %v8682_v51  ;;  %v8692_v51 = vld [vmem:[#allocation5 + $0x448] sm:$0xff] }
 0x755   :  { %9213 = vmatpush1.bf16.msra.mxu1 %v8681_v9  ;;  %v17479_v9 = vld [vmem:[#allocation70_spill] sm:$0xff] }
 0x756   :  { %9295 = vmatprep.subr.bf16.mxu1 %v8684_v32  ;;  %v17480_v32 = vld [vmem:[#allocation75_spill] sm:$0xff] }
 0x758   :  { %9215 = vmatmul.mubr.bf16.vlgmr.msra.gmra.mrb[0].mxu1 %v17475_v18  ;;  %v8695_v18 = vld [vmem:[#allocation5 + $0x460] sm:$0xff] }
 0x759   :  { %9296 = vmatpush1.bf16.msra.mxu1 %v8683_v6  ;;  %9224 = vmatprep.mubr.bf16.mxu1 %v17476_v59  ;;  %v8693_v6 = vld [vmem:[#allocation5 + $0x450] sm:$0xff]  ;;  %v8698_v59 = vld [vmem:[#allocation5 + $0x478] sm:$0xff] }
 0x75a   :  { %9297 = vmatprep.subr.bf16.mxu1 %v8686_v56  ;;  %v8696_v56 = vld [vmem:[#allocation5 + $0x468] sm:$0xff] }
 0x75d   :  { %9298 = vmatpush1.bf16.msra.mxu1 %v8685_v54  ;;  %v17481_v54 = vld [vmem:[#allocation76_spill] sm:$0xff] }
 0x75e   :  { %9299 = vmatprep.subr.bf16.mxu1 %v8688_v35  ;;  %v17482_v35 = vld [vmem:[#allocation77_spill] sm:$0xff] }
 0x760   :  { %9225 = vmatmul.mubr.bf16.gmra.mrb[4].mxu1 %v17477_v49  ;;  %v8699_v49 = vld [vmem:[#allocation5 + $0x480] sm:$0xff] }
 0x761   :  { %9300 = vmatpush1.bf16.msra.mxu1 %v8687_v15  ;;  %9234 = vmatprep.mubr.bf16.mxu1 %v17478_v8  ;;  %v8697_v15 = vld [vmem:[#allocation5 + $0x470] sm:$0xff]  ;;  %v8702_v8 = vld [vmem:[#allocation5 + $0x498] sm:$0xff] }
 0x762   :  { %9301 = vmatprep.subr.bf16.mxu1 %v8690_v16  ;;  %v8700_v16 = vld [vmem:[#allocation5 + $0x488] sm:$0xff] }
 0x765   :  { %9302 = vmatpush1.bf16.msra.mxu1 %v8689_v4  ;;  %v17483_v4 = vld [vmem:[#allocation91_spill] sm:$0xff] }
 0x766   :  { %9303 = vmatprep.subr.bf16.mxu1 %v8692_v51  ;;  %v17484_v51 = vld [vmem:[#allocation68_spill] sm:$0xff] }
 0x768   :  { %9235 = vmatmul.mubr.bf16.gmra.mrb[8].mxu1 %v17479_v9  ;;  %v8703_v9 = vld [vmem:[#allocation5 + $0x4a0] sm:$0xff] }
 0x769   :  { %9304 = vmatpush1.bf16.msra.mxu1 %v8691_v46  ;;  %9244 = vmatprep.mubr.bf16.mxu1 %v17480_v32  ;;  %v8701_v46 = vld [vmem:[#allocation5 + $0x490] sm:$0xff]  ;;  %v8706_v32 = vld [vmem:[#allocation5 + $0x4b8] sm:$0xff] }
 0x76a   :  { %9305 = vmatprep.subr.bf16.mxu1 %v8694_v28  ;;  %v8704_v28 = vld [vmem:[#allocation5 + $0x4a8] sm:$0xff] }
 0x76d   :  { %9306 = vmatpush1.bf16.msra.mxu1 %v8693_v6  ;;  %v17485_v6 = vld [vmem:[#allocation95_spill] sm:$0xff] }
 0x76e   :  { %9307 = vmatprep.subr.bf16.mxu1 %v8696_v56  ;;  %v17486_v56 = vld [vmem:[#allocation103_spill] sm:$0xff] }
 0x770   :  { %9245 = vmatmul.mubr.bf16.gmra.mrb[12].mxu1 %v17481_v54  ;;  %v8707_v54 = vld [vmem:[#allocation5 + $0x4c0] sm:$0xff] }
 0x771   :  { %9308 = vmatpush1.bf16.msra.mxu1 %v8695_v18  ;;  %9254 = vmatprep.mubr.bf16.mxu1 %v17482_v35  ;;  %v8705_v18 = vld [vmem:[#allocation5 + $0x4b0] sm:$0xff]  ;;  %v8710_v35 = vld [vmem:[#allocation5 + $0x4d8] sm:$0xff] }
 0x772   :  { %9309 = vmatprep.subr.bf16.mxu1 %v8698_v59  ;;  %v8708_v59 = vld [vmem:[#allocation5 + $0x4c8] sm:$0xff] }
 0x775   :  { %9310 = vmatpush1.bf16.msra.mxu1 %v8697_v15  ;;  %v17487_v15 = vld [vmem:[#allocation100_spill] sm:$0xff] }
 0x776   :  { %9311 = vmatprep.subr.bf16.mxu1 %v8700_v16  ;;  %v17488_v16 = vld [vmem:[#allocation110_spill] sm:$0xff] }
 0x778   :  { %9255 = vmatmul.mubr.bf16.gmra.mrb[16].mxu1 %v17483_v4  ;;  %v8711_v4 = vld [vmem:[#allocation5 + $0x4e0] sm:$0xff] }
 0x779   :  { %9312 = vmatpush1.bf16.msra.mxu1 %v8699_v49  ;;  %9264 = vmatprep.mubr.bf16.mxu1 %v17484_v51  ;;  %v8709_v49 = vld [vmem:[#allocation5 + $0x4d0] sm:$0xff]  ;;  %v8714_v51 = vld [vmem:[#allocation5 + $0x4f8] sm:$0xff] }
 0x77a   :  { %9313 = vmatprep.subr.bf16.mxu1 %v8702_v8  ;;  %v8712_v8 = vld [vmem:[#allocation5 + $0x4e8] sm:$0xff] }
 0x77d   :  { %9314 = vmatpush1.bf16.msra.mxu1 %v8701_v46  ;;  %v17489_v46 = vld [vmem:[#allocation120_spill] sm:$0xff] }
 0x77e   :  { %9315 = vmatprep.subr.bf16.mxu1 %v8704_v28  ;;  %v17490_v28 = vcombine.high %v14967_v45, %v14971_v61 }
 0x780   :  { %9265 = vmatmul.mubr.bf16.gmra.mrb[20].mxu1 %v17485_v6  ;;  %v8715_v6 = vld [vmem:[#allocation5 + $0x500] sm:$0xff] }
 0x781   :  { %9316 = vmatpush1.bf16.msra.mxu1 %v8703_v9  ;;  %9274 = vmatprep.mubr.bf16.mxu1 %v17486_v56  ;;  %v8713_v9 = vld [vmem:[#allocation5 + $0x4f0] sm:$0xff]  ;;  %v8718_v56 = vld [vmem:[#allocation5 + $0x518] sm:$0xff] }
 0x782   :  { %9317 = vmatprep.subr.bf16.mxu1 %v8706_v32  ;;  %v8716_v32 = vld [vmem:[#allocation5 + $0x508] sm:$0xff] }
 0x785   :  { %9318 = vmatpush1.bf16.msra.mxu1 %v8705_v18  ;;  %v17491_v18 = vcombine.low %v14967_v45, %v14971_v61  ;;  %v17496_v45 = vld [vmem:[#allocation170_spill] sm:$0xff] }
 0x786   :  { %9319 = vmatprep.subr.bf16.mxu1 %v8708_v59  ;;  %v17492_v59 = vld [vmem:[#allocation150_spill] sm:$0xff] }
 0x788   :  { %9275 = vmatmul.mubr.bf16.gmra.mrb[24].mxu1 %v17487_v15  ;;  %v8720_v15 = vld [vmem:[#allocation5 + $0x528] sm:$0xff] }
 0x789   :  { %9320 = vmatpush1.bf16.msra.mxu1 %v8707_v54  ;;  %9284 = vmatprep.mubr.bf16.mxu1 %v17488_v16  ;;  %v17493_v54 = vcombine.high %v14975_v48, %v17492_v59  ;;  %v8719_v16 = vld [vmem:[#allocation5 + $0x520] sm:$0xff] }
 0x78a   :  { %9321 = vmatprep.subr.bf16.mxu1 %v8710_v35  ;;  %v8717_v35 = vld [vmem:[#allocation5 + $0x510] sm:$0xff] }
 0x78d   :  { %9322 = vmatpush1.bf16.msra.mxu1 %v8709_v49  ;;  %v8722_v49 = vld [vmem:[#allocation5 + $0x538] sm:$0xff] }
 0x78e   :  { %9323 = vmatprep.subr.bf16.mxu1 %v8712_v8  ;;  %v17494_v8 = vcombine.low %v14975_v48, %v17492_v59  ;;  %v17500_v48 = vld [vmem:[#allocation41_spill] sm:$0xff]  ;;  %v8728_v59 = vld [vmem:[#allocation5 + $0x568] sm:$0xff] }
 0x790   :  { %9285 = vmatmul.mubr.bf16.gmra.mrb[28].mxu1 %v17489_v46  ;;  %v8724_v46 = vld [vmem:[#allocation5 + $0x548] sm:$0xff] }
 0x791   :  { %9324 = vmatpush1.bf16.msra.mxu1 %v8711_v4  ;;  %9327 = vmatprep.mubr.bf16.mxu1 %v17490_v28  ;;  %v17495_v4 = vld [vmem:[#allocation165_spill] sm:$0xff]  ;;  %v8723_v28 = vld [vmem:[#allocation5 + $0x540] sm:$0xff] }
 0x792   :  { %9325 = vmatprep.subr.bf16.mxu1 %v8714_v51  ;;  %v17497_v61 = vcombine.high %v17495_v4, %v17496_v45  ;;  %v8721_v51 = vld [vmem:[#allocation5 + $0x530] sm:$0xff] }
 0x795   :  { %9326 = vmatpush1.bf16.msra.mxu1 %v8713_v9  ;;  %v8726_v9 = vld [vmem:[#allocation5 + $0x558] sm:$0xff] }
 0x796   :  { %9408 = vmatprep.subr.bf16.mxu1 %v8716_v32  ;;  %v17498_v32 = vcombine.low %v17495_v4, %v17496_v45  ;;  %v8729_v4 = vld [vmem:[#allocation5 + $0x570] sm:$0xff]  ;;  %v8732_v45 = vld [vmem:[#allocation5 + $0x588] sm:$0xff] }
 0x798   :  { %9328 = vmatmul.mubr.bf16.vlgmr.msra.gmra.mrb[0].mxu1 %v17491_v18  ;;  %v8725_v18 = vld [vmem:[#allocation5 + $0x550] sm:$0xff] }
 0x799   :  { %9409 = vmatpush1.bf16.msra.mxu1 %v8715_v6  ;;  %9337 = vmatprep.mubr.bf16.mxu1 %v17493_v54  ;;  %v17499_v6 = vld [vmem:[#allocation39_spill] sm:$0xff]  ;;  %v8727_v54 = vld [vmem:[#allocation5 + $0x560] sm:$0xff] }
 0x79a   :  { %9410 = vmatprep.subr.bf16.mxu1 %v8718_v56  ;;  %v17501_v56 = vcombine.high %v17499_v6, %v17500_v48 }
 0x79d   :  { %9411 = vmatpush1.bf16.msra.mxu1 %v8717_v35  ;;  %v8730_v35 = vld [vmem:[#allocation5 + $0x578] sm:$0xff] }
 0x79e   :  { %9412 = vmatprep.subr.bf16.mxu1 %v8720_v15  ;;  %v17502_v15 = vcombine.low %v17499_v6, %v17500_v48  ;;  %v8733_v6 = vld [vmem:[#allocation5 + $0x590] sm:$0xff]  ;;  %v8736_v48 = vld [vmem:[#allocation5 + $0x5a8] sm:$0xff] }
 0x7a0   :  { %9338 = vmatmul.mubr.bf16.gmra.mrb[4].mxu1 %v17494_v8 }
 0x7a1   :  { %9413 = vmatpush1.bf16.msra.mxu1 %v8719_v16  ;;  %9347 = vmatprep.mubr.bf16.mxu1 %v17497_v61  ;;  %v17503_v16 = vld [vmem:[#allocation58_spill] sm:$0xff] }
 0x7a2   :  { %9414 = vmatprep.subr.bf16.mxu1 %v8722_v49  ;;  %v17504_v49 = vld [vmem:[#allocation63_spill] sm:$0xff]  ;;  %v8731_v61 = vld [vmem:[#allocation5 + $0x580] sm:$0xff] }
 0x7a3   :  { %v17505_v8 = vcombine.high %v17503_v16, %v17504_v49 }
 0x7a5   :  { %9415 = vmatpush1.bf16.msra.mxu1 %v8721_v51  ;;  %v8734_v51 = vld [vmem:[#allocation5 + $0x598] sm:$0xff] }
 0x7a6   :  { %9416 = vmatprep.subr.bf16.mxu1 %v8724_v46  ;;  %v17506_v46 = vcombine.low %v17503_v16, %v17504_v49  ;;  %v8737_v16 = vld [vmem:[#allocation5 + $0x5b0] sm:$0xff]  ;;  %v8740_v49 = vld [vmem:[#allocation5 + $0x5c8] sm:$0xff] }
 0x7a8   :  { %9348 = vmatmul.mubr.bf16.gmra.mrb[8].mxu1 %v17498_v32 }
 0x7a9   :  { %9417 = vmatpush1.bf16.msra.mxu1 %v8723_v28  ;;  %9357 = vmatprep.mubr.bf16.mxu1 %v17501_v56  ;;  %v17507_v28 = vld [vmem:[#allocation80_spill] sm:$0xff]  ;;  %v8735_v56 = vld [vmem:[#allocation5 + $0x5a0] sm:$0xff] }
 0x7aa   :  { %9418 = vmatprep.subr.bf16.mxu1 %v8726_v9  ;;  %v17508_v9 = vld [vmem:[#allocation86_spill] sm:$0xff] }
 0x7ab   :  { %v17509_v32 = vcombine.high %v17507_v28, %v17508_v9 }
 0x7ad   :  { %9419 = vmatpush1.bf16.msra.mxu1 %v8725_v18  ;;  %v8738_v18 = vld [vmem:[#allocation5 + $0x5b8] sm:$0xff] }
 0x7ae   :  { %9420 = vmatprep.subr.bf16.mxu1 %v8728_v59  ;;  %v17510_v59 = vcombine.low %v17507_v28, %v17508_v9  ;;  %v8741_v28 = vld [vmem:[#allocation5 + $0x5d0] sm:$0xff]  ;;  %v8744_v9 = vld [vmem:[#allocation5 + $0x5e8] sm:$0xff] }
 0x7b0   :  { %9358 = vmatmul.mubr.bf16.gmra.mrb[12].mxu1 %v17502_v15 }
 0x7b1   :  { %9421 = vmatpush1.bf16.msra.mxu1 %v8727_v54  ;;  %9367 = vmatprep.mubr.bf16.mxu1 %v17505_v8  ;;  %v17511_v54 = vld [vmem:[#allocation109_spill] sm:$0xff]  ;;  %v8739_v8 = vld [vmem:[#allocation5 + $0x5c0] sm:$0xff] }
 0x7b2   :  { %9422 = vmatprep.subr.bf16.mxu1 %v8730_v35  ;;  %v17512_v35 = vld [vmem:[#allocation112_spill] sm:$0xff] }
 0x7b3   :  { %v17513_v15 = vcombine.high %v17511_v54, %v17512_v35 }
 0x7b5   :  { %9423 = vmatpush1.bf16.msra.mxu1 %v8729_v4  ;;  %v8742_v4 = vld [vmem:[#allocation5 + $0x5d8] sm:$0xff] }
 0x7b6   :  { %9424 = vmatprep.subr.bf16.mxu1 %v8732_v45  ;;  %v17514_v45 = vcombine.low %v17511_v54, %v17512_v35  ;;  %v8745_v54 = vld [vmem:[#allocation5 + $0x5f0] sm:$0xff]  ;;  %v8748_v35 = vld [vmem:[#allocation5 + $0x608] sm:$0xff] }
 0x7b8   :  { %9368 = vmatmul.mubr.bf16.gmra.mrb[16].mxu1 %v17506_v46 }
 0x7b9   :  { %9425 = vmatpush1.bf16.msra.mxu1 %v8731_v61  ;;  %9377 = vmatprep.mubr.bf16.mxu1 %v17509_v32  ;;  %v17515_v61 = vld [vmem:[#allocation122_spill] sm:$0xff] }
 0x7ba   :  { %9426 = vmatprep.subr.bf16.mxu1 %v8734_v51  ;;  %v17516_v51 = vld [vmem:[#allocation124_spill] sm:$0xff]  ;;  %v8743_v32 = vld [vmem:[#allocation5 + $0x5e0] sm:$0xff] }
 0x7bb   :  { %v17517_v46 = vcombine.high %v17515_v61, %v17516_v51 }
 0x7bd   :  { %9427 = vmatpush1.bf16.msra.mxu1 %v8733_v6  ;;  %v8746_v6 = vld [vmem:[#allocation5 + $0x5f8] sm:$0xff] }
 0x7be   :  { %9428 = vmatprep.subr.bf16.mxu1 %v8736_v48  ;;  %v17518_v48 = vcombine.low %v17515_v61, %v17516_v51  ;;  %v8749_v61 = vld [vmem:[#allocation5 + $0x610] sm:$0xff]  ;;  %v8752_v51 = vld [vmem:[#allocation5 + $0x628] sm:$0xff] }
 0x7c0   :  { %9378 = vmatmul.mubr.bf16.gmra.mrb[20].mxu1 %v17510_v59 }
 0x7c1   :  { %9429 = vmatpush1.bf16.msra.mxu1 %v8735_v56  ;;  %9387 = vmatprep.mubr.bf16.mxu1 %v17513_v15  ;;  %v17519_v56 = vld [vmem:[#allocation144_spill] sm:$0xff]  ;;  %v8747_v15 = vld [vmem:[#allocation5 + $0x600] sm:$0xff] }
 0x7c2   :  { %9430 = vmatprep.subr.bf16.mxu1 %v8738_v18  ;;  %v17520_v18 = vld [vmem:[#allocation148_spill] sm:$0xff] }
 0x7c3   :  { %v17521_v59 = vcombine.high %v17519_v56, %v17520_v18 }
 0x7c5   :  { %9431 = vmatpush1.bf16.msra.mxu1 %v8737_v16  ;;  %v8750_v16 = vld [vmem:[#allocation5 + $0x618] sm:$0xff] }
 0x7c6   :  { %9432 = vmatprep.subr.bf16.mxu1 %v8740_v49  ;;  %v17522_v49 = vcombine.low %v17519_v56, %v17520_v18  ;;  %v8753_v56 = vld [vmem:[#allocation5 + $0x630] sm:$0xff]  ;;  %v8756_v18 = vld [vmem:[#allocation5 + $0x648] sm:$0xff] }
 0x7c8   :  { %9388 = vmatmul.mubr.bf16.gmra.mrb[24].mxu1 %v17514_v45 }
 0x7c9   :  { %9433 = vmatpush1.bf16.msra.mxu1 %v8739_v8  ;;  %9397 = vmatprep.mubr.bf16.mxu1 %v17517_v46  ;;  %v17523_v8 = vld [vmem:[#allocation166_spill] sm:$0xff] }
 0x7ca   :  { %9434 = vmatprep.subr.bf16.mxu1 %v8742_v4  ;;  %v17524_v4 = vld [vmem:[#allocation168_spill] sm:$0xff]  ;;  %v8751_v46 = vld [vmem:[#allocation5 + $0x620] sm:$0xff] }
 0x7cb   :  { %v17525_v45 = vcombine.high %v17523_v8, %v17524_v4 }
 0x7cd   :  { %9435 = vmatpush1.bf16.msra.mxu1 %v8741_v28  ;;  %v8754_v28 = vld [vmem:[#allocation5 + $0x638] sm:$0xff] }
 0x7ce   :  { %9436 = vmatprep.subr.bf16.mxu1 %v8744_v9  ;;  %v17526_v9 = vcombine.low %v17523_v8, %v17524_v4  ;;  %v8757_v8 = vld [vmem:[#allocation5 + $0x650] sm:$0xff]  ;;  %v8760_v4 = vld [vmem:[#allocation5 + $0x668] sm:$0xff] }
 0x7d0   :  { %9398 = vmatmul.mubr.bf16.gmra.mrb[28].mxu1 %v17518_v48 }
 0x7d1   :  { %9437 = vmatpush1.bf16.msra.mxu1 %v8743_v32  ;;  %9440 = vmatprep.mubr.bf16.mxu1 %v17521_v59  ;;  %v17527_v32 = vld [vmem:[#allocation45_spill] sm:$0xff]  ;;  %v8755_v59 = vld [vmem:[#allocation5 + $0x640] sm:$0xff] }
 0x7d2   :  { %9438 = vmatprep.subr.bf16.mxu1 %v8746_v6  ;;  %v17528_v6 = vld [vmem:[#allocation49_spill] sm:$0xff] }
 0x7d3   :  { %v17529_v48 = vcombine.high %v17527_v32, %v17528_v6 }
 0x7d5   :  { %9439 = vmatpush1.bf16.msra.mxu1 %v8745_v54  ;;  %v8758_v54 = vld [vmem:[#allocation5 + $0x658] sm:$0xff] }
 0x7d6   :  { %9521 = vmatprep.subr.bf16.mxu1 %v8748_v35  ;;  %v17530_v35 = vcombine.low %v17527_v32, %v17528_v6  ;;  %v8761_v32 = vld [vmem:[#allocation5 + $0x670] sm:$0xff]  ;;  %v8764_v6 = vld [vmem:[#allocation5 + $0x688] sm:$0xff] }
 0x7d8   :  { %9441 = vmatmul.mubr.bf16.vlgmr.msra.gmra.mrb[0].mxu1 %v17522_v49 }
 0x7d9   :  { %9522 = vmatpush1.bf16.msra.mxu1 %v8747_v15  ;;  %9450 = vmatprep.mubr.bf16.mxu1 %v17525_v45  ;;  %v17531_v15 = vld [vmem:[#allocation40_spill] sm:$0xff]  ;;  %v8759_v45 = vld [vmem:[#allocation5 + $0x660] sm:$0xff] }
 0x7da   :  { %9523 = vmatprep.subr.bf16.mxu1 %v8750_v16  ;;  %v17532_v16 = vld [vmem:[#allocation42_spill] sm:$0xff] }
 0x7db   :  { %v17533_v49 = vcombine.high %v17531_v15, %v17532_v16 }
 0x7dd   :  { %9524 = vmatpush1.bf16.msra.mxu1 %v8749_v61  ;;  %v8762_v61 = vld [vmem:[#allocation5 + $0x678] sm:$0xff] }
 0x7de   :  { %9525 = vmatprep.subr.bf16.mxu1 %v8752_v51  ;;  %v17534_v51 = vcombine.low %v17531_v15, %v17532_v16  ;;  %v8765_v15 = vld [vmem:[#allocation5 + $0x690] sm:$0xff]  ;;  %v8768_v16 = vld [vmem:[#allocation5 + $0x6a8] sm:$0xff] }
 0x7e0   :  { %9451 = vmatmul.mubr.bf16.gmra.mrb[4].mxu1 %v17526_v9 }
 0x7e1   :  { %9526 = vmatpush1.bf16.msra.mxu1 %v8751_v46  ;;  %9460 = vmatprep.mubr.bf16.mxu1 %v17529_v48  ;;  %v17535_v46 = vld [vmem:[#allocation67_spill] sm:$0xff]  ;;  %v8763_v48 = vld [vmem:[#allocation5 + $0x680] sm:$0xff] }
 0x7e2   :  { %9527 = vmatprep.subr.bf16.mxu1 %v8754_v28  ;;  %v17536_v28 = vld [vmem:[#allocation69_spill] sm:$0xff] }
 0x7e3   :  { %v17537_v9 = vcombine.high %v17535_v46, %v17536_v28 }
 0x7e5   :  { %9528 = vmatpush1.bf16.msra.mxu1 %v8753_v56  ;;  %v8766_v56 = vld [vmem:[#allocation5 + $0x698] sm:$0xff] }
 0x7e6   :  { %9529 = vmatprep.subr.bf16.mxu1 %v8756_v18  ;;  %v17538_v18 = vcombine.low %v17535_v46, %v17536_v28  ;;  %v8769_v46 = vld [vmem:[#allocation5 + $0x6b0] sm:$0xff]  ;;  %v8772_v28 = vld [vmem:[#allocation5 + $0x6c8] sm:$0xff] }
 0x7e8   :  { %9461 = vmatmul.mubr.bf16.gmra.mrb[8].mxu1 %v17530_v35 }
 0x7e9   :  { %9530 = vmatpush1.bf16.msra.mxu1 %v8755_v59  ;;  %9470 = vmatprep.mubr.bf16.mxu1 %v17533_v49  ;;  %v17539_v59 = vld [vmem:[#allocation61_spill] sm:$0xff]  ;;  %v8767_v49 = vld [vmem:[#allocation5 + $0x6a0] sm:$0xff] }
 0x7ea   :  { %9531 = vmatprep.subr.bf16.mxu1 %v8758_v54  ;;  %v17540_v54 = vld [vmem:[#allocation64_spill] sm:$0xff] }
 0x7eb   :  { %v17541_v35 = vcombine.high %v17539_v59, %v17540_v54 }
 0x7ed   :  { %9532 = vmatpush1.bf16.msra.mxu1 %v8757_v8  ;;  %v8770_v8 = vld [vmem:[#allocation5 + $0x6b8] sm:$0xff] }
 0x7ee   :  { %9533 = vmatprep.subr.bf16.mxu1 %v8760_v4  ;;  %v17542_v4 = vcombine.low %v17539_v59, %v17540_v54  ;;  %v8773_v59 = vld [vmem:[#allocation5 + $0x6d0] sm:$0xff]  ;;  %v8776_v54 = vld [vmem:[#allocation5 + $0x6e8] sm:$0xff] }
 0x7f0   :  { %9471 = vmatmul.mubr.bf16.gmra.mrb[12].mxu1 %v17534_v51 }
 0x7f1   :  { %9534 = vmatpush1.bf16.msra.mxu1 %v8759_v45  ;;  %9480 = vmatprep.mubr.bf16.mxu1 %v17537_v9  ;;  %v17543_v45 = vld [vmem:[#allocation89_spill] sm:$0xff]  ;;  %v8771_v9 = vld [vmem:[#allocation5 + $0x6c0] sm:$0xff] }
 0x7f2   :  { %9535 = vmatprep.subr.bf16.mxu1 %v8762_v61  ;;  %v17544_v61 = vld [vmem:[#allocation90_spill] sm:$0xff] }
 0x7f3   :  { %v17545_v51 = vcombine.high %v17543_v45, %v17544_v61 }
 0x7f5   :  { %9536 = vmatpush1.bf16.msra.mxu1 %v8761_v32  ;;  %v8774_v32 = vld [vmem:[#allocation5 + $0x6d8] sm:$0xff] }
 0x7f6   :  { %9537 = vmatprep.subr.bf16.mxu1 %v8764_v6  ;;  %v17546_v6 = vcombine.low %v17543_v45, %v17544_v61  ;;  %v8779_v45 = vld [vmem:[#allocation5 + $0x700] sm:$0xff]  ;;  %v8782_v61 = vld [vmem:[#allocation5 + $0x718] sm:$0xff] }
 0x7f8   :  { %9481 = vmatmul.mubr.bf16.gmra.mrb[16].mxu1 %v17538_v18 }
 0x7f9   :  { %9538 = vmatpush1.bf16.msra.mxu1 %v8763_v48  ;;  %9490 = vmatprep.mubr.bf16.mxu1 %v17541_v35  ;;  %v17547_v48 = vld [vmem:[#allocation83_spill] sm:$0xff]  ;;  %v8775_v35 = vld [vmem:[#allocation5 + $0x6e0] sm:$0xff] }
 0x7fa   :  { %9539 = vmatprep.subr.bf16.mxu1 %v8766_v56  ;;  %v17548_v56 = vld [vmem:[#allocation87_spill] sm:$0xff] }
 0x7fb   :  { %v17549_v18 = vcombine.high %v17547_v48, %v17548_v56 }
 0x7fd   :  { %9540 = vmatpush1.bf16.msra.mxu1 %v8765_v15  ;;  %v8778_v15 = vld [vmem:[#allocation5 + $0x6f8] sm:$0xff] }
 0x7fe   :  { %9541 = vmatprep.subr.bf16.mxu1 %v8768_v16  ;;  %v17550_v16 = vcombine.low %v17547_v48, %v17548_v56  ;;  %v17554_v48 = vld [vmem:[#allocation138_spill] sm:$0xff]  ;;  %v17555_v56 = vld [vmem:[#allocation88_spill] sm:$0xff] }
 0x800   :  { %9491 = vmatmul.mubr.bf16.gmra.mrb[20].mxu1 %v17542_v4  ;;  %v8780_v4 = vld [vmem:[#allocation5 + $0x708] sm:$0xff] }
 0x801   :  { %9542 = vmatpush1.bf16.msra.mxu1 %v8767_v49  ;;  %9500 = vmatprep.mubr.bf16.mxu1 %v17545_v51  ;;  %v17551_v49 = vld [vmem:[#allocation65_spill] sm:$0xff] }
 0x802   :  { %9543 = vmatprep.subr.bf16.mxu1 %v8770_v8  ;;  %v8777_v8 = vld [vmem:[#allocation5 + $0x6f0] sm:$0xff]  ;;  %v17552_v51 = vld [vmem:[#allocation129_spill] sm:$0xff] }
 0x805   :  { %9544 = vmatpush1.bf16.msra.mxu1 %v8769_v46  ;;  %v17553_v46 = vld [vmem:[#allocation81_spill] sm:$0xff] }
 0x806   :  { %9545 = vmatprep.subr.bf16.mxu1 %v8772_v28  ;;  %v8781_v28 = vld [vmem:[#allocation5 + $0x710] sm:$0xff] }
 0x808   :  { %9501 = vmatmul.mubr.bf16.gmra.mrb[24].mxu1 %v17546_v6  ;;  %v8786_v6 = vld [vmem:[#allocation5 + $0x738] sm:$0xff] }
 0x809   :  { %9546 = vmatpush1.bf16.msra.mxu1 %v8771_v9  ;;  %9510 = vmatprep.mubr.bf16.mxu1 %v17549_v18  ;;  %v8784_v9 = vld [vmem:[#allocation5 + $0x728] sm:$0xff]  ;;  %v8785_v18 = vld [vmem:[#allocation5 + $0x730] sm:$0xff] }
 0x80a   :  { %9547 = vmatprep.subr.bf16.mxu1 %v8774_v32  ;;  %v8783_v32 = vld [vmem:[#allocation5 + $0x720] sm:$0xff] }
 0x80d   :  { %9548 = vmatpush1.bf16.msra.mxu1 %v8773_v59  ;;  %v8788_v59 = vld [vmem:[#allocation5 + $0x748] sm:$0xff] }
 0x80e   :  { %9549 = vmatprep.subr.bf16.mxu1 %v8776_v54  ;;  %v8787_v54 = vld [vmem:[#allocation5 + $0x740] sm:$0xff] }
 0x810   :  { %9511 = vmatmul.mubr.bf16.gmra.mrb[28].mxu1 %v17550_v16  ;;  %v17557_v16 = vld [vmem:[#allocation108_spill] sm:$0xff] }
 0x811   :  { %9550 = vmatpush1.bf16.msra.mxu1 %v8775_v35  ;;  %9553 = vmatprep.mubr.bf16.mxu1 %v17551_v49  ;;  %v8790_v35 = vld [vmem:[#allocation5 + $0x758] sm:$0xff]  ;;  %v8789_v49 = vld [vmem:[#allocation5 + $0x750] sm:$0xff] }
 0x812   :  { %9551 = vmatprep.subr.bf16.mxu1 %v8778_v15  ;;  %v17556_v15 = vld [vmem:[#allocation153_spill] sm:$0xff] }
 0x815   :  { %9552 = vmatpush1.bf16.msra.mxu1 %v8777_v8  ;;  %v8792_v8 = vld [vmem:[#allocation5 + $0x768] sm:$0xff] }
 0x816   :  { %9634 = vmatprep.subr.bf16.mxu1 %v8780_v4  ;;  %v8791_v4 = vld [vmem:[#allocation5 + $0x760] sm:$0xff] }
 0x818   :  { %9554 = vmatmul.mubr.bf16.vlgmr.msra.gmra.mrb[0].mxu1 %v17552_v51  ;;  %v17559_v51 = vld [vmem:[#allocation113_spill] sm:$0xff] }
 0x819   :  { %9635 = vmatpush1.bf16.msra.mxu1 %v8779_v45  ;;  %9563 = vmatprep.mubr.bf16.mxu1 %v17553_v46  ;;  %v8794_v45 = vld [vmem:[#allocation5 + $0x778] sm:$0xff]  ;;  %v8793_v46 = vld [vmem:[#allocation5 + $0x770] sm:$0xff] }
 0x81a   :  { %9636 = vmatprep.subr.bf16.mxu1 %v8782_v61  ;;  %v17558_v61 = vld [vmem:[#allocation158_spill] sm:$0xff] }
 0x81d   :  { %9637 = vmatpush1.bf16.msra.mxu1 %v8781_v28  ;;  %v8796_v28 = vld [vmem:[#allocation5 + $0x788] sm:$0xff] }
 0x81e   :  { %9638 = vmatprep.subr.bf16.mxu1 %v8784_v9  ;;  %v8795_v9 = vld [vmem:[#allocation5 + $0x780] sm:$0xff] }
 0x820   :  { %9564 = vmatmul.mubr.bf16.gmra.mrb[4].mxu1 %v17554_v48  ;;  %v17561_v48 = vld [vmem:[#allocation127_spill] sm:$0xff] }
 0x821   :  { %9639 = vmatpush1.bf16.msra.mxu1 %v8783_v32  ;;  %9573 = vmatprep.mubr.bf16.mxu1 %v17555_v56  ;;  %v8798_v32 = vld [vmem:[#allocation5 + $0x798] sm:$0xff]  ;;  %v8797_v56 = vld [vmem:[#allocation5 + $0x790] sm:$0xff] }
 0x822   :  { %9640 = vmatprep.subr.bf16.mxu1 %v8786_v6  ;;  %v17560_v6 = vld [vmem:[#allocation31_spill] sm:$0xff] }
 0x825   :  { %9641 = vmatpush1.bf16.msra.mxu1 %v8785_v18  ;;  %v8800_v18 = vld [vmem:[#allocation5 + $0x7a8] sm:$0xff] }
 0x826   :  { %9642 = vmatprep.subr.bf16.mxu1 %v8788_v59  ;;  %v8799_v59 = vld [vmem:[#allocation5 + $0x7a0] sm:$0xff] }
 0x828   :  { %9574 = vmatmul.mubr.bf16.gmra.mrb[8].mxu1 %v17556_v15  ;;  %v17563_v15 = vld [vmem:[#allocation128_spill] sm:$0xff] }
 0x829   :  { %9643 = vmatpush1.bf16.msra.mxu1 %v8787_v54  ;;  %9583 = vmatprep.mubr.bf16.mxu1 %v17557_v16  ;;  %v8802_v54 = vld [vmem:[#allocation5 + $0x7b8] sm:$0xff]  ;;  %v8801_v16 = vld [vmem:[#allocation5 + $0x7b0] sm:$0xff] }
 0x82a   :  { %9644 = vmatprep.subr.bf16.mxu1 %v8790_v35  ;;  %v17562_v35 = vld [vmem:[#allocation34_spill] sm:$0xff] }
 0x82d   :  { %9645 = vmatpush1.bf16.msra.mxu1 %v8789_v49  ;;  %v8804_v49 = vld [vmem:[#allocation5 + $0x7c8] sm:$0xff] }
 0x82e   :  { %9646 = vmatprep.subr.bf16.mxu1 %v8792_v8  ;;  %v8803_v8 = vld [vmem:[#allocation5 + $0x7c0] sm:$0xff] }
 0x830   :  { %9584 = vmatmul.mubr.bf16.gmra.mrb[12].mxu1 %v17558_v61  ;;  %v17565_v61 = vld [vmem:[#allocation143_spill] sm:$0xff] }
 0x831   :  { %9647 = vmatpush1.bf16.msra.mxu1 %v8791_v4  ;;  %9593 = vmatprep.mubr.bf16.mxu1 %v17559_v51  ;;  %v8806_v4 = vld [vmem:[#allocation5 + $0x7d8] sm:$0xff]  ;;  %v8805_v51 = vld [vmem:[#allocation5 + $0x7d0] sm:$0xff] }
 0x832   :  { %9648 = vmatprep.subr.bf16.mxu1 %v8794_v45  ;;  %v17564_v45 = vld [vmem:[#allocation44_spill] sm:$0xff] }
 0x835   :  { %9649 = vmatpush1.bf16.msra.mxu1 %v8793_v46  ;;  %v8808_v46 = vld [vmem:[#allocation5 + $0x7e8] sm:$0xff] }
 0x836   :  { %9650 = vmatprep.subr.bf16.mxu1 %v8796_v28  ;;  %v8807_v28 = vld [vmem:[#allocation5 + $0x7e0] sm:$0xff] }
 0x838   :  { %9594 = vmatmul.mubr.bf16.gmra.mrb[16].mxu1 %v17560_v6  ;;  %v17567_v6 = vcombine.high %v15392_v37, %v15397_v30 }
 0x839   :  { %9651 = vmatpush1.bf16.msra.mxu1 %v8795_v9  ;;  %9603 = vmatprep.mubr.bf16.mxu1 %v17561_v48  ;;  %v8810_v9 = vld [vmem:[#allocation5 + $0x7f8] sm:$0xff]  ;;  %v8809_v48 = vld [vmem:[#allocation5 + $0x7f0] sm:$0xff] }
 0x83a   :  { %9652 = vmatprep.subr.bf16.mxu1 %v8798_v32  ;;  %v17566_v32 = vld [vmem:[#allocation48_spill] sm:$0xff] }
 0x83d   :  { %9653 = vmatpush1.bf16.msra.mxu1 %v8797_v56  ;;  %v8812_v56 = vld [vmem:[#allocation5 + $0x808] sm:$0xff] }
 0x83e   :  { %9654 = vmatprep.subr.bf16.mxu1 %v8800_v18  ;;  %v8811_v18 = vld [vmem:[#allocation5 + $0x800] sm:$0xff] }
 0x840   :  { %9604 = vmatmul.mubr.bf16.gmra.mrb[20].mxu1 %v17562_v35  ;;  %v17569_v35 = vcombine.high %v15403_v3, %v15412_v53 }
 0x841   :  { %9655 = vmatpush1.bf16.msra.mxu1 %v8799_v59  ;;  %9613 = vmatprep.mubr.bf16.mxu1 %v17563_v15  ;;  %v8814_v59 = vld [vmem:[#allocation5 + $0x818] sm:$0xff]  ;;  %v8813_v15 = vld [vmem:[#allocation5 + $0x810] sm:$0xff] }
 0x842   :  { %9656 = vmatprep.subr.bf16.mxu1 %v8802_v54  ;;  %v17568_v54 = vcombine.low %v15392_v37, %v15397_v30  ;;  %v17571_v37 = vcombine.high %v15417_v47, %v15422_v34  ;;  %v8817_v30 = vld [vmem:[#allocation5 + $0x830] sm:$0xff] }
 0x845   :  { %9657 = vmatpush1.bf16.msra.mxu1 %v8801_v16  ;;  %v8816_v16 = vld [vmem:[#allocation5 + $0x828] sm:$0xff] }
 0x846   :  { %9658 = vmatprep.subr.bf16.mxu1 %v8804_v49  ;;  %v8815_v49 = vld [vmem:[#allocation5 + $0x820] sm:$0xff] }
 0x848   :  { %9614 = vmatmul.mubr.bf16.gmra.mrb[24].mxu1 %v17564_v45  ;;  %v8820_v45 = vld [vmem:[#allocation5 + $0x848] sm:$0xff] }
 0x849   :  { %9659 = vmatpush1.bf16.msra.mxu1 %v8803_v8  ;;  %9623 = vmatprep.mubr.bf16.mxu1 %v17565_v61  ;;  %v8818_v8 = vld [vmem:[#allocation5 + $0x838] sm:$0xff]  ;;  %v8819_v61 = vld [vmem:[#allocation5 + $0x840] sm:$0xff] }
 0x84a   :  { %9660 = vmatprep.subr.bf16.mxu1 %v8806_v4  ;;  %v17570_v4 = vcombine.low %v15403_v3, %v15412_v53  ;;  %v17573_v3 = vcombine.high %v15435_v60, %v15440_v20  ;;  %v8821_v53 = vld [vmem:[#allocation5 + $0x850] sm:$0xff] }
 0x84d   :  { %9661 = vmatpush1.bf16.msra.mxu1 %v8805_v51  ;;  %v8822_v51 = vld [vmem:[#allocation5 + $0x858] sm:$0xff] }
 0x84e   :  { %9662 = vmatprep.subr.bf16.mxu1 %v8808_v46  ;;  %v17572_v46 = vcombine.low %v15417_v47, %v15422_v34  ;;  %v17575_v47 = vcombine.high %v15452_v11, %v15457_v39  ;;  %v8825_v34 = vld [vmem:[#allocation5 + $0x870] sm:$0xff] }
 0x850   :  { %9624 = vmatmul.mubr.bf16.gmra.mrb[28].mxu1 %v17566_v32  ;;  %v8826_v32 = vld [vmem:[#allocation5 + $0x878] sm:$0xff] }
 0x851   :  { %9663 = vmatpush1.bf16.msra.mxu1 %v8807_v28  ;;  %9666 = vmatprep.mubr.bf16.mxu1 %v17567_v6  ;;  %v8824_v28 = vld [vmem:[#allocation5 + $0x868] sm:$0xff]  ;;  %v17574_v6 = vcombine.low %v15435_v60, %v15440_v20  ;;  %v17577_v60 = vcombine.high %v15465_v55, %v15474_v43  ;;  %v8829_v20 = vld [vmem:[#allocation5 + $0x890] sm:$0xff] }
 0x852   :  { %9664 = vmatprep.subr.bf16.mxu1 %v8810_v9  ;;  %v8823_v9 = vld [vmem:[#allocation5 + $0x860] sm:$0xff] }
 0x855   :  { %9665 = vmatpush1.bf16.msra.mxu1 %v8809_v48  ;;  %v8828_v48 = vld [vmem:[#allocation5 + $0x888] sm:$0xff] }
 0x856   :  { %9747 = vmatprep.subr.bf16.mxu1 %v8812_v56  ;;  %v8827_v56 = vld [vmem:[#allocation5 + $0x880] sm:$0xff] }
 0x858   :  { %9667 = vmatmul.mubr.bf16.vlgmr.msra.gmra.mrb[0].mxu1 %v17568_v54  ;;  %v8832_v54 = vld [vmem:[#allocation5 + $0x8a8] sm:$0xff] }
 0x859   :  { %9748 = vmatpush1.bf16.msra.mxu1 %v8811_v18  ;;  %9676 = vmatprep.mubr.bf16.mxu1 %v17569_v35  ;;  %v8830_v18 = vld [vmem:[#allocation5 + $0x898] sm:$0xff]  ;;  %v8831_v35 = vld [vmem:[#allocation5 + $0x8a0] sm:$0xff] }
 0x85a   :  { %9749 = vmatprep.subr.bf16.mxu1 %v8814_v59  ;;  %v17576_v59 = vcombine.low %v15452_v11, %v15457_v39  ;;  %v17579_v11 = vld [vmem:[#allocation111_spill] sm:$0xff] }
 0x85b   :  { %v17580_v39 = vcombine.high %v15482_v29, %v17579_v11 }
 0x85d   :  { %9750 = vmatpush1.bf16.msra.mxu1 %v8813_v15  ;;  %v8834_v15 = vld [vmem:[#allocation5 + $0x8b8] sm:$0xff] }
 0x85e   :  { %9751 = vmatprep.subr.bf16.mxu1 %v8816_v16  ;;  %v17578_v16 = vcombine.low %v15465_v55, %v15474_v43  ;;  %v17583_v55 = vld [vmem:[#allocation106_spill] sm:$0xff] }
 0x860   :  { %9677 = vmatmul.mubr.bf16.gmra.mrb[4].mxu1 %v17570_v4  ;;  %v8835_v4 = vld [vmem:[#allocation5 + $0x8c0] sm:$0xff] }
 0x861   :  { %9752 = vmatpush1.bf16.msra.mxu1 %v8815_v49  ;;  %9686 = vmatprep.mubr.bf16.mxu1 %v17571_v37  ;;  %v8833_v49 = vld [vmem:[#allocation5 + $0x8b0] sm:$0xff]  ;;  %v8838_v37 = vld [vmem:[#allocation5 + $0x8d8] sm:$0xff] }
 0x862   :  { %9753 = vmatprep.subr.bf16.mxu1 %v8818_v8  ;;  %v8836_v8 = vld [vmem:[#allocation5 + $0x8c8] sm:$0xff] }
 0x865   :  { %9754 = vmatpush1.bf16.msra.mxu1 %v8817_v30  ;;  %v17581_v30 = vcombine.low %v15482_v29, %v17579_v11  ;;  %v8841_v29 = vld [vmem:[#allocation5 + $0x8f0] sm:$0xff] }
 0x866   :  { %9755 = vmatprep.subr.bf16.mxu1 %v8820_v45  ;;  %v17582_v45 = vld [vmem:[#allocation107_spill] sm:$0xff] }
 0x867   :  { %v17584_v43 = vcombine.high %v17582_v45, %v17583_v55 }
 0x868   :  { %9687 = vmatmul.mubr.bf16.gmra.mrb[8].mxu1 %v17572_v46  ;;  %v8839_v46 = vld [vmem:[#allocation5 + $0x8e0] sm:$0xff] }
 0x869   :  { %9756 = vmatpush1.bf16.msra.mxu1 %v8819_v61  ;;  %9696 = vmatprep.mubr.bf16.mxu1 %v17573_v3  ;;  %v8837_v61 = vld [vmem:[#allocation5 + $0x8d0] sm:$0xff]  ;;  %v8842_v3 = vld [vmem:[#allocation5 + $0x8f8] sm:$0xff] }
 0x86a   :  { %9757 = vmatprep.subr.bf16.mxu1 %v8822_v51  ;;  %v8840_v51 = vld [vmem:[#allocation5 + $0x8e8] sm:$0xff] }
 0x86d   :  { %9758 = vmatpush1.bf16.msra.mxu1 %v8821_v53  ;;  %v17585_v53 = vcombine.low %v17582_v45, %v17583_v55 }
 0x86e   :  { %9759 = vmatprep.subr.bf16.mxu1 %v8824_v28 }
 0x870   :  { %9697 = vmatmul.mubr.bf16.gmra.mrb[12].mxu1 %v17574_v6 }
 0x871   :  { %9760 = vmatpush1.bf16.msra.mxu1 %v8823_v9  ;;  %9706 = vmatprep.mubr.bf16.mxu1 %v17575_v47 }
 0x872   :  { %9761 = vmatprep.subr.bf16.mxu1 %v8826_v32 }
 0x875   :  { %9762 = vmatpush1.bf16.msra.mxu1 %v8825_v34 }
 0x876   :  { %9763 = vmatprep.subr.bf16.mxu1 %v8828_v48 }
 0x878   :  { %9707 = vmatmul.mubr.bf16.gmra.mrb[16].mxu1 %v17576_v59 }
 0x879   :  { %9764 = vmatpush1.bf16.msra.mxu1 %v8827_v56  ;;  %9716 = vmatprep.mubr.bf16.mxu1 %v17577_v60 }
 0x87a   :  { %9765 = vmatprep.subr.bf16.mxu1 %v8830_v18 }
 0x87d   :  { %9766 = vmatpush1.bf16.msra.mxu1 %v8829_v20 }
 0x87e   :  { %9767 = vmatprep.subr.bf16.mxu1 %v8832_v54 }
 0x880   :  { %9717 = vmatmul.mubr.bf16.gmra.mrb[20].mxu1 %v17578_v16 }
 0x881   :  { %9768 = vmatpush1.bf16.msra.mxu1 %v8831_v35  ;;  %9726 = vmatprep.mubr.bf16.mxu1 %v17580_v39 }
 0x882   :  { %9769 = vmatprep.subr.bf16.mxu1 %v8834_v15 }
 0x885   :  { %9770 = vmatpush1.bf16.msra.mxu1 %v8833_v49 }
 0x886   :  { %9771 = vmatprep.subr.bf16.mxu1 %v8836_v8 }
 0x888   :  { %9727 = vmatmul.mubr.bf16.gmra.mrb[24].mxu1 %v17581_v30 }
 0x889   :  { %9772 = vmatpush1.bf16.msra.mxu1 %v8835_v4  ;;  %9736 = vmatprep.mubr.bf16.mxu1 %v17584_v43 }
 0x88a   :  { %9773 = vmatprep.subr.bf16.mxu1 %v8838_v37 }
 0x88d   :  { %9774 = vmatpush1.bf16.msra.mxu1 %v8837_v61 }
 0x88e   :  { %9775 = vmatprep.subr.bf16.mxu1 %v8840_v51 }
 0x890   :  { %9737 = vmatmul.mubr.bf16.gmra.mrb[28].mxu1 %v17585_v53 }
 0x891   :  { %9776 = vmatpush1.bf16.msra.mxu1 %v8839_v46  ;;  %9779 = vmatprep.mubr.bf16.mxu1 %v11025_v40 }
 0x892   :  { %9777 = vmatprep.subr.bf16.mxu1 %v8842_v3 }
 0x895   :  { %9778 = vmatpush1.bf16.msra.mxu1 %v8841_v29 }
 0x898   :  { %9780 = vmatmul.mubr.bf16.vlgmr.msra.gmra.mrb[0].mxu1 %v11024_v0 }
 0x899   :  { %9789 = vmatprep.mubr.bf16.mxu1 %v11027_v58 }
 0x8a0   :  { %9790 = vmatmul.mubr.bf16.gmra.mrb[4].mxu1 %v11026_v14 }
 0x8a1   :  { %9799 = vmatprep.mubr.bf16.mxu1 %v11029_v7 }
 0x8a8   :  { %9800 = vmatmul.mubr.bf16.gmra.mrb[8].mxu1 %v11028_v52 }
 0x8a9   :  { %9809 = vmatprep.mubr.bf16.mxu1 %v11031_v21 }
 0x8b0   :  { %9810 = vmatmul.mubr.bf16.gmra.mrb[12].mxu1 %v11030_v5 }
 0x8b1   :  { %9819 = vmatprep.mubr.bf16.mxu1 %v11033_v41 }
 0x8b8   :  { %9820 = vmatmul.mubr.bf16.gmra.mrb[16].mxu1 %v11032_v33 }
 0x8b9   :  { %9829 = vmatprep.mubr.bf16.mxu1 %v11035_v19 }
 0x8c0   :  { %9830 = vmatmul.mubr.bf16.gmra.mrb[20].mxu1 %v11034_v12 }
 0x8c1   :  { %9839 = vmatprep.mubr.bf16.mxu1 %v11037_v31 }
 0x8c8   :  { %9840 = vmatmul.mubr.bf16.gmra.mrb[24].mxu1 %v11036_v42 }
 0x8c9   :  { %9849 = vmatprep.mubr.bf16.mxu1 %v11039_v63 }
 0x8d0   :  { %9850 = vmatmul.mubr.bf16.gmra.mrb[28].mxu1 %v11038_v2 }
 0x96b   :  { %v16028_v62 = vpop.f32.mrb[0].mxu1 }
 0x96c   :  { %v16030_v50 = vpop.f32.mrb[1].mxu1  ;;  %v9860_v36 = vmul.f32 %v16028_v62, %v16028_v62 }
 0x96d   :  { %v16032_v13 = vpop.f32.mrb[2].mxu1  ;;  %v9861_v57 = vmul.f32 %v16030_v50, %v16030_v50 }
 0x96e   :  { %v9862_v44 = vmul.f32 %v16032_v13, %v16032_v13  ;;  %v9892_v26 = vadd.f32 %v16032_v13, %v16028_v62  ;;  %v16040_v23 = vpop.f32.mrb[3].mxu1 }
 0x96f   :  { %v9863_v10 = vmul.f32 %v16040_v23, %v16040_v23  ;;  %v9913_v24 = vadd.f32 %v16040_v23, %v16030_v50 }
 0x970   :  { %v9934_v17 = vadd.f32 %v9862_v44, %v9860_v36 }
 0x971   :  { %v9955_v22 = vadd.f32 %v9863_v10, %v9861_v57 }
 0x973   :  { %v16048_v1 = vpop.f32.mrb[4].mxu1 }
 0x974   :  { %v9864_v38 = vmul.f32 %v16048_v1, %v16048_v1  ;;  %v9893_v0 = vadd.f32 %v9892_v26, %v16048_v1  ;;  %v16053_v40 = vpop.f32.mrb[5].mxu1 }
 0x975   :  { %v9865_v14 = vmul.f32 %v16053_v40, %v16053_v40  ;;  %v9914_v25 = vadd.f32 %v9913_v24, %v16053_v40  ;;  %v16058_v27 = vpop.f32.mrb[6].mxu1 }
 0x976   :  { %v9935_v58 = vadd.f32 %v9934_v17, %v9864_v38  ;;  %v9866_v52 = vmul.f32 %v16058_v27, %v16058_v27  ;;  %v9894_v7 = vadd.f32 %v9893_v0, %v16058_v27  ;;  %v16063_v5 = vpop.f32.mrb[7].mxu1 }
 0x977   :  { %v9956_v21 = vadd.f32 %v9955_v22, %v9865_v14  ;;  %v9867_v33 = vmul.f32 %v16063_v5, %v16063_v5  ;;  %v9915_v41 = vadd.f32 %v9914_v25, %v16063_v5 }
 0x978   :  { %v9936_v12 = vadd.f32 %v9935_v58, %v9866_v52 }
 0x979   :  { %v9957_v19 = vadd.f32 %v9956_v21, %v9867_v33 }
 0x97b   :  { %v16068_v42 = vpop.f32.mrb[8].mxu1 }
 0x97c   :  { %v9868_v31 = vmul.f32 %v16068_v42, %v16068_v42  ;;  %v9895_v2 = vadd.f32 %v9894_v7, %v16068_v42  ;;  %v16073_v63 = vpop.f32.mrb[9].mxu1 }
 0x97d   :  { %v9869_v28 = vmul.f32 %v16073_v63, %v16073_v63  ;;  %v9916_v9 = vadd.f32 %v9915_v41, %v16073_v63  ;;  %v16078_v32 = vpop.f32.mrb[10].mxu1 }
 0x97e   :  { %v9937_v6 = vadd.f32 %v9936_v12, %v9868_v31  ;;  %v9870_v47 = vmul.f32 %v16078_v32, %v16078_v32  ;;  %v9896_v34 = vadd.f32 %v9895_v2, %v16078_v32  ;;  %v16083_v48 = vpop.f32.mrb[11].mxu1 }
 0x97f   :  { %v9958_v56 = vadd.f32 %v9957_v19, %v9869_v28  ;;  %v9871_v18 = vmul.f32 %v16083_v48, %v16083_v48  ;;  %v9917_v59 = vadd.f32 %v9916_v9, %v16083_v48 }
 0x980   :  { %v9938_v60 = vadd.f32 %v9937_v6, %v9870_v47 }
 0x981   :  { %v9959_v20 = vadd.f32 %v9958_v56, %v9871_v18 }
 0x983   :  { %v16088_v54 = vpop.f32.mrb[12].mxu1 }
 0x984   :  { %v9872_v35 = vmul.f32 %v16088_v54, %v16088_v54  ;;  %v9897_v15 = vadd.f32 %v9896_v34, %v16088_v54  ;;  %v16093_v16 = vpop.f32.mrb[13].mxu1 }
 0x985   :  { %v9873_v11 = vmul.f32 %v16093_v16, %v16093_v16  ;;  %v9918_v39 = vadd.f32 %v9917_v59, %v16093_v16  ;;  %v16098_v49 = vpop.f32.mrb[14].mxu1 }
 0x986   :  { %v9939_v8 = vadd.f32 %v9938_v60, %v9872_v35  ;;  %v9874_v4 = vmul.f32 %v16098_v49, %v16098_v49  ;;  %v9898_v37 = vadd.f32 %v9897_v15, %v16098_v49  ;;  %v16103_v30 = vpop.f32.mrb[15].mxu1 }
 0x987   :  { %v9960_v45 = vadd.f32 %v9959_v20, %v9873_v11  ;;  %v9875_v55 = vmul.f32 %v16103_v30, %v16103_v30  ;;  %v9919_v43 = vadd.f32 %v9918_v39, %v16103_v30 }
 0x988   :  { %v9940_v61 = vadd.f32 %v9939_v8, %v9874_v4 }
 0x989   :  { %v9961_v51 = vadd.f32 %v9960_v45, %v9875_v55 }
 0x98b   :  { %v16108_v46 = vpop.f32.mrb[16].mxu1 }
 0x98c   :  { %v9876_v3 = vmul.f32 %v16108_v46, %v16108_v46  ;;  %v9899_v53 = vadd.f32 %v9898_v37, %v16108_v46  ;;  %v16113_v29 = vpop.f32.mrb[17].mxu1 }
 0x98d   :  { %v9877_v36 = vmul.f32 %v16113_v29, %v16113_v29  ;;  %v9920_v44 = vadd.f32 %v9919_v43, %v16113_v29  ;;  %v16118_v26 = vpop.f32.mrb[18].mxu1 }
 0x98e   :  { %v9941_v57 = vadd.f32 %v9940_v61, %v9876_v3  ;;  %v9878_v10 = vmul.f32 %v16118_v26, %v16118_v26  ;;  %v9900_v24 = vadd.f32 %v9899_v53, %v16118_v26  ;;  %v16123_v17 = vpop.f32.mrb[19].mxu1 }
 0x98f   :  { %v9962_v22 = vadd.f32 %v9961_v51, %v9877_v36  ;;  %v9879_v38 = vmul.f32 %v16123_v17, %v16123_v17  ;;  %v9921_v0 = vadd.f32 %v9920_v44, %v16123_v17 }
 0x990   :  { %v9942_v14 = vadd.f32 %v9941_v57, %v9878_v10 }
 0x991   :  { %v9963_v25 = vadd.f32 %v9962_v22, %v9879_v38 }
 0x993   :  { %v16128_v58 = vpop.f32.mrb[20].mxu1 }
 0x994   :  { %v9880_v52 = vmul.f32 %v16128_v58, %v16128_v58  ;;  %v9901_v7 = vadd.f32 %v9900_v24, %v16128_v58  ;;  %v16133_v21 = vpop.f32.mrb[21].mxu1 }
 0x995   :  { %v9881_v33 = vmul.f32 %v16133_v21, %v16133_v21  ;;  %v9922_v41 = vadd.f32 %v9921_v0, %v16133_v21  ;;  %v16138_v12 = vpop.f32.mrb[22].mxu1 }
 0x996   :  { %v9943_v19 = vadd.f32 %v9942_v14, %v9880_v52  ;;  %v9882_v31 = vmul.f32 %v16138_v12, %v16138_v12  ;;  %v9902_v2 = vadd.f32 %v9901_v7, %v16138_v12  ;;  %v16143_v28 = vpop.f32.mrb[23].mxu1 }
 0x997   :  { %v9964_v9 = vadd.f32 %v9963_v25, %v9881_v33  ;;  %v9883_v6 = vmul.f32 %v16143_v28, %v16143_v28  ;;  %v9923_v47 = vadd.f32 %v9922_v41, %v16143_v28 }
 0x998   :  { %v9944_v34 = vadd.f32 %v9943_v19, %v9882_v31 }
 0x999   :  { %v9965_v56 = vadd.f32 %v9964_v9, %v9883_v6 }
 0x99b   :  { %v16148_v18 = vpop.f32.mrb[24].mxu1 }
 0x99c   :  { %v9884_v59 = vmul.f32 %v16148_v18, %v16148_v18  ;;  %v9903_v60 = vadd.f32 %v9902_v2, %v16148_v18  ;;  %v16153_v20 = vpop.f32.mrb[25].mxu1 }
 0x99d   :  { %v9885_v35 = vmul.f32 %v16153_v20, %v16153_v20  ;;  %v9924_v15 = vadd.f32 %v9923_v47, %v16153_v20  ;;  %v16158_v11 = vpop.f32.mrb[26].mxu1 }
 0x99e   :  { %v9945_v39 = vadd.f32 %v9944_v34, %v9884_v59  ;;  %v9886_v8 = vmul.f32 %v16158_v11, %v16158_v11  ;;  %v9904_v4 = vadd.f32 %v9903_v60, %v16158_v11  ;;  %v16163_v37 = vpop.f32.mrb[27].mxu1 }
 0x99f   :  { %v9966_v45 = vadd.f32 %v9965_v56, %v9885_v35  ;;  %v9887_v55 = vmul.f32 %v16163_v37, %v16163_v37  ;;  %v9925_v43 = vadd.f32 %v9924_v15, %v16163_v37 }
 0x9a0   :  { %v9946_v61 = vadd.f32 %v9945_v39, %v9886_v8 }
 0x9a1   :  { %v9967_v51 = vadd.f32 %v9966_v45, %v9887_v55 }
 0x9a3   :  { %v16168_v3 = vpop.f32.mrb[28].mxu1 }
 0x9a4   :  { %v9888_v53 = vmul.f32 %v16168_v3, %v16168_v3  ;;  %v9905_v36 = vadd.f32 %v9904_v4, %v16168_v3  ;;  %v16173_v44 = vpop.f32.mrb[29].mxu1 }
 0x9a5   :  { %17586 = vst [vmem:[#allocation98_spill] sm:$0xff] %v16173_v44  ;;  %v9889_v57 = vmul.f32 %v16173_v44, %v16173_v44  ;;  %v9926_v10 = vadd.f32 %v9925_v43, %v16173_v44  ;;  %v16178_v24 = vpop.f32.mrb[30].mxu1 }
 0x9a6   :  { %v9947_v22 = vadd.f32 %v9946_v61, %v9888_v53  ;;  %v9890_v38 = vmul.f32 %v16178_v24, %v16178_v24  ;;  %v9906_v0 = vadd.f32 %v9905_v36, %v16178_v24  ;;  %v16183_v14 = vpop.f32.mrb[31].mxu1 }
 0x9a7   :  { %17587 = vst [vmem:[#allocation131_spill] sm:$0xff] %v16183_v14  ;;  %v9968_v25 = vadd.f32 %v9967_v51, %v9889_v57  ;;  %v9891_v52 = vmul.f32 %v16183_v14, %v16183_v14  ;;  %v9927_v7 = vadd.f32 %v9926_v10, %v16183_v14 }
 0x9a8   :  { %v9907_v33 = vrot.slane %v9906_v0, 4  ;;  %v9948_v41 = vadd.f32 %v9947_v22, %v9890_v38 }
 0x9a9   :  { %v9928_v19 = vrot.slane %v9927_v7, 4  ;;  %v9969_v31 = vadd.f32 %v9968_v25, %v9891_v52 }
 0x9aa   :  { %v9908_v2 = vadd.f32 %v9907_v33, %v9906_v0  ;;  %v9949_v9 = vrot.slane %v9948_v41, 4 }
 0x9ab   :  { %v9929_v6 = vadd.f32 %v9928_v19, %v9927_v7  ;;  %v9970_v47 = vrot.slane %v9969_v31, 4 }
 0x9ac   :  { %v9909_v34 = vrot.slane %v9908_v2, 2  ;;  %v9950_v56 = vadd.f32 %v9949_v9, %v9948_v41 }
 0x9ad   :  { %v9930_v59 = vrot.slane %v9929_v6, 2  ;;  %v9971_v60 = vadd.f32 %v9970_v47, %v9969_v31 }
 0x9ae   :  { %v9910_v35 = vadd.f32 %v9909_v34, %v9908_v2  ;;  %v9951_v15 = vrot.slane %v9950_v56, 2 }
 0x9af   :  { %v9931_v39 = vadd.f32 %v9930_v59, %v9929_v6  ;;  %v9972_v8 = vrot.slane %v9971_v60, 2 }
 0x9b0   :  { %v9911_v4 = vrot.slane %v9910_v35, 1  ;;  %v9952_v45 = vadd.f32 %v9951_v15, %v9950_v56 }
 0x9b1   :  { %v9932_v55 = vrot.slane %v9931_v39, 1  ;;  %v9973_v43 = vadd.f32 %v9972_v8, %v9971_v60 }
 0x9b2   :  { %v9912_v61 = vadd.f32 %v9911_v4, %v9910_v35  ;;  %v9953_v51 = vrot.slane %v9952_v45, 1 }
 0x9b3   :  { %v9933_v53 = vadd.f32 %v9932_v55, %v9931_v39  ;;  %v9974_v36 = vrot.slane %v9973_v43, 1 }
 0x9b4   :  { %v9954_v57 = vadd.f32 %v9953_v51, %v9952_v45  ;;  %v16188_v10 = vmul.f32 0.0078125, %v9912_v61  ;;  %v10096_v51 = vld [vmem:[#allocation15] sm:$0x3] }
 0x9b5   :  { %v9975_v22 = vadd.f32 %v9974_v36, %v9973_v43  ;;  %v16190_v38 = vmul.f32 0.0078125, %v9933_v53  ;;  %v10052_v43 = vld [vmem:[#allocation13] sm:$0x3] }
 0x9b6   :  { %v9978_v0 = vmul.f32 0.0078125, %v9954_v57  ;;  %v9980_v25 = vmul.f32 %v16188_v10, %v16188_v10  ;;  %v9984_v52 = vsub.f32 %v16028_v62, %v16188_v10  ;;  %v9986_v7 = vsub.f32 %v16032_v13, %v16188_v10  ;;  %v17588_v53 = vld [vmem:[#allocation62_spill] sm:$0xff] }
 0x9b7   :  { %v9988_v33 = vsub.f32 %v16048_v1, %v16188_v10  ;;  %v9990_v41 = vsub.f32 %v16058_v27, %v16188_v10  ;;  %v9992_v19 = vsub.f32 %v16068_v42, %v16188_v10  ;;  %v9994_v31 = vsub.f32 %v16078_v32, %v16188_v10 }
 0x9b8   :  { %v9982_v2 = vsub.f32 %v9978_v0, %v9980_v25  ;;  %v9996_v9 = vsub.f32 %v16088_v54, %v16188_v10  ;;  %v9998_v62 = vsub.f32 %v16098_v49, %v16188_v10  ;;  %v10000_v13 = vsub.f32 %v16108_v46, %v16188_v10 }
 0x9b9   :  { %v10002_v1 = vsub.f32 %v16118_v26, %v16188_v10  ;;  %v10004_v27 = vsub.f32 %v16128_v58, %v16188_v10  ;;  %v10006_v42 = vsub.f32 %v16138_v12, %v16188_v10  ;;  %v10008_v32 = vsub.f32 %v16148_v18, %v16188_v10 }
 0x9ba   :  { %v10010_v54 = vsub.f32 %v16158_v11, %v16188_v10  ;;  %v10012_v49 = vsub.f32 %v16168_v3, %v16188_v10  ;;  %v10014_v46 = vsub.f32 %v16178_v24, %v16188_v10  ;;  %v10016_v6 = vadd.f32 1e-05, %v9982_v2  ;;  %v10160_v24 = vld [vmem:[#allocation7 + $0xa0] sm:$0xff]  ;;  %v10162_v3 = vld [vmem:[#allocation7 + $0xb0] sm:$0xff] }
 0x9bb   :  { %v9979_v26 = vmul.f32 0.0078125, %v9975_v22  ;;  %v9981_v58 = vmul.f32 %v16190_v38, %v16190_v38  ;;  %v10057_v36 = vrot.slane %v10052_v43, %v17588_v53  ;;  %v10101_v10 = vrot.slane %v10096_v51, %v17588_v53  ;;  %v17589_v22 = vld [vmem:[#allocation60_spill] sm:$0xff] }
 0x9bc   :  { %11692 = vrsqrt.f32 %v10016_v6  ;;  %v16263_v0 = vrot.slane %v10052_v43, %v17589_v22  ;;  %v16266_v25 = vrot.slane %v10096_v51, %v17589_v22 }
 0x9bd   :  { %v9983_v47 = vsub.f32 %v9979_v26, %v9981_v58 }
 0x9be   :  { %17590 = vst [vmem:[#allocation134_spill] sm:$0xff] %v16263_v0  ;;  %17591 = vst [vmem:[#allocation123_spill] sm:$0xff] %v16266_v25 }
 0x9bf   :  { %v10017_v61 = vadd.f32 1e-05, %v9983_v47 }
 0x9c1   :  { %11694 = vrsqrt.f32 %v10017_v61 }
 0x9c6   :  { %v11693_v57 = vpop.eup %11692 }
 0x9c7   :  { %v10020_v2 = vmul.f32 %v11693_v57, %v9984_v52  ;;  %v10022_v6 = vmul.f32 %v11693_v57, %v9986_v7  ;;  %v10024_v26 = vmul.f32 %v11693_v57, %v9988_v33  ;;  %v10026_v58 = vmul.f32 %v11693_v57, %v9990_v41 }
 0x9c8   :  { %v10028_v55 = vmul.f32 %v11693_v57, %v9992_v19  ;;  %v10030_v45 = vmul.f32 %v11693_v57, %v9994_v31  ;;  %v10032_v47 = vmul.f32 %v11693_v57, %v9996_v9  ;;  %v10034_v4 = vmul.f32 %v11693_v57, %v9998_v62 }
 0x9c9   :  { %v10036_v8 = vmul.f32 %v11693_v57, %v10000_v13  ;;  %v10038_v39 = vmul.f32 %v11693_v57, %v10002_v1  ;;  %v10040_v15 = vmul.f32 %v11693_v57, %v10004_v27  ;;  %v10042_v35 = vmul.f32 %v11693_v57, %v10006_v42 }
 0x9ca   :  { %v10044_v53 = vmul.f32 %v11693_v57, %v10008_v32  ;;  %v10046_v61 = vmul.f32 %v11693_v57, %v10010_v54  ;;  %v10048_v60 = vmul.f32 %v11693_v57, %v10012_v49  ;;  %v10050_v43 = vmul.f32 %v11693_v57, %v10014_v46  ;;  %v10140_v32 = vld [vmem:[#allocation7] sm:$0xff] }
 0x9cb   :  { %v10064_v59 = vmul.f32 %v10057_v36, %v10020_v2  ;;  %v10066_v56 = vmul.f32 %v10057_v36, %v10022_v6  ;;  %v10068_v51 = vmul.f32 %v10057_v36, %v10024_v26  ;;  %v10070_v22 = vmul.f32 %v10057_v36, %v10026_v58  ;;  %v10142_v2 = vld [vmem:[#allocation7 + $0x10] sm:$0xff]  ;;  %v10144_v6 = vld [vmem:[#allocation7 + $0x20] sm:$0xff] }
 0x9cc   :  { %v10072_v52 = vmul.f32 %v10057_v36, %v10028_v55  ;;  %v10074_v7 = vmul.f32 %v10057_v36, %v10030_v45  ;;  %v10076_v33 = vmul.f32 %v10057_v36, %v10032_v47  ;;  %v10078_v41 = vmul.f32 %v10057_v36, %v10034_v4  ;;  %v10146_v26 = vld [vmem:[#allocation7 + $0x30] sm:$0xff]  ;;  %v16268_v55 = vpop.eup %11694  ;;  %v10152_v58 = vld [vmem:[#allocation7 + $0x60] sm:$0xff] }
 0x9cd   :  { %v10080_v19 = vmul.f32 %v10057_v36, %v10036_v8  ;;  %v10082_v31 = vmul.f32 %v10057_v36, %v10038_v39  ;;  %v10084_v9 = vmul.f32 %v10057_v36, %v10040_v15  ;;  %v10086_v62 = vmul.f32 %v10057_v36, %v10042_v35  ;;  %v10148_v15 = vld [vmem:[#allocation7 + $0x40] sm:$0xff]  ;;  %v10150_v35 = vld [vmem:[#allocation7 + $0x50] sm:$0xff] }
 0x9ce   :  { %v10088_v13 = vmul.f32 %v10057_v36, %v10044_v53  ;;  %v10090_v1 = vmul.f32 %v10057_v36, %v10046_v61  ;;  %v10092_v27 = vmul.f32 %v10057_v36, %v10048_v60  ;;  %v10094_v42 = vmul.f32 %v10057_v36, %v10050_v43  ;;  %v10158_v61 = vld [vmem:[#allocation7 + $0x90] sm:$0xff] }
 0x9cf   :  { %v10108_v54 = vadd.f32 %v10101_v10, %v10064_v59  ;;  %v10110_v49 = vadd.f32 %v10101_v10, %v10066_v56  ;;  %v10112_v46 = vadd.f32 %v10101_v10, %v10068_v51  ;;  %v10114_v57 = vadd.f32 %v10101_v10, %v10070_v22  ;;  %v10154_v59 = vld [vmem:[#allocation7 + $0x70] sm:$0xff]  ;;  %v10156_v56 = vld [vmem:[#allocation7 + $0x80] sm:$0xff] }
 0x9d0   :  { %v10116_v45 = vadd.f32 %v10101_v10, %v10072_v52  ;;  %v10118_v4 = vadd.f32 %v10101_v10, %v10074_v7  ;;  %v10120_v8 = vadd.f32 %v10101_v10, %v10076_v33  ;;  %v10122_v39 = vadd.f32 %v10101_v10, %v10078_v41  ;;  %v10164_v52 = vld [vmem:[#allocation7 + $0xc0] sm:$0xff]  ;;  %v10166_v7 = vld [vmem:[#allocation7 + $0xd0] sm:$0xff] }
 0x9d1   :  { %v10124_v47 = vadd.f32 %v10101_v10, %v10080_v19  ;;  %v10126_v60 = vadd.f32 %v10101_v10, %v10082_v31  ;;  %v10128_v36 = vadd.f32 %v10101_v10, %v10084_v9  ;;  %v10130_v53 = vadd.f32 %v10101_v10, %v10086_v62  ;;  %v10168_v33 = vld [vmem:[#allocation7 + $0xe0] sm:$0xff]  ;;  %v10170_v41 = vld [vmem:[#allocation7 + $0xf0] sm:$0xff] }
 0x9d2   :  { %v10132_v43 = vadd.f32 %v10101_v10, %v10088_v13  ;;  %v10134_v51 = vadd.f32 %v10101_v10, %v10090_v1  ;;  %v10136_v22 = vadd.f32 %v10101_v10, %v10092_v27  ;;  %v10138_v34 = vadd.f32 %v10101_v10, %v10094_v42 }
 0x9d3   :  { %v10172_v11 = vadd.f32 %v10140_v32, %v10108_v54  ;;  %v10174_v18 = vadd.f32 %v10142_v2, %v10110_v49  ;;  %v10176_v12 = vadd.f32 %v10144_v6, %v10112_v46  ;;  %v10178_v19 = vadd.f32 %v10146_v26, %v10114_v57 }
 0x9d4   :  { %v10180_v31 = vadd.f32 %v10148_v15, %v10116_v45  ;;  %v10182_v9 = vadd.f32 %v10150_v35, %v10118_v4  ;;  %v10184_v62 = vadd.f32 %v10152_v58, %v10120_v8  ;;  %v10186_v25 = vadd.f32 %v10154_v59, %v10122_v39  ;;  %v17606_v45 = vld [vmem:[#allocation98_spill] sm:$0xff]  ;;  %v17608_v8 = vld [vmem:[#allocation131_spill] sm:$0xff] }
 0x9d5   :  { %v10188_v0 = vadd.f32 %v10156_v56, %v10124_v47  ;;  %v10190_v14 = vadd.f32 %v10158_v61, %v10126_v60  ;;  %v10192_v13 = vadd.f32 %v10160_v24, %v10128_v36  ;;  %v10194_v1 = vadd.f32 %v10162_v3, %v10130_v53  ;;  %10204 = vst [vmem:[#allocation16] sm:$0xff] %v10172_v11  ;;  %v17610_v15 = vld [vmem:[#allocation134_spill] sm:$0xff] }
 0x9d6   :  { %10206 = vst [vmem:[#allocation16 + $0x10] sm:$0xff] %v10174_v18  ;;  %10208 = vst [vmem:[#allocation16 + $0x20] sm:$0xff] %v10176_v12  ;;  %v10196_v10 = vadd.f32 %v10164_v52, %v10132_v43  ;;  %v10198_v27 = vadd.f32 %v10166_v7, %v10134_v51  ;;  %v10200_v42 = vadd.f32 %v10168_v33, %v10136_v22  ;;  %v10141_v52 = vld [vmem:[#allocation7 + $0x8] sm:$0xff] }
 0x9d7   :  { %10210 = vst [vmem:[#allocation16 + $0x30] sm:$0xff] %v10178_v19  ;;  %v10202_v44 = vadd.f32 %v10170_v41, %v10138_v34  ;;  %10212 = vst [vmem:[#allocation16 + $0x40] sm:$0xff] %v10180_v31  ;;  %v17592_v24 = vsub.f32 %v16030_v50, %v16190_v38  ;;  %v17593_v12 = vsub.f32 %v16040_v23, %v16190_v38  ;;  %v17611_v7 = vld [vmem:[#allocation123_spill] sm:$0xff] }
 0x9d8   :  { %10214 = vst [vmem:[#allocation16 + $0x50] sm:$0xff] %v10182_v9  ;;  %10216 = vst [vmem:[#allocation16 + $0x60] sm:$0xff] %v10184_v62  ;;  %v17594_v3 = vsub.f32 %v16053_v40, %v16190_v38  ;;  %v17596_v50 = vsub.f32 %v16073_v63, %v16190_v38  ;;  %v17598_v32 = vsub.f32 %v16093_v16, %v16190_v38  ;;  %v10143_v9 = vld [vmem:[#allocation7 + $0x18] sm:$0xff]  ;;  %v10145_v62 = vld [vmem:[#allocation7 + $0x28] sm:$0xff] }
 0x9d9   :  { %10218 = vst [vmem:[#allocation16 + $0x70] sm:$0xff] %v10186_v25  ;;  %10220 = vst [vmem:[#allocation16 + $0x80] sm:$0xff] %v10188_v0  ;;  %v10021_v11 = vmul.f32 %v16268_v55, %v17592_v24  ;;  %v10023_v18 = vmul.f32 %v16268_v55, %v17593_v12  ;;  %v17597_v25 = vsub.f32 %v16083_v48, %v16190_v38  ;;  %v10149_v24 = vld [vmem:[#allocation7 + $0x48] sm:$0xff] }
 0x9da   :  { %10222 = vst [vmem:[#allocation16 + $0x90] sm:$0xff] %v10190_v14  ;;  %10224 = vst [vmem:[#allocation16 + $0xa0] sm:$0xff] %v10192_v13  ;;  %v10025_v34 = vmul.f32 %v16268_v55, %v17594_v3  ;;  %v17595_v14 = vsub.f32 %v16063_v5, %v16190_v38  ;;  %v10029_v23 = vmul.f32 %v16268_v55, %v17596_v50  ;;  %v10147_v13 = vld [vmem:[#allocation7 + $0x38] sm:$0xff]  ;;  %v10153_v12 = vld [vmem:[#allocation7 + $0x68] sm:$0xff] }
 0x9db   :  { %10226 = vst [vmem:[#allocation16 + $0xb0] sm:$0xff] %v10194_v1  ;;  %10228 = vst [vmem:[#allocation16 + $0xc0] sm:$0xff] %v10196_v10  ;;  %v10031_v40 = vmul.f32 %v16268_v55, %v17597_v25  ;;  %v10033_v5 = vmul.f32 %v16268_v55, %v17598_v32  ;;  %v17599_v54 = vsub.f32 %v16103_v30, %v16190_v38  ;;  %v10157_v50 = vld [vmem:[#allocation7 + $0x88] sm:$0xff] }
 0x9dc   :  { %v10027_v0 = vmul.f32 %v16268_v55, %v17595_v14  ;;  %10230 = vst [vmem:[#allocation16 + $0xd0] sm:$0xff] %v10198_v27  ;;  %10232 = vst [vmem:[#allocation16 + $0xe0] sm:$0xff] %v10200_v42  ;;  %v17600_v63 = vsub.f32 %v16113_v29, %v16190_v38  ;;  %v17601_v48 = vsub.f32 %v16123_v17, %v16190_v38 }
 0x9dd   :  { %10234 = vst [vmem:[#allocation16 + $0xf0] sm:$0xff] %v10202_v44  ;;  %v10035_v44 = vmul.f32 %v16268_v55, %v17599_v54  ;;  %v17602_v16 = vsub.f32 %v16133_v21, %v16190_v38  ;;  %v17603_v30 = vsub.f32 %v16143_v28, %v16190_v38  ;;  %v17604_v29 = vsub.f32 %v16153_v20, %v16190_v38  ;;  %v10161_v54 = vld [vmem:[#allocation7 + $0xa8] sm:$0xff] }
 0x9de   :  { %v10037_v49 = vmul.f32 %v16268_v55, %v17600_v63  ;;  %v10039_v46 = vmul.f32 %v16268_v55, %v17601_v48  ;;  %v17605_v17 = vsub.f32 %v16163_v37, %v16190_v38  ;;  %v17607_v21 = vsub.f32 %v17606_v45, %v16190_v38  ;;  %v10165_v63 = vld [vmem:[#allocation7 + $0xc8] sm:$0xff] }
 0x9df   :  { %v10041_v57 = vmul.f32 %v16268_v55, %v17602_v16  ;;  %v10043_v2 = vmul.f32 %v16268_v55, %v17603_v30  ;;  %v10045_v6 = vmul.f32 %v16268_v55, %v17604_v29  ;;  %v17609_v28 = vsub.f32 %v17608_v8, %v16190_v38  ;;  %v10169_v48 = vld [vmem:[#allocation7 + $0xe8] sm:$0xff] }
 0x9e0   :  { %v10047_v26 = vmul.f32 %v16268_v55, %v17605_v17  ;;  %v10049_v4 = vmul.f32 %v16268_v55, %v17607_v21  ;;  %v10065_v35 = vmul.f32 %v17610_v15, %v10021_v11  ;;  %v10067_v20 = vmul.f32 %v17610_v15, %v10023_v18  ;;  %v10151_v11 = vld [vmem:[#allocation7 + $0x58] sm:$0xff] }
 0x9e1   :  { %v10051_v39 = vmul.f32 %v16268_v55, %v17609_v28  ;;  %v10069_v58 = vmul.f32 %v17610_v15, %v10025_v34  ;;  %v10071_v37 = vmul.f32 %v17610_v15, %v10027_v0  ;;  %v10073_v47 = vmul.f32 %v17610_v15, %v10029_v23  ;;  %v10155_v0 = vld [vmem:[#allocation7 + $0x78] sm:$0xff] }
 0x9e2   :  { %v10075_v60 = vmul.f32 %v17610_v15, %v10031_v40  ;;  %v10077_v36 = vmul.f32 %v17610_v15, %v10033_v5  ;;  %v10079_v53 = vmul.f32 %v17610_v15, %v10035_v44  ;;  %v10081_v38 = vmul.f32 %v17610_v15, %v10037_v49  ;;  %v10159_v23 = vld [vmem:[#allocation7 + $0x98] sm:$0xff] }
 0x9e3   :  { %v10083_v55 = vmul.f32 %v17610_v15, %v10039_v46  ;;  %v10085_v59 = vmul.f32 %v17610_v15, %v10041_v57  ;;  %v10087_v56 = vmul.f32 %v17610_v15, %v10043_v2  ;;  %v10089_v61 = vmul.f32 %v17610_v15, %v10045_v6  ;;  %v10163_v44 = vld [vmem:[#allocation7 + $0xb8] sm:$0xff] }
 0x9e4   :  { %v10091_v43 = vmul.f32 %v17610_v15, %v10047_v26  ;;  %v10093_v51 = vmul.f32 %v17610_v15, %v10049_v4  ;;  %v10095_v22 = vmul.f32 %v17610_v15, %v10051_v39  ;;  %v10109_v33 = vadd.f32 %v17611_v7, %v10065_v35  ;;  %v10167_v49 = vld [vmem:[#allocation7 + $0xd8] sm:$0xff] }
 0x9e5   :  { %v10111_v41 = vadd.f32 %v17611_v7, %v10067_v20  ;;  %v10113_v19 = vadd.f32 %v17611_v7, %v10069_v58  ;;  %v10115_v31 = vadd.f32 %v17611_v7, %v10071_v37  ;;  %v10117_v1 = vadd.f32 %v17611_v7, %v10073_v47  ;;  %v10171_v46 = vld [vmem:[#allocation7 + $0xf8] sm:$0xff] }
 0x9e6   :  { %v10119_v10 = vadd.f32 %v17611_v7, %v10075_v60  ;;  %v10121_v27 = vadd.f32 %v17611_v7, %v10077_v36  ;;  %v10123_v42 = vadd.f32 %v17611_v7, %v10079_v53  ;;  %v10125_v18 = vadd.f32 %v17611_v7, %v10081_v38 }
 0x9e7   :  { %v10127_v3 = vadd.f32 %v17611_v7, %v10083_v55  ;;  %v10129_v34 = vadd.f32 %v17611_v7, %v10085_v59  ;;  %v10131_v14 = vadd.f32 %v17611_v7, %v10087_v56  ;;  %v10133_v25 = vadd.f32 %v17611_v7, %v10089_v61 }
 0x9e8   :  { %v10135_v40 = vadd.f32 %v17611_v7, %v10091_v43  ;;  %v10137_v32 = vadd.f32 %v17611_v7, %v10093_v51  ;;  %v10139_v5 = vadd.f32 %v17611_v7, %v10095_v22  ;;  %v10173_v16 = vadd.f32 %v10141_v52, %v10109_v33 }
 0x9e9   :  { %v10175_v57 = vadd.f32 %v10143_v9, %v10111_v41  ;;  %v10177_v30 = vadd.f32 %v10145_v62, %v10113_v19  ;;  %v10179_v2 = vadd.f32 %v10147_v13, %v10115_v31  ;;  %v10181_v29 = vadd.f32 %v10149_v24, %v10117_v1 }
 0x9ea   :  { %v10183_v6 = vadd.f32 %v10151_v11, %v10119_v10  ;;  %v10185_v17 = vadd.f32 %v10153_v12, %v10121_v27  ;;  %v10187_v26 = vadd.f32 %v10155_v0, %v10123_v42  ;;  %v10189_v45 = vadd.f32 %v10157_v50, %v10125_v18  ;;  %10205 = vst [vmem:[#allocation16 + $0x8] sm:$0xff] %v10173_v16 }
 0x9eb   :  { %v10191_v21 = vadd.f32 %v10159_v23, %v10127_v3  ;;  %v10193_v4 = vadd.f32 %v10161_v54, %v10129_v34  ;;  %v10195_v8 = vadd.f32 %v10163_v44, %v10131_v14  ;;  %10207 = vst [vmem:[#allocation16 + $0x18] sm:$0xff] %v10175_v57  ;;  %10209 = vst [vmem:[#allocation16 + $0x28] sm:$0xff] %v10177_v30 }
 0x9ec   :  { %10211 = vst [vmem:[#allocation16 + $0x38] sm:$0xff] %v10179_v2  ;;  %v10197_v28 = vadd.f32 %v10165_v63, %v10133_v25  ;;  %v10199_v39 = vadd.f32 %v10167_v49, %v10135_v40  ;;  %v10201_v15 = vadd.f32 %v10169_v48, %v10137_v32  ;;  %v10203_v35 = vadd.f32 %v10171_v46, %v10139_v5 }
 0x9ed   :  { %10213 = vst [vmem:[#allocation16 + $0x48] sm:$0xff] %v10181_v29  ;;  %10215 = vst [vmem:[#allocation16 + $0x58] sm:$0xff] %v10183_v6 }
 0x9ee   :  { %10217 = vst [vmem:[#allocation16 + $0x68] sm:$0xff] %v10185_v17  ;;  %10219 = vst [vmem:[#allocation16 + $0x78] sm:$0xff] %v10187_v26 }
 0x9ef   :  { %10221 = vst [vmem:[#allocation16 + $0x88] sm:$0xff] %v10189_v45  ;;  %10223 = vst [vmem:[#allocation16 + $0x98] sm:$0xff] %v10191_v21 }
 0x9f0   :  { %10225 = vst [vmem:[#allocation16 + $0xa8] sm:$0xff] %v10193_v4  ;;  %10227 = vst [vmem:[#allocation16 + $0xb8] sm:$0xff] %v10195_v8 }
 0x9f1   :  { %10229 = vst [vmem:[#allocation16 + $0xc8] sm:$0xff] %v10197_v28  ;;  %10231 = vst [vmem:[#allocation16 + $0xd8] sm:$0xff] %v10199_v39 }
 0x9f2   :  { %10233 = vst [vmem:[#allocation16 + $0xe8] sm:$0xff] %v10201_v15  ;;  %10235 = vst [vmem:[#allocation16 + $0xf8] sm:$0xff] %v10203_v35 }
 0x9f3   :  { %11817 = shalt.err (!%p11814_p2)
}
 0x9f4   :  { %s11818_s10 = scalar_lea.hbm %s16388_s7, 4096 }
 0x9f5   :  { %p11819_p3 = scmp.ne.s32.totalorder %s16388_s7, %s11818_s10  ;;  %p11822_p4 = scmp.lt.u32.totalorder %s11818_s10, %s16388_s7 }
 0x9f7   :  { %p11824_p5 = pnand %p11822_p4, %p11819_p3 }
 0x9f9   :  { %11827 = shalt.err (!%p11824_p5)
}
 0x9fa   :  { %10247 = dma.vmem_to_hbm [thread:$0]  %s10242_s2, 4096, %s16388_s7, [#allocation9], %s11843_s5, %s11843_s5, %s11844_s27  }
 0x9fb   :  { %11838 = dma.done.wait [#allocation9], 4096  }
 0x9fc   :  { %11839 = vsyncadd [#allocation9], 4294963200 }
 0x9fd   :  { %10251 = vsyncpa [#allocation8], 1 }
 0x9fe   :  { %10252 = vsyncpa [#allocation11], 1 }
 0x9ff   :  { %10253 = vsyncpa [#allocation14], 1 }
 0xa00   :  { %10254 = vsyncpa [#allocation9], 1 }
 0xa01   :  { %10255 = vsyncmov [#allocation6] }
 0xa04   :  { %s10256_s16 = vpop.sfrf %10255 }
 0xa05   :  { %p11040_p6 = scmp.ne.s32.totalorder %s10256_s16, 0 }
 0xa07   :  { %10260 = shalt.err (%p11040_p6)  }
 0xa08   :  { %10262 = vsyncmov [#allocation6 + $0x1] }
 0xa0b   :  { %s10263_s18 = vpop.sfrf %10262 }
 0xa0c   :  { %p11041_p7 = scmp.ne.s32.totalorder %s10263_s18, 0 }
 0xa0e   :  { %10267 = shalt.err (%p11041_p7)  }

</bundles_post_ra>
